<compile_context>
chip_gen: v5e
topology: v5e:2x2
jax: 0.10.0
libtpu: 0.0.40
codegen_flags: <defaults>
</compile_context>

<pallas_src>
import functools

import jax
import jax.numpy as jnp
import numpy as np
from jax.experimental import pallas as pl
from jax.experimental.pallas import tpu as pltpu


# dtype used at MXU boundaries (cast right before each jnp.dot, f32 accum).
# One-hot values (0/1) and power-of-two weight scalings are exact in bf16.
MXU_DTYPE = jnp.bfloat16


# ----------------------------------------------------------------------------
# Shared math helpers (used inside the Pallas kernel and in the pure-JAX
# oracle that mirrors the kernel's math)
# ----------------------------------------------------------------------------
def _dot(a, b):
    return jnp.dot(a.astype(MXU_DTYPE), b.astype(MXU_DTYPE),
                   preferred_element_type=jnp.float32)


def _mlp_split(terms, w0, b0, w1, b1, w2, b2):
    """3-layer MLP (ReLU, ReLU, identity); first layer as a split-weight matmul
    over `terms` (equivalent to concatenating the terms along features)."""
    h = b0
    off = 0
    for t in terms:
        k = t.shape[-1]
        h = h + _dot(t, w0[off:off + k, :])
        off += k
    h = jnp.maximum(h, 0.0)
    h = jnp.maximum(_dot(h, w1) + b1, 0.0)
    return _dot(h, w2) + b2


def _layer_norm(y, gamma, beta, eps=1e-5):
    mu = jnp.mean(y, axis=-1, keepdims=True)
    var = jnp.mean(jnp.square(y - mu), axis=-1, keepdims=True)
    return (y - mu) * jax.lax.rsqrt(var + eps) * gamma + beta


# ----------------------------------------------------------------------------
# Fused Pallas kernel: encoder -> processor (num_steps) -> decoder
# ----------------------------------------------------------------------------
def _fused_epd_kernel(num_steps, *refs):
    recv_ref, send_ref, x_ref, e_ref = refs[0:4]      # recv/send: (E, 1) int32
    enc_n = refs[4:12]        # W0,b0,W1,b1,W2,b2,gamma,beta
    enc_e = refs[12:20]
    pe = refs[20:30]          # processor edge-MLP (stacked over steps):
                              #   W0a,W0b,W0e(2^s-folded),b0,W1,b1,W2,b2,gamma,beta
    pn = refs[30:38]          # processor node-MLP (stacked): W0,b0,W1,b1,W2,b2,gamma,beta
    dec = refs[38:44]         # decoder W0,b0,W1,b1,W2(padded),b2(padded)
    out_ref = refs[44]        # (N, out_pad) f32, lane-dense

    n_nodes = x_ref.shape[0]
    n_edges = e_ref.shape[0]

    def load(wrefs, step=None):
        if step is None:
            return [r[...] for r in wrefs]
        return [r[step] for r in wrefs]

    def run_mlp(terms, w, ln):
        y = _mlp_split(terms, w[0], w[1], w[2], w[3], w[4], w[5])
        if ln:
            y = _layer_norm(y, w[6], w[7])
        return y

    # ---- gather / scatter one-hots: built ONCE (indices constant across steps) ----
    # Fused gather matrix G = [recv-one-hot | send-one-hot]  (E, 2N): one K = 2N
    # MXU dot per step gathers both hoisted projections at once.
    iota2 = jax.lax.broadcasted_iota(jnp.int32, (n_edges, 2 * n_nodes), 1)
    hot = (iota2 == recv_ref[...]) | (iota2 == (send_ref[...] + n_nodes))
    gath = hot.astype(jnp.float32).astype(MXU_DTYPE)                 # (E, 2N) bf16
    # Receiver one-hot, used TRANSPOSED (contract over E) for the scatter-add —
    # no separate (N, E) scatter matrix is materialized.
    iota1 = jax.lax.broadcasted_iota(jnp.int32, (n_edges, n_nodes), 1)
    scat = (iota1 == recv_ref[...]).astype(jnp.float32).astype(MXU_DTYPE)  # (E, N)

    # ---- Encoder ----
    x = run_mlp([x_ref[...]], load(enc_n), ln=True)                  # (N, L) f32
    e = run_mlp([e_ref[...]], load(enc_e), ln=True)                  # (E, L) f32
    # Faithful PyG semantics: update() returns the ORIGINAL e_features, so each
    # step does e <- 2*e.  The 2^s factor is folded into the per-step edge-MLP
    # e-block weights in the wrapper; e stays read-only here (cast to bf16 once).
    e_bf = e.astype(MXU_DTYPE)

    # ---- Processor (InteractionNetwork stack) ----
    for s in range(num_steps):
        w0a, w0b, w0e, b0, w1, b1, w2, b2, gamma, beta = load(pe, s)
        x_res = x

        # Hoisted edge-MLP first layer: project x on the node axis, then gather
        # both projections with ONE (E, 2N) x (2N, H) dot.
        xa = _dot(x, w0a)                                            # (N, H)
        xb = _dot(x, w0b)                                            # (N, H)
        ab = jnp.concatenate([xa, xb], axis=0).astype(MXU_DTYPE)     # (2N, H)
        h = (jnp.dot(gath, ab, preferred_element_type=jnp.float32)
             + jnp.dot(e_bf, w0e.astype(MXU_DTYPE),
                       preferred_element_type=jnp.float32)
             + b0)                                                   # (E, H)
        h = jnp.maximum(h, 0.0)
        h = jnp.maximum(_dot(h, w1) + b1, 0.0)
        msg = _layer_norm(_dot(h, w2) + b2, gamma, beta)             # (E, L)

        # aggregate(): scatter-add onto receivers via a transposed MXU dot.
        agg = jax.lax.dot_general(
            scat, msg.astype(MXU_DTYPE),
            dimension_numbers=(((0,), (0,)), ((), ())),
            preferred_element_type=jnp.float32)                      # (N, L)

        # update(): node_fn(cat[agg, x]) as a split-weight matmul, + residual.
        x = run_mlp([agg, x], load(pn, s), ln=True) + x_res

    # ---- Decoder (no LayerNorm; W2/b2 lane-padded to a multiple of 128) ----
    out_ref[...] = run_mlp([x], load(dec), ln=False)


# ----------------------------------------------------------------------------
# Wrapper
# ----------------------------------------------------------------------------
def _vmem_capacity_bytes():
    try:
        return int(pltpu.get_tpu_info().vmem_capacity_bytes)
    except Exception:
        return 64 * 1024 * 1024    # conservative fallback (v7x per-core VMEM)


def encode_process_decode(params, x, edge_index, e_features):
    senders = edge_index[0].astype(jnp.int32)    # x_j (source)
    receivers = edge_index[1].astype(jnp.int32)  # x_i (target); aggregation index
    num_nodes = x.shape[0]
    num_edges = e_features.shape[0]
    num_steps = len(params["proc"])
    latent = params["enc_node"]["W"][2].shape[1]
    hidden = params["enc_node"]["W"][1].shape[0]
    node_out = params["dec"]["W"][2].shape[1]
    out_pad = ((node_out + 127) // 128) * 128    # lane-dense output width

    def wb(p):
        out = []
        for i in range(3):
            out.append(p["W"][i])
            out.append(p["b"][i].reshape(1, -1))
        return out

    def wb_ln(p):
        return wb(p) + [p["gamma"].reshape(1, -1), p["beta"].reshape(1, -1)]

    def stacked_edge():
        steps = [st["edge"] for st in params["proc"]]
        w0a, w0b, w0e = [], [], []
        for s, st in enumerate(steps):
            w0 = st["W"][0]                        # (3L, H): [x_i | x_j | e] blocks
            w0a.append(w0[:latent, :])
            w0b.append(w0[latent:2 * latent, :])
            # fold e <- 2*e per step into the e-block (exact: power-of-2 scale)
            w0e.append(w0[2 * latent:, :] * (2.0 ** s))
        return [jnp.stack(w0a), jnp.stack(w0b), jnp.stack(w0e),
                jnp.stack([st["b"][0].reshape(1, -1) for st in steps]),
                jnp.stack([st["W"][1] for st in steps]),
                jnp.stack([st["b"][1].reshape(1, -1) for st in steps]),
                jnp.stack([st["W"][2] for st in steps]),
                jnp.stack([st["b"][2].reshape(1, -1) for st in steps]),
                jnp.stack([st["gamma"].reshape(1, -1) for st in steps]),
                jnp.stack([st["beta"].reshape(1, -1) for st in steps])]

    def stacked_node():
        steps = [st["node"] for st in params["proc"]]
        out = []
        for i in range(3):
            out.append(jnp.stack([st["W"][i] for st in steps]))
            out.append(jnp.stack([st["b"][i].reshape(1, -1) for st in steps]))
        out.append(jnp.stack([st["gamma"].reshape(1, -1) for st in steps]))
        out.append(jnp.stack([st["beta"].reshape(1, -1) for st in steps]))
        return out

    # Lane-dense decoder output: zero-pad W2/b2 to out_pad columns.
    dec_w = wb(params["dec"])
    w2, b2 = dec_w[4], dec_w[5]
    w2p = jnp.zeros((w2.shape[0], out_pad), w2.dtype).at[:, :node_out].set(w2)
    b2p = jnp.zeros((1, out_pad), b2.dtype).at[:, :node_out].set(b2)
    dec_w = dec_w[:4] + [w2p, b2p]

    args = ([receivers.reshape(num_edges, 1), senders.reshape(num_edges, 1),
             x, e_features]
            + wb_ln(params["enc_node"]) + wb_ln(params["enc_edge"])
            + stacked_edge() + stacked_node() + dec_w)

    # Generation-aware VMEM budget: args + one-hots + construction temporaries
    # (i32 iota / f32 intermediate) + a superset of the live f32 activations.
    arg_bytes = sum(int(np.prod(a.shape)) * jnp.dtype(a.dtype).itemsize
                    for a in args)
    onehot_bytes = (num_edges * 2 * num_nodes * (2 + 4 + 4)
                    + num_edges * num_nodes * (2 + 4 + 4))
    act_bytes = 4 * (6 * num_edges * max(latent, hidden)
                     + 6 * num_nodes * max(latent, hidden, out_pad))
    footprint = arg_bytes + onehot_bytes + act_bytes
    vmem_cap = _vmem_capacity_bytes()
    assert 2 * footprint < vmem_cap, (
        "graph too large for the single-shot fused kernel; tile over edges "
        "(see TODOs at the top of this file)")
    vmem_limit = int(min(0.9 * vmem_cap, max(32 * 1024 * 1024, 4 * footprint)))

    vmem_spec = pl.BlockSpec(memory_space=pltpu.MemorySpace.VMEM)
    out = pl.pallas_call(
        functools.partial(_fused_epd_kernel, num_steps),
        out_shape=jax.ShapeDtypeStruct((num_nodes, out_pad), jnp.float32),
        in_specs=[vmem_spec] * len(args),
        out_specs=vmem_spec,
        compiler_params=pltpu.CompilerParams(vmem_limit_bytes=vmem_limit),
    )(*args)
    return out[:, :node_out]


# ----------------------------------------------------------------------------
# Pure-JAX oracle mirroring the kernel math (hoisted edge-MLP first layer,
# bf16 at MXU boundaries, msg re-quantized to bf16 before the scatter-add).
# ----------------------------------------------------------------------------
def encode_process_decode_ref(params, x, edge_index, e_features):
    senders = edge_index[0].astype(jnp.int32)
    receivers = edge_index[1].astype(jnp.int32)
    n = x.shape[0]
    latent = params["enc_node"]["W"][2].shape[1]

    def run(terms, p, ln):
        y = _mlp_split(terms, p["W"][0], p["b"][0][None, :],
                       p["W"][1], p["b"][1][None, :],
                       p["W"][2], p["b"][2][None, :])
        if ln:
            y = _layer_norm(y, p["gamma"][None, :], p["beta"][None, :])
        return y

    x = run([x], params["enc_node"], True)
    e = run([e_features], params["enc_edge"], True)
    for st in params["proc"]:
        x_res, e_res = x, e
        pw = st["edge"]
        w0 = pw["W"][0]
        # hoisted first layer (matches kernel): project on nodes, gather projections
        xa = _dot(x, w0[:latent, :]).astype(MXU_DTYPE).astype(jnp.float32)
        xb = _dot(x, w0[latent:2 * latent, :]).astype(MXU_DTYPE).astype(jnp.float32)
        h = (jnp.take(xa, receivers, axis=0) + jnp.take(xb, senders, axis=0)
             + _dot(e, w0[2 * latent:, :]) + pw["b"][0][None, :])
        h = jnp.maximum(h, 0.0)
        h = jnp.maximum(_dot(h, pw["W"][1]) + pw["b"][1][None, :], 0.0)
        msg = _dot(h, pw["W"][2]) + pw["b"][2][None, :]
        msg = _layer_norm(msg, pw["gamma"][None, :], pw["beta"][None, :])
        agg = jax.ops.segment_sum(
            msg.astype(MXU_DTYPE).astype(jnp.float32), receivers, num_segments=n)
        x = run([agg, x], st["node"], True) + x_res
        e = e + e_res   # faithful PyG semantics: e doubles each step
    return run([x], params["dec"], False)


# ----------------------------------------------------------------------------
# Parameter initialization (deterministic, PyTorch-Linear-like uniform init)
# ----------------------------------------------------------------------------
def init_linear(key, d_in, d_out):
    k1, k2 = jax.random.split(key)
    bound = 1.0 / np.sqrt(d_in)
    W = jax.random.uniform(k1, (d_in, d_out), jnp.float32, -bound, bound)
    b = jax.random.uniform(k2, (d_out,), jnp.float32, -bound, bound)
    return W, b


def init_mlp(key, d_in, hidden, d_out, num_hidden_layers=2):
    sizes = [d_in] + [hidden] * num_hidden_layers + [d_out]
    Ws, bs = [], []
    for i in range(len(sizes) - 1):
        key, sub = jax.random.split(key)
        W, b = init_linear(sub, sizes[i], sizes[i + 1])
        Ws.append(W)
        bs.append(b)
    return {"W": Ws, "b": bs}


def init_mlp_ln(key, d_in, hidden, d_out, num_hidden_layers=2):
    k1, k2, k3 = jax.random.split(key, 3)
    p = init_mlp(k1, d_in, hidden, d_out, num_hidden_layers)
    p["gamma"] = 1.0 + 0.1 * jax.random.normal(k2, (d_out,), jnp.float32)
    p["beta"] = 0.1 * jax.random.normal(k3, (d_out,), jnp.float32)
    return p


def init_encode_process_decode(key, node_in, node_out, edge_in, latent_dim,
                               num_message_passing_steps, mlp_num_layers,
                               mlp_hidden_dim):
    assert mlp_num_layers == 2, "fused Pallas MLP specialized for 2 hidden layers"
    keys = jax.random.split(key, 3 + 2 * num_message_passing_steps)
    params = {
        "enc_node": init_mlp_ln(keys[0], node_in, mlp_hidden_dim, latent_dim),
        "enc_edge": init_mlp_ln(keys[1], edge_in, mlp_hidden_dim, latent_dim),
        "proc": [],
        "dec": init_mlp(keys[2], latent_dim, mlp_hidden_dim, node_out),
    }
    for s in range(num_message_passing_steps):
        params["proc"].append({
            # edge_fn input: x_i ++ x_j ++ e  -> 3 * latent
            "edge": init_mlp_ln(keys[3 + 2 * s], 3 * latent_dim, mlp_hidden_dim, latent_dim),
            # node_fn input: aggregated ++ x  -> 2 * latent
            "node": init_mlp_ln(keys[4 + 2 * s], 2 * latent_dim, mlp_hidden_dim, latent_dim),
        })
    return params


# ----------------------------------------------------------------------------
# Main
# ----------------------------------------------------------------------------
if __name__ == "__main__":
    NODE_IN = 16
    NODE_OUT = 2
    EDGE_IN = 3
    LATENT = 32
    NUM_MP_STEPS = 2
    MLP_NUM_LAYERS = 2
    MLP_HIDDEN = 32
    N_NODES = 64
    N_EDGES = 256

    root = jax.random.PRNGKey(0)
    k_par, k_x, k_e, k_src, k_dst = jax.random.split(root, 5)

    params = init_encode_process_decode(
        k_par, NODE_IN, NODE_OUT, EDGE_IN, LATENT,
        NUM_MP_STEPS, MLP_NUM_LAYERS, MLP_HIDDEN)

    x = jax.random.normal(k_x, (N_NODES, NODE_IN), jnp.float32)
    e_features = jax.random.normal(k_e, (N_EDGES, EDGE_IN), jnp.float32)
    edge_index = jnp.stack([
        jax.random.randint(k_src, (N_EDGES,), 0, N_NODES),
        jax.random.randint(k_dst, (N_EDGES,), 0, N_NODES),
    ], axis=0).astype(jnp.int32)  # [2, E]  row0 = source (j), row1 = target (i)

    fwd = jax.jit(functools.partial(encode_process_decode, params))
    out = fwd(x, edge_index, e_features)
    jax.block_until_ready(out)

    assert out.shape == (N_NODES, NODE_OUT), out.shape
    assert bool(jnp.all(jnp.isfinite(out)))

    ref = encode_process_decode_ref(params, x, edge_index, e_features)
    np.testing.assert_allclose(np.asarray(out), np.asarray(ref),
                               rtol=2e-2, atol=2e-2)

    print("KERNEL_OK")
</pallas_src>

<mosaic_0001>
module attributes {stable_mosaic.version = 11 : i64} {
  func.func @_fused_epd_kernel(%arg0: memref<256x1xi32, #tpu.memory_space<vmem>>, %arg1: memref<256x1xi32, #tpu.memory_space<vmem>>, %arg2: memref<64x16xf32, #tpu.memory_space<vmem>>, %arg3: memref<256x3xf32, #tpu.memory_space<vmem>>, %arg4: memref<16x32xf32, #tpu.memory_space<vmem>>, %arg5: memref<1x32xf32, #tpu.memory_space<vmem>>, %arg6: memref<32x32xf32, #tpu.memory_space<vmem>>, %arg7: memref<1x32xf32, #tpu.memory_space<vmem>>, %arg8: memref<32x32xf32, #tpu.memory_space<vmem>>, %arg9: memref<1x32xf32, #tpu.memory_space<vmem>>, %arg10: memref<1x32xf32, #tpu.memory_space<vmem>>, %arg11: memref<1x32xf32, #tpu.memory_space<vmem>>, %arg12: memref<3x32xf32, #tpu.memory_space<vmem>>, %arg13: memref<1x32xf32, #tpu.memory_space<vmem>>, %arg14: memref<32x32xf32, #tpu.memory_space<vmem>>, %arg15: memref<1x32xf32, #tpu.memory_space<vmem>>, %arg16: memref<32x32xf32, #tpu.memory_space<vmem>>, %arg17: memref<1x32xf32, #tpu.memory_space<vmem>>, %arg18: memref<1x32xf32, #tpu.memory_space<vmem>>, %arg19: memref<1x32xf32, #tpu.memory_space<vmem>>, %arg20: memref<2x32x32xf32, #tpu.memory_space<vmem>>, %arg21: memref<2x32x32xf32, #tpu.memory_space<vmem>>, %arg22: memref<2x32x32xf32, #tpu.memory_space<vmem>>, %arg23: memref<2x1x32xf32, #tpu.memory_space<vmem>>, %arg24: memref<2x32x32xf32, #tpu.memory_space<vmem>>, %arg25: memref<2x1x32xf32, #tpu.memory_space<vmem>>, %arg26: memref<2x32x32xf32, #tpu.memory_space<vmem>>, %arg27: memref<2x1x32xf32, #tpu.memory_space<vmem>>, %arg28: memref<2x1x32xf32, #tpu.memory_space<vmem>>, %arg29: memref<2x1x32xf32, #tpu.memory_space<vmem>>, %arg30: memref<2x64x32xf32, #tpu.memory_space<vmem>>, %arg31: memref<2x1x32xf32, #tpu.memory_space<vmem>>, %arg32: memref<2x32x32xf32, #tpu.memory_space<vmem>>, %arg33: memref<2x1x32xf32, #tpu.memory_space<vmem>>, %arg34: memref<2x32x32xf32, #tpu.memory_space<vmem>>, %arg35: memref<2x1x32xf32, #tpu.memory_space<vmem>>, %arg36: memref<2x1x32xf32, #tpu.memory_space<vmem>>, %arg37: memref<2x1x32xf32, #tpu.memory_space<vmem>>, %arg38: memref<32x32xf32, #tpu.memory_space<vmem>>, %arg39: memref<1x32xf32, #tpu.memory_space<vmem>>, %arg40: memref<32x32xf32, #tpu.memory_space<vmem>>, %arg41: memref<1x32xf32, #tpu.memory_space<vmem>>, %arg42: memref<32x128xf32, #tpu.memory_space<vmem>>, %arg43: memref<1x128xf32, #tpu.memory_space<vmem>>, %arg44: memref<64x128xf32, #tpu.memory_space<vmem>>) attributes {dimension_semantics = [], scalar_prefetch = 0 : i64, scratch_operands = 0 : i64, tpu.core_type = #tpu.core_type<tc>} {
    %0 = tpu.iota {dimensions = array<i32: 1>} : vector<256x128xi32>
    %c0 = arith.constant 0 : index
    %c0_0 = arith.constant 0 : index
    %1 = vector.load %arg0[%c0, %c0_0] : memref<256x1xi32, #tpu.memory_space<vmem>>, vector<256x1xi32>
    %2 = vector.broadcast %1 : vector<256x1xi32> to vector<256x128xi32>
    %3 = arith.cmpi eq, %0, %2 : vector<256x128xi32>
    %c0_1 = arith.constant 0 : index
    %c0_2 = arith.constant 0 : index
    %4 = vector.load %arg1[%c0_1, %c0_2] : memref<256x1xi32, #tpu.memory_space<vmem>>, vector<256x1xi32>
    %c64_i32 = arith.constant 64 : i32
    %5 = vector.broadcast %c64_i32 : i32 to vector<256x1xi32>
    %6 = arith.addi %4, %5 : vector<256x1xi32>
    %7 = vector.broadcast %6 : vector<256x1xi32> to vector<256x128xi32>
    %8 = arith.cmpi eq, %0, %7 : vector<256x128xi32>
    %9 = arith.ori %3, %8 : vector<256x128xi1>
    %10 = arith.extui %9 : vector<256x128xi1> to vector<256x128xi32>
    %11 = arith.sitofp %10 : vector<256x128xi32> to vector<256x128xf32>
    %12 = arith.truncf %11 : vector<256x128xf32> to vector<256x128xbf16>
    %13 = tpu.iota {dimensions = array<i32: 1>} : vector<256x64xi32>
    %c0_3 = arith.constant 0 : index
    %c0_4 = arith.constant 0 : index
    %14 = vector.load %arg0[%c0_3, %c0_4] : memref<256x1xi32, #tpu.memory_space<vmem>>, vector<256x1xi32>
    %15 = vector.broadcast %14 : vector<256x1xi32> to vector<256x64xi32>
    %16 = arith.cmpi eq, %13, %15 : vector<256x64xi32>
    %17 = arith.extui %16 : vector<256x64xi1> to vector<256x64xi32>
    %18 = arith.sitofp %17 : vector<256x64xi32> to vector<256x64xf32>
    %19 = arith.truncf %18 : vector<256x64xf32> to vector<256x64xbf16>
    %c0_5 = arith.constant 0 : index
    %c0_6 = arith.constant 0 : index
    %20 = vector.load %arg2[%c0_5, %c0_6] : memref<64x16xf32, #tpu.memory_space<vmem>>, vector<64x16xf32>
    %c0_7 = arith.constant 0 : index
    %c0_8 = arith.constant 0 : index
    %21 = vector.load %arg4[%c0_7, %c0_8] : memref<16x32xf32, #tpu.memory_space<vmem>>, vector<16x32xf32>
    %c0_9 = arith.constant 0 : index
    %c0_10 = arith.constant 0 : index
    %22 = vector.load %arg5[%c0_9, %c0_10] : memref<1x32xf32, #tpu.memory_space<vmem>>, vector<1x32xf32>
    %c0_11 = arith.constant 0 : index
    %c0_12 = arith.constant 0 : index
    %23 = vector.load %arg6[%c0_11, %c0_12] : memref<32x32xf32, #tpu.memory_space<vmem>>, vector<32x32xf32>
    %c0_13 = arith.constant 0 : index
    %c0_14 = arith.constant 0 : index
    %24 = vector.load %arg7[%c0_13, %c0_14] : memref<1x32xf32, #tpu.memory_space<vmem>>, vector<1x32xf32>
    %c0_15 = arith.constant 0 : index
    %c0_16 = arith.constant 0 : index
    %25 = vector.load %arg8[%c0_15, %c0_16] : memref<32x32xf32, #tpu.memory_space<vmem>>, vector<32x32xf32>
    %c0_17 = arith.constant 0 : index
    %c0_18 = arith.constant 0 : index
    %26 = vector.load %arg9[%c0_17, %c0_18] : memref<1x32xf32, #tpu.memory_space<vmem>>, vector<1x32xf32>
    %c0_19 = arith.constant 0 : index
    %c0_20 = arith.constant 0 : index
    %27 = vector.load %arg10[%c0_19, %c0_20] : memref<1x32xf32, #tpu.memory_space<vmem>>, vector<1x32xf32>
    %c0_21 = arith.constant 0 : index
    %c0_22 = arith.constant 0 : index
    %28 = vector.load %arg11[%c0_21, %c0_22] : memref<1x32xf32, #tpu.memory_space<vmem>>, vector<1x32xf32>
    %29 = arith.truncf %20 : vector<64x16xf32> to vector<64x16xbf16>
    %30 = arith.truncf %21 : vector<16x32xf32> to vector<16x32xbf16>
    %cst = arith.constant dense<0.000000e+00> : vector<64x32xf32>
    %31 = tpu.matmul %29, %30, %cst {dimension_numbers = #tpu.dot_dimension_numbers<[1], [0], [0], [1], [0, 0, 1, 1], [], []>} : vector<64x16xbf16>, vector<16x32xbf16>, vector<64x32xf32> -> vector<64x32xf32>
    %32 = vector.broadcast %22 : vector<1x32xf32> to vector<64x32xf32>
    %33 = arith.addf %32, %31 : vector<64x32xf32>
    %cst_23 = arith.constant 0.000000e+00 : f32
    %34 = vector.broadcast %cst_23 : f32 to vector<64x32xf32>
    %35 = arith.maximumf %33, %34 : vector<64x32xf32>
    %36 = arith.truncf %35 : vector<64x32xf32> to vector<64x32xbf16>
    %37 = arith.truncf %23 : vector<32x32xf32> to vector<32x32xbf16>
    %cst_24 = arith.constant dense<0.000000e+00> : vector<64x32xf32>
    %38 = tpu.matmul %36, %37, %cst_24 {dimension_numbers = #tpu.dot_dimension_numbers<[1], [0], [0], [1], [0, 0, 1, 1], [], []>} : vector<64x32xbf16>, vector<32x32xbf16>, vector<64x32xf32> -> vector<64x32xf32>
    %39 = vector.broadcast %24 : vector<1x32xf32> to vector<64x32xf32>
    %40 = arith.addf %38, %39 : vector<64x32xf32>
    %cst_25 = arith.constant 0.000000e+00 : f32
    %41 = vector.broadcast %cst_25 : f32 to vector<64x32xf32>
    %42 = arith.maximumf %40, %41 : vector<64x32xf32>
    %43 = arith.truncf %42 : vector<64x32xf32> to vector<64x32xbf16>
    %44 = arith.truncf %25 : vector<32x32xf32> to vector<32x32xbf16>
    %cst_26 = arith.constant dense<0.000000e+00> : vector<64x32xf32>
    %45 = tpu.matmul %43, %44, %cst_26 {dimension_numbers = #tpu.dot_dimension_numbers<[1], [0], [0], [1], [0, 0, 1, 1], [], []>} : vector<64x32xbf16>, vector<32x32xbf16>, vector<64x32xf32> -> vector<64x32xf32>
    %46 = vector.broadcast %26 : vector<1x32xf32> to vector<64x32xf32>
    %47 = arith.addf %45, %46 : vector<64x32xf32>
    %cst_27 = arith.constant dense<0.000000e+00> : vector<64xf32>
    %48 = vector.multi_reduction <add>, %47, %cst_27 [1] : vector<64x32xf32> to vector<64xf32>
    %49 = vector.shape_cast %48 : vector<64xf32> to vector<64x1xf32>
    %cst_28 = arith.constant 3.200000e+01 : f32
    %50 = vector.broadcast %cst_28 : f32 to vector<64x1xf32>
    %51 = arith.divf %49, %50 : vector<64x1xf32>
    %52 = vector.broadcast %51 : vector<64x1xf32> to vector<64x32xf32>
    %53 = arith.subf %47, %52 : vector<64x32xf32>
    %54 = arith.mulf %53, %53 : vector<64x32xf32>
    %cst_29 = arith.constant dense<0.000000e+00> : vector<64xf32>
    %55 = vector.multi_reduction <add>, %54, %cst_29 [1] : vector<64x32xf32> to vector<64xf32>
    %56 = vector.shape_cast %55 : vector<64xf32> to vector<64x1xf32>
    %cst_30 = arith.constant 3.200000e+01 : f32
    %57 = vector.broadcast %cst_30 : f32 to vector<64x1xf32>
    %58 = arith.divf %56, %57 : vector<64x1xf32>
    %59 = vector.broadcast %51 : vector<64x1xf32> to vector<64x32xf32>
    %60 = arith.subf %47, %59 : vector<64x32xf32>
    %cst_31 = arith.constant 9.99999974E-6 : f32
    %61 = vector.broadcast %cst_31 : f32 to vector<64x1xf32>
    %62 = arith.addf %58, %61 : vector<64x1xf32>
    %63 = math.rsqrt %62 : vector<64x1xf32>
    %64 = vector.broadcast %63 : vector<64x1xf32> to vector<64x32xf32>
    %65 = arith.mulf %60, %64 : vector<64x32xf32>
    %66 = vector.broadcast %27 : vector<1x32xf32> to vector<64x32xf32>
    %67 = arith.mulf %65, %66 : vector<64x32xf32>
    %68 = vector.broadcast %28 : vector<1x32xf32> to vector<64x32xf32>
    %69 = arith.addf %67, %68 : vector<64x32xf32>
    %c0_32 = arith.constant 0 : index
    %c0_33 = arith.constant 0 : index
    %70 = vector.load %arg3[%c0_32, %c0_33] : memref<256x3xf32, #tpu.memory_space<vmem>>, vector<256x3xf32>
    %c0_34 = arith.constant 0 : index
    %c0_35 = arith.constant 0 : index
    %71 = vector.load %arg12[%c0_34, %c0_35] : memref<3x32xf32, #tpu.memory_space<vmem>>, vector<3x32xf32>
    %c0_36 = arith.constant 0 : index
    %c0_37 = arith.constant 0 : index
    %72 = vector.load %arg13[%c0_36, %c0_37] : memref<1x32xf32, #tpu.memory_space<vmem>>, vector<1x32xf32>
    %c0_38 = arith.constant 0 : index
    %c0_39 = arith.constant 0 : index
    %73 = vector.load %arg14[%c0_38, %c0_39] : memref<32x32xf32, #tpu.memory_space<vmem>>, vector<32x32xf32>
    %c0_40 = arith.constant 0 : index
    %c0_41 = arith.constant 0 : index
    %74 = vector.load %arg15[%c0_40, %c0_41] : memref<1x32xf32, #tpu.memory_space<vmem>>, vector<1x32xf32>
    %c0_42 = arith.constant 0 : index
    %c0_43 = arith.constant 0 : index
    %75 = vector.load %arg16[%c0_42, %c0_43] : memref<32x32xf32, #tpu.memory_space<vmem>>, vector<32x32xf32>
    %c0_44 = arith.constant 0 : index
    %c0_45 = arith.constant 0 : index
    %76 = vector.load %arg17[%c0_44, %c0_45] : memref<1x32xf32, #tpu.memory_space<vmem>>, vector<1x32xf32>
    %c0_46 = arith.constant 0 : index
    %c0_47 = arith.constant 0 : index
    %77 = vector.load %arg18[%c0_46, %c0_47] : memref<1x32xf32, #tpu.memory_space<vmem>>, vector<1x32xf32>
    %c0_48 = arith.constant 0 : index
    %c0_49 = arith.constant 0 : index
    %78 = vector.load %arg19[%c0_48, %c0_49] : memref<1x32xf32, #tpu.memory_space<vmem>>, vector<1x32xf32>
    %79 = arith.truncf %70 : vector<256x3xf32> to vector<256x3xbf16>
    %80 = arith.truncf %71 : vector<3x32xf32> to vector<3x32xbf16>
    %cst_50 = arith.constant dense<0.000000e+00> : vector<256x32xf32>
    %81 = tpu.matmul %79, %80, %cst_50 {dimension_numbers = #tpu.dot_dimension_numbers<[1], [0], [0], [1], [0, 0, 1, 1], [], []>} : vector<256x3xbf16>, vector<3x32xbf16>, vector<256x32xf32> -> vector<256x32xf32>
    %82 = vector.broadcast %72 : vector<1x32xf32> to vector<256x32xf32>
    %83 = arith.addf %82, %81 : vector<256x32xf32>
    %cst_51 = arith.constant 0.000000e+00 : f32
    %84 = vector.broadcast %cst_51 : f32 to vector<256x32xf32>
    %85 = arith.maximumf %83, %84 : vector<256x32xf32>
    %86 = arith.truncf %85 : vector<256x32xf32> to vector<256x32xbf16>
    %87 = arith.truncf %73 : vector<32x32xf32> to vector<32x32xbf16>
    %cst_52 = arith.constant dense<0.000000e+00> : vector<256x32xf32>
    %88 = tpu.matmul %86, %87, %cst_52 {dimension_numbers = #tpu.dot_dimension_numbers<[1], [0], [0], [1], [0, 0, 1, 1], [], []>} : vector<256x32xbf16>, vector<32x32xbf16>, vector<256x32xf32> -> vector<256x32xf32>
    %89 = vector.broadcast %74 : vector<1x32xf32> to vector<256x32xf32>
    %90 = arith.addf %88, %89 : vector<256x32xf32>
    %cst_53 = arith.constant 0.000000e+00 : f32
    %91 = vector.broadcast %cst_53 : f32 to vector<256x32xf32>
    %92 = arith.maximumf %90, %91 : vector<256x32xf32>
    %93 = arith.truncf %92 : vector<256x32xf32> to vector<256x32xbf16>
    %94 = arith.truncf %75 : vector<32x32xf32> to vector<32x32xbf16>
    %cst_54 = arith.constant dense<0.000000e+00> : vector<256x32xf32>
    %95 = tpu.matmul %93, %94, %cst_54 {dimension_numbers = #tpu.dot_dimension_numbers<[1], [0], [0], [1], [0, 0, 1, 1], [], []>} : vector<256x32xbf16>, vector<32x32xbf16>, vector<256x32xf32> -> vector<256x32xf32>
    %96 = vector.broadcast %76 : vector<1x32xf32> to vector<256x32xf32>
    %97 = arith.addf %95, %96 : vector<256x32xf32>
    %cst_55 = arith.constant dense<0.000000e+00> : vector<256xf32>
    %98 = vector.multi_reduction <add>, %97, %cst_55 [1] : vector<256x32xf32> to vector<256xf32>
    %99 = vector.shape_cast %98 : vector<256xf32> to vector<256x1xf32>
    %cst_56 = arith.constant 3.200000e+01 : f32
    %100 = vector.broadcast %cst_56 : f32 to vector<256x1xf32>
    %101 = arith.divf %99, %100 : vector<256x1xf32>
    %102 = vector.broadcast %101 : vector<256x1xf32> to vector<256x32xf32>
    %103 = arith.subf %97, %102 : vector<256x32xf32>
    %104 = arith.mulf %103, %103 : vector<256x32xf32>
    %cst_57 = arith.constant dense<0.000000e+00> : vector<256xf32>
    %105 = vector.multi_reduction <add>, %104, %cst_57 [1] : vector<256x32xf32> to vector<256xf32>
    %106 = vector.shape_cast %105 : vector<256xf32> to vector<256x1xf32>
    %cst_58 = arith.constant 3.200000e+01 : f32
    %107 = vector.broadcast %cst_58 : f32 to vector<256x1xf32>
    %108 = arith.divf %106, %107 : vector<256x1xf32>
    %109 = vector.broadcast %101 : vector<256x1xf32> to vector<256x32xf32>
    %110 = arith.subf %97, %109 : vector<256x32xf32>
    %cst_59 = arith.constant 9.99999974E-6 : f32
    %111 = vector.broadcast %cst_59 : f32 to vector<256x1xf32>
    %112 = arith.addf %108, %111 : vector<256x1xf32>
    %113 = math.rsqrt %112 : vector<256x1xf32>
    %114 = vector.broadcast %113 : vector<256x1xf32> to vector<256x32xf32>
    %115 = arith.mulf %110, %114 : vector<256x32xf32>
    %116 = vector.broadcast %77 : vector<1x32xf32> to vector<256x32xf32>
    %117 = arith.mulf %115, %116 : vector<256x32xf32>
    %118 = vector.broadcast %78 : vector<1x32xf32> to vector<256x32xf32>
    %119 = arith.addf %117, %118 : vector<256x32xf32>
    %120 = arith.truncf %119 : vector<256x32xf32> to vector<256x32xbf16>
    %c0_60 = arith.constant 0 : index
    %c0_61 = arith.constant 0 : index
    %c0_62 = arith.constant 0 : index
    %121 = vector.load %arg20[%c0_60, %c0_61, %c0_62] : memref<2x32x32xf32, #tpu.memory_space<vmem>>, vector<1x32x32xf32>
    %122 = vector.shape_cast %121 : vector<1x32x32xf32> to vector<32x32xf32>
    %c0_63 = arith.constant 0 : index
    %c0_64 = arith.constant 0 : index
    %c0_65 = arith.constant 0 : index
    %123 = vector.load %arg21[%c0_63, %c0_64, %c0_65] : memref<2x32x32xf32, #tpu.memory_space<vmem>>, vector<1x32x32xf32>
    %124 = vector.shape_cast %123 : vector<1x32x32xf32> to vector<32x32xf32>
    %c0_66 = arith.constant 0 : index
    %c0_67 = arith.constant 0 : index
    %c0_68 = arith.constant 0 : index
    %125 = vector.load %arg22[%c0_66, %c0_67, %c0_68] : memref<2x32x32xf32, #tpu.memory_space<vmem>>, vector<1x32x32xf32>
    %126 = vector.shape_cast %125 : vector<1x32x32xf32> to vector<32x32xf32>
    %c0_69 = arith.constant 0 : index
    %c0_70 = arith.constant 0 : index
    %c0_71 = arith.constant 0 : index
    %127 = vector.load %arg23[%c0_69, %c0_70, %c0_71] : memref<2x1x32xf32, #tpu.memory_space<vmem>>, vector<1x1x32xf32>
    %128 = vector.shape_cast %127 : vector<1x1x32xf32> to vector<1x32xf32>
    %c0_72 = arith.constant 0 : index
    %c0_73 = arith.constant 0 : index
    %c0_74 = arith.constant 0 : index
    %129 = vector.load %arg24[%c0_72, %c0_73, %c0_74] : memref<2x32x32xf32, #tpu.memory_space<vmem>>, vector<1x32x32xf32>
    %130 = vector.shape_cast %129 : vector<1x32x32xf32> to vector<32x32xf32>
    %c0_75 = arith.constant 0 : index
    %c0_76 = arith.constant 0 : index
    %c0_77 = arith.constant 0 : index
    %131 = vector.load %arg25[%c0_75, %c0_76, %c0_77] : memref<2x1x32xf32, #tpu.memory_space<vmem>>, vector<1x1x32xf32>
    %132 = vector.shape_cast %131 : vector<1x1x32xf32> to vector<1x32xf32>
    %c0_78 = arith.constant 0 : index
    %c0_79 = arith.constant 0 : index
    %c0_80 = arith.constant 0 : index
    %133 = vector.load %arg26[%c0_78, %c0_79, %c0_80] : memref<2x32x32xf32, #tpu.memory_space<vmem>>, vector<1x32x32xf32>
    %134 = vector.shape_cast %133 : vector<1x32x32xf32> to vector<32x32xf32>
    %c0_81 = arith.constant 0 : index
    %c0_82 = arith.constant 0 : index
    %c0_83 = arith.constant 0 : index
    %135 = vector.load %arg27[%c0_81, %c0_82, %c0_83] : memref<2x1x32xf32, #tpu.memory_space<vmem>>, vector<1x1x32xf32>
    %136 = vector.shape_cast %135 : vector<1x1x32xf32> to vector<1x32xf32>
    %c0_84 = arith.constant 0 : index
    %c0_85 = arith.constant 0 : index
    %c0_86 = arith.constant 0 : index
    %137 = vector.load %arg28[%c0_84, %c0_85, %c0_86] : memref<2x1x32xf32, #tpu.memory_space<vmem>>, vector<1x1x32xf32>
    %138 = vector.shape_cast %137 : vector<1x1x32xf32> to vector<1x32xf32>
    %c0_87 = arith.constant 0 : index
    %c0_88 = arith.constant 0 : index
    %c0_89 = arith.constant 0 : index
    %139 = vector.load %arg29[%c0_87, %c0_88, %c0_89] : memref<2x1x32xf32, #tpu.memory_space<vmem>>, vector<1x1x32xf32>
    %140 = vector.shape_cast %139 : vector<1x1x32xf32> to vector<1x32xf32>
    %141 = arith.truncf %69 : vector<64x32xf32> to vector<64x32xbf16>
    %142 = arith.truncf %122 : vector<32x32xf32> to vector<32x32xbf16>
    %cst_90 = arith.constant dense<0.000000e+00> : vector<64x32xf32>
    %143 = tpu.matmul %141, %142, %cst_90 {dimension_numbers = #tpu.dot_dimension_numbers<[1], [0], [0], [1], [0, 0, 1, 1], [], []>} : vector<64x32xbf16>, vector<32x32xbf16>, vector<64x32xf32> -> vector<64x32xf32>
    %144 = arith.truncf %69 : vector<64x32xf32> to vector<64x32xbf16>
    %145 = arith.truncf %124 : vector<32x32xf32> to vector<32x32xbf16>
    %cst_91 = arith.constant dense<0.000000e+00> : vector<64x32xf32>
    %146 = tpu.matmul %144, %145, %cst_91 {dimension_numbers = #tpu.dot_dimension_numbers<[1], [0], [0], [1], [0, 0, 1, 1], [], []>} : vector<64x32xbf16>, vector<32x32xbf16>, vector<64x32xf32> -> vector<64x32xf32>
    %147 = tpu.concatenate %143, %146 in 0 : vector<64x32xf32>, vector<64x32xf32> -> vector<128x32xf32>
    %148 = arith.truncf %147 : vector<128x32xf32> to vector<128x32xbf16>
    %cst_92 = arith.constant dense<0.000000e+00> : vector<256x32xf32>
    %149 = tpu.matmul %12, %148, %cst_92 {dimension_numbers = #tpu.dot_dimension_numbers<[1], [0], [0], [1], [0, 0, 1, 1], [], []>} : vector<256x128xbf16>, vector<128x32xbf16>, vector<256x32xf32> -> vector<256x32xf32>
    %150 = arith.truncf %126 : vector<32x32xf32> to vector<32x32xbf16>
    %cst_93 = arith.constant dense<0.000000e+00> : vector<256x32xf32>
    %151 = tpu.matmul %120, %150, %cst_93 {dimension_numbers = #tpu.dot_dimension_numbers<[1], [0], [0], [1], [0, 0, 1, 1], [], []>} : vector<256x32xbf16>, vector<32x32xbf16>, vector<256x32xf32> -> vector<256x32xf32>
    %152 = arith.addf %149, %151 : vector<256x32xf32>
    %153 = vector.broadcast %128 : vector<1x32xf32> to vector<256x32xf32>
    %154 = arith.addf %152, %153 : vector<256x32xf32>
    %cst_94 = arith.constant 0.000000e+00 : f32
    %155 = vector.broadcast %cst_94 : f32 to vector<256x32xf32>
    %156 = arith.maximumf %154, %155 : vector<256x32xf32>
    %157 = arith.truncf %156 : vector<256x32xf32> to vector<256x32xbf16>
    %158 = arith.truncf %130 : vector<32x32xf32> to vector<32x32xbf16>
    %cst_95 = arith.constant dense<0.000000e+00> : vector<256x32xf32>
    %159 = tpu.matmul %157, %158, %cst_95 {dimension_numbers = #tpu.dot_dimension_numbers<[1], [0], [0], [1], [0, 0, 1, 1], [], []>} : vector<256x32xbf16>, vector<32x32xbf16>, vector<256x32xf32> -> vector<256x32xf32>
    %160 = vector.broadcast %132 : vector<1x32xf32> to vector<256x32xf32>
    %161 = arith.addf %159, %160 : vector<256x32xf32>
    %cst_96 = arith.constant 0.000000e+00 : f32
    %162 = vector.broadcast %cst_96 : f32 to vector<256x32xf32>
    %163 = arith.maximumf %161, %162 : vector<256x32xf32>
    %164 = arith.truncf %163 : vector<256x32xf32> to vector<256x32xbf16>
    %165 = arith.truncf %134 : vector<32x32xf32> to vector<32x32xbf16>
    %cst_97 = arith.constant dense<0.000000e+00> : vector<256x32xf32>
    %166 = tpu.matmul %164, %165, %cst_97 {dimension_numbers = #tpu.dot_dimension_numbers<[1], [0], [0], [1], [0, 0, 1, 1], [], []>} : vector<256x32xbf16>, vector<32x32xbf16>, vector<256x32xf32> -> vector<256x32xf32>
    %167 = vector.broadcast %136 : vector<1x32xf32> to vector<256x32xf32>
    %168 = arith.addf %166, %167 : vector<256x32xf32>
    %cst_98 = arith.constant dense<0.000000e+00> : vector<256xf32>
    %169 = vector.multi_reduction <add>, %168, %cst_98 [1] : vector<256x32xf32> to vector<256xf32>
    %170 = vector.shape_cast %169 : vector<256xf32> to vector<256x1xf32>
    %cst_99 = arith.constant 3.200000e+01 : f32
    %171 = vector.broadcast %cst_99 : f32 to vector<256x1xf32>
    %172 = arith.divf %170, %171 : vector<256x1xf32>
    %173 = vector.broadcast %172 : vector<256x1xf32> to vector<256x32xf32>
    %174 = arith.subf %168, %173 : vector<256x32xf32>
    %175 = arith.mulf %174, %174 : vector<256x32xf32>
    %cst_100 = arith.constant dense<0.000000e+00> : vector<256xf32>
    %176 = vector.multi_reduction <add>, %175, %cst_100 [1] : vector<256x32xf32> to vector<256xf32>
    %177 = vector.shape_cast %176 : vector<256xf32> to vector<256x1xf32>
    %cst_101 = arith.constant 3.200000e+01 : f32
    %178 = vector.broadcast %cst_101 : f32 to vector<256x1xf32>
    %179 = arith.divf %177, %178 : vector<256x1xf32>
    %180 = vector.broadcast %172 : vector<256x1xf32> to vector<256x32xf32>
    %181 = arith.subf %168, %180 : vector<256x32xf32>
    %cst_102 = arith.constant 9.99999974E-6 : f32
    %182 = vector.broadcast %cst_102 : f32 to vector<256x1xf32>
    %183 = arith.addf %179, %182 : vector<256x1xf32>
    %184 = math.rsqrt %183 : vector<256x1xf32>
    %185 = vector.broadcast %184 : vector<256x1xf32> to vector<256x32xf32>
    %186 = arith.mulf %181, %185 : vector<256x32xf32>
    %187 = vector.broadcast %138 : vector<1x32xf32> to vector<256x32xf32>
    %188 = arith.mulf %186, %187 : vector<256x32xf32>
    %189 = vector.broadcast %140 : vector<1x32xf32> to vector<256x32xf32>
    %190 = arith.addf %188, %189 : vector<256x32xf32>
    %191 = arith.truncf %190 : vector<256x32xf32> to vector<256x32xbf16>
    %cst_103 = arith.constant dense<0.000000e+00> : vector<64x32xf32>
    %192 = tpu.matmul %19, %191, %cst_103 {dimension_numbers = #tpu.dot_dimension_numbers<[0], [0], [1], [1], [0, 1, 1, 1], [], []>} : vector<256x64xbf16>, vector<256x32xbf16>, vector<64x32xf32> -> vector<64x32xf32>
    %c0_104 = arith.constant 0 : index
    %c0_105 = arith.constant 0 : index
    %c0_106 = arith.constant 0 : index
    %193 = vector.load %arg30[%c0_104, %c0_105, %c0_106] : memref<2x64x32xf32, #tpu.memory_space<vmem>>, vector<1x64x32xf32>
    %194 = vector.shape_cast %193 : vector<1x64x32xf32> to vector<64x32xf32>
    %c0_107 = arith.constant 0 : index
    %c0_108 = arith.constant 0 : index
    %c0_109 = arith.constant 0 : index
    %195 = vector.load %arg31[%c0_107, %c0_108, %c0_109] : memref<2x1x32xf32, #tpu.memory_space<vmem>>, vector<1x1x32xf32>
    %196 = vector.shape_cast %195 : vector<1x1x32xf32> to vector<1x32xf32>
    %c0_110 = arith.constant 0 : index
    %c0_111 = arith.constant 0 : index
    %c0_112 = arith.constant 0 : index
    %197 = vector.load %arg32[%c0_110, %c0_111, %c0_112] : memref<2x32x32xf32, #tpu.memory_space<vmem>>, vector<1x32x32xf32>
    %198 = vector.shape_cast %197 : vector<1x32x32xf32> to vector<32x32xf32>
    %c0_113 = arith.constant 0 : index
    %c0_114 = arith.constant 0 : index
    %c0_115 = arith.constant 0 : index
    %199 = vector.load %arg33[%c0_113, %c0_114, %c0_115] : memref<2x1x32xf32, #tpu.memory_space<vmem>>, vector<1x1x32xf32>
    %200 = vector.shape_cast %199 : vector<1x1x32xf32> to vector<1x32xf32>
    %c0_116 = arith.constant 0 : index
    %c0_117 = arith.constant 0 : index
    %c0_118 = arith.constant 0 : index
    %201 = vector.load %arg34[%c0_116, %c0_117, %c0_118] : memref<2x32x32xf32, #tpu.memory_space<vmem>>, vector<1x32x32xf32>
    %202 = vector.shape_cast %201 : vector<1x32x32xf32> to vector<32x32xf32>
    %c0_119 = arith.constant 0 : index
    %c0_120 = arith.constant 0 : index
    %c0_121 = arith.constant 0 : index
    %203 = vector.load %arg35[%c0_119, %c0_120, %c0_121] : memref<2x1x32xf32, #tpu.memory_space<vmem>>, vector<1x1x32xf32>
    %204 = vector.shape_cast %203 : vector<1x1x32xf32> to vector<1x32xf32>
    %c0_122 = arith.constant 0 : index
    %c0_123 = arith.constant 0 : index
    %c0_124 = arith.constant 0 : index
    %205 = vector.load %arg36[%c0_122, %c0_123, %c0_124] : memref<2x1x32xf32, #tpu.memory_space<vmem>>, vector<1x1x32xf32>
    %206 = vector.shape_cast %205 : vector<1x1x32xf32> to vector<1x32xf32>
    %c0_125 = arith.constant 0 : index
    %c0_126 = arith.constant 0 : index
    %c0_127 = arith.constant 0 : index
    %207 = vector.load %arg37[%c0_125, %c0_126, %c0_127] : memref<2x1x32xf32, #tpu.memory_space<vmem>>, vector<1x1x32xf32>
    %208 = vector.shape_cast %207 : vector<1x1x32xf32> to vector<1x32xf32>
    %209 = vector.extract_strided_slice %194 {offsets = [0, 0], sizes = [32, 32], strides = [1, 1]} : vector<64x32xf32> to vector<32x32xf32>
    %210 = arith.truncf %192 : vector<64x32xf32> to vector<64x32xbf16>
    %211 = arith.truncf %209 : vector<32x32xf32> to vector<32x32xbf16>
    %cst_128 = arith.constant dense<0.000000e+00> : vector<64x32xf32>
    %212 = tpu.matmul %210, %211, %cst_128 {dimension_numbers = #tpu.dot_dimension_numbers<[1], [0], [0], [1], [0, 0, 1, 1], [], []>} : vector<64x32xbf16>, vector<32x32xbf16>, vector<64x32xf32> -> vector<64x32xf32>
    %213 = vector.broadcast %196 : vector<1x32xf32> to vector<64x32xf32>
    %214 = arith.addf %213, %212 : vector<64x32xf32>
    %215 = vector.extract_strided_slice %194 {offsets = [32, 0], sizes = [32, 32], strides = [1, 1]} : vector<64x32xf32> to vector<32x32xf32>
    %216 = arith.truncf %69 : vector<64x32xf32> to vector<64x32xbf16>
    %217 = arith.truncf %215 : vector<32x32xf32> to vector<32x32xbf16>
    %cst_129 = arith.constant dense<0.000000e+00> : vector<64x32xf32>
    %218 = tpu.matmul %216, %217, %cst_129 {dimension_numbers = #tpu.dot_dimension_numbers<[1], [0], [0], [1], [0, 0, 1, 1], [], []>} : vector<64x32xbf16>, vector<32x32xbf16>, vector<64x32xf32> -> vector<64x32xf32>
    %219 = arith.addf %214, %218 : vector<64x32xf32>
    %cst_130 = arith.constant 0.000000e+00 : f32
    %220 = vector.broadcast %cst_130 : f32 to vector<64x32xf32>
    %221 = arith.maximumf %219, %220 : vector<64x32xf32>
    %222 = arith.truncf %221 : vector<64x32xf32> to vector<64x32xbf16>
    %223 = arith.truncf %198 : vector<32x32xf32> to vector<32x32xbf16>
    %cst_131 = arith.constant dense<0.000000e+00> : vector<64x32xf32>
    %224 = tpu.matmul %222, %223, %cst_131 {dimension_numbers = #tpu.dot_dimension_numbers<[1], [0], [0], [1], [0, 0, 1, 1], [], []>} : vector<64x32xbf16>, vector<32x32xbf16>, vector<64x32xf32> -> vector<64x32xf32>
    %225 = vector.broadcast %200 : vector<1x32xf32> to vector<64x32xf32>
    %226 = arith.addf %224, %225 : vector<64x32xf32>
    %cst_132 = arith.constant 0.000000e+00 : f32
    %227 = vector.broadcast %cst_132 : f32 to vector<64x32xf32>
    %228 = arith.maximumf %226, %227 : vector<64x32xf32>
    %229 = arith.truncf %228 : vector<64x32xf32> to vector<64x32xbf16>
    %230 = arith.truncf %202 : vector<32x32xf32> to vector<32x32xbf16>
    %cst_133 = arith.constant dense<0.000000e+00> : vector<64x32xf32>
    %231 = tpu.matmul %229, %230, %cst_133 {dimension_numbers = #tpu.dot_dimension_numbers<[1], [0], [0], [1], [0, 0, 1, 1], [], []>} : vector<64x32xbf16>, vector<32x32xbf16>, vector<64x32xf32> -> vector<64x32xf32>
    %232 = vector.broadcast %204 : vector<1x32xf32> to vector<64x32xf32>
    %233 = arith.addf %231, %232 : vector<64x32xf32>
    %cst_134 = arith.constant dense<0.000000e+00> : vector<64xf32>
    %234 = vector.multi_reduction <add>, %233, %cst_134 [1] : vector<64x32xf32> to vector<64xf32>
    %235 = vector.shape_cast %234 : vector<64xf32> to vector<64x1xf32>
    %cst_135 = arith.constant 3.200000e+01 : f32
    %236 = vector.broadcast %cst_135 : f32 to vector<64x1xf32>
    %237 = arith.divf %235, %236 : vector<64x1xf32>
    %238 = vector.broadcast %237 : vector<64x1xf32> to vector<64x32xf32>
    %239 = arith.subf %233, %238 : vector<64x32xf32>
    %240 = arith.mulf %239, %239 : vector<64x32xf32>
    %cst_136 = arith.constant dense<0.000000e+00> : vector<64xf32>
    %241 = vector.multi_reduction <add>, %240, %cst_136 [1] : vector<64x32xf32> to vector<64xf32>
    %242 = vector.shape_cast %241 : vector<64xf32> to vector<64x1xf32>
    %cst_137 = arith.constant 3.200000e+01 : f32
    %243 = vector.broadcast %cst_137 : f32 to vector<64x1xf32>
    %244 = arith.divf %242, %243 : vector<64x1xf32>
    %245 = vector.broadcast %237 : vector<64x1xf32> to vector<64x32xf32>
    %246 = arith.subf %233, %245 : vector<64x32xf32>
    %cst_138 = arith.constant 9.99999974E-6 : f32
    %247 = vector.broadcast %cst_138 : f32 to vector<64x1xf32>
    %248 = arith.addf %244, %247 : vector<64x1xf32>
    %249 = math.rsqrt %248 : vector<64x1xf32>
    %250 = vector.broadcast %249 : vector<64x1xf32> to vector<64x32xf32>
    %251 = arith.mulf %246, %250 : vector<64x32xf32>
    %252 = vector.broadcast %206 : vector<1x32xf32> to vector<64x32xf32>
    %253 = arith.mulf %251, %252 : vector<64x32xf32>
    %254 = vector.broadcast %208 : vector<1x32xf32> to vector<64x32xf32>
    %255 = arith.addf %253, %254 : vector<64x32xf32>
    %256 = arith.addf %255, %69 : vector<64x32xf32>
    %c1 = arith.constant 1 : index
    %c0_139 = arith.constant 0 : index
    %c0_140 = arith.constant 0 : index
    %257 = vector.load %arg20[%c1, %c0_139, %c0_140] : memref<2x32x32xf32, #tpu.memory_space<vmem>>, vector<1x32x32xf32>
    %258 = vector.shape_cast %257 : vector<1x32x32xf32> to vector<32x32xf32>
    %c1_141 = arith.constant 1 : index
    %c0_142 = arith.constant 0 : index
    %c0_143 = arith.constant 0 : index
    %259 = vector.load %arg21[%c1_141, %c0_142, %c0_143] : memref<2x32x32xf32, #tpu.memory_space<vmem>>, vector<1x32x32xf32>
    %260 = vector.shape_cast %259 : vector<1x32x32xf32> to vector<32x32xf32>
    %c1_144 = arith.constant 1 : index
    %c0_145 = arith.constant 0 : index
    %c0_146 = arith.constant 0 : index
    %261 = vector.load %arg22[%c1_144, %c0_145, %c0_146] : memref<2x32x32xf32, #tpu.memory_space<vmem>>, vector<1x32x32xf32>
    %262 = vector.shape_cast %261 : vector<1x32x32xf32> to vector<32x32xf32>
    %c1_147 = arith.constant 1 : index
    %c0_148 = arith.constant 0 : index
    %c0_149 = arith.constant 0 : index
    %263 = vector.load %arg23[%c1_147, %c0_148, %c0_149] : memref<2x1x32xf32, #tpu.memory_space<vmem>>, vector<1x1x32xf32>
    %264 = vector.shape_cast %263 : vector<1x1x32xf32> to vector<1x32xf32>
    %c1_150 = arith.constant 1 : index
    %c0_151 = arith.constant 0 : index
    %c0_152 = arith.constant 0 : index
    %265 = vector.load %arg24[%c1_150, %c0_151, %c0_152] : memref<2x32x32xf32, #tpu.memory_space<vmem>>, vector<1x32x32xf32>
    %266 = vector.shape_cast %265 : vector<1x32x32xf32> to vector<32x32xf32>
    %c1_153 = arith.constant 1 : index
    %c0_154 = arith.constant 0 : index
    %c0_155 = arith.constant 0 : index
    %267 = vector.load %arg25[%c1_153, %c0_154, %c0_155] : memref<2x1x32xf32, #tpu.memory_space<vmem>>, vector<1x1x32xf32>
    %268 = vector.shape_cast %267 : vector<1x1x32xf32> to vector<1x32xf32>
    %c1_156 = arith.constant 1 : index
    %c0_157 = arith.constant 0 : index
    %c0_158 = arith.constant 0 : index
    %269 = vector.load %arg26[%c1_156, %c0_157, %c0_158] : memref<2x32x32xf32, #tpu.memory_space<vmem>>, vector<1x32x32xf32>
    %270 = vector.shape_cast %269 : vector<1x32x32xf32> to vector<32x32xf32>
    %c1_159 = arith.constant 1 : index
    %c0_160 = arith.constant 0 : index
    %c0_161 = arith.constant 0 : index
    %271 = vector.load %arg27[%c1_159, %c0_160, %c0_161] : memref<2x1x32xf32, #tpu.memory_space<vmem>>, vector<1x1x32xf32>
    %272 = vector.shape_cast %271 : vector<1x1x32xf32> to vector<1x32xf32>
    %c1_162 = arith.constant 1 : index
    %c0_163 = arith.constant 0 : index
    %c0_164 = arith.constant 0 : index
    %273 = vector.load %arg28[%c1_162, %c0_163, %c0_164] : memref<2x1x32xf32, #tpu.memory_space<vmem>>, vector<1x1x32xf32>
    %274 = vector.shape_cast %273 : vector<1x1x32xf32> to vector<1x32xf32>
    %c1_165 = arith.constant 1 : index
    %c0_166 = arith.constant 0 : index
    %c0_167 = arith.constant 0 : index
    %275 = vector.load %arg29[%c1_165, %c0_166, %c0_167] : memref<2x1x32xf32, #tpu.memory_space<vmem>>, vector<1x1x32xf32>
    %276 = vector.shape_cast %275 : vector<1x1x32xf32> to vector<1x32xf32>
    %277 = arith.truncf %256 : vector<64x32xf32> to vector<64x32xbf16>
    %278 = arith.truncf %258 : vector<32x32xf32> to vector<32x32xbf16>
    %cst_168 = arith.constant dense<0.000000e+00> : vector<64x32xf32>
    %279 = tpu.matmul %277, %278, %cst_168 {dimension_numbers = #tpu.dot_dimension_numbers<[1], [0], [0], [1], [0, 0, 1, 1], [], []>} : vector<64x32xbf16>, vector<32x32xbf16>, vector<64x32xf32> -> vector<64x32xf32>
    %280 = arith.truncf %256 : vector<64x32xf32> to vector<64x32xbf16>
    %281 = arith.truncf %260 : vector<32x32xf32> to vector<32x32xbf16>
    %cst_169 = arith.constant dense<0.000000e+00> : vector<64x32xf32>
    %282 = tpu.matmul %280, %281, %cst_169 {dimension_numbers = #tpu.dot_dimension_numbers<[1], [0], [0], [1], [0, 0, 1, 1], [], []>} : vector<64x32xbf16>, vector<32x32xbf16>, vector<64x32xf32> -> vector<64x32xf32>
    %283 = tpu.concatenate %279, %282 in 0 : vector<64x32xf32>, vector<64x32xf32> -> vector<128x32xf32>
    %284 = arith.truncf %283 : vector<128x32xf32> to vector<128x32xbf16>
    %cst_170 = arith.constant dense<0.000000e+00> : vector<256x32xf32>
    %285 = tpu.matmul %12, %284, %cst_170 {dimension_numbers = #tpu.dot_dimension_numbers<[1], [0], [0], [1], [0, 0, 1, 1], [], []>} : vector<256x128xbf16>, vector<128x32xbf16>, vector<256x32xf32> -> vector<256x32xf32>
    %286 = arith.truncf %262 : vector<32x32xf32> to vector<32x32xbf16>
    %cst_171 = arith.constant dense<0.000000e+00> : vector<256x32xf32>
    %287 = tpu.matmul %120, %286, %cst_171 {dimension_numbers = #tpu.dot_dimension_numbers<[1], [0], [0], [1], [0, 0, 1, 1], [], []>} : vector<256x32xbf16>, vector<32x32xbf16>, vector<256x32xf32> -> vector<256x32xf32>
    %288 = arith.addf %285, %287 : vector<256x32xf32>
    %289 = vector.broadcast %264 : vector<1x32xf32> to vector<256x32xf32>
    %290 = arith.addf %288, %289 : vector<256x32xf32>
    %cst_172 = arith.constant 0.000000e+00 : f32
    %291 = vector.broadcast %cst_172 : f32 to vector<256x32xf32>
    %292 = arith.maximumf %290, %291 : vector<256x32xf32>
    %293 = arith.truncf %292 : vector<256x32xf32> to vector<256x32xbf16>
    %294 = arith.truncf %266 : vector<32x32xf32> to vector<32x32xbf16>
    %cst_173 = arith.constant dense<0.000000e+00> : vector<256x32xf32>
    %295 = tpu.matmul %293, %294, %cst_173 {dimension_numbers = #tpu.dot_dimension_numbers<[1], [0], [0], [1], [0, 0, 1, 1], [], []>} : vector<256x32xbf16>, vector<32x32xbf16>, vector<256x32xf32> -> vector<256x32xf32>
    %296 = vector.broadcast %268 : vector<1x32xf32> to vector<256x32xf32>
    %297 = arith.addf %295, %296 : vector<256x32xf32>
    %cst_174 = arith.constant 0.000000e+00 : f32
    %298 = vector.broadcast %cst_174 : f32 to vector<256x32xf32>
    %299 = arith.maximumf %297, %298 : vector<256x32xf32>
    %300 = arith.truncf %299 : vector<256x32xf32> to vector<256x32xbf16>
    %301 = arith.truncf %270 : vector<32x32xf32> to vector<32x32xbf16>
    %cst_175 = arith.constant dense<0.000000e+00> : vector<256x32xf32>
    %302 = tpu.matmul %300, %301, %cst_175 {dimension_numbers = #tpu.dot_dimension_numbers<[1], [0], [0], [1], [0, 0, 1, 1], [], []>} : vector<256x32xbf16>, vector<32x32xbf16>, vector<256x32xf32> -> vector<256x32xf32>
    %303 = vector.broadcast %272 : vector<1x32xf32> to vector<256x32xf32>
    %304 = arith.addf %302, %303 : vector<256x32xf32>
    %cst_176 = arith.constant dense<0.000000e+00> : vector<256xf32>
    %305 = vector.multi_reduction <add>, %304, %cst_176 [1] : vector<256x32xf32> to vector<256xf32>
    %306 = vector.shape_cast %305 : vector<256xf32> to vector<256x1xf32>
    %cst_177 = arith.constant 3.200000e+01 : f32
    %307 = vector.broadcast %cst_177 : f32 to vector<256x1xf32>
    %308 = arith.divf %306, %307 : vector<256x1xf32>
    %309 = vector.broadcast %308 : vector<256x1xf32> to vector<256x32xf32>
    %310 = arith.subf %304, %309 : vector<256x32xf32>
    %311 = arith.mulf %310, %310 : vector<256x32xf32>
    %cst_178 = arith.constant dense<0.000000e+00> : vector<256xf32>
    %312 = vector.multi_reduction <add>, %311, %cst_178 [1] : vector<256x32xf32> to vector<256xf32>
    %313 = vector.shape_cast %312 : vector<256xf32> to vector<256x1xf32>
    %cst_179 = arith.constant 3.200000e+01 : f32
    %314 = vector.broadcast %cst_179 : f32 to vector<256x1xf32>
    %315 = arith.divf %313, %314 : vector<256x1xf32>
    %316 = vector.broadcast %308 : vector<256x1xf32> to vector<256x32xf32>
    %317 = arith.subf %304, %316 : vector<256x32xf32>
    %cst_180 = arith.constant 9.99999974E-6 : f32
    %318 = vector.broadcast %cst_180 : f32 to vector<256x1xf32>
    %319 = arith.addf %315, %318 : vector<256x1xf32>
    %320 = math.rsqrt %319 : vector<256x1xf32>
    %321 = vector.broadcast %320 : vector<256x1xf32> to vector<256x32xf32>
    %322 = arith.mulf %317, %321 : vector<256x32xf32>
    %323 = vector.broadcast %274 : vector<1x32xf32> to vector<256x32xf32>
    %324 = arith.mulf %322, %323 : vector<256x32xf32>
    %325 = vector.broadcast %276 : vector<1x32xf32> to vector<256x32xf32>
    %326 = arith.addf %324, %325 : vector<256x32xf32>
    %327 = arith.truncf %326 : vector<256x32xf32> to vector<256x32xbf16>
    %cst_181 = arith.constant dense<0.000000e+00> : vector<64x32xf32>
    %328 = tpu.matmul %19, %327, %cst_181 {dimension_numbers = #tpu.dot_dimension_numbers<[0], [0], [1], [1], [0, 1, 1, 1], [], []>} : vector<256x64xbf16>, vector<256x32xbf16>, vector<64x32xf32> -> vector<64x32xf32>
    %c1_182 = arith.constant 1 : index
    %c0_183 = arith.constant 0 : index
    %c0_184 = arith.constant 0 : index
    %329 = vector.load %arg30[%c1_182, %c0_183, %c0_184] : memref<2x64x32xf32, #tpu.memory_space<vmem>>, vector<1x64x32xf32>
    %330 = vector.shape_cast %329 : vector<1x64x32xf32> to vector<64x32xf32>
    %c1_185 = arith.constant 1 : index
    %c0_186 = arith.constant 0 : index
    %c0_187 = arith.constant 0 : index
    %331 = vector.load %arg31[%c1_185, %c0_186, %c0_187] : memref<2x1x32xf32, #tpu.memory_space<vmem>>, vector<1x1x32xf32>
    %332 = vector.shape_cast %331 : vector<1x1x32xf32> to vector<1x32xf32>
    %c1_188 = arith.constant 1 : index
    %c0_189 = arith.constant 0 : index
    %c0_190 = arith.constant 0 : index
    %333 = vector.load %arg32[%c1_188, %c0_189, %c0_190] : memref<2x32x32xf32, #tpu.memory_space<vmem>>, vector<1x32x32xf32>
    %334 = vector.shape_cast %333 : vector<1x32x32xf32> to vector<32x32xf32>
    %c1_191 = arith.constant 1 : index
    %c0_192 = arith.constant 0 : index
    %c0_193 = arith.constant 0 : index
    %335 = vector.load %arg33[%c1_191, %c0_192, %c0_193] : memref<2x1x32xf32, #tpu.memory_space<vmem>>, vector<1x1x32xf32>
    %336 = vector.shape_cast %335 : vector<1x1x32xf32> to vector<1x32xf32>
    %c1_194 = arith.constant 1 : index
    %c0_195 = arith.constant 0 : index
    %c0_196 = arith.constant 0 : index
    %337 = vector.load %arg34[%c1_194, %c0_195, %c0_196] : memref<2x32x32xf32, #tpu.memory_space<vmem>>, vector<1x32x32xf32>
    %338 = vector.shape_cast %337 : vector<1x32x32xf32> to vector<32x32xf32>
    %c1_197 = arith.constant 1 : index
    %c0_198 = arith.constant 0 : index
    %c0_199 = arith.constant 0 : index
    %339 = vector.load %arg35[%c1_197, %c0_198, %c0_199] : memref<2x1x32xf32, #tpu.memory_space<vmem>>, vector<1x1x32xf32>
    %340 = vector.shape_cast %339 : vector<1x1x32xf32> to vector<1x32xf32>
    %c1_200 = arith.constant 1 : index
    %c0_201 = arith.constant 0 : index
    %c0_202 = arith.constant 0 : index
    %341 = vector.load %arg36[%c1_200, %c0_201, %c0_202] : memref<2x1x32xf32, #tpu.memory_space<vmem>>, vector<1x1x32xf32>
    %342 = vector.shape_cast %341 : vector<1x1x32xf32> to vector<1x32xf32>
    %c1_203 = arith.constant 1 : index
    %c0_204 = arith.constant 0 : index
    %c0_205 = arith.constant 0 : index
    %343 = vector.load %arg37[%c1_203, %c0_204, %c0_205] : memref<2x1x32xf32, #tpu.memory_space<vmem>>, vector<1x1x32xf32>
    %344 = vector.shape_cast %343 : vector<1x1x32xf32> to vector<1x32xf32>
    %345 = vector.extract_strided_slice %330 {offsets = [0, 0], sizes = [32, 32], strides = [1, 1]} : vector<64x32xf32> to vector<32x32xf32>
    %346 = arith.truncf %328 : vector<64x32xf32> to vector<64x32xbf16>
    %347 = arith.truncf %345 : vector<32x32xf32> to vector<32x32xbf16>
    %cst_206 = arith.constant dense<0.000000e+00> : vector<64x32xf32>
    %348 = tpu.matmul %346, %347, %cst_206 {dimension_numbers = #tpu.dot_dimension_numbers<[1], [0], [0], [1], [0, 0, 1, 1], [], []>} : vector<64x32xbf16>, vector<32x32xbf16>, vector<64x32xf32> -> vector<64x32xf32>
    %349 = vector.broadcast %332 : vector<1x32xf32> to vector<64x32xf32>
    %350 = arith.addf %349, %348 : vector<64x32xf32>
    %351 = vector.extract_strided_slice %330 {offsets = [32, 0], sizes = [32, 32], strides = [1, 1]} : vector<64x32xf32> to vector<32x32xf32>
    %352 = arith.truncf %256 : vector<64x32xf32> to vector<64x32xbf16>
    %353 = arith.truncf %351 : vector<32x32xf32> to vector<32x32xbf16>
    %cst_207 = arith.constant dense<0.000000e+00> : vector<64x32xf32>
    %354 = tpu.matmul %352, %353, %cst_207 {dimension_numbers = #tpu.dot_dimension_numbers<[1], [0], [0], [1], [0, 0, 1, 1], [], []>} : vector<64x32xbf16>, vector<32x32xbf16>, vector<64x32xf32> -> vector<64x32xf32>
    %355 = arith.addf %350, %354 : vector<64x32xf32>
    %cst_208 = arith.constant 0.000000e+00 : f32
    %356 = vector.broadcast %cst_208 : f32 to vector<64x32xf32>
    %357 = arith.maximumf %355, %356 : vector<64x32xf32>
    %358 = arith.truncf %357 : vector<64x32xf32> to vector<64x32xbf16>
    %359 = arith.truncf %334 : vector<32x32xf32> to vector<32x32xbf16>
    %cst_209 = arith.constant dense<0.000000e+00> : vector<64x32xf32>
    %360 = tpu.matmul %358, %359, %cst_209 {dimension_numbers = #tpu.dot_dimension_numbers<[1], [0], [0], [1], [0, 0, 1, 1], [], []>} : vector<64x32xbf16>, vector<32x32xbf16>, vector<64x32xf32> -> vector<64x32xf32>
    %361 = vector.broadcast %336 : vector<1x32xf32> to vector<64x32xf32>
    %362 = arith.addf %360, %361 : vector<64x32xf32>
    %cst_210 = arith.constant 0.000000e+00 : f32
    %363 = vector.broadcast %cst_210 : f32 to vector<64x32xf32>
    %364 = arith.maximumf %362, %363 : vector<64x32xf32>
    %365 = arith.truncf %364 : vector<64x32xf32> to vector<64x32xbf16>
    %366 = arith.truncf %338 : vector<32x32xf32> to vector<32x32xbf16>
    %cst_211 = arith.constant dense<0.000000e+00> : vector<64x32xf32>
    %367 = tpu.matmul %365, %366, %cst_211 {dimension_numbers = #tpu.dot_dimension_numbers<[1], [0], [0], [1], [0, 0, 1, 1], [], []>} : vector<64x32xbf16>, vector<32x32xbf16>, vector<64x32xf32> -> vector<64x32xf32>
    %368 = vector.broadcast %340 : vector<1x32xf32> to vector<64x32xf32>
    %369 = arith.addf %367, %368 : vector<64x32xf32>
    %cst_212 = arith.constant dense<0.000000e+00> : vector<64xf32>
    %370 = vector.multi_reduction <add>, %369, %cst_212 [1] : vector<64x32xf32> to vector<64xf32>
    %371 = vector.shape_cast %370 : vector<64xf32> to vector<64x1xf32>
    %cst_213 = arith.constant 3.200000e+01 : f32
    %372 = vector.broadcast %cst_213 : f32 to vector<64x1xf32>
    %373 = arith.divf %371, %372 : vector<64x1xf32>
    %374 = vector.broadcast %373 : vector<64x1xf32> to vector<64x32xf32>
    %375 = arith.subf %369, %374 : vector<64x32xf32>
    %376 = arith.mulf %375, %375 : vector<64x32xf32>
    %cst_214 = arith.constant dense<0.000000e+00> : vector<64xf32>
    %377 = vector.multi_reduction <add>, %376, %cst_214 [1] : vector<64x32xf32> to vector<64xf32>
    %378 = vector.shape_cast %377 : vector<64xf32> to vector<64x1xf32>
    %cst_215 = arith.constant 3.200000e+01 : f32
    %379 = vector.broadcast %cst_215 : f32 to vector<64x1xf32>
    %380 = arith.divf %378, %379 : vector<64x1xf32>
    %381 = vector.broadcast %373 : vector<64x1xf32> to vector<64x32xf32>
    %382 = arith.subf %369, %381 : vector<64x32xf32>
    %cst_216 = arith.constant 9.99999974E-6 : f32
    %383 = vector.broadcast %cst_216 : f32 to vector<64x1xf32>
    %384 = arith.addf %380, %383 : vector<64x1xf32>
    %385 = math.rsqrt %384 : vector<64x1xf32>
    %386 = vector.broadcast %385 : vector<64x1xf32> to vector<64x32xf32>
    %387 = arith.mulf %382, %386 : vector<64x32xf32>
    %388 = vector.broadcast %342 : vector<1x32xf32> to vector<64x32xf32>
    %389 = arith.mulf %387, %388 : vector<64x32xf32>
    %390 = vector.broadcast %344 : vector<1x32xf32> to vector<64x32xf32>
    %391 = arith.addf %389, %390 : vector<64x32xf32>
    %392 = arith.addf %391, %256 : vector<64x32xf32>
    %c0_217 = arith.constant 0 : index
    %c0_218 = arith.constant 0 : index
    %393 = vector.load %arg38[%c0_217, %c0_218] : memref<32x32xf32, #tpu.memory_space<vmem>>, vector<32x32xf32>
    %c0_219 = arith.constant 0 : index
    %c0_220 = arith.constant 0 : index
    %394 = vector.load %arg39[%c0_219, %c0_220] : memref<1x32xf32, #tpu.memory_space<vmem>>, vector<1x32xf32>
    %c0_221 = arith.constant 0 : index
    %c0_222 = arith.constant 0 : index
    %395 = vector.load %arg40[%c0_221, %c0_222] : memref<32x32xf32, #tpu.memory_space<vmem>>, vector<32x32xf32>
    %c0_223 = arith.constant 0 : index
    %c0_224 = arith.constant 0 : index
    %396 = vector.load %arg41[%c0_223, %c0_224] : memref<1x32xf32, #tpu.memory_space<vmem>>, vector<1x32xf32>
    %c0_225 = arith.constant 0 : index
    %c0_226 = arith.constant 0 : index
    %397 = vector.load %arg42[%c0_225, %c0_226] : memref<32x128xf32, #tpu.memory_space<vmem>>, vector<32x128xf32>
    %c0_227 = arith.constant 0 : index
    %c0_228 = arith.constant 0 : index
    %398 = vector.load %arg43[%c0_227, %c0_228] : memref<1x128xf32, #tpu.memory_space<vmem>>, vector<1x128xf32>
    %399 = arith.truncf %392 : vector<64x32xf32> to vector<64x32xbf16>
    %400 = arith.truncf %393 : vector<32x32xf32> to vector<32x32xbf16>
    %cst_229 = arith.constant dense<0.000000e+00> : vector<64x32xf32>
    %401 = tpu.matmul %399, %400, %cst_229 {dimension_numbers = #tpu.dot_dimension_numbers<[1], [0], [0], [1], [0, 0, 1, 1], [], []>} : vector<64x32xbf16>, vector<32x32xbf16>, vector<64x32xf32> -> vector<64x32xf32>
    %402 = vector.broadcast %394 : vector<1x32xf32> to vector<64x32xf32>
    %403 = arith.addf %402, %401 : vector<64x32xf32>
    %cst_230 = arith.constant 0.000000e+00 : f32
    %404 = vector.broadcast %cst_230 : f32 to vector<64x32xf32>
    %405 = arith.maximumf %403, %404 : vector<64x32xf32>
    %406 = arith.truncf %405 : vector<64x32xf32> to vector<64x32xbf16>
    %407 = arith.truncf %395 : vector<32x32xf32> to vector<32x32xbf16>
    %cst_231 = arith.constant dense<0.000000e+00> : vector<64x32xf32>
    %408 = tpu.matmul %406, %407, %cst_231 {dimension_numbers = #tpu.dot_dimension_numbers<[1], [0], [0], [1], [0, 0, 1, 1], [], []>} : vector<64x32xbf16>, vector<32x32xbf16>, vector<64x32xf32> -> vector<64x32xf32>
    %409 = vector.broadcast %396 : vector<1x32xf32> to vector<64x32xf32>
    %410 = arith.addf %408, %409 : vector<64x32xf32>
    %cst_232 = arith.constant 0.000000e+00 : f32
    %411 = vector.broadcast %cst_232 : f32 to vector<64x32xf32>
    %412 = arith.maximumf %410, %411 : vector<64x32xf32>
    %413 = arith.truncf %412 : vector<64x32xf32> to vector<64x32xbf16>
    %414 = arith.truncf %397 : vector<32x128xf32> to vector<32x128xbf16>
    %cst_233 = arith.constant dense<0.000000e+00> : vector<64x128xf32>
    %415 = tpu.matmul %413, %414, %cst_233 {dimension_numbers = #tpu.dot_dimension_numbers<[1], [0], [0], [1], [0, 0, 1, 1], [], []>} : vector<64x32xbf16>, vector<32x128xbf16>, vector<64x128xf32> -> vector<64x128xf32>
    %416 = vector.broadcast %398 : vector<1x128xf32> to vector<64x128xf32>
    %417 = arith.addf %415, %416 : vector<64x128xf32>
    %c0_234 = arith.constant 0 : index
    %c0_235 = arith.constant 0 : index
    %418 = vector.load %arg44[%c0_234, %c0_235] : memref<64x128xf32, #tpu.memory_space<vmem>>, vector<64x128xf32>
    tpu.vector_store %arg44[%c0_234, %c0_235], %417 {strides = array<i32>} : memref<64x128xf32, #tpu.memory_space<vmem>>, vector<64x128xf32>,
    return
  }
}

</mosaic_0001>

<bundles_post_ra>
// kernel: encode_process_decode.1
= control target key start
LH: loop header
LB: loop body
LE: loop exit
PB: predicated region body
PF: predicated region fallthrough
CT: control target
= control target key end

     0   :  { %s7745_s3 = smov 4   ;;  %s7746_s7 = smov 2   ;;  %vm757_vm0 = vcmask 130048   ;;  %vm13115_vm1 = vcmask 261120   ;;  %vm1244_vm2 = vcmask 1040384   ;;  %vm1245_vm3 = vcmask 1041408   ;;  %s13104_s0 = inlined_call_operand.smem [shape: u32[45], index: -1, kind: input, shape index: {}] }
   0x1   :  { %s6835_s6 = sld [smem:[%s13104_s0 + %s7745_s3]]   ;;  %s7747_s11 = smov 5   ;;  %vm1195_vm4 = vcmask 23552  }
   0x2   :  { %s6833_s10 = sld [smem:[%s13104_s0 + %s7746_s7]]   ;;  %s7748_s15 = smov 7  }
   0x3   :  { %s7811_s14 = sld [smem:[%s13104_s0 + %s7747_s11]]   ;;  %s7749_s19 = smov 6  }
   0x4   :  { %s7816_s18 = sld [smem:[%s13104_s0 + %s7748_s15]]   ;;  %s7750_s23 = smov 8  }
   0x5   :  { %s6837_s22 = sld [smem:[%s13104_s0 + %s7749_s19]]   ;;  %s7751_s27 = smov 9  }
   0x6   :  { %s6839_s26 = sld [smem:[%s13104_s0 + %s7750_s23]]   ;;  %s7752_s1 = smov 12  }
   0x7   :  { %v737_v0 = vld [vmem:[%s6835_s6] sm:$0xff]  ;;  %v738_v1 = vld [vmem:[%s6835_s6 + $0x8] sm:$0xff]  ;;  %s7832_s30 = sld [smem:[%s13104_s0 + %s7751_s27]]   ;;  %s7754_s5 = smov 3  }
   0x8   :  { %v756_v2 = vpack.c.bf16 %v738_v1, %v737_v0  ;;  %v729_v3 = vld [vmem:[%s6833_s10] sm:$0xff]  ;;  %v730_v4 = vld [vmem:[%s6833_s10 + $0x8] sm:$0xff]  ;;  %v731_v5 = vld [vmem:[%s6833_s10 + $0x10] sm:$0xff]  ;;  %s6843_s4 = sld [smem:[%s13104_s0 + %s7752_s1]]   ;;  %s7755_s9 = smov 13  }
   0x9   :  { %v752_v6 = vpack.c.bf16 %v730_v4, %v729_v3  ;;  %v732_v7 = vld [vmem:[%s6833_s10 + $0x18] sm:$0xff]  ;;  %v733_v9 = vld [vmem:[%s6833_s10 + $0x20] sm:$0xff]  ;;  %v734_v10 = vld [vmem:[%s6833_s10 + $0x28] sm:$0xff]  ;;  %s7843_s8 = sld [smem:[%s13104_s0 + %s7754_s5]]   ;;  %s7756_s13 = smov 14  }
   0xa   :  { %777 = vmatpush.bf16.msra.mxu0 %v756_v2  ;;  %7266 = vmatpush.bf16.msra.mxu1 %v756_v2  ;;  %v753_v8 = vpack.c.bf16 %v732_v7, %v731_v5  ;;  %v754_v11 = vpack.c.bf16 %v734_v10, %v733_v9  ;;  %v735_v12 = vld [vmem:[%s6833_s10 + $0x30] sm:$0xff]  ;;  %v736_v13 = vld [vmem:[%s6833_s10 + $0x38] sm:$0xff]  ;;  %v7463_v23 = vld [vmem:[%s7811_s14] ss:$0 sm:$0xff]  ;;  %v7753_v10 = vmov 65535   ;;  %s7860_s12 = sld [smem:[%s13104_s0 + %s7755_s9]]   ;;  %s7757_s17 = smov 15  }
   0xb   :  { %v755_v14 = vpack.c.bf16 %v736_v13, %v735_v12  ;;  %v742_v15 = vld [vmem:[%s6837_s22 + $0x10] sm:$0xff]  ;;  %v743_v16 = vld [vmem:[%s6837_s22 + $0x18] sm:$0xff]  ;;  %v740_v18 = vld [vmem:[%s6837_s22] sm:$0xff]  ;;  %s6845_s16 = sld [smem:[%s13104_s0 + %s7756_s13]]   ;;  %s7760_s21 = smov 10  }
   0xc   :  { %v823_v17 = vpack.c.bf16 %v743_v16, %v742_v15  ;;  %v741_v19 = vld [vmem:[%s6837_s22 + $0x8] sm:$0xff]  ;;  %v747_v50 = vld [vmem:[%s6839_s26 + $0x10] sm:$0xff]  ;;  %v748_v51 = vld [vmem:[%s6839_s26 + $0x18] sm:$0xff]  ;;  %s7930_s20 = sld [smem:[%s13104_s0 + %s7757_s17]]   ;;  %s7761_s25 = smov 11  }
   0xd   :  { %6940 = vmatmul.msk.bf16.vlgmr.msra.gmra.mxu0 %vm757_vm0, %v752_v6  ;;  %6941 = vmatmul.msk.bf16.vlgmr.msra.gmra.mxu1 %vm757_vm0, %v753_v8  ;;  %v822_v20 = vpack.c.bf16 %v741_v19, %v740_v18  ;;  %v882_v52 = vpack.c.bf16 %v748_v51, %v747_v50  ;;  %v745_v53 = vld [vmem:[%s6839_s26] sm:$0xff]  ;;  %v746_v54 = vld [vmem:[%s6839_s26 + $0x8] sm:$0xff]  ;;  %s7970_s24 = sld [smem:[%s13104_s0 + %s7760_s21]]   ;;  %s7762_s2 = smov 1  }
   0xe   :  { %846 = vmatpush.bf16.msra.mxu1 %v823_v17  ;;  %v881_v55 = vpack.c.bf16 %v746_v54, %v745_v53  ;;  %v7464_v57 = vld [vmem:[%s7816_s18] ss:$0 sm:$0xff]  ;;  %s7977_s28 = sld [smem:[%s13104_s0 + %s7761_s25]]   ;;  %s7763_s6 = smov 16  }
   0xf   :  { %904 = vmatpush.bf16.msra.mxu2 %v882_v52  ;;  %v1164_v7 = vld [vmem:[%s6843_s4] sm:$0x7]  ;;  %v1146_v54 = vld [vmem:[%s7843_s8 + $0x70] sm:$0xff]  ;;  %s7997_s1 = sld [smem:[%s13104_s0]]   ;;  %s7765_s15 = smov 20  }
  0x10   :  { %v1194_v9 = vpack.c.bf16 %v1164_v7, %v1164_v7  ;;  %s8016_s5 = sld [smem:[%s13104_s0 + %s7762_s2]]   ;;  %s7768_s26 = smov 19  }
  0x11   :  { %s6847_s10 = sld [smem:[%s13104_s0 + %s7763_s6]]   ;;  %s7771_s6 = smov 23  }
  0x12   :  { %847 = vmatpush.bf16.msra.mxu1 %v822_v20  ;;  %v1134_v20 = vld [vmem:[%s7843_s8 + $0x10] sm:$0xff]  ;;  %s8088_s18 = sld [smem:[%s13104_s0 + %s7765_s15]]   ;;  %s7773_s15 = smov 25  }
  0x13   :  { %905 = vmatpush.bf16.msra.mxu2 %v881_v55  ;;  %v1147_v55 = vld [vmem:[%s7843_s8 + $0x78] sm:$0xff]  ;;  %s8595_s29 = sld [smem:[%s13104_s0 + %s7768_s26]]   ;;  %s7776_s26 = smov 30  }
  0x14   :  { %s7778_s7 = smov 29   ;;  %s7779_s13 = smov 31  }
  0x15   :  { %s10433_s11 = sld [smem:[%s13104_s0 + %s7778_s7]]   ;;  %s7781_s23 = smov 33  }
  0x16   :  { %s11388_s17 = sld [smem:[%s13104_s0 + %s7779_s13]]   ;;  %s7783_s3 = smov 35  }
  0x17   :  { %s11412_s27 = sld [smem:[%s13104_s0 + %s7781_s23]]   ;;  %s7784_s13 = smov 36  }
  0x18   :  { %s7791_s9 = smov 43  }
  0x1d   :  { %6942 = vmatmul.msk.bf16.gmra.mxu1 %vm757_vm0, %v754_v11  ;;  %v1246_v11 = vsel %vm1244_vm2, 4294967295, %v7753_v10 }
  0x1e   :  { %v1247_v12 = vsel %vm1245_vm3, %v1246_v11, 0 }
  0x1f   :  { %v1249_v13 = vand.u32 %v1247_v12, %v1194_v9  ;;  %v1167_v9 = vld [vmem:[%s6845_s16 + $0x8] sm:$0xff] }
  0x21   :  { %7267 = vmatpush.bf16.msra.mxu3 %v1249_v13 }
  0x2d   :  { %6943 = vmatmul.msk.bf16.gmra.mxu1 %vm757_vm0, %v755_v14 }
  0x8a   :  { %v779_v21 = vpop.f32.mrf.mxu0  ;;  %v784_v22 = vpop.f32.mrf.mxu1 }
  0x8b   :  { %v802_v24 = vadd.f32 %v7463_v23, %v779_v21  ;;  %v804_v32 = vadd.f32 %v7463_v23, %v784_v22  ;;  %v1135_v21 = vld [vmem:[%s7843_s8 + $0x18] sm:$0xff] }
  0x8d   :  { %v810_v28 = vmax.f32 %v802_v24, 0.0  ;;  %v812_v34 = vmax.f32 %v804_v32, 0.0 }
  0x92   :  { %v781_v25 = vpop.f32.mrf.mxu0  ;;  %v786_v26 = vpop.f32.mrf.mxu1 }
  0x93   :  { %v803_v27 = vadd.f32 %v7463_v23, %v781_v25  ;;  %v805_v33 = vadd.f32 %v7463_v23, %v786_v26 }
  0x95   :  { %v811_v29 = vmax.f32 %v803_v27, 0.0  ;;  %v813_v35 = vmax.f32 %v805_v33, 0.0  ;;  %v1132_v33 = vld [vmem:[%s7843_s8] sm:$0xff] }
  0x97   :  { %v818_v30 = vpack.c.bf16 %v811_v29, %v810_v28  ;;  %v819_v36 = vpack.c.bf16 %v813_v35, %v812_v34  ;;  %v1136_v29 = vld [vmem:[%s7843_s8 + $0x20] sm:$0xff]  ;;  %v1133_v34 = vld [vmem:[%s7843_s8 + $0x8] sm:$0xff] }
  0x98   :  { %v1178_v35 = vpack.c.bf16 %v1133_v34, %v1132_v33 }
  0x99   :  { %6944 = vmatmul.msk.bf16.vlgmr.msra.gmra.mxu1 %vm13115_vm1, %v818_v30  ;;  %v1137_v30 = vld [vmem:[%s7843_s8 + $0x28] sm:$0xff] }
  0x9a   :  { %v789_v31 = vpop.f32.mrf.mxu1  ;;  %v1180_v32 = vpack.c.bf16 %v1137_v30, %v1136_v29 }
  0x9b   :  { %v806_v38 = vadd.f32 %v7463_v23, %v789_v31 }
  0x9d   :  { %v814_v41 = vmax.f32 %v806_v38, 0.0 }
  0xa2   :  { %v791_v37 = vpop.f32.mrf.mxu1 }
  0xa3   :  { %v807_v39 = vadd.f32 %v7463_v23, %v791_v37  ;;  %v1139_v37 = vld [vmem:[%s7843_s8 + $0x38] sm:$0xff] }
  0xa5   :  { %v815_v42 = vmax.f32 %v807_v39, 0.0  ;;  %v1140_v39 = vld [vmem:[%s7843_s8 + $0x40] sm:$0xff] }
  0xa7   :  { %v820_v43 = vpack.c.bf16 %v815_v42, %v814_v41  ;;  %v1142_v42 = vld [vmem:[%s7843_s8 + $0x50] sm:$0xff] }
  0xa9   :  { %6945 = vmatmul.msk.bf16.gmra.mxu1 %vm13115_vm1, %v819_v36  ;;  %v1138_v36 = vld [vmem:[%s7843_s8 + $0x30] sm:$0xff] }
  0xaa   :  { %v794_v40 = vpop.f32.mrf.mxu1  ;;  %v1181_v38 = vpack.c.bf16 %v1139_v37, %v1138_v36 }
  0xab   :  { %v808_v45 = vadd.f32 %v7463_v23, %v794_v40  ;;  %v1141_v40 = vld [vmem:[%s7843_s8 + $0x48] sm:$0xff] }
  0xac   :  { %v1182_v41 = vpack.c.bf16 %v1141_v40, %v1140_v39  ;;  %v7758_v40 = vmov 32.0  }
  0xad   :  { %v816_v47 = vmax.f32 %v808_v45, 0.0  ;;  %v1144_v45 = vld [vmem:[%s7843_s8 + $0x60] sm:$0xff]  ;;  %7496 = vrcp.f32 %v7758_v40 }
  0xb2   :  { %v796_v44 = vpop.f32.mrf.mxu1 }
  0xb3   :  { %v809_v46 = vadd.f32 %v7463_v23, %v796_v44  ;;  %v1179_v23 = vpack.c.bf16 %v1135_v21, %v1134_v20 }
  0xb5   :  { %v817_v48 = vmax.f32 %v809_v46, 0.0  ;;  %6953 = vmatmul.msk.bf16.vlgmr.msra.gmra.mxu3 %vm1195_vm4, %v1179_v23  ;;  %v1145_v46 = vld [vmem:[%s7843_s8 + $0x68] sm:$0xff] }
  0xb7   :  { %v821_v49 = vpack.c.bf16 %v817_v48, %v816_v47  ;;  %v1184_v47 = vpack.c.bf16 %v1145_v46, %v1144_v45  ;;  %v7873_v48 = vld [vmem:[%s7832_s30] ss:$0 sm:$0xff]  ;;  %s7770_s30 = smov 22  }
  0xb8   :  { %s9074_s4 = sld [smem:[%s13104_s0 + %s7770_s30]]   ;;  %s7777_s30 = smov 28  }
  0xb9   :  { %6946 = vmatmul.msk.bf16.gmra.mxu1 %vm13115_vm1, %v820_v43  ;;  %v1143_v43 = vld [vmem:[%s7843_s8 + $0x58] sm:$0xff] }
  0xba   :  { %v1183_v44 = vpack.c.bf16 %v1143_v43, %v1142_v42  ;;  %v7497_v42 = vpop.eup %7496 }
  0xbb   :  { %v952_v45 = vmul.f32 32.0, %v7497_v42  ;;  %vm956_vm5 = vweird.f32 %v7497_v42 }
  0xc5   :  { %6954 = vmatmul.msk.bf16.gmra.mxu3 %vm1195_vm4, %v1180_v32  ;;  %v1151_v32 = vld [vmem:[%s7843_s8 + $0x98] sm:$0xff] }
  0xc9   :  { %6947 = vmatmul.msk.bf16.gmra.mxu1 %vm13115_vm1, %v821_v49 }
  0xd5   :  { %6955 = vmatmul.msk.bf16.gmra.mxu3 %vm1195_vm4, %v1181_v38 }
  0xe5   :  { %6956 = vmatmul.msk.bf16.gmra.mxu3 %vm1195_vm4, %v1182_v41 }
  0xf5   :  { %6957 = vmatmul.msk.bf16.gmra.mxu3 %vm1195_vm4, %v1183_v44 }
 0x105   :  { %6958 = vmatmul.msk.bf16.gmra.mxu3 %vm1195_vm4, %v1184_v47 }
 0x116   :  { %v849_v56 = vpop.f32.mrf.mxu1 }
 0x117   :  { %v850_v58 = vadd.f32 %v7464_v57, %v849_v56 }
 0x119   :  { %v869_v61 = vmax.f32 %v850_v58, 0.0 }
 0x11e   :  { %v851_v59 = vpop.f32.mrf.mxu1 }
 0x11f   :  { %v852_v60 = vadd.f32 %v7464_v57, %v851_v59 }
 0x121   :  { %v870_v62 = vmax.f32 %v852_v60, 0.0 }
 0x123   :  { %v877_v63 = vpack.c.bf16 %v870_v62, %v869_v61 }
 0x125   :  { %6948 = vmatmul.msk.bf16.vlgmr.msra.gmra.mxu2 %vm13115_vm1, %v877_v63 }
 0x126   :  { %v854_v0 = vpop.f32.mrf.mxu1  ;;  %1258 = vmatpush.bf16.msra.mxu2 %v1249_v13 }
 0x127   :  { %v855_v1 = vadd.f32 %v7464_v57, %v854_v0 }
 0x129   :  { %v871_v3 = vmax.f32 %v855_v1, 0.0 }
 0x12e   :  { %v856_v2 = vpop.f32.mrf.mxu1 }
 0x12f   :  { %v857_v4 = vadd.f32 %v7464_v57, %v856_v2 }
 0x131   :  { %v872_v5 = vmax.f32 %v857_v4, 0.0  ;;  %v1169_v4 = vld [vmem:[%s6845_s16 + $0x18] sm:$0xff] }
 0x133   :  { %v878_v6 = vpack.c.bf16 %v872_v5, %v871_v3  ;;  %v1168_v3 = vld [vmem:[%s6845_s16 + $0x10] sm:$0xff] }
 0x134   :  { %v1424_v5 = vpack.c.bf16 %v1169_v4, %v1168_v3 }
 0x135   :  { %6949 = vmatmul.msk.bf16.gmra.mxu2 %vm13115_vm1, %v878_v6 }
 0x136   :  { %v859_v8 = vpop.f32.mrf.mxu1  ;;  %1482 = vmatpush.bf16.msrb.mxu0 %v1424_v5 }
 0x137   :  { %v860_v14 = vadd.f32 %v7464_v57, %v859_v8  ;;  %v1166_v8 = vld [vmem:[%s6845_s16] sm:$0xff]  ;;  %s7792_s16 = smov 44  }
 0x138   :  { %v1423_v10 = vpack.c.bf16 %v1167_v9, %v1166_v8  ;;  %v1265_v12 = vpop.f32.mrf.mxu3  ;;  %v7759_v8 = vmov 0   ;;  %s6875_s19 = sld [smem:[%s13104_s0 + %s7792_s16]]  }
 0x139   :  { %v873_v16 = vmax.f32 %v860_v14, 0.0  ;;  %7460 = vset.pattern.permute.xlu0 %v7759_v8  ;;  %7462 = vset.pattern.permute.xlu2 %v7759_v8 }
 0x13a   :  { %1483 = vmatpush.bf16.msrb.mxu0 %v1423_v10  ;;  %7461 = vset.pattern.permute.xlu1 %v7759_v8  ;;  %v346_v8 = vld [vmem:[%s8016_s5 + $0x8] sm:$0xff] }
 0x13e   :  { %v861_v15 = vpop.f32.mrf.mxu1 }
 0x13f   :  { %v862_v17 = vadd.f32 %v7464_v57, %v861_v15 }
 0x141   :  { %v874_v18 = vmax.f32 %v862_v17, 0.0  ;;  %v1267_v17 = vpop.f32.mrf.mxu3 }
 0x143   :  { %v879_v19 = vpack.c.bf16 %v874_v18, %v873_v16  ;;  %v1148_v18 = vld [vmem:[%s7843_s8 + $0x80] sm:$0xff] }
 0x145   :  { %6950 = vmatmul.msk.bf16.gmra.mxu2 %vm13115_vm1, %v879_v19  ;;  %v1149_v19 = vld [vmem:[%s7843_s8 + $0x88] sm:$0xff] }
 0x146   :  { %v864_v22 = vpop.f32.mrf.mxu1  ;;  %v1186_v21 = vpack.c.bf16 %v1149_v19, %v1148_v18 }
 0x147   :  { %v865_v24 = vadd.f32 %v7464_v57, %v864_v22  ;;  %v7922_v22 = vld [vmem:[%s7860_s12] ss:$0 sm:$0xff] }
 0x148   :  { %v1345_v34 = vadd.f32 %v7922_v22, %v1265_v12 }
 0x149   :  { %v875_v26 = vmax.f32 %v865_v24, 0.0  ;;  %v1270_v23 = vpop.f32.mrf.mxu3 }
 0x14a   :  { %v1377_v37 = vmax.f32 %v1345_v34, 0.0  ;;  %v1347_v43 = vadd.f32 %v7922_v22, %v1270_v23 }
 0x14c   :  { %v1379_v46 = vmax.f32 %v1347_v43, 0.0  ;;  %v1156_v43 = vld [vmem:[%s7843_s8 + $0xc0] sm:$0xff] }
 0x14e   :  { %v866_v25 = vpop.f32.mrf.mxu1 }
 0x14f   :  { %v867_v27 = vadd.f32 %v7464_v57, %v866_v25  ;;  %v1185_v57 = vpack.c.bf16 %v1147_v55, %v1146_v54 }
 0x151   :  { %v876_v28 = vmax.f32 %v867_v27, 0.0  ;;  %6959 = vmatmul.msk.bf16.gmra.mxu3 %vm1195_vm4, %v1185_v57  ;;  %v1272_v29 = vpop.f32.mrf.mxu3 }
 0x152   :  { %v1348_v44 = vadd.f32 %v7922_v22, %v1272_v29 }
 0x153   :  { %v880_v31 = vpack.c.bf16 %v876_v28, %v875_v26 }
 0x154   :  { %v1380_v47 = vmax.f32 %v1348_v44, 0.0  ;;  %v1157_v44 = vld [vmem:[%s7843_s8 + $0xc8] sm:$0xff] }
 0x155   :  { %6951 = vmatmul.msk.bf16.gmra.mxu2 %vm13115_vm1, %v880_v31  ;;  %v1150_v31 = vld [vmem:[%s7843_s8 + $0x90] sm:$0xff] }
 0x156   :  { %v1187_v33 = vpack.c.bf16 %v1151_v32, %v1150_v31 }
 0x159   :  { %v1275_v36 = vpop.f32.mrf.mxu3 }
 0x161   :  { %6960 = vmatmul.msk.bf16.gmra.mxu3 %vm1195_vm4, %v1186_v21  ;;  %v1277_v41 = vpop.f32.mrf.mxu3 }
 0x165   :  { %6952 = vmatmul.msk.bf16.vlgmr.msra.gmra.mxu2 %vm1195_vm4, %v1178_v35  ;;  %v1346_v35 = vadd.f32 %v7922_v22, %v1267_v17 }
 0x167   :  { %v1378_v38 = vmax.f32 %v1346_v35, 0.0 }
 0x169   :  { %v1408_v39 = vpack.c.bf16 %v1378_v38, %v1377_v37  ;;  %v1280_v55 = vpop.f32.mrf.mxu3 }
 0x16a   :  { %v1351_v18 = vadd.f32 %v7922_v22, %v1280_v55 }
 0x171   :  { %6961 = vmatmul.msk.bf16.gmra.mxu3 %vm1195_vm4, %v1187_v33 }
 0x1a8   :  { %v907_v49 = vpop.f32.mrf.mxu2 }
 0x1a9   :  { %v7877_v50 = vadd.f32 %v7873_v48, %v907_v49  ;;  %v1152_v49 = vld [vmem:[%s7843_s8 + $0xa0] sm:$0xff] }
 0x1ab   :  { %v927_v51 = vsel %vm13115_vm1, %v7877_v50, 0.0 }
 0x1ac   :  { %928 = vadd.xlane.f32.xlu0 %v927_v51  ;;  %v1153_v51 = vld [vmem:[%s7843_s8 + $0xa8] sm:$0xff] }
 0x1ad   :  { %v1188_v54 = vpack.c.bf16 %v1153_v51, %v1152_v49 }
 0x1af   :  { %6962 = vmatmul.msk.bf16.gmra.mxu3 %vm1195_vm4, %v1188_v54 }
 0x1b0   :  { %v909_v52 = vpop.f32.mrf.mxu2 }
 0x1b1   :  { %v7882_v53 = vadd.f32 %v7873_v48, %v909_v52  ;;  %v953_v52 = vsub.f32 1.0, %v952_v45  ;;  %v185_v45 = vld [vmem:[%s7997_s1] sm:$0xff] }
 0x1b3   :  { %v930_v56 = vsel %vm13115_vm1, %v7882_v53, 0.0  ;;  %v954_v57 = vmul.f32 %v7497_v42, %v953_v52 }
 0x1b4   :  { %931 = vadd.xlane.f32.xlu0 %v930_v56  ;;  %v1409_v56 = vpack.c.bf16 %v1380_v47, %v1379_v46  ;;  %v1190_v46 = vpack.c.bf16 %v1157_v44, %v1156_v43  ;;  %v8058_v44 = vld [vmem:[%s7930_s20] ss:$0 sm:$0xff] }
 0x1b8   :  { %v912_v58 = vpop.f32.mrf.mxu2 }
 0x1b9   :  { %v7890_v59 = vadd.f32 %v7873_v48, %v912_v58  ;;  %v955_v58 = vadd.f32 %v7497_v42, %v954_v57 }
 0x1bb   :  { %v933_v60 = vsel %vm13115_vm1, %v7890_v59, 0.0 }
 0x1bc   :  { %934 = vadd.xlane.f32.xlu1 %v933_v60  ;;  %v1349_v60 = vadd.f32 %v7922_v22, %v1275_v36 }
 0x1c0   :  { %v914_v61 = vpop.f32.mrf.mxu2 }
 0x1c1   :  { %v7895_v62 = vadd.f32 %v7873_v48, %v914_v61  ;;  %v1350_v61 = vadd.f32 %v7922_v22, %v1277_v41 }
 0x1c3   :  { %v936_v63 = vsel %vm13115_vm1, %v7895_v62, 0.0  ;;  %v1382_v4 = vmax.f32 %v1350_v61, 0.0 }
 0x1c4   :  { %937 = vadd.xlane.f32.xlu1 %v936_v63  ;;  %v1282_v63 = vpop.f32.mrf.mxu3 }
 0x1c5   :  { %v1352_v19 = vadd.f32 %v7922_v22, %v1282_v63  ;;  %v345_v63 = vld [vmem:[%s8016_s5] sm:$0xff] }
 0x1c7   :  { %v1384_v23 = vmax.f32 %v1352_v19, 0.0  ;;  %v1171_v19 = vld [vmem:[%s6847_s10] sm:$0xff] }
 0x1c8   :  { %v917_v0 = vpop.f32.mrf.mxu2 }
 0x1c9   :  { %v7903_v1 = vadd.f32 %v7873_v48, %v917_v0  ;;  %v7947_v0 = vsel %vm956_vm5, %v7497_v42, %v955_v58 }
 0x1cb   :  { %v939_v2 = vsel %vm13115_vm1, %v7903_v1, 0.0 }
 0x1cc   :  { %940 = vadd.xlane.f32.xlu2 %v939_v2  ;;  %v1381_v2 = vmax.f32 %v1349_v60, 0.0  ;;  %v1285_v12 = vpop.f32.mrf.mxu3 }
 0x1cd   :  { %v1353_v36 = vadd.f32 %v7922_v22, %v1285_v12 }
 0x1ce   :  { %v1410_v9 = vpack.c.bf16 %v1382_v4, %v1381_v2  ;;  %v1159_v2 = vld [vmem:[%s7843_s8 + $0xd8] sm:$0xff]  ;;  %v377_v4 = vadd.s32 64, %v345_v63 }
 0x1cf   :  { %v1385_v40 = vmax.f32 %v1353_v36, 0.0  ;;  %v349_v36 = vld [vmem:[%s8016_s5 + $0x20] sm:$0xff] }
 0x1d0   :  { %v919_v6 = vpop.f32.mrf.mxu2  ;;  %v381_v43 = vadd.s32 64, %v349_v36  ;;  %v2548_v36 = vld [vmem:[%s8088_s18 + $0x18] sm:$0xff] }
 0x1d1   :  { %v7908_v7 = vadd.f32 %v7873_v48, %v919_v6 }
 0x1d3   :  { %v942_v11 = vsel %vm13115_vm1, %v7908_v7, 0.0 }
 0x1d4   :  { %943 = vadd.xlane.f32.xlu2 %v942_v11 }
 0x1d8   :  { %v922_v13 = vpop.f32.mrf.mxu2 }
 0x1d9   :  { %v7913_v14 = vadd.f32 %v7873_v48, %v922_v13 }
 0x1db   :  { %v945_v15 = vsel %vm13115_vm1, %v7913_v14, 0.0 }
 0x1dc   :  { %946 = vadd.xlane.f32.xlu2 %v945_v15 }
 0x1e0   :  { %v7917_v16 = vpop.f32.mrf.mxu2 }
 0x1e8   :  { %v1260_v20 = vpop.f32.mrf.mxu2 }
 0x1e9   :  { %v1343_v24 = vadd.f32 %v7922_v22, %v1260_v20 }
 0x1eb   :  { %v1375_v26 = vmax.f32 %v1343_v24, 0.0 }
 0x1f0   :  { %v1262_v25 = vpop.f32.mrf.mxu2 }
 0x1f1   :  { %v1344_v27 = vadd.f32 %v7922_v22, %v1262_v25  ;;  %v1287_v25 = vpop.f32.mrf.mxu3 }
 0x1f2   :  { %v1354_v37 = vadd.f32 %v7922_v22, %v1287_v25 }
 0x1f3   :  { %v1376_v28 = vmax.f32 %v1344_v27, 0.0  ;;  %v1154_v27 = vld [vmem:[%s7843_s8 + $0xb0] sm:$0xff] }
 0x1f4   :  { %v1386_v42 = vmax.f32 %v1354_v37, 0.0  ;;  %v1162_v37 = vld [vmem:[%s7843_s8 + $0xf0] sm:$0xff] }
 0x1f5   :  { %v1407_v30 = vpack.c.bf16 %v1376_v28, %v1375_v26  ;;  %v1155_v28 = vld [vmem:[%s7843_s8 + $0xb8] sm:$0xff] }
 0x1f7   :  { %6968 = vmatmul.msk.bf16.vlgmr.msrb.gmra.mxu0 %vm13115_vm1, %v1407_v30  ;;  %v1189_v30 = vpack.c.bf16 %v1155_v28, %v1154_v27 }
 0x1f9   :  { %6963 = vmatmul.msk.bf16.gmra.mxu3 %vm1195_vm4, %v1189_v30  ;;  %v1290_v35 = vpop.f32.mrf.mxu3  ;;  %v186_v30 = vld [vmem:[%s7997_s1 + $0x8] sm:$0xff] }
 0x1fa   :  { %v1355_v54 = vadd.f32 %v7922_v22, %v1290_v35 }
 0x1fc   :  { %v1387_v60 = vmax.f32 %v1355_v54, 0.0  ;;  %v347_v54 = vld [vmem:[%s8016_s5 + $0x10] sm:$0xff] }
 0x1fd   :  { %v379_v63 = vadd.s32 64, %v347_v54 }
 0x201   :  { %v1292_v47 = vpop.f32.mrf.mxu3 }
 0x202   :  { %v1356_v55 = vadd.f32 %v7922_v22, %v1292_v47  ;;  %v351_v47 = vld [vmem:[%s8016_s5 + $0x30] sm:$0xff] }
 0x204   :  { %v1388_v61 = vmax.f32 %v1356_v55, 0.0  ;;  %v383_v55 = vadd.s32 64, %v351_v47 }
 0x207   :  { %6969 = vmatmul.msk.bf16.gmra.mxu0 %vm13115_vm1, %v1408_v39 }
 0x209   :  { %6964 = vmatmul.msk.bf16.gmra.mxu3 %vm1195_vm4, %v1190_v46  ;;  %v1295_v58 = vpop.f32.mrf.mxu3 }
 0x217   :  { %6970 = vmatmul.msk.bf16.gmra.mxu0 %vm13115_vm1, %v1409_v56 }
 0x21f   :  { %v929_v3 = vpop.xlane.xlu0 %928 }
 0x220   :  { %v958_v5 = vmul.f32 %v7947_v0, %v929_v3  ;;  %v1413_v3 = vpack.c.bf16 %v1388_v61, %v1387_v60  ;;  %v192_v61 = vld [vmem:[%s7997_s1 + $0x38] sm:$0xff] }
 0x222   :  { %v7951_v6 = vsub.f32 %v7877_v50, %v958_v5  ;;  %v7960_v50 = vadd.f32 %v7873_v48, %v7917_v16  ;;  %v1383_v16 = vmax.f32 %v1351_v18, 0.0 }
 0x224   :  { %v974_v10 = vmul.f32 %v7951_v6, %v7951_v6  ;;  %v948_v48 = vsel %vm13115_vm1, %v7960_v50, 0.0  ;;  %v1411_v29 = vpack.c.bf16 %v1384_v23, %v1383_v16  ;;  %v1160_v23 = vld [vmem:[%s7843_s8 + $0xe0] sm:$0xff] }
 0x226   :  { %v982_v11 = vsel %vm13115_vm1, %v974_v10, 0.0  ;;  %v1173_v10 = vld [vmem:[%s6847_s10 + $0x10] sm:$0xff] }
 0x227   :  { %6971 = vmatmul.msk.bf16.gmra.mxu0 %vm13115_vm1, %v1410_v9  ;;  %983 = vadd.xlane.f32.xlu0 %v982_v11  ;;  %v932_v13 = vpop.xlane.xlu0 %931  ;;  %v1297_v9 = vpop.f32.mrf.mxu3  ;;  %v1174_v11 = vld [vmem:[%s6847_s10 + $0x18] sm:$0xff] }
 0x228   :  { %v959_v15 = vmul.f32 %v7947_v0, %v932_v13  ;;  %v1614_v12 = vpack.c.bf16 %v1174_v11, %v1173_v10  ;;  %v1357_v13 = vadd.f32 %v7922_v22, %v1295_v58  ;;  %v1358_v18 = vadd.f32 %v7922_v22, %v1297_v9  ;;  %v189_v9 = vld [vmem:[%s7997_s1 + $0x20] sm:$0xff] }
 0x22a   :  { %v7963_v17 = vsub.f32 %v7882_v53, %v959_v15  ;;  %v378_v15 = vadd.s32 64, %v346_v8  ;;  %1672 = vmatpush.bf16.msra.mxu1 %v1614_v12  ;;  %v1390_v16 = vmax.f32 %v1358_v18, 0.0  ;;  %v193_v8 = vld [vmem:[%s7997_s1 + $0x40] sm:$0xff]  ;;  %v355_v18 = vld [vmem:[%s8016_s5 + $0x50] sm:$0xff] }
 0x22c   :  { %v975_v20 = vmul.f32 %v7963_v17, %v7963_v17 }
 0x22e   :  { %v985_v53 = vsel %vm13115_vm1, %v975_v20, 0.0  ;;  %v1172_v20 = vld [vmem:[%s6847_s10 + $0x8] sm:$0xff]  ;;  %s9202_s10 = sld [smem:[%s13104_s0 + %s7771_s6]]  }
 0x22f   :  { %v935_v21 = vpop.xlane.xlu1 %934  ;;  %949 = vadd.xlane.f32.xlu0 %v948_v48  ;;  %986 = vadd.xlane.f32.xlu1 %v985_v53  ;;  %v1613_v48 = vpack.c.bf16 %v1172_v20, %v1171_v19  ;;  %v1389_v53 = vmax.f32 %v1357_v13, 0.0  ;;  %v1300_v35 = vpop.f32.mrf.mxu3  ;;  %v354_v13 = vld [vmem:[%s8016_s5 + $0x48] sm:$0xff]  ;;  %s10423_s6 = sld [smem:[%s13104_s0 + %s7777_s30]]   ;;  %s7790_s30 = smov 42  }
 0x230   :  { %v960_v24 = vmul.f32 %v7947_v0, %v935_v21  ;;  %s6873_s7 = sld [smem:[%s13104_s0 + %s7790_s30]]  }
 0x231   :  { %1673 = vmatpush.bf16.msra.mxu1 %v1613_v48  ;;  %v1414_v25 = vpack.c.bf16 %v1390_v16, %v1389_v53  ;;  %v350_v48 = vld [vmem:[%s8016_s5 + $0x28] sm:$0xff]  ;;  %v386_v53 = vadd.s32 64, %v354_v13 }
 0x232   :  { %v7984_v26 = vsub.f32 %v7890_v59, %v960_v24  ;;  %v1161_v24 = vld [vmem:[%s7843_s8 + $0xe8] sm:$0xff] }
 0x233   :  { %v1192_v27 = vpack.c.bf16 %v1161_v24, %v1160_v23  ;;  %v387_v23 = vadd.s32 64, %v355_v18 }
 0x234   :  { %v976_v31 = vmul.f32 %v7984_v26, %v7984_v26 }
 0x236   :  { %v988_v32 = vsel %vm13115_vm1, %v976_v31, 0.0 }
 0x237   :  { %6972 = vmatmul.msk.bf16.gmra.mxu0 %vm13115_vm1, %v1411_v29  ;;  %v938_v33 = vpop.xlane.xlu1 %937  ;;  %989 = vadd.xlane.f32.xlu1 %v988_v32  ;;  %v187_v29 = vld [vmem:[%s7997_s1 + $0x10] sm:$0xff]  ;;  %v348_v32 = vld [vmem:[%s8016_s5 + $0x18] sm:$0xff] }
 0x238   :  { %v961_v59 = vmul.f32 %v7947_v0, %v938_v33  ;;  %v380_v33 = vadd.s32 64, %v348_v32  ;;  %v196_v32 = vld [vmem:[%s7997_s1 + $0x58] sm:$0xff] }
 0x23a   :  { %v8000_v34 = vsub.f32 %v7895_v62, %v961_v59  ;;  %v1412_v62 = vpack.c.bf16 %v1386_v42, %v1385_v40  ;;  %v188_v59 = vld [vmem:[%s7997_s1 + $0x18] sm:$0xff]  ;;  %v190_v42 = vld [vmem:[%s7997_s1 + $0x28] sm:$0xff] }
 0x23c   :  { %v977_v38 = vmul.f32 %v8000_v34, %v8000_v34 }
 0x23e   :  { %v991_v39 = vsel %vm13115_vm1, %v977_v38, 0.0  ;;  %v1163_v38 = vld [vmem:[%s7843_s8 + $0xf8] sm:$0xff] }
 0x23f   :  { %v941_v41 = vpop.xlane.xlu2 %940  ;;  %992 = vadd.xlane.f32.xlu2 %v991_v39  ;;  %v1359_v39 = vadd.f32 %v7922_v22, %v1300_v35  ;;  %v1193_v40 = vpack.c.bf16 %v1163_v38, %v1162_v37  ;;  %v2547_v35 = vld [vmem:[%s8088_s18 + $0x10] sm:$0xff]  ;;  %v357_v37 = vld [vmem:[%s8016_s5 + $0x60] sm:$0xff] }
 0x240   :  { %v962_v21 = vmul.f32 %v7947_v0, %v941_v41  ;;  %v2575_v38 = vpack.c.bf16 %v2548_v36, %v2547_v35 }
 0x241   :  { %v1391_v46 = vmax.f32 %v1359_v39, 0.0 }
 0x242   :  { %v8041_v28 = vsub.f32 %v7903_v1, %v962_v21  ;;  %2594 = vmatpush.bf16.msra.mxu2 %v2575_v38  ;;  %v365_v38 = vld [vmem:[%s8016_s5 + $0xa0] sm:$0xff] }
 0x243   :  { %218 = vperm.xlu0 %7460, %v185_v45   ;;  %v1302_v45 = vpop.f32.mrf.mxu3 }
 0x244   :  { %v978_v31 = vmul.f32 %v8041_v28, %v8041_v28 }
 0x246   :  { %v994_v1 = vsel %vm13115_vm1, %v978_v31, 0.0 }
 0x247   :  { %6973 = vmatmul.msk.bf16.gmra.mxu0 %vm13115_vm1, %v1412_v62  ;;  %v944_v49 = vpop.xlane.xlu2 %943  ;;  %v1360_v62 = vadd.f32 %v7922_v22, %v1302_v45  ;;  %v389_v45 = vadd.s32 64, %v357_v37 }
 0x248   :  { %v963_v51 = vmul.f32 %v7947_v0, %v944_v49 }
 0x24a   :  { %v8019_v52 = vsub.f32 %v7908_v7, %v963_v51  ;;  %v1158_v7 = vld [vmem:[%s7843_s8 + $0xd0] sm:$0xff]  ;;  %v1392_v51 = vmax.f32 %v1360_v62, 0.0  ;;  %s7764_s8 = smov 17   ;;  %v2546_v62 = vld [vmem:[%s8088_s18 + $0x8] sm:$0xff] }
 0x24b   :  { %v1191_v5 = vpack.c.bf16 %v1159_v2, %v1158_v7  ;;  %s8067_s14 = sld [smem:[%s13104_s0 + %s7764_s8]]   ;;  %v1305_v7 = vpop.f32.mrf.mxu3  ;;  %s7772_s8 = smov 24  }
 0x24c   :  { %v979_v56 = vmul.f32 %v8019_v52, %v8019_v52  ;;  %v1361_v11 = vadd.f32 %v7922_v22, %v1305_v7 }
 0x24d   :  { %6965 = vmatmul.msk.bf16.gmra.mxu3 %vm1195_vm4, %v1191_v5  ;;  %v194_v5 = vld [vmem:[%s7997_s1 + $0x48] sm:$0xff] }
 0x24e   :  { %v997_v57 = vsel %vm13115_vm1, %v979_v56, 0.0  ;;  %v1415_v56 = vpack.c.bf16 %v1392_v51, %v1391_v46  ;;  %v1393_v19 = vmax.f32 %v1361_v11, 0.0  ;;  %v2545_v46 = vld [vmem:[%s8088_s18] sm:$0xff] }
 0x24f   :  { %998 = vadd.xlane.f32.xlu1 %v997_v57  ;;  %v2574_v51 = vpack.c.bf16 %v2546_v62, %v2545_v46  ;;  %v397_v62 = vadd.s32 64, %v365_v38 }
 0x251   :  { %2595 = vmatpush.bf16.msra.mxu2 %v2574_v51 }
 0x253   :  { %v1307_v10 = vpop.f32.mrf.mxu3 }
 0x254   :  { %v1362_v12 = vadd.f32 %v7922_v22, %v1307_v10 }
 0x256   :  { %v1394_v20 = vmax.f32 %v1362_v12, 0.0 }
 0x257   :  { %6974 = vmatmul.msk.bf16.gmra.mxu0 %vm13115_vm1, %v1413_v3  ;;  %410 = vperm.xlu2 %7462, %v377_v4  }
 0x258   :  { %v1416_v16 = vpack.c.bf16 %v1394_v20, %v1393_v19 }
 0x25d   :  { %6966 = vmatmul.msk.bf16.gmra.mxu3 %vm1195_vm4, %v1192_v27  ;;  %v382_v27 = vadd.s32 64, %v350_v48  ;;  %v947_v48 = vpop.xlane.xlu2 %946 }
 0x25f   :  { %413 = vperm.xlu2 %7462, %v378_v15  }
 0x267   :  { %6975 = vmatmul.msk.bf16.gmra.mxu0 %vm13115_vm1, %v1414_v25  ;;  %224 = vperm.xlu2 %7462, %v187_v29  }
 0x268   :  { %221 = vperm.xlu1 %7461, %v186_v30  }
 0x26d   :  { %995 = vadd.xlane.f32.xlu0 %v994_v1  ;;  %6967 = vmatmul.msk.bf16.gmra.mxu3 %vm1195_vm4, %v1193_v40  ;;  %v191_v1 = vld [vmem:[%s7997_s1 + $0x30] sm:$0xff] }
 0x26e   :  { %v359_v40 = vld [vmem:[%s8016_s5 + $0x70] sm:$0xff] }
 0x26f   :  { %419 = vperm.xlu2 %7462, %v380_v33   ;;  %v198_v33 = vld [vmem:[%s7997_s1 + $0x68] sm:$0xff] }
 0x270   :  { %227 = vperm.xlu1 %7461, %v188_v59   ;;  %v1310_v59 = vpop.f32.mrf.mxu3 }
 0x274   :  { %v1485_v41 = vpop.f32.mrf.mxu0 }
 0x275   :  { %v1486_v49 = vadd.f32 %v8058_v44, %v1485_v41 }
 0x277   :  { %233 = vperm.xlu2 %7462, %v190_v42   ;;  %v1565_v58 = vmax.f32 %v1486_v49, 0.0  ;;  %6976 = vmatmul.msk.bf16.gmra.mxu0 %vm13115_vm1, %v1415_v56  ;;  %v352_v42 = vld [vmem:[%s8016_s5 + $0x38] sm:$0xff]  ;;  %v391_v49 = vadd.s32 64, %v359_v40 }
 0x278   :  { %422 = vperm.xlu1 %7461, %v381_v43  }
 0x27c   :  { %v1487_v57 = vpop.f32.mrf.mxu0 }
 0x27d   :  { %v1488_v60 = vadd.f32 %v8058_v44, %v1487_v57  ;;  %v384_v57 = vadd.s32 64, %v352_v42 }
 0x27f   :  { %v1566_v2 = vmax.f32 %v1488_v60, 0.0  ;;  %428 = vperm.xlu2 %7462, %v383_v55  }
 0x280   :  { %239 = vperm.xlu1 %7461, %v192_v61   ;;  %v1363_v61 = vadd.f32 %v7922_v22, %v1310_v59 }
 0x281   :  { %v1597_v3 = vpack.c.bf16 %v1566_v2, %v1565_v58  ;;  %416 = vperm.xlu0 %7460, %v379_v63   ;;  %v1312_v58 = vpop.f32.mrf.mxu3 }
 0x282   :  { %v1364_v63 = vadd.f32 %v7922_v22, %v1312_v58  ;;  %v1395_v2 = vmax.f32 %v1363_v61, 0.0 }
 0x283   :  { %6984 = vmatmul.msk.bf16.vlgmr.msra.gmra.mxu1 %vm13115_vm1, %v1597_v3 }
 0x284   :  { %v1490_v4 = vpop.f32.mrf.mxu0 }
 0x285   :  { %v1491_v15 = vadd.f32 %v8058_v44, %v1490_v4  ;;  %v353_v4 = vld [vmem:[%s8016_s5 + $0x40] sm:$0xff] }
 0x286   :  { %v385_v13 = vadd.s32 64, %v353_v4 }
 0x287   :  { %245 = vperm.xlu2 %7462, %v194_v5   ;;  %v1567_v24 = vmax.f32 %v1491_v15, 0.0  ;;  %6977 = vmatmul.msk.bf16.gmra.mxu0 %vm13115_vm1, %v1416_v16  ;;  %v1396_v5 = vmax.f32 %v1364_v63, 0.0  ;;  %v202_v15 = vld [vmem:[%s7997_s1 + $0x88] sm:$0xff] }
 0x288   :  { %242 = vperm.xlu1 %7461, %v193_v8  }
 0x289   :  { %230 = vperm.xlu0 %7460, %v189_v9   ;;  %v1417_v10 = vpack.c.bf16 %v1396_v5, %v1395_v2  ;;  %v1315_v61 = vpop.f32.mrf.mxu3 }
 0x28c   :  { %v1492_v21 = vpop.f32.mrf.mxu0 }
 0x28d   :  { %v1493_v25 = vadd.f32 %v8058_v44, %v1492_v21 }
 0x28f   :  { %v1568_v29 = vmax.f32 %v1493_v25, 0.0  ;;  %437 = vperm.xlu2 %7462, %v386_v53  }
 0x290   :  { %440 = vperm.xlu1 %7461, %v387_v23  }
 0x291   :  { %425 = vperm.xlu0 %7460, %v382_v27   ;;  %v1598_v30 = vpack.c.bf16 %v1568_v29, %v1567_v24 }
 0x293   :  { %6985 = vmatmul.msk.bf16.gmra.mxu1 %vm13115_vm1, %v1598_v30 }
 0x294   :  { %v1495_v31 = vpop.f32.mrf.mxu0 }
 0x295   :  { %v1496_v39 = vadd.f32 %v8058_v44, %v1495_v31  ;;  %v204_v31 = vld [vmem:[%s7997_s1 + $0x98] sm:$0xff] }
 0x297   :  { %251 = vperm.xlu2 %7462, %v196_v32   ;;  %v1569_v54 = vmax.f32 %v1496_v39, 0.0  ;;  %6978 = vmatmul.msk.bf16.gmra.mxu0 %vm13115_vm1, %v1417_v10 }
 0x298   :  { %257 = vperm.xlu1 %7461, %v198_v33  }
 0x299   :  { %236 = vperm.xlu0 %7460, %v191_v1   ;;  %v195_v1 = vld [vmem:[%s7997_s1 + $0x50] sm:$0xff] }
 0x29a   :  { %v984_v41 = vpop.xlane.xlu0 %983 }
 0x29b   :  { %v1006_v43 = vmul.f32 %v984_v41, %v7947_v0  ;;  %v356_v41 = vld [vmem:[%s8016_s5 + $0x58] sm:$0xff] }
 0x29c   :  { %v1497_v47 = vpop.f32.mrf.mxu0 }
 0x29d   :  { %v1014_v55 = vadd.f32 1e-05, %v1006_v43  ;;  %v1498_v56 = vadd.f32 %v8058_v44, %v1497_v47  ;;  %v8125_v47 = vld [vmem:[%s7970_s24] ss:$0 sm:$0xff] }
 0x29f   :  { %7498 = vrsqrt.f32 %v1014_v55  ;;  %v1570_v60 = vmax.f32 %v1498_v56, 0.0  ;;  %446 = vperm.xlu2 %7462, %v389_v45   ;;  %vm1028_vm7 = vweird.f32 %v1014_v55 }
 0x2a0   :  { %452 = vperm.xlu1 %7461, %v391_v49  }
 0x2a1   :  { %431 = vperm.xlu0 %7460, %v384_v57   ;;  %v1599_v7 = vpack.c.bf16 %v1570_v60, %v1569_v54  ;;  %v388_v54 = vadd.s32 64, %v356_v41  ;;  %v8130_v60 = vld [vmem:[%s7977_s28] ss:$0 sm:$0xff] }
 0x2a2   :  { %v987_v3 = vpop.xlane.xlu1 %986 }
 0x2a3   :  { %v1007_v8 = vmul.f32 %v987_v3, %v7947_v0  ;;  %6986 = vmatmul.msk.bf16.gmra.mxu1 %vm13115_vm1, %v1599_v7  ;;  %v964_v3 = vmul.f32 %v7947_v0, %v947_v48 }
 0x2a4   :  { %v1500_v9 = vpop.f32.mrf.mxu0 }
 0x2a5   :  { %v7499_v11 = vpop.eup %7498  ;;  %v1015_v12 = vadd.f32 1e-05, %v1007_v8  ;;  %v1501_v20 = vadd.f32 %v8058_v44, %v1500_v9 }
 0x2a6   :  { %v1023_v18 = vmul.f32 %v7499_v11, %v1014_v55  ;;  %vm1029_vm6 = vweird.f32 %v7499_v11 }
 0x2a7   :  { %7500 = vrsqrt.f32 %v1015_v12  ;;  %v1571_v27 = vmax.f32 %v1501_v20, 0.0  ;;  %vm1030_vm8 = vmor %vm1028_vm7, %vm1029_vm6  ;;  %vm1038_vm10 = vweird.f32 %v1015_v12  ;;  %v8146_v20 = vsub.f32 %v7913_v14, %v964_v3 }
 0x2a8   :  { %v1024_v19 = vmul.f32 %v7499_v11, %v1023_v18  ;;  %269 = vperm.xlu1 %7461, %v202_v15  }
 0x2a9   :  { %434 = vperm.xlu0 %7460, %v385_v13   ;;  %v1365_v13 = vadd.f32 %v7922_v22, %v1315_v61 }
 0x2aa   :  { %v1025_v53 = vmul.f32 0.5, %v1024_v19  ;;  %v990_v16 = vpop.xlane.xlu1 %989  ;;  %v197_v19 = vld [vmem:[%s7997_s1 + $0x60] sm:$0xff] }
 0x2ab   :  { %v1008_v21 = vmul.f32 %v990_v16, %v7947_v0 }
 0x2ac   :  { %v1026_v23 = vsub.f32 1.5, %v1025_v53  ;;  %v1502_v24 = vpop.f32.mrf.mxu0 }
 0x2ad   :  { %v7501_v25 = vpop.eup %7500  ;;  %v8113_v29 = vadd.f32 1e-05, %v1008_v21  ;;  %v1503_v30 = vadd.f32 %v8058_v44, %v1502_v24  ;;  %v1317_v21 = vpop.f32.mrf.mxu3  ;;  %v1397_v24 = vmax.f32 %v1365_v13, 0.0 }
 0x2ae   :  { %v1027_v32 = vmul.f32 %v7499_v11, %v1026_v23  ;;  %v1033_v33 = vmul.f32 %v7501_v25, %v1015_v12  ;;  %vm1039_vm9 = vweird.f32 %v7501_v25 }
 0x2af   :  { %7502 = vrsqrt.f32 %v8113_v29  ;;  %v1572_v59 = vmax.f32 %v1503_v30, 0.0  ;;  %vm1040_vm11 = vmor %vm1038_vm10, %vm1039_vm9  ;;  %vm1048_vm13 = vweird.f32 %v8113_v29  ;;  %v980_v30 = vmul.f32 %v8146_v20, %v8146_v20 }
 0x2b0   :  { %v1034_v35 = vmul.f32 %v7501_v25, %v1033_v33  ;;  %275 = vperm.xlu1 %7461, %v204_v31   ;;  %v1031_v36 = vsel %vm1030_vm8, %v7499_v11, %v1027_v32 }
 0x2b1   :  { %248 = vperm.xlu0 %7460, %v195_v1   ;;  %v1600_v37 = vpack.c.bf16 %v1572_v59, %v1571_v27  ;;  %v1102_v43 = vmul.f32 %v1031_v36, %v7951_v6 }
 0x2b2   :  { %v1035_v39 = vmul.f32 0.5, %v1034_v35  ;;  %v993_v40 = vpop.xlane.xlu2 %992  ;;  %v1000_v35 = vsel %vm13115_vm1, %v980_v30, 0.0 }
 0x2b3   :  { %v1009_v42 = vmul.f32 %v993_v40, %v7947_v0  ;;  %6987 = vmatmul.msk.bf16.gmra.mxu1 %vm13115_vm1, %v1600_v37  ;;  %v1113_v6 = vmul.f32 %v8125_v47, %v1102_v43 }
 0x2b4   :  { %v1036_v45 = vsub.f32 1.5, %v1035_v39  ;;  %v1505_v46 = vpop.f32.mrf.mxu0 }
 0x2b5   :  { %v7503_v49 = vpop.eup %7502  ;;  %v1017_v51 = vadd.f32 1e-05, %v1009_v42  ;;  %v1506_v7 = vadd.f32 %v8058_v44, %v1505_v46  ;;  %v8137_v9 = vadd.f32 %v8130_v60, %v1113_v6  ;;  %v1320_v38 = vpop.f32.mrf.mxu3 }
 0x2b6   :  { %v1037_v55 = vmul.f32 %v7501_v25, %v1036_v45  ;;  %v1043_v56 = vmul.f32 %v7503_v49, %v8113_v29  ;;  %vm1049_vm12 = vweird.f32 %v7503_v49  ;;  %v1367_v6 = vadd.f32 %v7922_v22, %v1320_v38 }
 0x2b7   :  { %7504 = vrsqrt.f32 %v1017_v51  ;;  %13314 = vst [vmem:[#allocation2_spill] sm:$0xff] %v8137_v9  ;;  %v1573_v11 = vmax.f32 %v1506_v7, 0.0  ;;  %vm1050_vm14 = vmor %vm1048_vm13, %vm1049_vm12  ;;  %vm1058_vm0 = vweird.f32 %v1017_v51 }
 0x2b8   :  { %v1041_v57 = vsel %vm1040_vm11, %v7501_v25, %v1037_v55  ;;  %v1044_v58 = vmul.f32 %v7503_v49, %v1043_v56  ;;  %470 = vperm.xlu1 %7461, %v397_v62   ;;  %v1366_v25 = vadd.f32 %v7922_v22, %v1317_v21  ;;  %v1399_v7 = vmax.f32 %v1367_v6, 0.0 }
 0x2b9   :  { %v1103_v63 = vmul.f32 %v1041_v57, %v7963_v17  ;;  %443 = vperm.xlu0 %7460, %v388_v54   ;;  %v950_v54 = vpop.xlane.xlu0 %949 }
 0x2ba   :  { %v1045_v2 = vmul.f32 0.5, %v1044_v58  ;;  %v1398_v31 = vmax.f32 %v1366_v25, 0.0 }
 0x2bb   :  { %v1114_v4 = vmul.f32 %v8125_v47, %v1103_v63  ;;  %v183_v63 = vlaneseq }
 0x2bc   :  { %v1046_v5 = vsub.f32 1.5, %v1045_v2  ;;  %v1507_v8 = vpop.f32.mrf.mxu0  ;;  %v1418_v1 = vpack.c.bf16 %v1398_v31, %v1397_v24  ;;  %v200_v24 = vld [vmem:[%s7997_s1 + $0x78] sm:$0xff] }
 0x2bd   :  { %v7505_v10 = vpop.eup %7504  ;;  %v1508_v12 = vadd.f32 %v8058_v44, %v1507_v8  ;;  %v8141_v17 = vadd.f32 %v8130_v60, %v1114_v4  ;;  %v1322_v57 = vpop.f32.mrf.mxu3 }
 0x2be   :  { %v1047_v15 = vmul.f32 %v7503_v49, %v1046_v5  ;;  %v1053_v18 = vmul.f32 %v7505_v10, %v1017_v51  ;;  %vm1059_vm15 = vweird.f32 %v7505_v10  ;;  %6979 = vmatmul.msk.bf16.gmra.mxu0 %vm13115_vm1, %v1418_v1  ;;  %v411_v51 = vpop.permute.xlu2 %410  ;;  %v1368_v61 = vadd.f32 %v7922_v22, %v1322_v57  ;;  %v361_v1 = vld [vmem:[%s8016_s5 + $0x80] sm:$0xff] }
 0x2bf   :  { %13315 = vst [vmem:[#allocation3_spill] sm:$0xff] %v8141_v17  ;;  %v1574_v48 = vmax.f32 %v1508_v12, 0.0  ;;  %v8150_v53 = vpack.c.bf16 %v8141_v17, %v8137_v9  ;;  %vm1060_vm2 = vmor %vm1058_vm0, %vm1059_vm15  ;;  %v8186_v5 = vand.u32 127, %v183_v63 }
 0x2c0   :  { %v1054_v16 = vmul.f32 %v7505_v10, %v1053_v18  ;;  %v1051_v14 = vsel %vm1050_vm14, %v7503_v49, %v1047_v15  ;;  %v1400_v2 = vmax.f32 %v1368_v61, 0.0  ;;  %v13321_v18 = vmov 0 }
 0x2c1   :  { %13316 = vst [vmem:[#allocation4_spill] sm:$0xff] %v8150_v53  ;;  %7000 = vmatmul.msk.bf16.vlgmr.msra.gmra.mxu2 %vm13115_vm1, %v8150_v53  ;;  %254 = vperm.xlu0 %7460, %v197_v19   ;;  %v1601_v23 = vpack.c.bf16 %v1574_v48, %v1573_v11  ;;  %v1104_v33 = vmul.f32 %v1051_v14, %v7984_v26  ;;  %v8188_v8 = vpop.permute.xlu0 %218  ;;  %v13324_v48 = vmov 0 }
 0x2c2   :  { %v1055_v27 = vmul.f32 0.5, %v1054_v16  ;;  %v999_v37 = vpop.xlane.xlu1 %998  ;;  %v1419_v4 = vpack.c.bf16 %v1400_v2, %v1399_v7  ;;  %13320 = vst [vmem:[#allocation8_spill] sm:$0xff] %v8186_v5  ;;  %vm505_vm3 = vcmp.eq.s32.totalorder %v8186_v5, %v411_v51  ;;  %vm13106_vm5 = vcmp.eq.s32.totalorder %v8186_v5, %v8188_v8  ;;  %v363_v51 = vld [vmem:[%s8016_s5 + $0x90] sm:$0xff] }
 0x2c3   :  { %6988 = vmatmul.msk.bf16.gmra.mxu1 %vm13115_vm1, %v1601_v23  ;;  %v1115_v41 = vmul.f32 %v8125_v47, %v1104_v33  ;;  %v1011_v26 = vmul.f32 %v999_v37, %v7947_v0  ;;  %vm8203_vm6 = vmor %vm13106_vm5, %vm505_vm3  ;;  %v965_v14 = vmul.f32 %v7947_v0, %v950_v54  ;;  %v395_v61 = vadd.s32 64, %v363_v51 }
 0x2c4   :  { %v1056_v29 = vsub.f32 1.5, %v1055_v27  ;;  %v1510_v32 = vpop.f32.mrf.mxu0  ;;  %v13322_v18 = vsel %vm8203_vm6, 4294967295, %v13321_v18 }
 0x2c5   :  { %v1511_v39 = vadd.f32 %v8058_v44, %v1510_v32  ;;  %v8169_v62 = vadd.f32 %v8130_v60, %v1115_v41  ;;  %v8174_v55 = vadd.f32 1e-05, %v1011_v26  ;;  %13323 = vst [vmem:[#allocation9_spill] sm:$0xff] %v13322_v18  ;;  %v393_v41 = vadd.s32 64, %v361_v1 }
 0x2c6   :  { %v1057_v59 = vmul.f32 %v7505_v10, %v1056_v29 }
 0x2c7   :  { %v1575_v45 = vmax.f32 %v1511_v39, 0.0  ;;  %13317 = vst [vmem:[#allocation5_spill] sm:$0xff] %v8169_v62  ;;  %7506 = vrsqrt.f32 %v8174_v55  ;;  %vm1078_vm11 = vweird.f32 %v8174_v55 }
 0x2c8   :  { %v1061_v36 = vsel %vm1060_vm2, %v7505_v10, %v1057_v59  ;;  %1001 = vadd.xlane.f32.xlu2 %v1000_v35  ;;  %v414_v10 = vpop.permute.xlu2 %413 }
 0x2c9   :  { %v1105_v40 = vmul.f32 %v1061_v36, %v8000_v34  ;;  %vm506_vm4 = vcmp.eq.s32.totalorder %v8186_v5, %v414_v10  ;;  %v8231_v36 = vsub.f32 %v7960_v50, %v965_v14 }
 0x2cb   :  { %v1116_v42 = vmul.f32 %v8125_v47, %v1105_v40 }
 0x2cc   :  { %v1512_v43 = vpop.f32.mrf.mxu0 }
 0x2cd   :  { %v1513_v46 = vadd.f32 %v8058_v44, %v1512_v43  ;;  %v8172_v49 = vadd.f32 %v8130_v60, %v1116_v42  ;;  %v8192_v12 = vpop.eup %7506  ;;  %v981_v43 = vmul.f32 %v8231_v36, %v8231_v36 }
 0x2ce   :  { %6980 = vmatmul.msk.bf16.gmra.mxu0 %vm13115_vm1, %v1419_v4  ;;  %v1073_v19 = vmul.f32 %v8192_v12, %v8174_v55  ;;  %vm1079_vm10 = vweird.f32 %v8192_v12 }
 0x2cf   :  { %13318 = vst [vmem:[#allocation6_spill] sm:$0xff] %v8172_v49  ;;  %v1576_v34 = vmax.f32 %v1513_v46, 0.0  ;;  %v8178_v56 = vpack.c.bf16 %v8172_v49, %v8169_v62  ;;  %v1003_v54 = vsel %vm13115_vm1, %v981_v43, 0.0  ;;  %vm8247_vm12 = vmor %vm1078_vm11, %vm1079_vm10 }
 0x2d0   :  { %v1325_v11 = vpop.f32.mrf.mxu3  ;;  %v1074_v30 = vmul.f32 %v8192_v12, %v1073_v19  ;;  %v8234_v26 = vpop.permute.xlu2 %224 }
 0x2d1   :  { %13319 = vst [vmem:[#allocation7_spill] sm:$0xff] %v8178_v56  ;;  %v1602_v58 = vpack.c.bf16 %v1576_v34, %v1575_v45  ;;  %7001 = vmatmul.msk.bf16.gmra.mxu2 %vm13115_vm1, %v8178_v56  ;;  %v1369_v25 = vadd.f32 %v7922_v22, %v1325_v11  ;;  %vm13108_vm0 = vcmp.eq.s32.totalorder %v8186_v5, %v8234_v26 }
 0x2d2   :  { %v1075_v39 = vmul.f32 0.5, %v1074_v30 }
 0x2d3   :  { %6989 = vmatmul.msk.bf16.gmra.mxu1 %vm13115_vm1, %v1602_v58  ;;  %v1401_v59 = vmax.f32 %v1369_v25, 0.0 }
 0x2d4   :  { %v1515_v3 = vpop.f32.mrf.mxu0  ;;  %v1076_v45 = vsub.f32 1.5, %v1075_v39 }
 0x2d5   :  { %v1516_v13 = vadd.f32 %v8058_v44, %v1515_v3 }
 0x2d6   :  { %v1077_v57 = vmul.f32 %v8192_v12, %v1076_v45  ;;  %v8304_v45 = vld [vmem:[%s8067_s14] ss:$0 sm:$0xff] }
 0x2d7   :  { %v1577_v21 = vmax.f32 %v1516_v13, 0.0 }
 0x2d8   :  { %v1327_v29 = vpop.f32.mrf.mxu3  ;;  %v420_v10 = vpop.permute.xlu2 %419  ;;  %v1081_v19 = vsel %vm8247_vm12, %v8192_v12, %v1077_v57  ;;  %v13329_v12 = vmov 0 }
 0x2d9   :  { %v1370_v35 = vadd.f32 %v7922_v22, %v1327_v29  ;;  %vm508_vm13 = vcmp.eq.s32.totalorder %v8186_v5, %v420_v10  ;;  %v206_v29 = vld [vmem:[%s7997_s1 + $0xa8] sm:$0xff]  ;;  %v13338_v10 = vmov 0 }
 0x2da   :  { %v8198_v15 = vpop.permute.xlu1 %221 }
 0x2db   :  { %vm13105_vm7 = vcmp.eq.s32.totalorder %v8186_v5, %v8198_v15  ;;  %v1402_v38 = vmax.f32 %v1370_v35, 0.0 }
 0x2dc   :  { %vm8214_vm8 = vmor %vm13105_vm7, %vm506_vm4  ;;  %v1517_v16 = vpop.f32.mrf.mxu0 }
 0x2dd   :  { %v13325_v48 = vsel %vm8214_vm8, 4294967295, %v13324_v48  ;;  %v1518_v23 = vadd.f32 %v8058_v44, %v1517_v16  ;;  %v1420_v42 = vpack.c.bf16 %v1402_v38, %v1401_v59  ;;  %v358_v59 = vld [vmem:[%s8016_s5 + $0x68] sm:$0xff] }
 0x2de   :  { %13326 = vst [vmem:[#allocation10_spill] sm:$0xff] %v13325_v48 }
 0x2df   :  { %v1578_v27 = vmax.f32 %v1518_v23, 0.0  ;;  %6981 = vmatmul.msk.bf16.gmra.mxu0 %vm13115_vm1, %v1420_v42 }
 0x2e0   :  { %263 = vperm.xlu2 %7462, %v200_v24   ;;  %v996_v31 = vpop.xlane.xlu0 %995  ;;  %v1330_v50 = vpop.f32.mrf.mxu3 }
 0x2e1   :  { %v1603_v32 = vpack.c.bf16 %v1578_v27, %v1577_v21  ;;  %v1010_v33 = vmul.f32 %v996_v31, %v7947_v0  ;;  %v1371_v2 = vadd.f32 %v7922_v22, %v1330_v50  ;;  %v1107_v27 = vmul.f32 %v1081_v19, %v8019_v52  ;;  %v8289_v38 = vpop.permute.xlu2 %233  ;;  %v7738_v50 = vld [vmem:[%s7860_s12] ss:$0 sm:$0xff]  ;;  %s7766_s12 = smov 21  }
 0x2e2   :  { %v8251_v11 = vpop.permute.xlu1 %227  ;;  %v13332_v31 = vmov 0  ;;  %s8509_s22 = sld [smem:[%s13104_s0 + %s7766_s12]]  }
 0x2e3   :  { %v1018_v37 = vadd.f32 1e-05, %v1010_v33  ;;  %6990 = vmatmul.msk.bf16.gmra.mxu1 %vm13115_vm1, %v1603_v32  ;;  %vm13107_vm14 = vcmp.eq.s32.totalorder %v8186_v5, %v8251_v11  ;;  %v1403_v23 = vmax.f32 %v1371_v2, 0.0  ;;  %v1118_v1 = vmul.f32 %v8125_v47, %v1107_v27  ;;  %s9583_s12 = sld [smem:[%s13104_s0 + %s7773_s15]]  }
 0x2e4   :  { %v1520_v40 = vpop.f32.mrf.mxu0  ;;  %vm8265_vm3 = vmor %vm13107_vm14, %vm508_vm13  ;;  %s13094_s15 = sld [smem:[%s13104_s0 + %s7791_s9]]  }
 0x2e5   :  { %7508 = vrsqrt.f32 %v1018_v37  ;;  %v1521_v46 = vadd.f32 %v8058_v44, %v1520_v40  ;;  %vm1068_vm2 = vweird.f32 %v1018_v37  ;;  %v13330_v12 = vsel %vm8265_vm3, 4294967295, %v13329_v12 }
 0x2e6   :  { %13331 = vst [vmem:[#allocation11_spill] sm:$0xff] %v13330_v12  ;;  %v390_v40 = vadd.s32 64, %v358_v59  ;;  %v8297_v42 = vadd.f32 %v8130_v60, %v1118_v1 }
 0x2e7   :  { %v1579_v63 = vmax.f32 %v1521_v46, 0.0 }
 0x2e8   :  { %458 = vperm.xlu2 %7462, %v393_v41   ;;  %v1332_v55 = vpop.f32.mrf.mxu3  ;;  %13336 = vst [vmem:[#allocation14_spill] sm:$0xff] %v8297_v42 }
 0x2e9   :  { %v1372_v24 = vadd.f32 %v7922_v22, %v1332_v55  ;;  %v429_v4 = vpop.permute.xlu2 %428  ;;  %v13341_v55 = vmov 0 }
 0x2ea   :  { %v423_v51 = vpop.permute.xlu1 %422 }
 0x2eb   :  { %v7509_v34 = vpop.eup %7508  ;;  %1004 = vadd.xlane.f32.xlu0 %v1003_v54  ;;  %v1404_v30 = vmax.f32 %v1372_v24, 0.0  ;;  %vm509_vm13 = vcmp.eq.s32.totalorder %v8186_v5, %v423_v51 }
 0x2ec   :  { %v1063_v58 = vmul.f32 %v7509_v34, %v1018_v37  ;;  %v1522_v6 = vpop.f32.mrf.mxu0  ;;  %vm1069_vm15 = vweird.f32 %v7509_v34 }
 0x2ed   :  { %v1523_v7 = vadd.f32 %v8058_v44, %v1522_v6  ;;  %vm1070_vm4 = vmor %vm1068_vm2, %vm1069_vm15  ;;  %v1421_v32 = vpack.c.bf16 %v1404_v30, %v1403_v23  ;;  %vm13109_vm2 = vcmp.eq.s32.totalorder %v8186_v5, %v8289_v38 }
 0x2ee   :  { %v1064_v3 = vmul.f32 %v7509_v34, %v1063_v58 }
 0x2ef   :  { %v1580_v13 = vmax.f32 %v1523_v7, 0.0  ;;  %6982 = vmatmul.msk.bf16.gmra.mxu0 %vm13115_vm1, %v1421_v32 }
 0x2f0   :  { %v1065_v16 = vmul.f32 0.5, %v1064_v3  ;;  %464 = vperm.xlu2 %7462, %v395_v61   ;;  %v1335_v35 = vpop.f32.mrf.mxu3 }
 0x2f1   :  { %v1604_v21 = vpack.c.bf16 %v1580_v13, %v1579_v63  ;;  %v1373_v46 = vadd.f32 %v7738_v50, %v1335_v35  ;;  %v199_v13 = vld [vmem:[%s7997_s1 + $0x70] sm:$0xff]  ;;  %v13344_v35 = vmov 0 }
 0x2f2   :  { %v1066_v25 = vsub.f32 1.5, %v1065_v16  ;;  %v8348_v32 = vpop.permute.xlu1 %239 }
 0x2f3   :  { %6991 = vmatmul.msk.bf16.gmra.mxu1 %vm13115_vm1, %v1604_v21  ;;  %v417_v14 = vpop.permute.xlu0 %416  ;;  %v1405_v6 = vmax.f32 %v1373_v46, 0.0  ;;  %vm13111_vm9 = vcmp.eq.s32.totalorder %v8186_v5, %v8348_v32 }
 0x2f4   :  { %v1067_v22 = vmul.f32 %v7509_v34, %v1066_v25  ;;  %vm507_vm10 = vcmp.eq.s32.totalorder %v8186_v5, %v417_v14  ;;  %v360_v25 = vld [vmem:[%s8016_s5 + $0x78] sm:$0xff] }
 0x2f5   :  { %vm8275_vm11 = vmor %vm13108_vm0, %vm507_vm10  ;;  %v392_v30 = vadd.s32 64, %v360_v25  ;;  %v203_v25 = vld [vmem:[%s7997_s1 + $0x90] sm:$0xff] }
 0x2f6   :  { %v13333_v31 = vsel %vm8275_vm11, 4294967295, %v13332_v31  ;;  %v1071_v33 = vsel %vm1070_vm4, %v7509_v34, %v1067_v22 }
 0x2f7   :  { %13334 = vst [vmem:[#allocation12_spill] sm:$0xff] %v13333_v31  ;;  %v1106_v52 = vmul.f32 %v1071_v33, %v8041_v28  ;;  %v1525_v28 = vpop.f32.mrf.mxu0 }
 0x2f8   :  { %281 = vperm.xlu2 %7462, %v206_v29   ;;  %v1526_v34 = vadd.f32 %v8058_v44, %v1525_v28  ;;  %v1337_v57 = vpop.f32.mrf.mxu3  ;;  %v8346_v29 = vpop.permute.xlu2 %245 }
 0x2f9   :  { %v1117_v37 = vmul.f32 %v8125_v47, %v1106_v52  ;;  %v1374_v61 = vadd.f32 %v7738_v50, %v1337_v57  ;;  %v13347_v50 = vmov 0  ;;  %vm13113_vm0 = vcmp.eq.s32.totalorder %v8186_v5, %v8346_v29 }
 0x2fa   :  { %v1581_v19 = vmax.f32 %v1526_v34, 0.0  ;;  %v362_v34 = vld [vmem:[%s8016_s5 + $0x88] sm:$0xff] }
 0x2fb   :  { %v8291_v39 = vpop.permute.xlu0 %230  ;;  %v8294_v41 = vadd.f32 %v8130_v60, %v1117_v37  ;;  %v1406_v2 = vmax.f32 %v1374_v61, 0.0  ;;  %v201_v37 = vld [vmem:[%s7997_s1 + $0x80] sm:$0xff] }
 0x2fc   :  { %vm13110_vm15 = vcmp.eq.s32.totalorder %v8186_v5, %v8291_v39 }
 0x2fd   :  { %13335 = vst [vmem:[#allocation13_spill] sm:$0xff] %v8294_v41  ;;  %v8301_v43 = vpack.c.bf16 %v8297_v42, %v8294_v41  ;;  %vm8323_vm4 = vmor %vm13110_vm15, %vm509_vm13  ;;  %v1422_v21 = vpack.c.bf16 %v1406_v2, %v1405_v6  ;;  %vm511_vm13 = vcmp.eq.s32.totalorder %v8186_v5, %v429_v4  ;;  %v8383_v6 = vpop.permute.xlu1 %242  ;;  %v394_v2 = vadd.s32 64, %v362_v34 }
 0x2fe   :  { %v13339_v10 = vsel %vm8323_vm4, 4294967295, %v13338_v10 }
 0x2ff   :  { %13337 = vst [vmem:[#allocation15_spill] sm:$0xff] %v8301_v43  ;;  %449 = vperm.xlu0 %7460, %v390_v40   ;;  %7002 = vmatmul.msk.bf16.gmra.mxu2 %vm13115_vm1, %v8301_v43  ;;  %v1527_v3 = vpop.f32.mrf.mxu0 }
 0x300   :  { %v1675_v54 = vpop.f32.mrf.mxu1  ;;  %13340 = vst [vmem:[#allocation16_spill] sm:$0xff] %v13339_v10  ;;  %v1528_v16 = vadd.f32 %v8058_v44, %v1527_v3  ;;  %6983 = vmatmul.msk.bf16.gmra.mxu0 %vm13115_vm1, %v1422_v21  ;;  %v438_v51 = vpop.permute.xlu2 %437  ;;  %v13350_v3 = vmov 0 }
 0x301   :  { %v8314_v58 = vadd.f32 %v8304_v45, %v1675_v54 }
 0x302   :  { %v1582_v23 = vmax.f32 %v1528_v16, 0.0 }
 0x303   :  { %v426_v63 = vpop.permute.xlu0 %425  ;;  %v1755_v7 = vsel %vm13115_vm1, %v8314_v58, 0.0 }
 0x304   :  { %vm510_vm10 = vcmp.eq.s32.totalorder %v8186_v5, %v426_v63  ;;  %1756 = vadd.xlane.f32.xlu1 %v1755_v7  ;;  %v1605_v14 = vpack.c.bf16 %v1582_v23, %v1581_v19 }
 0x305   :  { %vm8333_vm12 = vmor %vm13109_vm2, %vm510_vm10  ;;  %vm514_vm2 = vcmp.eq.s32.totalorder %v8186_v5, %v438_v51 }
 0x306   :  { %v13342_v55 = vsel %vm8333_vm12, 4294967295, %v13341_v55  ;;  %6992 = vmatmul.msk.bf16.gmra.mxu1 %vm13115_vm1, %v1605_v14  ;;  %v441_v14 = vpop.permute.xlu1 %440 }
 0x307   :  { %13343 = vst [vmem:[#allocation17_spill] sm:$0xff] %v13342_v55  ;;  %260 = vperm.xlu0 %7460, %v199_v13   ;;  %v1530_v22 = vpop.f32.mrf.mxu0  ;;  %v13353_v13 = vmov 0 }
 0x308   :  { %v1677_v24 = vpop.f32.mrf.mxu1  ;;  %v1531_v52 = vadd.f32 %v8058_v44, %v1530_v22 }
 0x309   :  { %v8401_v4 = vadd.f32 %v8304_v45, %v1677_v24 }
 0x30a   :  { %v1583_v40 = vmax.f32 %v1531_v52, 0.0  ;;  %v364_v52 = vld [vmem:[%s8016_s5 + $0x98] sm:$0xff] }
 0x30b   :  { %v8344_v27 = vpop.permute.xlu0 %236  ;;  %v1758_v16 = vsel %vm13115_vm1, %v8401_v4, 0.0 }
 0x30c   :  { %vm13112_vm10 = vcmp.eq.s32.totalorder %v8186_v5, %v8344_v27 }
 0x30d   :  { %vm8361_vm7 = vmor %vm13112_vm10, %vm511_vm13  ;;  %vm13114_vm13 = vcmp.eq.s32.totalorder %v8186_v5, %v8383_v6 }
 0x30e   :  { %v13345_v35 = vsel %vm8361_vm7, 4294967295, %v13344_v35 }
 0x30f   :  { %455 = vperm.xlu0 %7460, %v392_v30   ;;  %v1532_v59 = vpop.f32.mrf.mxu0  ;;  %13346 = vst [vmem:[#allocation18_spill] sm:$0xff] %v13345_v35  ;;  %v2549_v35 = vld [vmem:[%s8509_s22] sm:$0xff] }
 0x310   :  { %v8350_v33 = vpop.f32.mrf.mxu1  ;;  %v1533_v28 = vadd.f32 %v8058_v44, %v1532_v59 }
 0x312   :  { %v1584_v46 = vmax.f32 %v1533_v28, 0.0 }
 0x313   :  { %v432_v1 = vpop.permute.xlu0 %431 }
 0x314   :  { %vm512_vm5 = vcmp.eq.s32.totalorder %v8186_v5, %v432_v1  ;;  %v1606_v57 = vpack.c.bf16 %v1584_v46, %v1583_v40  ;;  %v8428_v1 = vpop.permute.xlu2 %251  ;;  %v13356_v46 = vmov 0 }
 0x315   :  { %vm8371_vm14 = vmor %vm13111_vm9, %vm512_vm5  ;;  %vm13139_vm10 = vcmp.eq.s32.totalorder %v8186_v5, %v8428_v1 }
 0x316   :  { %v13348_v50 = vsel %vm8371_vm14, 4294967295, %v13347_v50  ;;  %6993 = vmatmul.msk.bf16.gmra.mxu1 %vm13115_vm1, %v1606_v57  ;;  %vm8394_vm5 = vmor %vm13113_vm0, %vm514_vm2  ;;  %vm13410_vm14 = vcmask 261120  }
 0x317   :  { %13349 = vst [vmem:[#allocation19_spill] sm:$0xff] %v13348_v50  ;;  %266 = vperm.xlu0 %7460, %v201_v37   ;;  %v13351_v3 = vsel %vm8394_vm5, 4294967295, %v13350_v3  ;;  %v1535_v23 = vpop.f32.mrf.mxu0  ;;  %v396_v37 = vadd.s32 64, %v364_v52  ;;  %v8530_v50 = vld [vmem:[%s7930_s20] ss:$0 sm:$0xff]  ;;  %vm13380_vm5 = vcmask 261120  }
 0x318   :  { %v1682_v54 = vpop.f32.mrf.mxu1  ;;  %13352 = vst [vmem:[#allocation20_spill] sm:$0xff] %v13351_v3  ;;  %v1536_v40 = vadd.f32 %v8058_v44, %v1535_v23  ;;  %vm13381_vm7 = vmmov %vm13380_vm5  ;;  %s7767_s20 = smov 18  }
 0x319   :  { %v8386_v61 = vadd.f32 %v8304_v45, %v1682_v54  ;;  %v13359_v54 = vmov 0  ;;  %s8586_s25 = sld [smem:[%s13104_s0 + %s7767_s20]]   ;;  %s7775_s20 = smov 27  }
 0x31a   :  { %v1585_v34 = vmax.f32 %v1536_v40, 0.0  ;;  %v207_v40 = vld [vmem:[%s7997_s1 + $0xb0] sm:$0xff] }
 0x31b   :  { %v435_v63 = vpop.permute.xlu0 %434  ;;  %v1764_v7 = vsel %vm13115_vm1, %v8386_v61, 0.0 }
 0x31c   :  { %vm513_vm15 = vcmp.eq.s32.totalorder %v8186_v5, %v435_v63  ;;  %1765 = vadd.xlane.f32.xlu1 %v1764_v7 }
 0x31d   :  { %vm8407_vm9 = vmor %vm13114_vm13, %vm513_vm15  ;;  %vm515_vm15 = vcmp.eq.s32.totalorder %v8186_v5, %v441_v14 }
 0x31e   :  { %v13354_v13 = vsel %vm8407_vm9, 4294967295, %v13353_v13 }
 0x31f   :  { %13355 = vst [vmem:[#allocation21_spill] sm:$0xff] %v13354_v13  ;;  %461 = vperm.xlu0 %7460, %v394_v2   ;;  %v1537_v28 = vpop.f32.mrf.mxu0  ;;  %v205_v2 = vld [vmem:[%s7997_s1 + $0xa0] sm:$0xff] }
 0x320   :  { %v1685_v19 = vpop.f32.mrf.mxu1  ;;  %v1538_v51 = vadd.f32 %v8058_v44, %v1537_v28 }
 0x321   :  { %1759 = vadd.xlane.f32.xlu2 %v1758_v16  ;;  %v8420_v24 = vadd.f32 %v8304_v45, %v1685_v19  ;;  %v366_v16 = vld [vmem:[%s8016_s5 + $0xa8] sm:$0xff] }
 0x322   :  { %v1586_v57 = vmax.f32 %v1538_v51, 0.0  ;;  %v398_v14 = vadd.s32 64, %v366_v16 }
 0x323   :  { %v8417_v21 = vpop.permute.xlu0 %248  ;;  %v1767_v22 = vsel %vm13115_vm1, %v8420_v24, 0.0 }
 0x324   :  { %vm13116_vm2 = vcmp.eq.s32.totalorder %v8186_v5, %v8417_v21  ;;  %v1607_v7 = vpack.c.bf16 %v1586_v57, %v1585_v34  ;;  %v8474_v34 = vpop.permute.xlu1 %257 }
 0x325   :  { %vm8439_vm0 = vmor %vm13116_vm2, %vm515_vm15  ;;  %vm13362_vm2 = vcmask 261120  }
 0x326   :  { %v13357_v46 = vsel %vm8439_vm0, 4294967295, %v13356_v46  ;;  %6994 = vmatmul.msk.bf16.gmra.mxu1 %vm13362_vm2, %v1607_v7  ;;  %vm326_vm0 = vcmp.eq.s32.totalorder %v8186_v5, %v8474_v34  ;;  %v13399_v34 = vmov 0 }
 0x327   :  { %272 = vperm.xlu0 %7460, %v203_v25   ;;  %13358 = vst [vmem:[#allocation22_spill] sm:$0xff] %v13357_v46 }
 0x328   :  { %v8423_v30 = vpop.f32.mrf.mxu1 }
 0x329   :  { %1768 = vadd.xlane.f32.xlu2 %v1767_v22  ;;  %v8466_v22 = vpop.permute.xlu2 %446 }
 0x32b   :  { %v444_v59 = vpop.permute.xlu0 %443 }
 0x32c   :  { %vm516_vm13 = vcmp.eq.s32.totalorder %v8186_v5, %v444_v59  ;;  %v8488_v41 = vpop.permute.xlu1 %452 }
 0x32d   :  { %vm8448_vm1 = vmor %vm13139_vm10, %vm516_vm13 }
 0x32e   :  { %v13360_v54 = vsel %vm8448_vm1, 4294967295, %v13359_v54  ;;  %vm13363_vm13 = vmmov %vm13362_vm2 }
 0x32f   :  { %13361 = vst [vmem:[#allocation23_spill] sm:$0xff] %v13360_v54  ;;  %467 = vperm.xlu0 %7460, %v396_v37  }
 0x330   :  { %v8456_v63 = vpop.f32.mrf.mxu1 }
 0x337   :  { %278 = vperm.xlu0 %7460, %v205_v2  }
 0x338   :  { %v1692_v19 = vpop.f32.mrf.mxu1 }
 0x339   :  { %v8462_v23 = vadd.f32 %v8304_v45, %v1692_v19 }
 0x33b   :  { %v1776_v25 = vsel %vm13363_vm13, %v8462_v23, 0.0  ;;  %v1540_v28 = vpop.f32.mrf.mxu0  ;;  %v1002_v51 = vpop.xlane.xlu2 %1001  ;;  %vm13364_vm13 = vmmov %vm13362_vm2 }
 0x33c   :  { %1777 = vadd.xlane.f32.xlu1 %v1776_v25  ;;  %v1012_v7 = vmul.f32 %v1002_v51, %v7947_v0 }
 0x33e   :  { %v8482_v25 = vadd.f32 1e-05, %v1012_v7 }
 0x33f   :  { %473 = vperm.xlu0 %7460, %v398_v14   ;;  %v1541_v14 = vadd.f32 %v8058_v44, %v1540_v28 }
 0x340   :  { %v1695_v52 = vpop.f32.mrf.mxu1  ;;  %7510 = vrsqrt.f32 %v8482_v25  ;;  %vm1088_vm15 = vweird.f32 %v8482_v25 }
 0x341   :  { %v8469_v59 = vadd.f32 %v8304_v45, %v1695_v52 }
 0x343   :  { %v1779_v37 = vsel %vm13362_vm2, %v8469_v59, 0.0  ;;  %v1542_v16 = vpop.f32.mrf.mxu0 }
 0x344   :  { %1780 = vadd.xlane.f32.xlu1 %v1779_v37  ;;  %v1543_v52 = vadd.f32 %v8058_v44, %v1542_v16  ;;  %v1587_v37 = vmax.f32 %v1541_v14, 0.0 }
 0x346   :  { %v1588_v42 = vmax.f32 %v1543_v52, 0.0  ;;  %v8494_v7 = vpop.eup %7510  ;;  %v8502_v52 = vpop.permute.xlu1 %269 }
 0x347   :  { %284 = vperm.xlu0 %7460, %v207_v40   ;;  %v1083_v14 = vmul.f32 %v8494_v7, %v8482_v25  ;;  %13365 = vst [vmem:[#allocation24_spill] sm:$0xff] %v8502_v52 }
 0x348   :  { %v1697_v57 = vpop.f32.mrf.mxu1  ;;  %v1608_v51 = vpack.c.bf16 %v1588_v42, %v1587_v37 }
 0x349   :  { %v8478_v2 = vadd.f32 %v8304_v45, %v1697_v57 }
 0x34a   :  { %6995 = vmatmul.msk.bf16.gmra.mxu1 %vm13362_vm2, %v1608_v51 }
 0x34b   :  { %v1782_v19 = vsel %vm13364_vm13, %v8478_v2, 0.0  ;;  %v1545_v57 = vpop.f32.mrf.mxu0  ;;  %vm13366_vm13 = vmmov %vm13362_vm2 }
 0x34c   :  { %1783 = vadd.xlane.f32.xlu2 %v1782_v19  ;;  %v8492_v19 = vpop.permute.xlu0 %254  ;;  %v1546_v16 = vadd.f32 %v8058_v44, %v1545_v57  ;;  %v1084_v57 = vmul.f32 %v8494_v7, %v1083_v14  ;;  %v2552_v14 = vld [vmem:[%s8509_s22 + $0x18] sm:$0xff] }
 0x34e   :  { %v1085_v3 = vmul.f32 0.5, %v1084_v57 }
 0x350   :  { %v8486_v40 = vpop.f32.mrf.mxu1 }
 0x353   :  { %v1547_v37 = vpop.f32.mrf.mxu0 }
 0x354   :  { %v1548_v51 = vadd.f32 %v8058_v44, %v1547_v37  ;;  %v8522_v37 = vpop.permute.xlu1 %275 }
 0x355   :  { %13368 = vst [vmem:[#allocation25_spill] sm:$0xff] %v8522_v37 }
 0x356   :  { %v1590_v9 = vmax.f32 %v1548_v51, 0.0  ;;  %v1086_v51 = vsub.f32 1.5, %v1085_v3 }
 0x358   :  { %v1702_v49 = vpop.f32.mrf.mxu1  ;;  %v1087_v10 = vmul.f32 %v8494_v7, %v1086_v51 }
 0x359   :  { %v8497_v28 = vadd.f32 %v8304_v45, %v1702_v49  ;;  %v1589_v49 = vmax.f32 %v1546_v16, 0.0 }
 0x35b   :  { %v1788_v42 = vsel %vm13366_vm13, %v8497_v28, 0.0  ;;  %v1609_v13 = vpack.c.bf16 %v1590_v9, %v1589_v49  ;;  %vm13367_vm13 = vmmov %vm13362_vm2  ;;  %v2550_v9 = vld [vmem:[%s8509_s22 + $0x8] sm:$0xff] }
 0x35c   :  { %1789 = vadd.xlane.f32.xlu1 %v1788_v42  ;;  %v1550_v16 = vpop.f32.mrf.mxu0 }
 0x35d   :  { %6996 = vmatmul.msk.bf16.gmra.mxu1 %vm13367_vm13, %v1609_v13  ;;  %v1551_v13 = vadd.f32 %v8530_v50, %v1550_v16 }
 0x35e   :  { %v1005_v62 = vpop.xlane.xlu0 %1004 }
 0x35f   :  { %v1013_v17 = vmul.f32 %v1005_v62, %v7947_v0  ;;  %v2551_v62 = vld [vmem:[%s8509_s22 + $0x10] sm:$0xff]  ;;  %v1591_v16 = vmax.f32 %v1551_v13, 0.0 }
 0x360   :  { %v1705_v46 = vpop.f32.mrf.mxu1 }
 0x361   :  { %v1021_v42 = vadd.f32 1e-05, %v1013_v17  ;;  %v8515_v54 = vadd.f32 %v8304_v45, %v1705_v46  ;;  %v2618_v17 = vpack.c.bf16 %v2552_v14, %v2551_v62  ;;  %v8539_v62 = vadd.f32 %v8304_v45, %v8350_v33 }
 0x363   :  { %7512 = vrsqrt.f32 %v1021_v42  ;;  %v1791_v44 = vsel %vm13362_vm2, %v8515_v54, 0.0  ;;  %2625 = vmatpush.bf16.msra.mxu2 %v2618_v17  ;;  %vm1089_vm2 = vweird.f32 %v8494_v7 }
 0x364   :  { %1792 = vadd.xlane.f32.xlu2 %v1791_v44  ;;  %v2617_v44 = vpack.c.bf16 %v2550_v9, %v2549_v35  ;;  %v1552_v17 = vpop.f32.mrf.mxu0  ;;  %vm8542_vm10 = vmor %vm1088_vm15, %vm1089_vm2  ;;  %v8552_v9 = vpop.permute.xlu1 %470  ;;  %vm517_vm15 = vcmp.eq.s32.totalorder %v8186_v5, %v8466_v22  ;;  %vm13372_vm2 = vcmask 261120  }
 0x365   :  { %v1553_v51 = vadd.f32 %v8530_v50, %v1552_v17  ;;  %v1091_v33 = vsel %vm8542_vm10, %v8494_v7, %v1087_v10  ;;  %13371 = vst [vmem:[#allocation26_spill] sm:$0xff] %v8552_v9  ;;  %v1761_v13 = vsel %vm13372_vm2, %v8539_v62, 0.0  ;;  %vm1098_vm10 = vweird.f32 %v1021_v42 }
 0x366   :  { %v1108_v22 = vmul.f32 %v1091_v33, %v8146_v20  ;;  %v8590_v20 = vadd.f32 %v8304_v45, %v8423_v30 }
 0x367   :  { %2626 = vmatpush.bf16.msra.mxu2 %v2617_v44 }
 0x368   :  { %v1707_v46 = vpop.f32.mrf.mxu1 }
 0x369   :  { %v7513_v49 = vpop.eup %7512  ;;  %v8527_v57 = vadd.f32 %v8304_v45, %v1707_v46 }
 0x36a   :  { %v1093_v55 = vmul.f32 %v7513_v49, %v1021_v42  ;;  %vm13376_vm2 = vweird.f32 %v7513_v49  ;;  %v13377_v42 = vmov 0 }
 0x36b   :  { %v1794_v3 = vsel %vm13367_vm13, %v8527_v57, 0.0  ;;  %vm13146_vm13 = vcmp.eq.s32.totalorder %v8186_v5, %v8492_v19  ;;  %vm1100_vm9 = vmor %vm1098_vm10, %vm13376_vm2 }
 0x36c   :  { %v1094_v14 = vmul.f32 %v7513_v49, %v1093_v55  ;;  %1795 = vadd.xlane.f32.xlu1 %v1794_v3  ;;  %v1592_v55 = vmax.f32 %v1553_v51, 0.0  ;;  %vm8561_vm1 = vmor %vm13146_vm13, %vm517_vm15  ;;  %v13373_v3 = vmov 0  ;;  %v1555_v51 = vpop.f32.mrf.mxu0 }
 0x36d   :  { %v13374_v3 = vsel %vm8561_vm1, 4294967295, %v13373_v3  ;;  %vm13385_vm10 = vmmov %vm13381_vm7 }
 0x36e   :  { %v1095_v46 = vmul.f32 0.5, %v1094_v14  ;;  %13375 = vst [vmem:[#allocation27_spill] sm:$0xff] %v13374_v3  ;;  %v1610_v14 = vpack.c.bf16 %v1592_v55, %v1591_v16  ;;  %v264_v55 = vpop.permute.xlu2 %263 }
 0x36f   :  { %vm13151_vm2 = vcmp.eq.s32.totalorder %v8186_v5, %v264_v55  ;;  %vm13406_vm1 = vcmp.eq.s32.totalorder %v8186_v5, %v264_v55 }
 0x370   :  { %v1096_v25 = vsub.f32 1.5, %v1095_v46  ;;  %v1710_v44 = vpop.f32.mrf.mxu1  ;;  %6997 = vmatmul.msk.bf16.gmra.mxu1 %vm13381_vm7, %v1610_v14  ;;  %v1119_v46 = vmul.f32 %v8125_v47, %v1108_v22 }
 0x371   :  { %v8566_v10 = vadd.f32 %v8304_v45, %v1710_v44  ;;  %1762 = vadd.xlane.f32.xlu0 %v1761_v13  ;;  %v450_v7 = vpop.permute.xlu0 %449 }
 0x372   :  { %v1097_v17 = vmul.f32 %v7513_v49, %v1096_v25  ;;  %vm518_vm15 = vcmp.eq.s32.totalorder %v8186_v5, %v450_v7 }
 0x373   :  { %vm8576_vm13 = vmor %vm326_vm0, %vm518_vm15  ;;  %v1797_v35 = vsel %vm13380_vm5, %v8566_v10, 0.0 }
 0x374   :  { %v13378_v42 = vsel %vm8576_vm13, 4294967295, %v13377_v42  ;;  %v1101_v16 = vsel %vm1100_vm9, %v7513_v49, %v1097_v17  ;;  %1798 = vadd.xlane.f32.xlu1 %v1797_v35  ;;  %vm13382_vm9 = vmmov %vm13380_vm5  ;;  %v8611_v17 = vadd.f32 %v8130_v60, %v1119_v46  ;;  %v13170_v46 = vmov 1.0|1.0  }
 0x375   :  { %13379 = vst [vmem:[#allocation28_spill] sm:$0xff] %v13378_v42  ;;  %v1109_v33 = vmul.f32 %v1101_v16, %v8231_v36  ;;  %v1770_v13 = vsel %vm13382_vm9, %v8590_v20, 0.0  ;;  %vm13390_vm9 = vmmov %vm13381_vm7 }
 0x376   :  { %13383 = vst [vmem:[#allocation29_spill] sm:$0xff] %v8611_v17 }
 0x377   :  { %v1757_v30 = vpop.xlane.xlu1 %1756  ;;  %v1120_v49 = vmul.f32 %v8125_v47, %v1109_v33  ;;  %v1556_v47 = vadd.f32 %v8530_v50, %v1555_v51  ;;  %v1557_v33 = vpop.f32.mrf.mxu0 }
 0x378   :  { %v1851_v25 = vmul.f32 %v1757_v30, %v7947_v0  ;;  %v1712_v44 = vpop.f32.mrf.mxu1  ;;  %v1558_v30 = vadd.f32 %v8530_v50, %v1557_v33  ;;  %v13423_v33 = vmov 0 }
 0x379   :  { %v8608_v7 = vadd.f32 %v8304_v45, %v1712_v44  ;;  %1771 = vadd.xlane.f32.xlu0 %v1770_v13  ;;  %v261_v14 = vpop.permute.xlu0 %260  ;;  %v8614_v36 = vadd.f32 %v8130_v60, %v1120_v49  ;;  %v8630_v60 = vadd.f32 %v8304_v45, %v8456_v63  ;;  %v1593_v63 = vmax.f32 %v1556_v47, 0.0 }
 0x37a   :  { %v8618_v22 = vsub.f32 %v8314_v58, %v1851_v25  ;;  %vm13152_vm5 = vcmp.eq.s32.totalorder %v8186_v5, %v261_v14  ;;  %v13387_v58 = vmov 0  ;;  %v1594_v25 = vmax.f32 %v1558_v30, 0.0 }
 0x37b   :  { %13384 = vst [vmem:[#allocation30_spill] sm:$0xff] %v8614_v36  ;;  %v1800_v35 = vsel %vm13385_vm10, %v8608_v7, 0.0  ;;  %v8626_v16 = vpack.c.bf16 %v8614_v36, %v8611_v17  ;;  %vm8636_vm15 = vmpackc.low %vm13151_vm2, %vm13152_vm5  ;;  %v13393_v44 = vmov 0 }
 0x37c   :  { %1801 = vadd.xlane.f32.xlu2 %v1800_v35  ;;  %v13388_v58 = vsel %vm8636_vm15, 4294967295, %v13387_v58  ;;  %v1915_v51 = vmul.f32 %v8618_v22, %v8618_v22  ;;  %7349 = vmatpush.lsf.msk.bf16.msk.msrb.mxu2 %vm8636_vm15, %v13170_v46  ;;  %vm13391_vm10 = vmmov %vm13381_vm7  ;;  %vm13392_vm7 = vcmp.eq.s32.totalorder %v8186_v5, %v8492_v19  ;;  %v1611_v19 = vpack.c.bf16 %v1594_v25, %v1593_v63 }
 0x37d   :  { %13386 = vst [vmem:[#allocation31_spill] sm:$0xff] %v8626_v16  ;;  %7003 = vmatmul.msk.bf16.gmra.mxu2 %vm13390_vm9, %v8626_v16  ;;  %vm8655_vm2 = vmpackc.low %vm326_vm0, %vm13392_vm7  ;;  %vm13398_vm0 = vcmp.eq.s32.totalorder %v8186_v5, %v8428_v1  ;;  %v8692_v1 = vadd.f32 %v8304_v45, %v8486_v40  ;;  %v13413_v40 = vmov 0 }
 0x37e   :  { %13389 = vst [vmem:[#allocation32_spill] sm:$0xff] %v13388_v58  ;;  %v1947_v49 = vsel %vm13391_vm10, %v1915_v51, 0.0  ;;  %v13394_v44 = vsel %vm8655_vm2, 4294967295, %v13393_v44  ;;  %vm13396_vm5 = vmmov %vm13390_vm9  ;;  %vm519_vm9 = vcmp.eq.s32.totalorder %v8186_v5, %v8488_v41  ;;  %vm13397_vm10 = vcmp.eq.s32.totalorder %v8186_v5, %v8417_v21 }
 0x37f   :  { %1948 = vadd.xlane.f32.xlu1 %v1947_v49  ;;  %13395 = vst [vmem:[#allocation33_spill] sm:$0xff] %v13394_v44  ;;  %v1773_v13 = vsel %vm13396_vm5, %v8630_v60, 0.0  ;;  %vm8672_vm7 = vmpackc.low %vm13398_vm0, %vm13397_vm10  ;;  %vm13402_vm5 = vcmp.eq.s32.totalorder %v8186_v5, %v261_v14  ;;  %v13403_v41 = vmov 0  ;;  %v13407_v21 = vmov 0  ;;  %v1560_v14 = vpop.f32.mrf.mxu0 }
 0x380   :  { %7351 = vmatpush.lsf.msk.bf16.msk.msrb.mxu2 %vm8655_vm2, %v13170_v46  ;;  %v13400_v34 = vsel %vm8672_vm7, 4294967295, %v13399_v34  ;;  %vm8678_vm15 = vmor %vm13402_vm5, %vm519_vm9  ;;  %6998 = vmatmul.msk.bf16.gmra.mxu1 %vm13410_vm14, %v1611_v19  ;;  %vm13412_vm14 = vcmp.eq.s32.totalorder %v8186_v5, %v8346_v29  ;;  %vm13416_vm10 = vcmask 261120   ;;  %v1561_v51 = vadd.f32 %v8530_v50, %v1560_v14  ;;  %v368_v19 = vld [vmem:[%s8016_s5 + $0xb8] sm:$0xff]  ;;  %v209_v14 = vld [vmem:[%s7997_s1 + $0xc0] sm:$0xff] }
 0x381   :  { %1774 = vadd.xlane.f32.xlu0 %v1773_v13  ;;  %v456_v47 = vpop.permute.xlu0 %455  ;;  %13401 = vst [vmem:[#allocation34_spill] sm:$0xff] %v13400_v34  ;;  %v13404_v41 = vsel %vm8678_vm15, 4294967295, %v13403_v41  ;;  %v1785_v55 = vsel %vm13416_vm10, %v8692_v1, 0.0  ;;  %vm13162_vm5 = vcmp.eq.s32.totalorder %v8186_v5, %v8502_v52  ;;  %v13420_v29 = vmov 0 }
 0x382   :  { %13405 = vst [vmem:[#allocation35_spill] sm:$0xff] %v13404_v41  ;;  %vm520_vm2 = vcmp.eq.s32.totalorder %v8186_v5, %v456_v47  ;;  %v13429_v49 = vmov 0  ;;  %v8766_v47 = vpop.permute.xlu2 %458 }
 0x383   :  { %vm8685_vm13 = vmor %vm13406_vm1, %vm520_vm2  ;;  %vm13411_vm1 = vcmp.eq.s32.totalorder %v8186_v5, %v8383_v6  ;;  %13433 = vst [vmem:[#allocation43_spill] sm:$0xff] %v8766_v47 }
 0x384   :  { %v13408_v21 = vsel %vm8685_vm13, 4294967295, %v13407_v21  ;;  %7353 = vmatpush.lsf.msk.bf16.msk.msrb.mxu2 %vm8672_vm7, %v13170_v46  ;;  %vm8707_vm2 = vmpackc.low %vm13412_vm14, %vm13411_vm1  ;;  %vm13418_vm1 = vcmp.eq.s32.totalorder %v8186_v5, %v8344_v27  ;;  %vm13419_vm14 = vcmp.eq.s32.totalorder %v8186_v5, %v8348_v32  ;;  %v367_v27 = vld [vmem:[%s8016_s5 + $0xb0] sm:$0xff]  ;;  %v1595_v32 = vmax.f32 %v1561_v51, 0.0 }
 0x385   :  { %13409 = vst [vmem:[#allocation36_spill] sm:$0xff] %v13408_v21  ;;  %v13414_v40 = vsel %vm8707_vm2, 4294967295, %v13413_v40  ;;  %vm8729_vm10 = vmpackc.low %vm13419_vm14, %vm13418_vm1  ;;  %vm13426_vm1 = vcmask 261120   ;;  %vm13427_vm14 = vcmp.eq.s32.totalorder %v8186_v5, %v8291_v39  ;;  %v399_v25 = vadd.s32 64, %v367_v27  ;;  %v208_v39 = vld [vmem:[%s7997_s1 + $0xb8] sm:$0xff]  ;;  %v210_v27 = vld [vmem:[%s7997_s1 + $0xc8] sm:$0xff] }
 0x386   :  { %13415 = vst [vmem:[#allocation37_spill] sm:$0xff] %v13414_v40  ;;  %v13421_v29 = vsel %vm8729_vm10, 4294967295, %v13420_v29 }
 0x387   :  { %13422 = vst [vmem:[#allocation39_spill] sm:$0xff] %v13421_v29  ;;  %v1562_v6 = vpop.f32.mrf.mxu0 }
 0x388   :  { %7355 = vmatpush.lsf.msk.bf16.msk.msrb.mxu2 %vm8707_vm2, %v13170_v46  ;;  %v1563_v63 = vadd.f32 %v8530_v50, %v1562_v6 }
 0x389   :  { %1786 = vadd.xlane.f32.xlu0 %v1785_v55  ;;  %v8716_v35 = vpop.permute.xlu0 %266  ;;  %v400_v55 = vadd.s32 64, %v368_v19 }
 0x38a   :  { %13417 = vst [vmem:[#allocation38_spill] sm:$0xff] %v8716_v35  ;;  %vm13161_vm0 = vcmp.eq.s32.totalorder %v8186_v5, %v8716_v35  ;;  %v1596_v30 = vmax.f32 %v1563_v63, 0.0  ;;  %v8813_v51 = vpop.permute.xlu2 %464 }
 0x38b   :  { %vm8739_vm9 = vmpackc.low %vm13162_vm5, %vm13161_vm0  ;;  %vm13428_vm0 = vcmp.eq.s32.totalorder %v8186_v5, %v8289_v38  ;;  %v13436_v38 = vmov 0  ;;  %13448 = vst [vmem:[#allocation48_spill] sm:$0xff] %v8813_v51 }
 0x38c   :  { %v13424_v33 = vsel %vm8739_vm9, 4294967295, %v13423_v33  ;;  %7357 = vmatpush.lsf.msk.bf16.msk.msrb.mxu2 %vm8729_vm10, %v13170_v46  ;;  %vm8756_vm5 = vmpackc.low %vm13428_vm0, %vm13427_vm14  ;;  %v1612_v13 = vpack.c.bf16 %v1596_v30, %v1595_v32  ;;  %vm13434_vm0 = vcmp.eq.s32.totalorder %v8186_v5, %v8234_v26  ;;  %vm13435_vm14 = vcmp.eq.s32.totalorder %v8186_v5, %v8251_v11 }
 0x38d   :  { %13425 = vst [vmem:[#allocation40_spill] sm:$0xff] %v13424_v33  ;;  %7004 = vmatmul.msk.bf16.vlgmr.msra.gmra.mxu2 %vm13426_vm1, %v8150_v53  ;;  %v13430_v49 = vsel %vm8756_vm5, 4294967295, %v13429_v49  ;;  %vm8774_vm10 = vmpackc.low %vm13435_vm14, %vm13434_vm0  ;;  %v13441_v26 = vmov 0  ;;  %vm13167_vm14 = vcmp.eq.s32.totalorder %v8186_v5, %v8522_v37 }
 0x38e   :  { %13431 = vst [vmem:[#allocation41_spill] sm:$0xff] %v13430_v49  ;;  %v13437_v38 = vsel %vm8774_vm10, 4294967295, %v13436_v38 }
 0x38f   :  { %13438 = vst [vmem:[#allocation44_spill] sm:$0xff] %v13437_v38 }
 0x390   :  { %7359 = vmatpush.lsf.msk.bf16.msk.msrb.mxu2 %vm8756_vm5, %v13170_v46  ;;  %6999 = vmatmul.msk.bf16.gmra.mxu1 %vm13426_vm1, %v1612_v13  ;;  %vm13439_vm1 = vcmp.eq.s32.totalorder %v8186_v5, %v8188_v8  ;;  %vm13440_vm5 = vcmp.eq.s32.totalorder %v8186_v5, %v8198_v15  ;;  %v1715_v8 = vpop.f32.mrf.mxu1  ;;  %v13445_v15 = vmov 0 }
 0x391   :  { %v8763_v50 = vpop.permute.xlu0 %461  ;;  %vm8789_vm2 = vmpackc.low %vm13440_vm5, %vm13439_vm1  ;;  %vm13449_vm1 = vcmask 261120   ;;  %v8865_v53 = vadd.f32 %v8304_v45, %v1715_v8 }
 0x392   :  { %13432 = vst [vmem:[#allocation42_spill] sm:$0xff] %v8763_v50  ;;  %v13442_v26 = vsel %vm8789_vm2, 4294967295, %v13441_v26  ;;  %v8820_v63 = vpop.permute.xlu2 %281 }
 0x393   :  { %13443 = vst [vmem:[#allocation45_spill] sm:$0xff] %v13442_v26  ;;  %v8868_v26 = vpop.f32.mrf.mxu2 }
 0x394   :  { %476 = vperm.xlu2 %7462, %v399_v25   ;;  %7361 = vmatpush.lsf.msk.bf16.msk.msrb.mxu2 %vm8774_vm10, %v13170_v46  ;;  %13451 = vst [vmem:[#allocation50_spill] sm:$0xff] %v8820_v63  ;;  %v13453_v25 = vmov 0 }
 0x398   :  { %287 = vperm.xlu1 %7461, %v208_v39   ;;  %7363 = vmatpush.lsf.msk.bf16.msk.msrb.mxu2 %vm8789_vm2, %v13170_v46  ;;  %v1717_v32 = vpop.f32.mrf.mxu1  ;;  %vm13456_vm2 = vcmask 261120   ;;  %v1766_v46 = vpop.xlane.xlu1 %1765 }
 0x399   :  { %v8796_v11 = vpop.permute.xlu0 %272  ;;  %vm13457_vm10 = vmmov %vm13456_vm2  ;;  %v8851_v17 = vadd.f32 %v8304_v45, %v1717_v32 }
 0x39a   :  { %13444 = vst [vmem:[#allocation46_spill] sm:$0xff] %v8796_v11  ;;  %vm13166_vm0 = vcmp.eq.s32.totalorder %v8186_v5, %v8796_v11  ;;  %v1760_v39 = vpop.xlane.xlu2 %1759 }
 0x39b   :  { %vm8809_vm5 = vmpackc.low %vm13167_vm14, %vm13166_vm0  ;;  %vm13200_vm14 = vcmp.eq.s32.totalorder %v8186_v5, %v8820_v63 }
 0x39c   :  { %7299 = vllmr.8.mxu2  ;;  %290 = vperm.xlu2 %7462, %v209_v14   ;;  %v13446_v15 = vsel %vm8809_vm5, 4294967295, %v13445_v15 }
 0x39d   :  { %13447 = vst [vmem:[#allocation47_spill] sm:$0xff] %v13446_v15  ;;  %479 = vperm.xlu0 %7460, %v400_v55   ;;  %7005 = vmatmul.msk.bf16.gmra.mxu2 %vm13449_vm1, %v8178_v56  ;;  %v1854_v56 = vmul.f32 %v1766_v46, %v7947_v0 }
 0x3a0   :  { %v8840_v13 = vpop.f32.mrf.mxu1 }
 0x3a1   :  { %v8817_v6 = vpop.permute.xlu0 %467 }
 0x3a2   :  { %13450 = vst [vmem:[#allocation49_spill] sm:$0xff] %v8817_v6  ;;  %v1769_v14 = vpop.xlane.xlu2 %1768 }
 0x3a4   :  { %293 = vperm.xlu2 %7462, %v210_v27   ;;  %v1855_v27 = vmul.f32 %v1769_v14, %v7947_v0 }
 0x3a8   :  { %v1722_v19 = vpop.f32.mrf.mxu1 }
 0x3a9   :  { %v8822_v30 = vpop.permute.xlu0 %278  ;;  %v8843_v55 = vadd.f32 %v8304_v45, %v1722_v19 }
 0x3aa   :  { %13452 = vst [vmem:[#allocation51_spill] sm:$0xff] %v8822_v30  ;;  %vm13172_vm0 = vcmp.eq.s32.totalorder %v8186_v5, %v8822_v30 }
 0x3ab   :  { %vm8834_vm1 = vmpackc.low %vm13200_vm14, %vm13172_vm0 }
 0x3ac   :  { %v13454_v25 = vsel %vm8834_vm1, 4294967295, %v13453_v25  ;;  %vm13458_vm0 = vmmov %vm13456_vm2 }
 0x3ad   :  { %13455 = vst [vmem:[#allocation52_spill] sm:$0xff] %v13454_v25  ;;  %7006 = vmatmul.msk.bf16.gmra.mxu2 %vm13456_vm2, %v8301_v43  ;;  %v1812_v36 = vsel %vm13458_vm0, %v8843_v55, 0.0  ;;  %v8854_v43 = vsub.f32 %v8420_v24, %v1855_v27  ;;  %vm13459_vm2 = vmmov %vm13458_vm0  ;;  %v1852_v24 = vmul.f32 %v1760_v39, %v7947_v0  ;;  %v1803_v38 = vsel %vm13458_vm0, %v8865_v53, 0.0 }
 0x3ae   :  { %v1806_v19 = vsel %vm13459_vm2, %v8851_v17, 0.0  ;;  %vm13461_vm2 = vmmov %vm13458_vm0 }
 0x3af   :  { %v1919_v14 = vmul.f32 %v8854_v43, %v8854_v43  ;;  %v1778_v32 = vpop.xlane.xlu1 %1777  ;;  %v8880_v8 = vsub.f32 %v8401_v4, %v1852_v24 }
 0x3b0   :  { %v1725_v27 = vpop.f32.mrf.mxu1  ;;  %v1858_v46 = vmul.f32 %v1778_v32, %v7947_v0 }
 0x3b2   :  { %v8883_v39 = vsub.f32 %v8462_v23, %v1858_v46 }
 0x3b4   :  { %v1922_v23 = vmul.f32 %v8883_v39, %v8883_v39 }
 0x3b7   :  { %v1781_v34 = vpop.xlane.xlu1 %1780 }
 0x3b8   :  { %v1727_v49 = vpop.f32.mrf.mxu1  ;;  %v1859_v6 = vmul.f32 %v1781_v34, %v7947_v0 }
 0x3bd   :  { %7007 = vmatmul.msk.bf16.gmra.mxu2 %vm13457_vm10, %v8626_v16  ;;  %v8862_v16 = vsub.f32 %v8386_v61, %v1854_v56  ;;  %vm13460_vm10 = vmmov %vm13458_vm0  ;;  %v8877_v61 = vadd.f32 %v8304_v45, %v1725_v27  ;;  %v8890_v27 = vpop.permute.xlu0 %473 }
 0x3be   :  { %13463 = vst [vmem:[#allocation53_spill] sm:$0xff] %v8890_v27  ;;  %v8950_v27 = vadd.f32 %v8304_v45, %v1727_v49 }
 0x3bf   :  { %v1918_v56 = vmul.f32 %v8862_v16, %v8862_v16 }
 0x3c2   :  { %1813 = vadd.xlane.f32.xlu1 %v1812_v36  ;;  %v1959_v36 = vsel %vm13460_vm10, %v1919_v14, 0.0  ;;  %v1784_v14 = vpop.xlane.xlu2 %1783  ;;  %vm13462_vm10 = vmmov %vm13458_vm0 }
 0x3c3   :  { %v1815_v32 = vsel %vm13462_vm10, %v8877_v61, 0.0  ;;  %v1860_v4 = vmul.f32 %v1784_v14, %v7947_v0  ;;  %vm13466_vm10 = vmmov %vm13458_vm0 }
 0x3c5   :  { %v8899_v46 = vsub.f32 %v8478_v2, %v1860_v4  ;;  %v8904_v14 = vpop.permute.xlu0 %284 }
 0x3c6   :  { %13465 = vst [vmem:[#allocation54_spill] sm:$0xff] %v8904_v14 }
 0x3c7   :  { %1807 = vadd.xlane.f32.xlu0 %v1806_v19  ;;  %v1956_v19 = vsel %vm13461_vm2, %v1918_v56, 0.0  ;;  %vm13464_vm2 = vmmov %vm13458_vm0  ;;  %v1730_v29 = vpop.f32.mrf.mxu1 }
 0x3c8   :  { %v1968_v56 = vsel %vm13464_vm2, %v1922_v23, 0.0  ;;  %vm13467_vm2 = vmmov %vm13458_vm0  ;;  %v8978_v35 = vadd.f32 %v8304_v45, %v1730_v29 }
 0x3ca   :  { %1960 = vadd.xlane.f32.xlu1 %v1959_v36  ;;  %v1916_v36 = vmul.f32 %v8880_v8, %v8880_v8 }
 0x3cc   :  { %v1950_v24 = vsel %vm13458_vm0, %v1916_v36, 0.0 }
 0x3cd   :  { %1804 = vadd.xlane.f32.xlu2 %v1803_v38  ;;  %v8895_v38 = vpop.f32.mrf.mxu2 }
 0x3cf   :  { %1957 = vadd.xlane.f32.xlu0 %v1956_v19  ;;  %v1924_v19 = vmul.f32 %v8899_v46, %v8899_v46 }
 0x3d1   :  { %v1974_v40 = vsel %vm13466_vm10, %v1924_v19, 0.0  ;;  %vm13468_vm10 = vmmov %vm13458_vm0 }
 0x3d2   :  { %1816 = vadd.xlane.f32.xlu1 %v1815_v32 }
 0x3d5   :  { %1951 = vadd.xlane.f32.xlu2 %v1950_v24  ;;  %v8906_v32 = vpop.f32.mrf.mxu2  ;;  %v1732_v24 = vpop.f32.mrf.mxu1 }
 0x3d6   :  { %v8953_v11 = vadd.f32 %v8304_v45, %v1732_v24 }
 0x3d7   :  { %1969 = vadd.xlane.f32.xlu0 %v1968_v56  ;;  %v8915_v56 = vpop.xlane.xlu1 %1789 }
 0x3dd   :  { %v8910_v4 = vpop.f32.mrf.mxu2 }
 0x3df   :  { %1975 = vadd.xlane.f32.xlu0 %v1974_v40  ;;  %v1735_v40 = vpop.f32.mrf.mxu1 }
 0x3e4   :  { %v1763_v36 = vpop.xlane.xlu0 %1762 }
 0x3e5   :  { %v1853_v2 = vmul.f32 %v1763_v36, %v7947_v0  ;;  %v8920_v33 = vpop.f32.mrf.mxu2  ;;  %v8924_v36 = vadd.f32 %v8304_v45, %v8840_v13 }
 0x3e7   :  { %v8913_v23 = vsub.f32 %v8539_v62, %v1853_v2  ;;  %v1796_v62 = vpop.xlane.xlu1 %1795  ;;  %v1809_v25 = vsel %vm13467_vm2, %v8924_v36, 0.0  ;;  %v8938_v9 = vpop.f32.mrf.mxu1  ;;  %vm13469_vm2 = vmmov %vm13458_vm0 }
 0x3e8   :  { %v1864_v37 = vmul.f32 %v1796_v62, %v7947_v0  ;;  %v1818_v49 = vsel %vm13469_vm2, %v8950_v27, 0.0  ;;  %vm13471_vm2 = vmmov %vm13458_vm0 }
 0x3e9   :  { %v1917_v44 = vmul.f32 %v8913_v23, %v8913_v23  ;;  %vm13473_vm14 = vmmov %vm13471_vm2 }
 0x3ea   :  { %v1821_v34 = vsel %vm13473_vm14, %v8978_v35, 0.0  ;;  %vm13479_vm14 = vmmov %vm13471_vm2 }
 0x3eb   :  { %v1953_v58 = vsel %vm13458_vm0, %v1917_v44, 0.0 }
 0x3ec   :  { %1954 = vadd.xlane.f32.xlu2 %v1953_v58  ;;  %v1772_v19 = vpop.xlane.xlu0 %1771 }
 0x3ed   :  { %v1856_v15 = vmul.f32 %v1772_v19, %v7947_v0  ;;  %v8940_v19 = vpop.f32.mrf.mxu2 }
 0x3ef   :  { %v8928_v2 = vsub.f32 %v8590_v20, %v1856_v15  ;;  %v8944_v15 = vpop.xlane.xlu1 %1798 }
 0x3f1   :  { %v1920_v13 = vmul.f32 %v8928_v2, %v8928_v2 }
 0x3f4   :  { %1810 = vadd.xlane.f32.xlu2 %v1809_v25  ;;  %v1775_v44 = vpop.xlane.xlu0 %1774  ;;  %v1962_v25 = vsel %vm13468_vm10, %v1920_v13, 0.0  ;;  %vm13470_vm10 = vmmov %vm13458_vm0 }
 0x3f5   :  { %v1857_v58 = vmul.f32 %v1775_v44, %v7947_v0  ;;  %v1793_v44 = vpop.xlane.xlu2 %1792  ;;  %v1824_v24 = vsel %vm13470_vm10, %v8953_v11, 0.0  ;;  %vm13202_vm10 = vcmp.eq.s32.totalorder %v8186_v5, %v8904_v14 }
 0x3f7   :  { %v8934_v30 = vsub.f32 %v8630_v60, %v1857_v58 }
 0x3f9   :  { %v1921_v20 = vmul.f32 %v8934_v30, %v8934_v30 }
 0x3fb   :  { %v1965_v63 = vsel %vm13458_vm0, %v1921_v20, 0.0  ;;  %v8963_v20 = vpop.xlane.xlu1 %1948 }
 0x3fc   :  { %1963 = vadd.xlane.f32.xlu2 %v1962_v25  ;;  %1966 = vadd.xlane.f32.xlu1 %v1965_v63  ;;  %v1787_v60 = vpop.xlane.xlu0 %1786  ;;  %v1740_v25 = vpop.f32.mrf.mxu1 }
 0x3fd   :  { %v1861_v58 = vmul.f32 %v1787_v60, %v7947_v0  ;;  %v1802_v62 = vpop.xlane.xlu2 %1801 }
 0x3fe   :  { %v1866_v47 = vmul.f32 %v1802_v62, %v7947_v0 }
 0x3ff   :  { %v8956_v51 = vsub.f32 %v8692_v1, %v1861_v58  ;;  %v8971_v1 = vsub.f32 %v8527_v57, %v1864_v37  ;;  %v8974_v58 = vadd.f32 %v8304_v45, %v1735_v40  ;;  %v8990_v40 = vsub.f32 %v8469_v59, %v1859_v6 }
 0x400   :  { %v8959_v13 = vpop.f32.mrf.mxu2  ;;  %v8999_v29 = vsub.f32 %v8608_v7, %v1866_v47  ;;  %v13475_v59 = vmov 0  ;;  %v9015_v7 = vadd.f32 %v8304_v45, %v1740_v25  ;;  %v1862_v47 = vmul.f32 %v8915_v56, %v7947_v0 }
 0x401   :  { %v1925_v63 = vmul.f32 %v8956_v51, %v8956_v51  ;;  %v1827_v37 = vsel %vm13471_vm2, %v8974_v58, 0.0  ;;  %v1923_v6 = vmul.f32 %v8990_v40, %v8990_v40 }
 0x402   :  { %13474 = vst [vmem:[#allocation56_spill] sm:$0xff] %v8999_v29 }
 0x403   :  { %v1977_v60 = vsel %vm13458_vm0, %v1925_v63, 0.0  ;;  %v1928_v63 = vmul.f32 %v8971_v1, %v8971_v1  ;;  %13478 = vst [vmem:[#allocation58_spill] sm:$0xff] %v9015_v7  ;;  %v1971_v25 = vsel %vm13471_vm2, %v1923_v6, 0.0 }
 0x404   :  { %1819 = vadd.xlane.f32.xlu2 %v1818_v49  ;;  %1825 = vadd.xlane.f32.xlu1 %v1824_v24  ;;  %v9002_v24 = vpop.f32.mrf.mxu1 }
 0x405   :  { %1978 = vadd.xlane.f32.xlu0 %v1977_v60  ;;  %v1986_v49 = vsel %vm13471_vm2, %v1928_v63, 0.0  ;;  %v1930_v60 = vmul.f32 %v8999_v29, %v8999_v29  ;;  %v1833_v63 = vsel %vm13479_vm14, %v9015_v7, 0.0  ;;  %vm13481_vm14 = vmmov %vm13471_vm2  ;;  %v2554_v7 = vld [vmem:[%s9074_s4 + $0x8] sm:$0xff] }
 0x408   :  { %v8983_v52 = vpop.f32.mrf.mxu2 }
 0x40a   :  { %v8987_v57 = vpop.permute.xlu1 %287 }
 0x40b   :  { %13472 = vst [vmem:[#allocation55_spill] sm:$0xff] %v8987_v57  ;;  %vm13226_vm0 = vcmp.eq.s32.totalorder %v8186_v5, %v8987_v57  ;;  %v369_v57 = vld [vmem:[%s8016_s5 + $0xc0] sm:$0xff] }
 0x40c   :  { %1822 = vadd.xlane.f32.xlu2 %v1821_v34  ;;  %1828 = vadd.xlane.f32.xlu1 %v1827_v37  ;;  %vm9010_vm7 = vmpackc.low %vm13226_vm0, %vm13202_vm10  ;;  %v9028_v37 = vsub.f32 %v8497_v28, %v1862_v47  ;;  %v9032_v34 = vpop.f32.mrf.mxu1 }
 0x40d   :  { %v13476_v59 = vsel %vm9010_vm7, 4294967295, %v13475_v59  ;;  %1987 = vadd.xlane.f32.xlu0 %v1986_v49  ;;  %vm13480_vm10 = vmmov %vm13471_vm2  ;;  %v1863_v49 = vmul.f32 %v1793_v44, %v7947_v0  ;;  %v9048_v44 = vpop.permute.xlu2 %476 }
 0x40e   :  { %13477 = vst [vmem:[#allocation57_spill] sm:$0xff] %v13476_v59  ;;  %v1992_v56 = vsel %vm13480_vm10, %v1930_v60, 0.0  ;;  %v1926_v59 = vmul.f32 %v9028_v37, %v9028_v37  ;;  %vm13482_vm10 = vmmov %vm13471_vm2 }
 0x40f   :  { %v9040_v28 = vsub.f32 %v8515_v54, %v1863_v49  ;;  %13483 = vst [vmem:[#allocation59_spill] sm:$0xff] %v9048_v44  ;;  %v401_v54 = vadd.s32 64, %v369_v57  ;;  %v2043_v57 = vmul.f32 %v8963_v20, %v7947_v0 }
 0x410   :  { %v9023_v62 = vpop.f32.mrf.mxu2  ;;  %v1980_v47 = vsel %vm13481_vm14, %v1926_v59, 0.0  ;;  %vm13487_vm14 = vmmov %vm13471_vm2 }
 0x411   :  { %v1927_v6 = vmul.f32 %v9040_v28, %v9040_v28 }
 0x414   :  { %1972 = vadd.xlane.f32.xlu2 %v1971_v25  ;;  %1834 = vadd.xlane.f32.xlu1 %v1833_v63  ;;  %v1747_v60 = vpop.f32.mrf.mxu1  ;;  %v1983_v25 = vsel %vm13482_vm10, %v1927_v6, 0.0  ;;  %vm13492_vm10 = vmmov %vm13471_vm2 }
 0x415   :  { %1993 = vadd.xlane.f32.xlu0 %v1992_v56  ;;  %v9051_v56 = vadd.f32 %v8304_v45, %v1747_v60  ;;  %v9061_v6 = vpop.permute.xlu2 %290 }
 0x416   :  { %13486 = vst [vmem:[#allocation62_spill] sm:$0xff] %v9061_v6 }
 0x417   :  { %13484 = vst [vmem:[#allocation60_spill] sm:$0xff] %v9051_v56  ;;  %v1842_v59 = vsel %vm13471_vm2, %v9051_v56, 0.0  ;;  %v9069_v56 = vadd.f32 1e-05, %v2043_v57 }
 0x418   :  { %v9037_v14 = vpop.f32.mrf.mxu2 }
 0x419   :  { %7514 = vrsqrt.f32 %v9069_v56 }
 0x41c   :  { %1981 = vadd.xlane.f32.xlu1 %v1980_v47  ;;  %v1750_v47 = vpop.f32.mrf.mxu1 }
 0x41d   :  { %v9059_v29 = vadd.f32 %v8304_v45, %v1750_v47  ;;  %v9076_v45 = vpop.permute.xlu2 %293 }
 0x41e   :  { %13489 = vst [vmem:[#allocation64_spill] sm:$0xff] %v9076_v45  ;;  %v2556_v45 = vld [vmem:[%s9074_s4 + $0x18] sm:$0xff] }
 0x41f   :  { %13485 = vst [vmem:[#allocation61_spill] sm:$0xff] %v9059_v29  ;;  %v1845_v60 = vsel %vm13487_vm14, %v9059_v29, 0.0  ;;  %v9090_v41 = vpop.eup %7514  ;;  %vm13494_vm14 = vmmov %vm13471_vm2 }
 0x420   :  { %v9045_v63 = vpop.f32.mrf.mxu2 }
 0x424   :  { %1984 = vadd.xlane.f32.xlu1 %v1983_v25  ;;  %v9065_v25 = vpop.permute.xlu0 %479 }
 0x425   :  { %13488 = vst [vmem:[#allocation63_spill] sm:$0xff] %v9065_v25  ;;  %v2555_v25 = vld [vmem:[%s9074_s4 + $0x10] sm:$0xff] }
 0x426   :  { %v2657_v29 = vpack.c.bf16 %v2556_v45, %v2555_v25  ;;  %v2108_v25 = vmul.f32 %v9090_v41, %v9069_v56 }
 0x428   :  { %v9054_v49 = vpop.f32.mrf.mxu2  ;;  %2712 = vmatpush.bf16.msra.mxu2 %v2657_v29 }
 0x42c   :  { %482 = vperm.xlu2 %7462, %v401_v54   ;;  %1843 = vadd.xlane.f32.xlu1 %v1842_v59 }
 0x430   :  { %v2638_v44 = vpop.f32.mrf.mxu2 }
 0x434   :  { %1846 = vadd.xlane.f32.xlu1 %v1845_v60 }
 0x435   :  { %v1814_v5 = vpop.xlane.xlu1 %1813 }
 0x436   :  { %v1870_v47 = vmul.f32 %v1814_v5, %v7947_v0 }
 0x438   :  { %v2640_v54 = vpop.f32.mrf.mxu2 }
 0x43a   :  { %v1808_v59 = vpop.xlane.xlu0 %1807 }
 0x43b   :  { %v1868_v20 = vmul.f32 %v1808_v59, %v7947_v0  ;;  %v9093_v59 = vsub.f32 %v8843_v55, %v1870_v47  ;;  %v2109_v47 = vmul.f32 %v9090_v41, %v2108_v25 }
 0x43d   :  { %v9082_v60 = vsub.f32 %v8851_v17, %v1868_v20  ;;  %v9084_v57 = vpop.xlane.xlu1 %1960  ;;  %13491 = vst [vmem:[#allocation66_spill] sm:$0xff] %v9093_v59  ;;  %v2110_v42 = vmul.f32 0.5, %v2109_v47 }
 0x43f   :  { %13490 = vst [vmem:[#allocation65_spill] sm:$0xff] %v9082_v60  ;;  %v1932_v6 = vmul.f32 %v9082_v60, %v9082_v60  ;;  %v2553_v60 = vld [vmem:[%s9074_s4] sm:$0xff] }
 0x440   :  { %v1805_v50 = vpop.xlane.xlu2 %1804  ;;  %v2643_v21 = vpop.f32.mrf.mxu2  ;;  %v2656_v45 = vpack.c.bf16 %v2554_v7, %v2553_v60 }
 0x441   :  { %v1867_v5 = vmul.f32 %v1805_v50, %v7947_v0  ;;  %v1998_v17 = vsel %vm13492_vm10, %v1932_v6, 0.0  ;;  %v1934_v50 = vmul.f32 %v9093_v59, %v9093_v59  ;;  %vm13495_vm10 = vmmov %vm13471_vm2 }
 0x442   :  { %1999 = vadd.xlane.f32.xlu0 %v1998_v17  ;;  %2713 = vmatpush.bf16.msra.mxu2 %v2656_v45  ;;  %v1958_v29 = vpop.xlane.xlu0 %1957 }
 0x443   :  { %v9098_v20 = vsub.f32 %v8865_v53, %v1867_v5  ;;  %v2046_v59 = vmul.f32 %v1958_v29, %v7947_v0 }
 0x445   :  { %13493 = vst [vmem:[#allocation67_spill] sm:$0xff] %v9098_v20  ;;  %v1817_v3 = vpop.xlane.xlu1 %1816  ;;  %v1931_v55 = vmul.f32 %v9098_v20, %v9098_v20  ;;  %v2004_v20 = vsel %vm13494_vm14, %v1934_v50, 0.0  ;;  %vm13496_vm14 = vmmov %vm13495_vm10 }
 0x446   :  { %v1871_v6 = vmul.f32 %v1817_v3, %v7947_v0 }
 0x447   :  { %v1995_v53 = vsel %vm13471_vm2, %v1931_v55, 0.0  ;;  %v2654_v55 = vpack.c.bf16 %v2640_v54, %v2638_v44  ;;  %vm2114_vm2 = vweird.f32 %v9090_v41 }
 0x448   :  { %v1952_v5 = vpop.xlane.xlu2 %1951  ;;  %1996 = vadd.xlane.f32.xlu1 %v1995_v53  ;;  %v9112_v7 = vsub.f32 %v8877_v61, %v1871_v6  ;;  %v2645_v17 = vpop.f32.mrf.mxu2  ;;  %v9119_v53 = vadd.f32 1e-05, %v2046_v59  ;;  %v2111_v61 = vsub.f32 1.5, %v2110_v42  ;;  %v9122_v6 = vld [vmem:[%s8067_s14] ss:$0 sm:$0xff]  ;;  %s9449_s14 = sld [smem:[%s13104_s0 + %s7772_s8]]  }
 0x449   :  { %v2044_v60 = vmul.f32 %v1952_v5, %v7947_v0  ;;  %v2655_v3 = vpack.c.bf16 %v2645_v17, %v2643_v21  ;;  %v9126_v50 = vadd.f32 %v9122_v6, %v8938_v9  ;;  %v9144_v47 = vadd.f32 %v9122_v6, %v9002_v24  ;;  %s11444_s8 = sld [smem:[%s13104_s0 + %s7783_s3]]  }
 0x44a   :  { %2005 = vadd.xlane.f32.xlu0 %v2004_v20  ;;  %v1935_v25 = vmul.f32 %v9112_v7, %v9112_v7  ;;  %v2653_v20 = vpack.c.bf16 %v9054_v49, %v9045_v63  ;;  %v2112_v44 = vmul.f32 %v9090_v41, %v2111_v61  ;;  %v2652_v63 = vpack.c.bf16 %v9037_v14, %v9023_v62  ;;  %v9151_v62 = vld [vmem:[%s8586_s25] ss:$0 sm:$0xff] }
 0x44b   :  { %v2076_v45 = vadd.f32 1e-05, %v2044_v60  ;;  %2795 = vmatpush.bf16.msra.mxu3 %v2655_v3  ;;  %v1830_v9 = vsel %vm13496_vm14, %v9126_v50, 0.0  ;;  %v2047_v5 = vmul.f32 %v9084_v57, %v7947_v0 }
 0x44c   :  { %v2007_v21 = vsel %vm13495_vm10, %v1935_v25, 0.0  ;;  %vm2113_vm10 = vweird.f32 %v9069_v56  ;;  %v2651_v56 = vpack.c.bf16 %v8983_v52, %v8959_v13  ;;  %v2650_v52 = vpack.c.bf16 %v8940_v19, %v8920_v33  ;;  %v9167_v25 = vld [vmem:[%s8595_s29] ss:$0 sm:$0xff] }
 0x44d   :  { %7516 = vrsqrt.f32 %v2076_v45  ;;  %vm2115_vm0 = vmor %vm2113_vm10, %vm2114_vm2  ;;  %v9156_v24 = vadd.f32 1e-05, %v2047_v5  ;;  %vm13497_vm2 = vcmask 261120   ;;  %v9164_v13 = vadd.f32 %v9122_v6, %v9032_v34 }
 0x44e   :  { %7518 = vrsqrt.f32 %v9119_v53  ;;  %v2116_v59 = vsel %vm2115_vm0, %v9090_v41, %v2112_v44  ;;  %vm2123_vm0 = vweird.f32 %v2076_v45  ;;  %v1836_v57 = vsel %vm13497_vm2, %v9144_v47, 0.0 }
 0x44f   :  { %2796 = vmatpush.bf16.msra.mxu3 %v2654_v55  ;;  %v2427_v17 = vmul.f32 %v2116_v59, %v8618_v22  ;;  %7520 = vrsqrt.f32 %v9156_v24  ;;  %v2649_v34 = vpack.c.bf16 %v8910_v4, %v8906_v32  ;;  %v2648_v32 = vpack.c.bf16 %v8895_v38, %v8868_v26  ;;  %v1970_v4 = vpop.xlane.xlu0 %1969 }
 0x451   :  { %v2462_v55 = vmul.f32 %v9151_v62, %v2427_v17  ;;  %v13501_v17 = vmov 1.0|1.0  }
 0x452   :  { %2008 = vadd.xlane.f32.xlu0 %v2007_v21 }
 0x453   :  { %v7517_v29 = vpop.eup %7516  ;;  %2797 = vmatpush.bf16.msra.mxu3 %v2653_v20  ;;  %v1865_v20 = vmul.f32 %v8944_v15, %v7947_v0 }
 0x454   :  { %v2118_v42 = vmul.f32 %v7517_v29, %v2076_v45  ;;  %v9139_v54 = vpop.eup %7518  ;;  %vm2124_vm14 = vweird.f32 %v7517_v29 }
 0x455   :  { %1831 = vadd.xlane.f32.xlu2 %v1830_v9  ;;  %v2138_v41 = vmul.f32 %v9139_v54, %v9119_v53  ;;  %vm2125_vm10 = vmor %vm2123_vm0, %vm2124_vm14  ;;  %v9184_v15 = vsub.f32 %v8566_v10, %v1865_v20 }
 0x456   :  { %v2119_v49 = vmul.f32 %v7517_v29, %v2118_v42  ;;  %vm13498_vm14 = vmmov %vm13497_vm2 }
 0x457   :  { %2798 = vmatpush.bf16.msra.mxu3 %v2652_v63  ;;  %v2139_v45 = vmul.f32 %v9139_v54, %v2138_v41  ;;  %v1839_v44 = vsel %vm13498_vm14, %v9164_v13, 0.0  ;;  %vm13500_vm0 = vmmov %vm13497_vm2  ;;  %v1929_v10 = vmul.f32 %v9184_v15, %v9184_v15  ;;  %vm2144_vm2 = vweird.f32 %v9139_v54  ;;  %v1752_v41 = vpop.f32.mrf.mxu1 }
 0x458   :  { %v2120_v60 = vmul.f32 0.5, %v2119_v49  ;;  %v9188_v49 = vpop.eup %7520  ;;  %vm13503_vm14 = vmmov %vm13500_vm0 }
 0x459   :  { %v2140_v42 = vmul.f32 0.5, %v2139_v45 }
 0x45a   :  { %v2121_v14 = vsub.f32 1.5, %v2120_v60  ;;  %v2148_v60 = vmul.f32 %v9188_v49, %v9156_v24 }
 0x45b   :  { %2799 = vmatpush.bf16.msra.mxu3 %v2651_v56  ;;  %v2141_v59 = vsub.f32 1.5, %v2140_v42  ;;  %v2050_v56 = vmul.f32 %v1970_v4, %v7947_v0 }
 0x45c   :  { %v2122_v3 = vmul.f32 %v7517_v29, %v2121_v14 }
 0x45d   :  { %1837 = vadd.xlane.f32.xlu2 %v1836_v57  ;;  %v2142_v26 = vmul.f32 %v9139_v54, %v2141_v59  ;;  %v2149_v57 = vmul.f32 %v9188_v49, %v2148_v60 }
 0x45e   :  { %v2126_v22 = vsel %vm2125_vm10, %v7517_v29, %v2122_v3  ;;  %vm13502_vm10 = vmpackc.low %vm8214_vm8, %vm8203_vm6  ;;  %v1989_v3 = vsel %vm13503_vm14, %v1929_v10, 0.0  ;;  %vm13536_vm6 = vcmask 261120  }
 0x45f   :  { %v2428_v61 = vmul.f32 %v2126_v22, %v8880_v8  ;;  %v1955_v21 = vpop.xlane.xlu2 %1954  ;;  %2800 = vmatpush.bf16.msra.mxu3 %v2650_v52  ;;  %v2497_v8 = vadd.f32 %v9167_v25, %v2462_v55  ;;  %v9215_v52 = vadd.f32 1e-05, %v2050_v56  ;;  %v9218_v55 = vadd.f32 %v9122_v6, %v1752_v41 }
 0x460   :  { %v2045_v33 = vmul.f32 %v1955_v21, %v7947_v0 }
 0x461   :  { %v2463_v19 = vmul.f32 %v9151_v62, %v2428_v61 }
 0x462   :  { %v2077_v29 = vadd.f32 1e-05, %v2045_v33 }
 0x463   :  { %v2498_v9 = vadd.f32 %v9167_v25, %v2463_v19  ;;  %2801 = vmatpush.bf16.msra.mxu3 %v2649_v34 }
 0x464   :  { %7522 = vrsqrt.f32 %v2077_v29 }
 0x465   :  { %v9186_v63 = vpack.c.bf16 %v2498_v9, %v2497_v8  ;;  %1840 = vadd.xlane.f32.xlu2 %v1839_v44  ;;  %7524 = vrsqrt.f32 %v9215_v52 }
 0x467   :  { %13499 = vst [vmem:[#allocation68_spill] sm:$0xff] %v9186_v63  ;;  %7008 = vmatmul.msk.bf16.vlgmr.msra.gmra.mxu2 %vm13500_vm0, %v9186_v63  ;;  %v1811_v5 = vpop.xlane.xlu2 %1810  ;;  %2802 = vmatpush.bf16.msra.mxu3 %v2648_v32  ;;  %vm2143_vm0 = vweird.f32 %v9119_v53  ;;  %v2150_v53 = vmul.f32 0.5, %v2149_v57 }
 0x468   :  { %vm2145_vm9 = vmor %vm2143_vm0, %vm2144_vm2  ;;  %v1869_v21 = vmul.f32 %v1811_v5, %v7947_v0  ;;  %vm2133_vm2 = vweird.f32 %v2077_v29  ;;  %vm2154_vm0 = vweird.f32 %v9188_v49 }
 0x469   :  { %v2146_v45 = vsel %vm2145_vm9, %v9139_v54, %v2142_v26  ;;  %vm13504_vm9 = vmmov %vm13503_vm14 }
 0x46a   :  { %v7523_v14 = vpop.eup %7522  ;;  %7025 = vmatmul.msk.bf16.vlgmr.msra.gmra.mxu3 %vm13502_vm10, %v13501_v17  ;;  %v2430_v8 = vmul.f32 %v2146_v45, %v8862_v16  ;;  %v1848_v54 = vsel %vm13504_vm9, %v9218_v55, 0.0  ;;  %v9233_v32 = vsub.f32 %v8924_v36, %v1869_v21  ;;  %v2151_v16 = vsub.f32 1.5, %v2150_v53 }
 0x46b   :  { %v2128_v38 = vmul.f32 %v7523_v14, %v2077_v29  ;;  %vm2134_vm10 = vweird.f32 %v7523_v14  ;;  %v9239_v10 = vpop.eup %7524  ;;  %v1976_v29 = vpop.xlane.xlu0 %1975 }
 0x46c   :  { %vm2135_vm14 = vmor %vm2133_vm2, %vm2134_vm10  ;;  %v2465_v5 = vmul.f32 %v9151_v62, %v2430_v8  ;;  %v1933_v36 = vmul.f32 %v9233_v32, %v9233_v32  ;;  %v2052_v21 = vmul.f32 %v1976_v29, %v7947_v0  ;;  %vm2153_vm2 = vweird.f32 %v9156_v24 }
 0x46d   :  { %v2129_v22 = vmul.f32 %v7523_v14, %v2128_v38  ;;  %1990 = vadd.xlane.f32.xlu2 %v1989_v3  ;;  %vm13505_vm10 = vmpackc.low %vm8265_vm3, %vm8275_vm11  ;;  %vm2183_vm3 = vweird.f32 %v9215_v52 }
 0x46f   :  { %v2130_v61 = vmul.f32 0.5, %v2129_v22  ;;  %v1964_v20 = vpop.xlane.xlu2 %1963  ;;  %v1967_v33 = vpop.xlane.xlu1 %1966  ;;  %v2500_v22 = vadd.f32 %v9167_v25, %v2465_v5 }
 0x470   :  { %v2048_v19 = vmul.f32 %v1964_v20, %v7947_v0  ;;  %v2049_v34 = vmul.f32 %v1967_v33, %v7947_v0 }
 0x471   :  { %v2131_v44 = vsub.f32 1.5, %v2130_v61  ;;  %v2178_v61 = vmul.f32 %v9239_v10, %v9215_v52 }
 0x472   :  { %v9226_v6 = vadd.f32 1e-05, %v2048_v19  ;;  %v9228_v42 = vadd.f32 1e-05, %v2049_v34 }
 0x473   :  { %v2132_v9 = vmul.f32 %v7523_v14, %v2131_v44  ;;  %v2179_v24 = vmul.f32 %v9239_v10, %v2178_v61 }
 0x474   :  { %7526 = vrsqrt.f32 %v9226_v6 }
 0x475   :  { %v2136_v4 = vsel %vm2135_vm14, %v7523_v14, %v2132_v9  ;;  %7528 = vrsqrt.f32 %v9228_v42  ;;  %1849 = vadd.xlane.f32.xlu2 %v1848_v54  ;;  %vm9278_vm14 = vmor %vm2153_vm2, %vm2154_vm0  ;;  %vm2163_vm2 = vweird.f32 %v9226_v6 }
 0x476   :  { %v2429_v59 = vmul.f32 %v2136_v4, %v8913_v23  ;;  %v2152_v23 = vmul.f32 %v9188_v49, %v2151_v16  ;;  %v9290_v4 = vadd.f32 1e-05, %v2052_v21 }
 0x477   :  { %v1820_v60 = vpop.xlane.xlu2 %1819  ;;  %v1826_v56 = vpop.xlane.xlu1 %1825 }
 0x478   :  { %v1872_v26 = vmul.f32 %v1820_v60, %v7947_v0  ;;  %v1874_v14 = vmul.f32 %v1826_v56, %v7947_v0  ;;  %v2464_v38 = vmul.f32 %v9151_v62, %v2429_v59  ;;  %v2156_v9 = vsel %vm9278_vm14, %v9188_v49, %v2152_v23 }
 0x479   :  { %7530 = vrsqrt.f32 %v9290_v4 }
 0x47a   :  { %v7527_v41 = vpop.eup %7526  ;;  %v9249_v3 = vsub.f32 %v8953_v11, %v1874_v14  ;;  %v2499_v57 = vadd.f32 %v9167_v25, %v2464_v38  ;;  %7027 = vmatmul.msk.bf16.gmra.mxu3 %vm13505_vm10, %v13501_v17  ;;  %v2001_v11 = vsel %vm13504_vm9, %v1933_v36, 0.0  ;;  %v9269_v19 = vsub.f32 %v8950_v27, %v1872_v26  ;;  %vm13509_vm10 = vmmov %vm13504_vm9 }
 0x47b   :  { %v9253_v45 = vpop.eup %7528  ;;  %v2158_v20 = vmul.f32 %v7527_v41, %v9226_v6  ;;  %vm2164_vm0 = vweird.f32 %v7527_v41  ;;  %v2431_v26 = vmul.f32 %v2156_v9, %v8854_v43  ;;  %v2180_v38 = vmul.f32 0.5, %v2179_v24 }
 0x47c   :  { %v2168_v33 = vmul.f32 %v9253_v45, %v9228_v42  ;;  %v9271_v34 = vpack.c.bf16 %v2500_v22, %v2499_v57  ;;  %v1938_v53 = vmul.f32 %v9249_v3, %v9249_v3  ;;  %v1936_v36 = vmul.f32 %v9269_v19, %v9269_v19  ;;  %vm2165_vm14 = vmor %vm2163_vm2, %vm2164_vm0 }
 0x47d   :  { %v2159_v44 = vmul.f32 %v7527_v41, %v2158_v20  ;;  %2002 = vadd.xlane.f32.xlu2 %v2001_v11  ;;  %v2181_v11 = vsub.f32 1.5, %v2180_v38  ;;  %vm2174_vm0 = vweird.f32 %v9253_v45  ;;  %vm2184_vm2 = vweird.f32 %v9239_v10 }
 0x47e   :  { %13506 = vst [vmem:[#allocation69_spill] sm:$0xff] %v9271_v34  ;;  %v2169_v54 = vmul.f32 %v9253_v45, %v2168_v33  ;;  %7009 = vmatmul.msk.bf16.gmra.mxu2 %vm13509_vm10, %v9271_v34  ;;  %v2016_v27 = vsel %vm13504_vm9, %v1938_v53, 0.0  ;;  %vm13510_vm10 = vmmov %vm13504_vm9  ;;  %v1979_v53 = vpop.xlane.xlu0 %1978 }
 0x47f   :  { %v2160_v16 = vmul.f32 0.5, %v2159_v44  ;;  %v1823_v59 = vpop.xlane.xlu2 %1822  ;;  %v1829_v5 = vpop.xlane.xlu1 %1828  ;;  %2017 = vadd.xlane.f32.xlu0 %v2016_v27  ;;  %v2010_v22 = vsel %vm13510_vm10, %v1936_v36, 0.0  ;;  %v2182_v24 = vmul.f32 %v9239_v10, %v2181_v11  ;;  %vm2173_vm10 = vweird.f32 %v9228_v42 }
 0x480   :  { %v1873_v60 = vmul.f32 %v1823_v59, %v7947_v0  ;;  %v1875_v56 = vmul.f32 %v1829_v5, %v7947_v0  ;;  %v2170_v49 = vmul.f32 0.5, %v2169_v54  ;;  %v9317_v54 = vpop.eup %7530  ;;  %vm2175_vm11 = vmor %vm2173_vm10, %vm2174_vm0 }
 0x481   :  { %v2161_v29 = vsub.f32 1.5, %v2160_v16  ;;  %v2053_v16 = vmul.f32 %v1979_v53, %v7947_v0 }
 0x482   :  { %v9298_v14 = vsub.f32 %v8978_v35, %v1873_v60  ;;  %v9303_v57 = vsub.f32 %v8974_v58, %v1875_v56  ;;  %v2171_v21 = vsub.f32 1.5, %v2170_v49  ;;  %v2466_v58 = vmul.f32 %v9151_v62, %v2431_v26 }
 0x483   :  { %v2162_v23 = vmul.f32 %v7527_v41, %v2161_v29  ;;  %v2198_v56 = vmul.f32 %v9317_v54, %v9290_v4  ;;  %v9340_v49 = vadd.f32 1e-05, %v2053_v16 }
 0x484   :  { %v1937_v61 = vmul.f32 %v9298_v14, %v9298_v14  ;;  %v1939_v8 = vmul.f32 %v9303_v57, %v9303_v57  ;;  %v2501_v60 = vadd.f32 %v9167_v25, %v2466_v58 }
 0x485   :  { %v2166_v43 = vsel %vm2165_vm14, %v7527_v41, %v2162_v23  ;;  %2011 = vadd.xlane.f32.xlu2 %v2010_v22  ;;  %vm13513_vm14 = vmpackc.low %vm8333_vm12, %vm8323_vm4  ;;  %v2199_v23 = vmul.f32 %v9317_v54, %v2198_v56  ;;  %v13516_v56 = vld [vmem:[#allocation19_spill] sm:$0xff] }
 0x486   :  { %v2432_v35 = vmul.f32 %v2166_v43, %v8928_v2  ;;  %v2013_v20 = vsel %vm13504_vm9, %v1937_v61, 0.0  ;;  %v2172_v2 = vmul.f32 %v9253_v45, %v2171_v21  ;;  %v2019_v36 = vsel %vm13504_vm9, %v1939_v8, 0.0  ;;  %vm13515_vm4 = vmmov %vm13504_vm9  ;;  %v212_v61 = vld [vmem:[%s7997_s1 + $0xd8] sm:$0xff] }
 0x487   :  { %v1973_v33 = vpop.xlane.xlu2 %1972  ;;  %2014 = vadd.xlane.f32.xlu1 %v2013_v20  ;;  %v9310_v6 = vpop.xlane.xlu1 %1834  ;;  %v2200_v20 = vmul.f32 0.5, %v2199_v23 }
 0x488   :  { %v2051_v44 = vmul.f32 %v1973_v33, %v7947_v0  ;;  %v2467_v41 = vmul.f32 %v9151_v62, %v2432_v35  ;;  %v2176_v26 = vsel %vm2175_vm11, %v9253_v45, %v2172_v2  ;;  %vm13517_vm11 = vnez %v13516_v56 }
 0x489   :  { %v2433_v43 = vmul.f32 %v2176_v26, %v8934_v30  ;;  %v2201_v30 = vsub.f32 1.5, %v2200_v20 }
 0x48a   :  { %v2083_v27 = vadd.f32 1e-05, %v2051_v44  ;;  %v2502_v9 = vadd.f32 %v9167_v25, %v2467_v41  ;;  %7029 = vmatmul.msk.bf16.gmra.mxu3 %vm13513_vm14, %v13501_v17  ;;  %vm2185_vm14 = vmor %vm2183_vm3, %vm2184_vm2  ;;  %v1988_v44 = vpop.xlane.xlu0 %1987  ;;  %vm2204_vm2 = vweird.f32 %v9317_v54 }
 0x48b   :  { %v2186_v42 = vsel %vm2185_vm14, %v9239_v10, %v2182_v24  ;;  %v2468_v11 = vmul.f32 %v9151_v62, %v2433_v43  ;;  %v2056_v24 = vmul.f32 %v1988_v44, %v7947_v0  ;;  %vm2203_vm14 = vweird.f32 %v9290_v4 }
 0x48c   :  { %7532 = vrsqrt.f32 %v2083_v27  ;;  %v9336_v29 = vpack.c.bf16 %v2502_v9, %v2501_v60  ;;  %v2434_v45 = vmul.f32 %v2186_v42, %v8883_v39  ;;  %vm2193_vm10 = vweird.f32 %v2083_v27 }
 0x48d   :  { %2020 = vadd.xlane.f32.xlu2 %v2019_v36  ;;  %7534 = vrsqrt.f32 %v9340_v49  ;;  %v2503_v2 = vadd.f32 %v9167_v25, %v2468_v11  ;;  %v13518_v36 = vld [vmem:[#allocation18_spill] sm:$0xff]  ;;  %v2088_v20 = vadd.f32 1e-05, %v2056_v24 }
 0x48e   :  { %13514 = vst [vmem:[#allocation70_spill] sm:$0xff] %v9336_v29  ;;  %7010 = vmatmul.msk.bf16.gmra.mxu2 %vm13515_vm4, %v9336_v29  ;;  %v2469_v53 = vmul.f32 %v9151_v62, %v2434_v45  ;;  %vm13519_vm4 = vnez %v13518_v36 }
 0x48f   :  { %v1982_v38 = vpop.xlane.xlu1 %1981  ;;  %vm13520_vm0 = vmpackc.low %vm13517_vm11, %vm13519_vm4  ;;  %vm13522_vm4 = vcmask 261120   ;;  %vm2213_vm11 = vweird.f32 %v9340_v49 }
 0x490   :  { %v2054_v22 = vmul.f32 %v1982_v38, %v7947_v0  ;;  %v2504_v26 = vadd.f32 %v9167_v25, %v2469_v53  ;;  %v2202_v38 = vmul.f32 %v9317_v54, %v2201_v30 }
 0x492   :  { %v7533_v35 = vpop.eup %7532  ;;  %v9349_v52 = vadd.f32 1e-05, %v2054_v22  ;;  %v9373_v22 = vpack.c.bf16 %v2504_v26, %v2503_v2 }
 0x493   :  { %v2188_v21 = vmul.f32 %v7533_v35, %v2083_v27  ;;  %299 = vperm.xlu0 %7460, %v212_v61   ;;  %v9356_v8 = vpop.eup %7534  ;;  %vm2194_vm3 = vweird.f32 %v7533_v35  ;;  %v211_v61 = vld [vmem:[%s7997_s1 + $0xd0] sm:$0xff] }
 0x494   :  { %7536 = vrsqrt.f32 %v9349_v52  ;;  %v2208_v42 = vmul.f32 %v9356_v8, %v9340_v49  ;;  %vm2195_vm9 = vmor %vm2193_vm10, %vm2194_vm3  ;;  %13521 = vst [vmem:[#allocation71_spill] sm:$0xff] %v9373_v22 }
 0x495   :  { %v2189_v10 = vmul.f32 %v7533_v35, %v2188_v21  ;;  %v370_v21 = vld [vmem:[%s8016_s5 + $0xc8] sm:$0xff] }
 0x496   :  { %v2209_v11 = vmul.f32 %v9356_v8, %v2208_v42 }
 0x497   :  { %v2190_v33 = vmul.f32 0.5, %v2189_v10  ;;  %v1985_v58 = vpop.xlane.xlu1 %1984 }
 0x498   :  { %v2055_v39 = vmul.f32 %v1985_v58, %v7947_v0 }
 0x499   :  { %v2191_v41 = vsub.f32 1.5, %v2190_v33  ;;  %v402_v33 = vadd.s32 64, %v370_v21 }
 0x49a   :  { %v7537_v9 = vpop.eup %7536  ;;  %7031 = vmatmul.msk.bf16.gmra.mxu3 %vm13520_vm0, %v13501_v17  ;;  %v2087_v23 = vadd.f32 1e-05, %v2055_v39  ;;  %vm2205_vm0 = vmor %vm2203_vm14, %vm2204_vm2  ;;  %vm2223_vm14 = vweird.f32 %v9349_v52 }
 0x49b   :  { %v2192_v16 = vmul.f32 %v7533_v35, %v2191_v41  ;;  %v2218_v60 = vmul.f32 %v7537_v9, %v9349_v52  ;;  %v2206_v10 = vsel %vm2205_vm0, %v9317_v54, %v2202_v38  ;;  %vm2224_vm3 = vweird.f32 %v7537_v9 }
 0x49c   :  { %7538 = vrsqrt.f32 %v2087_v23  ;;  %v2436_v4 = vmul.f32 %v2206_v10, %v8899_v46  ;;  %v13525_v46 = vld [vmem:[#allocation21_spill] sm:$0xff]  ;;  %vm2225_vm0 = vmor %vm2223_vm14, %vm2224_vm3 }
 0x49d   :  { %v2196_v43 = vsel %vm2195_vm9, %v7533_v35, %v2192_v16  ;;  %v2219_v45 = vmul.f32 %v7537_v9, %v2218_v60  ;;  %7540 = vrsqrt.f32 %v2088_v20  ;;  %v2210_v35 = vmul.f32 0.5, %v2209_v11  ;;  %v13523_v16 = vld [vmem:[#allocation20_spill] sm:$0xff] }
 0x49e   :  { %7011 = vmatmul.msk.bf16.gmra.mxu2 %vm13522_vm4, %v9373_v22  ;;  %v2435_v27 = vmul.f32 %v2196_v43, %v8990_v40  ;;  %v2471_v41 = vmul.f32 %v9151_v62, %v2436_v4  ;;  %vm13524_vm4 = vnez %v13523_v16  ;;  %vm13526_vm2 = vnez %v13525_v46 }
 0x49f   :  { %v2220_v58 = vmul.f32 0.5, %v2219_v45  ;;  %v2211_v54 = vsub.f32 1.5, %v2210_v35  ;;  %vm13527_vm10 = vmpackc.low %vm13524_vm4, %vm13526_vm2  ;;  %vm2214_vm9 = vweird.f32 %v9356_v8  ;;  %vm13529_vm2 = vcmask 261120  }
 0x4a0   :  { %296 = vperm.xlu1 %7461, %v211_v61   ;;  %v2470_v53 = vmul.f32 %v9151_v62, %v2435_v27  ;;  %v2506_v60 = vadd.f32 %v9167_v25, %v2471_v41  ;;  %vm2215_vm12 = vmor %vm2213_vm11, %vm2214_vm9  ;;  %vm2233_vm9 = vweird.f32 %v2087_v23 }
 0x4a1   :  { %v2221_v30 = vsub.f32 1.5, %v2220_v58  ;;  %v2212_v26 = vmul.f32 %v9356_v8, %v2211_v54 }
 0x4a2   :  { %v7539_v44 = vpop.eup %7538  ;;  %v2505_v2 = vadd.f32 %v9167_v25, %v2470_v53  ;;  %v13530_v53 = vld [vmem:[#allocation23_spill] sm:$0xff] }
 0x4a3   :  { %v7541_v39 = vpop.eup %7540  ;;  %v2222_v24 = vmul.f32 %v7537_v9, %v2221_v30  ;;  %v2228_v40 = vmul.f32 %v7539_v44, %v2087_v23  ;;  %v2216_v45 = vsel %vm2215_vm12, %v9356_v8, %v2212_v26  ;;  %vm2234_vm11 = vweird.f32 %v7539_v44  ;;  %v13532_v8 = vld [vmem:[#allocation22_spill] sm:$0xff] }
 0x4a4   :  { %v2238_v38 = vmul.f32 %v7541_v39, %v2088_v20  ;;  %v9397_v42 = vpack.c.bf16 %v2506_v60, %v2505_v2  ;;  %v2437_v27 = vmul.f32 %v2216_v45, %v8956_v51  ;;  %vm13531_vm12 = vnez %v13530_v53  ;;  %vm2235_vm14 = vmor %vm2233_vm9, %vm2234_vm11  ;;  %v9419_v2 = vpop.permute.xlu2 %482  ;;  %v9423_v60 = vpop.xlane.xlu1 %1843 }
 0x4a5   :  { %485 = vperm.xlu2 %7462, %v402_v33   ;;  %v2226_v61 = vsel %vm2225_vm0, %v7537_v9, %v2222_v24  ;;  %v2229_v43 = vmul.f32 %v7539_v44, %v2228_v40  ;;  %vm13533_vm3 = vnez %v13532_v8  ;;  %vm2243_vm0 = vweird.f32 %v2088_v20  ;;  %v1994_v20 = vpop.xlane.xlu0 %1993 }
 0x4a6   :  { %13528 = vst [vmem:[#allocation72_spill] sm:$0xff] %v9397_v42  ;;  %v2239_v21 = vmul.f32 %v7541_v39, %v2238_v38  ;;  %v2438_v10 = vmul.f32 %v2226_v61, %v9028_v37  ;;  %v2472_v49 = vmul.f32 %v9151_v62, %v2437_v27  ;;  %v2058_v45 = vmul.f32 %v1994_v20, %v7947_v0 }
 0x4a7   :  { %v2230_v11 = vmul.f32 0.5, %v2229_v43  ;;  %v13539_v43 = vld [vmem:[#allocation27_spill] sm:$0xff] }
 0x4a8   :  { %v2240_v52 = vmul.f32 0.5, %v2239_v21  ;;  %v2473_v33 = vmul.f32 %v9151_v62, %v2438_v10  ;;  %v2507_v51 = vadd.f32 %v9167_v25, %v2472_v49 }
 0x4a9   :  { %v2231_v58 = vsub.f32 1.5, %v2230_v11 }
 0x4aa   :  { %7033 = vmatmul.msk.bf16.gmra.mxu3 %vm13527_vm10, %v13501_v17  ;;  %v2241_v9 = vsub.f32 1.5, %v2240_v52  ;;  %v2508_v4 = vadd.f32 %v9167_v25, %v2473_v33  ;;  %vm2244_vm10 = vweird.f32 %v7541_v39  ;;  %v9456_v52 = vadd.f32 1e-05, %v2058_v45 }
 0x4ab   :  { %v2232_v35 = vmul.f32 %v7539_v44, %v2231_v58  ;;  %vm2245_vm4 = vmor %vm2243_vm0, %vm2244_vm10 }
 0x4ac   :  { %v2242_v37 = vmul.f32 %v7541_v39, %v2241_v9  ;;  %v9415_v30 = vpack.c.bf16 %v2508_v4, %v2507_v51  ;;  %v1847_v27 = vpop.xlane.xlu1 %1846  ;;  %7542 = vrsqrt.f32 %v9456_v52  ;;  %v2560_v51 = vld [vmem:[%s9449_s14 + $0x10] sm:$0xff]  ;;  %vm13550_vm0 = vmpackc.low %vm8685_vm13, %vm8678_vm15 }
 0x4ad   :  { %v2236_v41 = vsel %vm2235_vm14, %v7539_v44, %v2232_v35 }
 0x4ae   :  { %7012 = vmatmul.msk.bf16.gmra.mxu2 %vm13529_vm2, %v9397_v42  ;;  %vm13534_vm2 = vmpackc.low %vm13531_vm12, %vm13533_vm3  ;;  %13535 = vst [vmem:[#allocation73_spill] sm:$0xff] %v9415_v30  ;;  %v2246_v54 = vsel %vm2245_vm4, %v7541_v39, %v2242_v37  ;;  %v2439_v24 = vmul.f32 %v2236_v41, %v9040_v28  ;;  %v13537_v39 = vld [vmem:[#allocation28_spill] sm:$0xff]  ;;  %vm13540_vm4 = vnez %v13539_v43  ;;  %v1877_v28 = vmul.f32 %v9310_v6, %v7947_v0  ;;  %v13544_v6 = vld [vmem:[#allocation58_spill] sm:$0xff] }
 0x4af   :  { %v2440_v40 = vmul.f32 %v2246_v54, %v8971_v1  ;;  %v2561_v37 = vld [vmem:[%s9449_s14 + $0x18] sm:$0xff] }
 0x4b0   :  { %v2474_v23 = vmul.f32 %v9151_v62, %v2439_v24  ;;  %v2968_v54 = vpack.c.bf16 %v2561_v37, %v2560_v51 }
 0x4b1   :  { %v2475_v26 = vmul.f32 %v9151_v62, %v2440_v40 }
 0x4b2   :  { %v2509_v44 = vadd.f32 %v9167_v25, %v2474_v23  ;;  %3026 = vmatpush.bf16.msra.mxu0 %v2968_v54 }
 0x4b3   :  { %v2510_v1 = vadd.f32 %v9167_v25, %v2475_v26 }
 0x4b5   :  { %v9442_v10 = vpack.c.bf16 %v2510_v1, %v2509_v44  ;;  %v2000_v26 = vpop.xlane.xlu0 %1999  ;;  %v2558_v44 = vld [vmem:[%s9449_s14] sm:$0xff]  ;;  %v1881_v1 = vmul.f32 %v1847_v27, %v7947_v0 }
 0x4b7   :  { %13542 = vst [vmem:[#allocation74_spill] sm:$0xff] %v9442_v10 }
 0x4ba   :  { %7035 = vmatmul.msk.bf16.gmra.mxu3 %vm13534_vm2, %v13501_v17  ;;  %vm13543_vm2 = vcmask 261120  }
 0x4bb   :  { %vm13545_vm10 = vmmov %vm13543_vm2  ;;  %v1997_v41 = vpop.xlane.xlu1 %1996 }
 0x4bc   :  { %vm13546_vm9 = vmmov %vm13543_vm2  ;;  %v2059_v20 = vmul.f32 %v1997_v41, %v7947_v0 }
 0x4bd   :  { %vm13547_vm14 = vmmov %vm13543_vm2 }
 0x4be   :  { %7013 = vmatmul.msk.bf16.gmra.mxu2 %vm13536_vm6, %v9415_v30  ;;  %vm13538_vm6 = vnez %v13537_v39  ;;  %v9493_v27 = vadd.f32 1e-05, %v2059_v20  ;;  %v372_v20 = vld [vmem:[%s8016_s5 + $0xd8] sm:$0xff] }
 0x4bf   :  { %vm13541_vm11 = vmpackc.low %vm13538_vm6, %vm13540_vm4  ;;  %vm13677_vm6 = vcmask 261120  }
 0x4c0   :  { %7544 = vrsqrt.f32 %v9493_v27 }
 0x4c8   :  { %v1832_v38 = vpop.xlane.xlu2 %1831 }
 0x4c9   :  { %v1876_v61 = vmul.f32 %v1832_v38, %v7947_v0  ;;  %v9473_v38 = vpop.eup %7542 }
 0x4ca   :  { %7037 = vmatmul.msk.bf16.gmra.mxu3 %vm13541_vm11, %v13501_v17  ;;  %vm13552_vm11 = vmmov %vm13543_vm2 }
 0x4cb   :  { %v9440_v21 = vsub.f32 %v9126_v50, %v1876_v61  ;;  %v9454_v50 = vsub.f32 %v13544_v6, %v1877_v28  ;;  %v2559_v61 = vld [vmem:[%s9449_s14 + $0x8] sm:$0xff] }
 0x4cc   :  { %v2967_v6 = vpack.c.bf16 %v2559_v61, %v2558_v44  ;;  %v13555_v44 = vld [vmem:[#allocation24_spill] sm:$0xff]  ;;  %v13557_v61 = vmov 0 }
 0x4cd   :  { %v1940_v11 = vmul.f32 %v9440_v21, %v9440_v21  ;;  %v1941_v4 = vmul.f32 %v9454_v50, %v9454_v50 }
 0x4ce   :  { %7014 = vmatmul.msk.bf16.gmra.mxu2 %vm13543_vm2, %v9442_v10  ;;  %3027 = vmatpush.bf16.msra.mxu0 %v2967_v6  ;;  %v9518_v6 = vpop.eup %7544 }
 0x4cf   :  { %v2022_v58 = vsel %vm13545_vm10, %v1940_v11, 0.0  ;;  %v2025_v23 = vsel %vm13547_vm14, %v1941_v4, 0.0  ;;  %vm13560_vm14 = vmmov %vm13552_vm11 }
 0x4d0   :  { %v1838_v33 = vpop.xlane.xlu2 %1837  ;;  %2023 = vadd.xlane.f32.xlu0 %v2022_v58  ;;  %v2258_v58 = vmul.f32 %v9473_v38, %v9456_v52 }
 0x4d1   :  { %v1878_v49 = vmul.f32 %v1838_v33, %v7947_v0  ;;  %v2060_v33 = vmul.f32 %v2000_v26, %v7947_v0  ;;  %v13554_v26 = vld [vmem:[#allocation8_spill] sm:$0xff] }
 0x4d2   :  { %v2259_v41 = vmul.f32 %v9473_v38, %v2258_v58  ;;  %vm13556_vm10 = vcmp.eq.s32.totalorder %v13554_v26, %v13555_v44 }
 0x4d3   :  { %v9462_v9 = vsub.f32 %v9144_v47, %v1878_v49  ;;  %v9499_v51 = vadd.f32 1e-05, %v2060_v33  ;;  %v13561_v33 = vld [vmem:[#allocation43_spill] sm:$0xff] }
 0x4d5   :  { %v1942_v35 = vmul.f32 %v9462_v9, %v9462_v9  ;;  %7546 = vrsqrt.f32 %v9499_v51 }
 0x4d7   :  { %v2028_v40 = vsel %vm13546_vm9, %v1942_v35, 0.0 }
 0x4d8   :  { %v1841_v24 = vpop.xlane.xlu2 %1840  ;;  %2029 = vadd.xlane.f32.xlu1 %v2028_v40  ;;  %2026 = vadd.xlane.f32.xlu0 %v2025_v23  ;;  %v13553_v23 = vld [vmem:[#allocation42_spill] sm:$0xff] }
 0x4d9   :  { %v1879_v47 = vmul.f32 %v1841_v24, %v7947_v0  ;;  %vm522_vm2 = vcmp.eq.s32.totalorder %v13554_v26, %v13553_v23  ;;  %v2268_v23 = vmul.f32 %v9518_v6, %v9493_v27 }
 0x4da   :  { %7039 = vmatmul.msk.bf16.gmra.mxu3 %vm13550_vm0, %v13501_v17  ;;  %vm9513_vm9 = vmor %vm13556_vm10, %vm522_vm2  ;;  %vm521_vm0 = vcmp.eq.s32.totalorder %v13554_v26, %v13561_v33  ;;  %vm2264_vm10 = vweird.f32 %v9473_v38 }
 0x4db   :  { %v9480_v28 = vsub.f32 %v9164_v13, %v1879_v47  ;;  %v13551_v13 = vld [vmem:[#allocation61_spill] sm:$0xff]  ;;  %v2260_v47 = vmul.f32 0.5, %v2259_v41  ;;  %v13558_v61 = vsel %vm9513_vm9, 4294967295, %v13557_v61  ;;  %v404_v41 = vadd.s32 64, %v372_v20 }
 0x4dc   :  { %v9496_v4 = vsub.f32 %v13551_v13, %v1881_v1  ;;  %13559 = vst [vmem:[#allocation58_spill] sm:$0xff] %v13558_v61  ;;  %v13564_v13 = vmov 0 }
 0x4dd   :  { %v1943_v49 = vmul.f32 %v9480_v28, %v9480_v28 }
 0x4de   :  { %v1945_v40 = vmul.f32 %v9496_v4, %v9496_v4 }
 0x4df   :  { %v2031_v35 = vsel %vm13552_vm11, %v1943_v49, 0.0  ;;  %v13562_v49 = vld [vmem:[#allocation38_spill] sm:$0xff] }
 0x4e0   :  { %v1991_v37 = vpop.xlane.xlu2 %1990  ;;  %2032 = vadd.xlane.f32.xlu2 %v2031_v35  ;;  %v2037_v1 = vsel %vm13560_vm14, %v1945_v40, 0.0  ;;  %vm13563_vm11 = vcmp.eq.s32.totalorder %v13554_v26, %v13562_v49  ;;  %v2261_v35 = vsub.f32 1.5, %v2260_v47  ;;  %v371_v47 = vld [vmem:[%s8016_s5 + $0xd0] sm:$0xff]  ;;  %vm2263_vm14 = vweird.f32 %v9456_v52 }
 0x4e1   :  { %v2057_v54 = vmul.f32 %v1991_v37, %v7947_v0  ;;  %vm9527_vm15 = vmor %vm13563_vm11, %vm521_vm0  ;;  %v2006_v37 = vpop.xlane.xlu0 %2005  ;;  %v403_v61 = vadd.s32 64, %v371_v47  ;;  %v13567_v47 = vld [vmem:[#allocation49_spill] sm:$0xff] }
 0x4e2   :  { %v13565_v13 = vsel %vm9527_vm15, 4294967295, %v13564_v13  ;;  %vm13236_vm2 = vmpackc.low %vm9513_vm9, %vm9527_vm15  ;;  %v2062_v20 = vmul.f32 %v2006_v37, %v7947_v0  ;;  %v2262_v33 = vmul.f32 %v9473_v38, %v2261_v35 }
 0x4e3   :  { %v2089_v24 = vadd.f32 1e-05, %v2057_v54  ;;  %13566 = vst [vmem:[#allocation61_spill] sm:$0xff] %v13565_v13  ;;  %v9531_v54 = vpop.eup %7546  ;;  %v2269_v13 = vmul.f32 %v9518_v6, %v2268_v23  ;;  %vm2265_vm0 = vmor %vm2263_vm14, %vm2264_vm10  ;;  %v9561_v23 = vld [vmem:[%s9202_s10] ss:$0 sm:$0xff] }
 0x4e4   :  { %v2278_v49 = vmul.f32 %v9531_v54, %v9499_v51  ;;  %v9553_v37 = vadd.f32 1e-05, %v2062_v20  ;;  %v2266_v35 = vsel %vm2265_vm0, %v9473_v38, %v2262_v33 }
 0x4e5   :  { %7548 = vrsqrt.f32 %v2089_v24  ;;  %v2270_v52 = vmul.f32 0.5, %v2269_v13  ;;  %vm2253_vm10 = vweird.f32 %v2089_v24 }
 0x4e6   :  { %v2279_v8 = vmul.f32 %v9531_v54, %v2278_v49  ;;  %7550 = vrsqrt.f32 %v9553_v37 }
 0x4e7   :  { %v2271_v13 = vsub.f32 1.5, %v2270_v52 }
 0x4e8   :  { %v9522_v58 = vpop.xlane.xlu2 %1849  ;;  %2038 = vadd.xlane.f32.xlu2 %v2037_v1  ;;  %v2280_v33 = vmul.f32 0.5, %v2279_v8 }
 0x4e9   :  { %v2009_v52 = vpop.xlane.xlu0 %2008 }
 0x4ea   :  { %7041 = vmatmul.msk.bf16.gmra.mxu3 %vm13236_vm2, %v13501_v17  ;;  %v2715_v1 = vpop.f32.mrf.mxu2  ;;  %vm524_vm2 = vcmp.eq.s32.totalorder %v13554_v26, %v13567_v47  ;;  %v2281_v47 = vsub.f32 1.5, %v2280_v33  ;;  %v2272_v33 = vmul.f32 %v9518_v6, %v2271_v13 }
 0x4eb   :  { %v7549_v40 = vpop.eup %7548 }
 0x4ec   :  { %v2248_v44 = vmul.f32 %v7549_v40, %v2089_v24  ;;  %491 = vperm.xlu0 %7460, %v404_v41   ;;  %vm2254_vm11 = vweird.f32 %v7549_v40 }
 0x4ed   :  { %v2804_v45 = vpop.f32.mrf.mxu3  ;;  %vm2255_vm14 = vmor %vm2253_vm10, %vm2254_vm11 }
 0x4ee   :  { %v2249_v11 = vmul.f32 %v7549_v40, %v2248_v44  ;;  %v2805_v44 = vadd.f32 %v2804_v45, %v2715_v1  ;;  %v13569_v45 = vld [vmem:[#allocation25_spill] sm:$0xff] }
 0x4ef   :  { %vm13570_vm0 = vcmp.eq.s32.totalorder %v13554_v26, %v13569_v45 }
 0x4f0   :  { %v2250_v43 = vmul.f32 0.5, %v2249_v11  ;;  %v2003_v39 = vpop.xlane.xlu2 %2002  ;;  %v13568_v11 = vld [vmem:[#allocation56_spill] sm:$0xff]  ;;  %vm9574_vm15 = vmor %vm13570_vm0, %vm524_vm2  ;;  %v2887_v8 = vadd.f32 %v9561_v23, %v2805_v44 }
 0x4f1   :  { %v2061_v53 = vmul.f32 %v2003_v39, %v7947_v0  ;;  %488 = vperm.xlu1 %7461, %v403_v61   ;;  %v2442_v46 = vmul.f32 %v2266_v35, %v13568_v11 }
 0x4f2   :  { %v2251_v41 = vsub.f32 1.5, %v2250_v43  ;;  %v2717_v43 = vpop.f32.mrf.mxu2 }
 0x4f3   :  { %v9563_v20 = vadd.f32 1e-05, %v2061_v53  ;;  %v13571_v53 = vmov 0  ;;  %v2477_v35 = vmul.f32 %v9151_v62, %v2442_v46 }
 0x4f4   :  { %v2252_v38 = vmul.f32 %v7549_v40, %v2251_v41  ;;  %v13572_v53 = vsel %vm9574_vm15, 4294967295, %v13571_v53  ;;  %v13575_v41 = vld [vmem:[#allocation46_spill] sm:$0xff] }
 0x4f5   :  { %7552 = vrsqrt.f32 %v9563_v20  ;;  %v2806_v61 = vpop.f32.mrf.mxu3  ;;  %13573 = vst [vmem:[#allocation42_spill] sm:$0xff] %v13572_v53  ;;  %vm13576_vm2 = vcmp.eq.s32.totalorder %v13554_v26, %v13575_v41  ;;  %v2512_v13 = vadd.f32 %v9167_v25, %v2477_v35  ;;  %v214_v41 = vld [vmem:[%s7997_s1 + $0xe8] sm:$0xff]  ;;  %v376_v53 = vld [vmem:[%s8016_s5 + $0xf8] sm:$0xff] }
 0x4f6   :  { %v2256_v39 = vsel %vm2255_vm14, %v7549_v40, %v2252_v38  ;;  %v2807_v1 = vadd.f32 %v2806_v61, %v2717_v43  ;;  %v13574_v40 = vld [vmem:[#allocation48_spill] sm:$0xff]  ;;  %v9597_v38 = vpop.eup %7550  ;;  %vm2274_vm14 = vweird.f32 %v9518_v6  ;;  %v2919_v43 = vmax.f32 %v2887_v8, 0.0 }
 0x4f7   :  { %v2441_v24 = vmul.f32 %v2256_v39, %v9184_v15  ;;  %vm523_vm11 = vcmp.eq.s32.totalorder %v13554_v26, %v13574_v40  ;;  %v13577_v15 = vmov 0  ;;  %v2282_v8 = vmul.f32 %v9531_v54, %v2281_v47 }
 0x4f8   :  { %v2012_v49 = vpop.xlane.xlu2 %2011  ;;  %vm9591_vm10 = vmor %vm13576_vm2, %vm523_vm11  ;;  %v2888_v44 = vadd.f32 %v9561_v23, %v2807_v1  ;;  %vm2273_vm11 = vweird.f32 %v9493_v27  ;;  %vm2284_vm2 = vweird.f32 %v9531_v54  ;;  %v2298_v40 = vmul.f32 %v9597_v38, %v9553_v37 }
 0x4f9   :  { %v13578_v15 = vsel %vm9591_vm10, 4294967295, %v13577_v15  ;;  %v2476_v11 = vmul.f32 %v9151_v62, %v2441_v24  ;;  %v2064_v39 = vmul.f32 %v2012_v49, %v7947_v0  ;;  %vm13238_vm0 = vmpackc.low %vm9574_vm15, %vm9591_vm10  ;;  %v2063_v24 = vmul.f32 %v2009_v52, %v7947_v0 }
 0x4fa   :  { %13579 = vst [vmem:[#allocation8_spill] sm:$0xff] %v13578_v15  ;;  %v2920_v61 = vmax.f32 %v2888_v44, 0.0  ;;  %7043 = vmatmul.msk.bf16.gmra.mxu3 %vm13238_vm0, %v13501_v17  ;;  %vm2275_vm0 = vmor %vm2273_vm11, %vm2274_vm14  ;;  %vm2283_vm10 = vweird.f32 %v9499_v51  ;;  %vm13581_vm15 = vcmask 261120   ;;  %v13583_v51 = vld [vmem:[#allocation67_spill] sm:$0xff]  ;;  %v2018_v15 = vpop.xlane.xlu0 %2017 }
 0x4fb   :  { %v9605_v46 = vpop.eup %7552  ;;  %v2511_v45 = vadd.f32 %v9167_v25, %v2476_v11  ;;  %v9627_v27 = vadd.f32 1e-05, %v2064_v39  ;;  %v2276_v35 = vsel %vm2275_vm0, %v9518_v6, %v2272_v33  ;;  %vm2285_vm9 = vmor %vm2283_vm10, %vm2284_vm2  ;;  %v9635_v11 = vadd.f32 1e-05, %v2063_v24  ;;  %v13584_v33 = vld [vmem:[#allocation53_spill] sm:$0xff] }
 0x4fc   :  { %v2288_v1 = vmul.f32 %v9605_v46, %v9563_v20  ;;  %v2951_v49 = vpack.c.bf16 %v2920_v61, %v2919_v43  ;;  %vm13582_vm13 = vmmov %vm13581_vm15  ;;  %v2286_v39 = vsel %vm2285_vm9, %v9531_v54, %v2282_v8  ;;  %v2299_v43 = vmul.f32 %v9597_v38, %v2298_v40 }
 0x4fd   :  { %v2809_v52 = vpop.f32.mrf.mxu3  ;;  %v9629_v44 = vpack.c.bf16 %v2512_v13, %v2511_v45  ;;  %v2443_v45 = vmul.f32 %v2276_v35, %v13583_v51  ;;  %7554 = vrsqrt.f32 %v9627_v27  ;;  %v1880_v54 = vmul.f32 %v9423_v60, %v7947_v0 }
 0x4fe   :  { %v2289_v47 = vmul.f32 %v9605_v46, %v2288_v1  ;;  %7056 = vmatmul.msk.bf16.vlgmr.msra.gmra.mxu0 %vm13581_vm15, %v2951_v49  ;;  %vm526_vm15 = vcmp.eq.s32.totalorder %v13554_v26, %v13584_v33  ;;  %v13585_v1 = vld [vmem:[#allocation65_spill] sm:$0xff]  ;;  %7556 = vrsqrt.f32 %v9635_v11  ;;  %v2300_v13 = vmul.f32 0.5, %v2299_v43  ;;  %v13591_v43 = vld [vmem:[#allocation26_spill] sm:$0xff] }
 0x4ff   :  { %13580 = vst [vmem:[#allocation24_spill] sm:$0xff] %v9629_v44  ;;  %7015 = vmatmul.msk.bf16.gmra.mxu2 %vm13582_vm13, %v9629_v44  ;;  %v2444_v24 = vmul.f32 %v2286_v39, %v13585_v1  ;;  %v216_v49 = vld [vmem:[%s7997_s1 + $0xf8] sm:$0xff]  ;;  %v2478_v40 = vmul.f32 %v9151_v62, %v2443_v45  ;;  %v13588_v35 = vmov 0  ;;  %v2015_v39 = vpop.xlane.xlu1 %2014  ;;  %vm525_vm10 = vcmp.eq.s32.totalorder %v13554_v26, %v13591_v43  ;;  %v13592_v45 = vld [vmem:[#allocation51_spill] sm:$0xff] }
 0x500   :  { %305 = vperm.xlu2 %7462, %v214_v41   ;;  %v2290_v6 = vmul.f32 0.5, %v2289_v47  ;;  %v13586_v41 = vld [vmem:[#allocation50_spill] sm:$0xff]  ;;  %vm13593_vm14 = vcmp.eq.s32.totalorder %v13554_v26, %v13592_v45  ;;  %v13594_v1 = vmov 0  ;;  %vm2294_vm2 = vweird.f32 %v9605_v46 }
 0x501   :  { %v2720_v61 = vpop.f32.mrf.mxu2  ;;  %vm13587_vm13 = vcmp.eq.s32.totalorder %v13554_v26, %v13586_v41  ;;  %v2479_v60 = vmul.f32 %v9151_v62, %v2444_v24  ;;  %vm9666_vm0 = vmor %vm13593_vm14, %vm525_vm10  ;;  %v2301_v41 = vsub.f32 1.5, %v2300_v13  ;;  %v2513_v62 = vadd.f32 %v9167_v25, %v2478_v40 }
 0x502   :  { %vm9654_vm9 = vmor %vm13587_vm13, %vm526_vm15  ;;  %v2291_v47 = vsub.f32 1.5, %v2290_v6  ;;  %v2810_v51 = vadd.f32 %v2809_v52, %v2720_v61  ;;  %v13595_v1 = vsel %vm9666_vm0, 4294967295, %v13594_v1  ;;  %v13597_v61 = vld [vmem:[#allocation60_spill] sm:$0xff]  ;;  %vm2304_vm15 = vweird.f32 %v9597_v38 }
 0x503   :  { %v13589_v35 = vsel %vm9654_vm9, 4294967295, %v13588_v35  ;;  %v9658_v33 = vpop.eup %7554  ;;  %13596 = vst [vmem:[#allocation38_spill] sm:$0xff] %v13595_v1  ;;  %v9674_v16 = vsub.f32 %v13597_v61, %v1880_v54  ;;  %vm13245_vm11 = vmpackc.low %vm9654_vm9, %vm9666_vm0  ;;  %v2514_v40 = vadd.f32 %v9167_v25, %v2479_v60  ;;  %vm2293_vm13 = vweird.f32 %v9563_v20 }
 0x504   :  { %13590 = vst [vmem:[#allocation43_spill] sm:$0xff] %v13589_v35  ;;  %v9671_v52 = vpop.eup %7556  ;;  %v2292_v24 = vmul.f32 %v9605_v46, %v2291_v47  ;;  %v2318_v13 = vmul.f32 %v9658_v33, %v9627_v27  ;;  %v2889_v54 = vadd.f32 %v9561_v23, %v2810_v51  ;;  %v408_v47 = vadd.s32 64, %v376_v53  ;;  %vm9704_vm14 = vmor %vm2293_vm13, %vm2294_vm2 }
 0x505   :  { %v2811_v8 = vpop.f32.mrf.mxu3  ;;  %v2308_v45 = vmul.f32 %v9671_v52, %v9635_v11  ;;  %vm2303_vm10 = vweird.f32 %v9553_v37  ;;  %vm13601_vm2 = vcmask 261120   ;;  %vm13617_vm0 = vcmask 261120  }
 0x506   :  { %v2296_v20 = vsel %vm9704_vm14, %v9605_v46, %v2292_v24  ;;  %v2319_v60 = vmul.f32 %v9658_v33, %v2318_v13 }
 0x507   :  { %v2445_v24 = vmul.f32 %v2296_v20, %v9233_v32  ;;  %v13607_v20 = vld [vmem:[#allocation55_spill] sm:$0xff] }
 0x508   :  { %311 = vperm.xlu2 %7462, %v216_v49   ;;  %v2065_v49 = vmul.f32 %v2015_v39, %v7947_v0  ;;  %v2302_v39 = vmul.f32 %v9597_v38, %v2301_v41  ;;  %v2921_v41 = vmax.f32 %v2889_v54, 0.0  ;;  %v1944_v54 = vmul.f32 %v9674_v16, %v9674_v16 }
 0x509   :  { %v2722_v6 = vpop.f32.mrf.mxu2  ;;  %vm13608_vm14 = vcmp.eq.s32.totalorder %v13554_v26, %v13607_v20 }
 0x50a   :  { %v2812_v43 = vadd.f32 %v2811_v8, %v2722_v6  ;;  %7045 = vmatmul.msk.bf16.gmra.mxu3 %vm13245_vm11, %v13501_v17  ;;  %v2066_v8 = vmul.f32 %v2018_v15, %v7947_v0  ;;  %v1882_v6 = vmul.f32 %v9522_v58, %v7947_v0  ;;  %v9708_v25 = vadd.f32 1e-05, %v2065_v49  ;;  %vm2305_vm11 = vmor %vm2303_vm10, %vm2304_vm15 }
 0x50b   :  { %v9710_v15 = vpack.c.bf16 %v2514_v40, %v2513_v62  ;;  %v2306_v49 = vsel %vm2305_vm11, %v9597_v38, %v2302_v39  ;;  %vm13602_vm15 = vmmov %vm13601_vm2  ;;  %v13603_v40 = vld [vmem:[#allocation63_spill] sm:$0xff]  ;;  %v13604_v38 = vld [vmem:[#allocation66_spill] sm:$0xff] }
 0x50c   :  { %v2890_v51 = vadd.f32 %v9561_v23, %v2812_v43  ;;  %v9718_v58 = vadd.f32 1e-05, %v2066_v8  ;;  %v2309_v43 = vmul.f32 %v9671_v52, %v2308_v45  ;;  %v9725_v46 = vsub.f32 %v9218_v55, %v1882_v6  ;;  %v13605_v39 = vld [vmem:[#allocation59_spill] sm:$0xff]  ;;  %vm13606_vm10 = vmmov %vm13601_vm2  ;;  %v9742_v6 = vld [vmem:[%s8586_s25] ss:$0 sm:$0xff]  ;;  %s9978_s25 = sld [smem:[%s13104_s0 + %s7775_s20]]  }
 0x50d   :  { %v2814_v53 = vpop.f32.mrf.mxu3  ;;  %13600 = vst [vmem:[#allocation49_spill] sm:$0xff] %v9710_v15  ;;  %7558 = vrsqrt.f32 %v9708_v25  ;;  %v2320_v8 = vmul.f32 0.5, %v2319_v60  ;;  %vm528_vm11 = vcmp.eq.s32.totalorder %v13554_v26, %v13603_v40  ;;  %vm527_vm13 = vcmp.eq.s32.totalorder %v13554_v26, %v13605_v39 }
 0x50e   :  { %v2922_v37 = vmax.f32 %v2890_v51, 0.0  ;;  %7560 = vrsqrt.f32 %v9718_v58  ;;  %v2310_v55 = vmul.f32 0.5, %v2309_v43  ;;  %v2034_v45 = vsel %vm13606_vm10, %v1944_v54, 0.0  ;;  %v13612_v54 = vld [vmem:[#allocation54_spill] sm:$0xff] }
 0x50f   :  { %7016 = vmatmul.msk.bf16.gmra.mxu2 %vm13601_vm2, %v9710_v15  ;;  %v1946_v51 = vmul.f32 %v9725_v46, %v9725_v46  ;;  %v2480_v61 = vmul.f32 %v9742_v6, %v2445_v24  ;;  %vm9748_vm2 = vmor %vm13608_vm14, %vm528_vm11  ;;  %v13609_v60 = vmov 0  ;;  %v13614_v24 = vmov 0 }
 0x510   :  { %503 = vperm.xlu2 %7462, %v408_v47   ;;  %v2952_v62 = vpack.c.bf16 %v2922_v37, %v2921_v41  ;;  %v2446_v47 = vmul.f32 %v2306_v49, %v13604_v38  ;;  %v13610_v60 = vsel %vm9748_vm2, 4294967295, %v13609_v60  ;;  %v2321_v41 = vsub.f32 1.5, %v2320_v8  ;;  %v9752_v37 = vpop.xlane.xlu2 %2020 }
 0x511   :  { %v2725_v13 = vpop.f32.mrf.mxu2  ;;  %13611 = vst [vmem:[#allocation56_spill] sm:$0xff] %v13610_v60  ;;  %v2311_v40 = vsub.f32 1.5, %v2310_v55  ;;  %vm2324_vm11 = vweird.f32 %v9658_v33 }
 0x512   :  { %7057 = vmatmul.msk.bf16.gmra.mxu0 %vm13602_vm15, %v2952_v62  ;;  %v2815_v49 = vadd.f32 %v2814_v53, %v2725_v13  ;;  %v2481_v62 = vmul.f32 %v9742_v6, %v2446_v47  ;;  %vm13613_vm15 = vcmp.eq.s32.totalorder %v13554_v26, %v13612_v54  ;;  %v2040_v53 = vsel %vm13617_vm0, %v1946_v51, 0.0  ;;  %v9773_v13 = vld [vmem:[%s8595_s29] ss:$0 sm:$0xff]  ;;  %s10244_s29 = sld [smem:[%s13104_s0 + %s7776_s26]]   ;;  %s7789_s26 = smov 41  }
 0x513   :  { %v9754_v43 = vpop.eup %7558  ;;  %vm9760_vm10 = vmor %vm13613_vm15, %vm527_vm13  ;;  %v2515_v47 = vadd.f32 %v9773_v13, %v2480_v61  ;;  %v2322_v39 = vmul.f32 %v9658_v33, %v2321_v41  ;;  %vm2314_vm0 = vweird.f32 %v9671_v52  ;;  %v2312_v61 = vmul.f32 %v9671_v52, %v2311_v40  ;;  %s13081_s28 = sld [smem:[%s13104_s0 + %s7789_s26]]  }
 0x514   :  { %v13615_v24 = vsel %vm9760_vm10, 4294967295, %v13614_v24  ;;  %v9764_v38 = vpop.eup %7560  ;;  %vm13248_vm14 = vmpackc.low %vm9748_vm2, %vm9760_vm10  ;;  %v2328_v55 = vmul.f32 %v9754_v43, %v9708_v25  ;;  %v2516_v51 = vadd.f32 %v9773_v13, %v2481_v62  ;;  %vm2323_vm13 = vweird.f32 %v9627_v27 }
 0x515   :  { %v2816_v32 = vpop.f32.mrf.mxu3  ;;  %13616 = vst [vmem:[#allocation25_spill] sm:$0xff] %v13615_v24  ;;  %v2338_v41 = vmul.f32 %v9764_v38, %v9718_v58  ;;  %vm2313_vm15 = vweird.f32 %v9635_v11  ;;  %vm2325_vm10 = vmor %vm2323_vm13, %vm2324_vm11  ;;  %vm13619_vm2 = vcmask 261120  }
 0x516   :  { %2035 = vadd.xlane.f32.xlu0 %v2034_v45  ;;  %v2891_v45 = vadd.f32 %v9561_v23, %v2815_v49  ;;  %v9796_v54 = vpack.c.bf16 %v2516_v51, %v2515_v47  ;;  %v2329_v62 = vmul.f32 %v9754_v43, %v2328_v55  ;;  %v13621_v51 = vld [vmem:[#allocation64_spill] sm:$0xff] }
 0x517   :  { %v2339_v11 = vmul.f32 %v9764_v38, %v2338_v41 }
 0x518   :  { %13618 = vst [vmem:[#allocation48_spill] sm:$0xff] %v9796_v54  ;;  %v2923_v40 = vmax.f32 %v2891_v45, 0.0 }
 0x519   :  { %v2727_v8 = vpop.f32.mrf.mxu2  ;;  %v2340_v45 = vmul.f32 0.5, %v2339_v11 }
 0x51a   :  { %v2817_v20 = vadd.f32 %v2816_v32, %v2727_v8  ;;  %7047 = vmatmul.msk.bf16.gmra.mxu3 %vm13248_vm14, %v13501_v17  ;;  %v2326_v8 = vsel %vm2325_vm10, %v9658_v33, %v2322_v39  ;;  %vm2315_vm14 = vmor %vm2313_vm15, %vm2314_vm0  ;;  %v2330_v39 = vmul.f32 0.5, %v2329_v62 }
 0x51b   :  { %2041 = vadd.xlane.f32.xlu1 %v2040_v53  ;;  %v2316_v27 = vsel %vm2315_vm14, %v9671_v52, %v2312_v61  ;;  %v2448_v47 = vmul.f32 %v2326_v8, %v9269_v19  ;;  %vm13620_vm10 = vmmov %vm13619_vm2  ;;  %vm529_vm14 = vcmp.eq.s32.totalorder %v13554_v26, %v9419_v2  ;;  %v13622_v19 = vmov 0 }
 0x51c   :  { %v2892_v32 = vadd.f32 %v9561_v23, %v2817_v20  ;;  %v486_v20 = vpop.permute.xlu2 %485  ;;  %v2447_v55 = vmul.f32 %v2316_v27, %v9112_v7  ;;  %v2331_v41 = vsub.f32 1.5, %v2330_v39  ;;  %v13626_v2 = vmov 0 }
 0x51d   :  { %v2819_v49 = vpop.f32.mrf.mxu3  ;;  %vm530_vm11 = vcmp.eq.s32.totalorder %v13554_v26, %v486_v20  ;;  %v2483_v61 = vmul.f32 %v9742_v6, %v2448_v47  ;;  %v2341_v62 = vsub.f32 1.5, %v2340_v45  ;;  %v373_v47 = vld [vmem:[%s8016_s5 + $0xe0] sm:$0xff] }
 0x51e   :  { %v2924_v53 = vmax.f32 %v2892_v32, 0.0  ;;  %v213_v32 = vld [vmem:[%s7997_s1 + $0xe0] sm:$0xff]  ;;  %v2482_v8 = vmul.f32 %v9742_v6, %v2447_v55 }
 0x51f   :  { %7017 = vmatmul.msk.bf16.gmra.mxu2 %vm13619_vm2, %v9796_v54  ;;  %vm13251_vm2 = vcmp.eq.s32.totalorder %v13554_v26, %v13621_v51 }
 0x520   :  { %v2953_v24 = vpack.c.bf16 %v2924_v53, %v2923_v40  ;;  %vm9818_vm0 = vmor %vm13251_vm2, %vm530_vm11  ;;  %v2332_v53 = vmul.f32 %v9754_v43, %v2331_v41  ;;  %vm2334_vm11 = vweird.f32 %v9754_v43  ;;  %v2517_v20 = vadd.f32 %v9773_v13, %v2482_v8 }
 0x521   :  { %v2730_v33 = vpop.f32.mrf.mxu2  ;;  %v13623_v19 = vsel %vm9818_vm0, 4294967295, %v13622_v19  ;;  %vm2333_vm2 = vweird.f32 %v9708_v25 }
 0x522   :  { %7058 = vmatmul.msk.bf16.gmra.mxu0 %vm13620_vm10, %v2953_v24  ;;  %13624 = vst [vmem:[#allocation46_spill] sm:$0xff] %v13623_v19  ;;  %v2820_v7 = vadd.f32 %v2819_v49, %v2730_v33  ;;  %v13625_v24 = vld [vmem:[#allocation62_spill] sm:$0xff]  ;;  %v2518_v49 = vadd.f32 %v9773_v13, %v2483_v61  ;;  %v2342_v33 = vmul.f32 %v9764_v38, %v2341_v62  ;;  %vm2335_vm9 = vmor %vm2333_vm2, %vm2334_vm11 }
 0x523   :  { %vm13252_vm13 = vcmp.eq.s32.totalorder %v13554_v26, %v13625_v24 }
 0x524   :  { %vm9829_vm15 = vmor %vm13252_vm13, %vm529_vm14  ;;  %v2893_v27 = vadd.f32 %v9561_v23, %v2820_v7  ;;  %vm2344_vm14 = vweird.f32 %v9764_v38  ;;  %vm2343_vm13 = vweird.f32 %v9718_v58  ;;  %v9854_v45 = vpack.c.bf16 %v2518_v49, %v2517_v20  ;;  %v374_v49 = vld [vmem:[%s8016_s5 + $0xe8] sm:$0xff] }
 0x525   :  { %v2821_v52 = vpop.f32.mrf.mxu3  ;;  %v13627_v2 = vsel %vm9829_vm15, 4294967295, %v13626_v2  ;;  %vm13254_vm10 = vmpackc.low %vm9818_vm0, %vm9829_vm15  ;;  %v405_v7 = vadd.s32 64, %v373_v47  ;;  %vm13630_vm15 = vcmask 261120   ;;  %vm13641_vm0 = vcmask 261120  }
 0x526   :  { %13628 = vst [vmem:[#allocation67_spill] sm:$0xff] %v13627_v2  ;;  %v2925_v61 = vmax.f32 %v2893_v27, 0.0  ;;  %vm13631_vm2 = vmmov %vm13630_vm15 }
 0x527   :  { %13629 = vst [vmem:[#allocation53_spill] sm:$0xff] %v9854_v45  ;;  %vm13635_vm11 = vmmov %vm13631_vm2 }
 0x529   :  { %v2732_v40 = vpop.f32.mrf.mxu2 }
 0x52a   :  { %v2822_v11 = vadd.f32 %v2821_v52, %v2732_v40  ;;  %7049 = vmatmul.msk.bf16.gmra.mxu3 %vm13254_vm10, %v13501_v17  ;;  %302 = vperm.xlu0 %7460, %v213_v32   ;;  %v2336_v52 = vsel %vm2335_vm9, %v9754_v43, %v2332_v53  ;;  %vm2345_vm10 = vmor %vm2343_vm13, %vm2344_vm14  ;;  %v2067_v32 = vmul.f32 %v9752_v37, %v7947_v0 }
 0x52b   :  { %v2346_v25 = vsel %vm2345_vm10, %v9764_v38, %v2342_v33  ;;  %v2449_v8 = vmul.f32 %v2336_v52, %v9298_v14  ;;  %vm13633_vm9 = vmmov %vm13631_vm2 }
 0x52c   :  { %v2894_v39 = vadd.f32 %v9561_v23, %v2822_v11  ;;  %v2450_v43 = vmul.f32 %v2346_v25, %v9249_v3  ;;  %v9865_v40 = vadd.f32 1e-05, %v2067_v32  ;;  %v406_v11 = vadd.s32 64, %v374_v49  ;;  %v9873_v3 = vpop.permute.xlu0 %299  ;;  %v215_v25 = vld [vmem:[%s7997_s1 + $0xf0] sm:$0xff]  ;;  %vm13634_vm13 = vmmov %vm13631_vm2  ;;  %s7774_s1 = smov 26  }
 0x52d   :  { %v2824_v55 = vpop.f32.mrf.mxu3  ;;  %v2484_v37 = vmul.f32 %v9742_v6, %v2449_v8  ;;  %s9900_s21 = sld [smem:[%s13104_s0 + %s7774_s1]]   ;;  %s7780_s1 = smov 32  }
 0x52e   :  { %v2926_v41 = vmax.f32 %v2894_v39, 0.0  ;;  %7562 = vrsqrt.f32 %v9865_v40  ;;  %v2485_v38 = vmul.f32 %v9742_v6, %v2450_v43  ;;  %v9884_v43 = vpop.permute.xlu1 %296  ;;  %vm2353_vm10 = vweird.f32 %v9865_v40  ;;  %s11401_s20 = sld [smem:[%s13104_s0 + %s7780_s1]]  }
 0x52f   :  { %7018 = vmatmul.msk.bf16.gmra.mxu2 %vm13630_vm15, %v9854_v45  ;;  %v2519_v20 = vadd.f32 %v9773_v13, %v2484_v37  ;;  %s11498_s1 = sld [smem:[%s13104_s0 + %s7784_s13]]  }
 0x530   :  { %v2954_v58 = vpack.c.bf16 %v2926_v41, %v2925_v61  ;;  %v2520_v39 = vadd.f32 %v9773_v13, %v2485_v38 }
 0x531   :  { %v2735_v62 = vpop.f32.mrf.mxu2 }
 0x532   :  { %494 = vperm.xlu0 %7460, %v405_v7   ;;  %7059 = vmatmul.msk.bf16.gmra.mxu0 %vm13631_vm2, %v2954_v58  ;;  %v2825_v27 = vadd.f32 %v2824_v55, %v2735_v62  ;;  %v9877_v41 = vpack.c.bf16 %v2520_v39, %v2519_v20 }
 0x534   :  { %v2895_v47 = vadd.f32 %v9561_v23, %v2825_v27  ;;  %v7563_v52 = vpop.eup %7562  ;;  %13632 = vst [vmem:[#allocation65_spill] sm:$0xff] %v9877_v41 }
 0x535   :  { %v2826_v53 = vpop.f32.mrf.mxu3  ;;  %v2348_v58 = vmul.f32 %v7563_v52, %v9865_v40  ;;  %vm2354_vm15 = vweird.f32 %v7563_v52 }
 0x536   :  { %v2927_v7 = vmax.f32 %v2895_v47, 0.0  ;;  %vm2355_vm14 = vmor %vm2353_vm10, %vm2354_vm15 }
 0x537   :  { %v2349_v37 = vmul.f32 %v7563_v52, %v2348_v58 }
 0x539   :  { %v2737_v14 = vpop.f32.mrf.mxu2  ;;  %v2350_v47 = vmul.f32 0.5, %v2349_v37 }
 0x53a   :  { %v2827_v33 = vadd.f32 %v2826_v53, %v2737_v14  ;;  %497 = vperm.xlu0 %7460, %v406_v11   ;;  %v375_v53 = vld [vmem:[%s8016_s5 + $0xf0] sm:$0xff]  ;;  %s7785_s5 = smov 37  }
 0x53b   :  { %v407_v20 = vadd.s32 64, %v375_v53  ;;  %s11503_s24 = sld [smem:[%s13104_s0 + %s7785_s5]]  }
 0x53c   :  { %v2896_v55 = vadd.f32 %v9561_v23, %v2827_v33 }
 0x53d   :  { %v2829_v61 = vpop.f32.mrf.mxu3 }
 0x53e   :  { %v2928_v32 = vmax.f32 %v2896_v55, 0.0 }
 0x53f   :  { %7019 = vmatmul.msk.bf16.gmra.mxu2 %vm13633_vm9, %v9877_v41 }
 0x540   :  { %v2955_v8 = vpack.c.bf16 %v2928_v32, %v2927_v7 }
 0x541   :  { %v2740_v62 = vpop.f32.mrf.mxu2 }
 0x542   :  { %308 = vperm.xlu0 %7460, %v215_v25   ;;  %7060 = vmatmul.msk.bf16.gmra.mxu0 %vm13634_vm13, %v2955_v8  ;;  %v2830_v38 = vadd.f32 %v2829_v61, %v2740_v62  ;;  %v2351_v25 = vsub.f32 1.5, %v2350_v47 }
 0x543   :  { %v2024_v49 = vpop.xlane.xlu0 %2023 }
 0x544   :  { %v2068_v27 = vmul.f32 %v2024_v49, %v7947_v0  ;;  %v2897_v39 = vadd.f32 %v9561_v23, %v2830_v38  ;;  %v2352_v60 = vmul.f32 %v7563_v52, %v2351_v25 }
 0x545   :  { %v2831_v11 = vpop.f32.mrf.mxu3 }
 0x546   :  { %v2100_v14 = vadd.f32 1e-05, %v2068_v27  ;;  %v2929_v61 = vmax.f32 %v2897_v39, 0.0 }
 0x548   :  { %7564 = vrsqrt.f32 %v2100_v14  ;;  %vm2363_vm9 = vweird.f32 %v2100_v14 }
 0x549   :  { %v2742_v33 = vpop.f32.mrf.mxu2 }
 0x54a   :  { %v2832_v55 = vadd.f32 %v2831_v11, %v2742_v33  ;;  %500 = vperm.xlu0 %7460, %v407_v20   ;;  %v2356_v33 = vsel %vm2355_vm14, %v7563_v52, %v2352_v60 }
 0x54b   :  { %v2030_v7 = vpop.xlane.xlu1 %2029  ;;  %v2027_v32 = vpop.xlane.xlu0 %2026  ;;  %v2451_v25 = vmul.f32 %v2356_v33, %v9303_v57 }
 0x54c   :  { %v2898_v8 = vadd.f32 %v9561_v23, %v2832_v55  ;;  %v2070_v58 = vmul.f32 %v2030_v7, %v7947_v0  ;;  %v2069_v49 = vmul.f32 %v2027_v32, %v7947_v0 }
 0x54d   :  { %v2834_v19 = vpop.f32.mrf.mxu3 }
 0x54e   :  { %v7565_v2 = vpop.eup %7564  ;;  %v2930_v62 = vmax.f32 %v2898_v8, 0.0  ;;  %v2102_v53 = vadd.f32 1e-05, %v2070_v58  ;;  %v2101_v37 = vadd.f32 1e-05, %v2069_v49 }
 0x54f   :  { %v2358_v27 = vmul.f32 %v7565_v2, %v2100_v14  ;;  %vm2364_vm2 = vweird.f32 %v7565_v2 }
 0x550   :  { %v2956_v11 = vpack.c.bf16 %v2930_v62, %v2929_v61  ;;  %7566 = vrsqrt.f32 %v2102_v53  ;;  %vm2365_vm13 = vmor %vm2363_vm9, %vm2364_vm2  ;;  %vm2373_vm2 = vweird.f32 %v2101_v37 }
 0x551   :  { %v2359_v38 = vmul.f32 %v7565_v2, %v2358_v27  ;;  %7568 = vrsqrt.f32 %v2101_v37  ;;  %v2745_v20 = vpop.f32.mrf.mxu2 }
 0x552   :  { %7061 = vmatmul.msk.bf16.gmra.mxu0 %vm13635_vm11, %v2956_v11  ;;  %v2835_v7 = vadd.f32 %v2834_v19, %v2745_v20  ;;  %v2486_v19 = vmul.f32 %v9742_v6, %v2451_v25  ;;  %vm2383_vm11 = vweird.f32 %v2102_v53 }
 0x553   :  { %v2360_v47 = vmul.f32 0.5, %v2359_v38 }
 0x554   :  { %v2899_v60 = vadd.f32 %v9561_v23, %v2835_v7 }
 0x555   :  { %v2361_v39 = vsub.f32 1.5, %v2360_v47  ;;  %v2836_v40 = vpop.f32.mrf.mxu3 }
 0x556   :  { %v7567_v55 = vpop.eup %7566  ;;  %v2931_v33 = vmax.f32 %v2899_v60, 0.0 }
 0x557   :  { %v7569_v32 = vpop.eup %7568  ;;  %v2362_v8 = vmul.f32 %v7565_v2, %v2361_v39  ;;  %v2378_v58 = vmul.f32 %v7567_v55, %v2102_v53  ;;  %vm2384_vm15 = vweird.f32 %v7567_v55  ;;  %v2565_v53 = vld [vmem:[%s9900_s21 + $0x10] sm:$0xff] }
 0x558   :  { %v2368_v49 = vmul.f32 %v7569_v32, %v2101_v37  ;;  %vm2374_vm10 = vweird.f32 %v7569_v32  ;;  %vm9907_vm14 = vmor %vm2383_vm11, %vm2384_vm15  ;;  %vm13265_vm15 = vcmp.eq.s32.totalorder %v13554_v26, %v9873_v3  ;;  %vm13645_vm11 = vcmask 261120  }
 0x559   :  { %v2366_v61 = vsel %vm2365_vm13, %v7565_v2, %v2362_v8  ;;  %v2379_v62 = vmul.f32 %v7567_v55, %v2378_v58  ;;  %v2747_v27 = vpop.f32.mrf.mxu2  ;;  %v2521_v58 = vadd.f32 %v9773_v13, %v2486_v19  ;;  %vm9912_vm13 = vmor %vm2373_vm2, %vm2374_vm10  ;;  %vm13266_vm10 = vcmp.eq.s32.totalorder %v13554_v26, %v9884_v43 }
 0x55a   :  { %v2452_v11 = vmul.f32 %v2366_v61, %v9440_v21  ;;  %v2369_v38 = vmul.f32 %v7569_v32, %v2368_v49  ;;  %v2837_v52 = vadd.f32 %v2836_v40, %v2747_v27 }
 0x55b   :  { %v2380_v57 = vmul.f32 0.5, %v2379_v62 }
 0x55c   :  { %v2370_v14 = vmul.f32 0.5, %v2369_v38  ;;  %v2900_v2 = vadd.f32 %v9561_v23, %v2837_v52  ;;  %v2487_v20 = vmul.f32 %v9742_v6, %v2452_v11  ;;  %v2566_v11 = vld [vmem:[%s9900_s21 + $0x18] sm:$0xff] }
 0x55d   :  { %v2381_v47 = vsub.f32 1.5, %v2380_v57  ;;  %v3158_v52 = vpack.c.bf16 %v2566_v11, %v2565_v53  ;;  %v13642_v57 = vmov 0 }
 0x55e   :  { %v2371_v21 = vsub.f32 1.5, %v2370_v14  ;;  %v2932_v39 = vmax.f32 %v2900_v2, 0.0  ;;  %v492_v7 = vpop.permute.xlu0 %491  ;;  %v2522_v61 = vadd.f32 %v9773_v13, %v2487_v20  ;;  %v2563_v14 = vld [vmem:[%s9900_s21] sm:$0xff]  ;;  %v2564_v2 = vld [vmem:[%s9900_s21 + $0x8] sm:$0xff] }
 0x55f   :  { %v2382_v8 = vmul.f32 %v7567_v55, %v2381_v47  ;;  %vm532_vm9 = vcmp.eq.s32.totalorder %v13554_v26, %v492_v7  ;;  %3216 = vmatpush.bf16.msra.mxu1 %v3158_v52  ;;  %v3157_v20 = vpack.c.bf16 %v2564_v2, %v2563_v14 }
 0x560   :  { %v2372_v49 = vmul.f32 %v7569_v32, %v2371_v21  ;;  %v2957_v25 = vpack.c.bf16 %v2932_v39, %v2931_v33  ;;  %v9916_v27 = vpack.c.bf16 %v2522_v61, %v2521_v58  ;;  %v2839_v33 = vpop.f32.mrf.mxu3  ;;  %v2033_v39 = vpop.xlane.xlu2 %2032  ;;  %v9970_v61 = vld [vmem:[%s9583_s12] ss:$0 sm:$0xff] }
 0x561   :  { %v2386_v37 = vsel %vm9907_vm14, %v7567_v55, %v2382_v8  ;;  %v13646_v55 = vmov 0  ;;  %v2071_v8 = vmul.f32 %v2033_v39, %v7947_v0 }
 0x562   :  { %13640 = vst [vmem:[#allocation50_spill] sm:$0xff] %v9916_v27  ;;  %7062 = vmatmul.msk.bf16.gmra.mxu0 %vm13641_vm0, %v2957_v25  ;;  %v2376_v38 = vsel %vm9912_vm13, %v7569_v32, %v2372_v49  ;;  %vm9932_vm0 = vmor %vm13265_vm15, %vm532_vm9  ;;  %7020 = vmatmul.msk.bf16.gmra.mxu2 %vm13645_vm11, %v9916_v27  ;;  %v2454_v32 = vmul.f32 %v2386_v37, %v9462_v9 }
 0x563   :  { %v489_v60 = vpop.permute.xlu1 %488  ;;  %v13643_v57 = vsel %vm9932_vm0, 4294967295, %v13642_v57  ;;  %v2453_v19 = vmul.f32 %v2376_v38, %v9454_v50  ;;  %3217 = vmatpush.bf16.msra.mxu1 %v3157_v20  ;;  %vm13650_vm13 = vmmov %vm13645_vm11  ;;  %v2103_v58 = vadd.f32 1e-05, %v2071_v8 }
 0x564   :  { %13644 = vst [vmem:[#allocation26_spill] sm:$0xff] %v13643_v57  ;;  %vm531_vm14 = vcmp.eq.s32.totalorder %v13554_v26, %v489_v60  ;;  %v2489_v50 = vmul.f32 %v9742_v6, %v2454_v32 }
 0x565   :  { %vm9942_vm2 = vmor %vm13266_vm10, %vm531_vm14  ;;  %v2488_v9 = vmul.f32 %v9742_v6, %v2453_v19  ;;  %7570 = vrsqrt.f32 %v2103_v58 }
 0x566   :  { %v13647_v55 = vsel %vm9942_vm2, 4294967295, %v13646_v55  ;;  %vm13260_vm9 = vmpackc.low %vm9932_vm0, %vm9942_vm2  ;;  %v2524_v21 = vadd.f32 %v9773_v13, %v2489_v50  ;;  %vm13655_vm2 = vcmask 261120  }
 0x567   :  { %13648 = vst [vmem:[#allocation51_spill] sm:$0xff] %v13647_v55  ;;  %7051 = vmatmul.msk.bf16.gmra.mxu3 %vm13260_vm9, %v13501_v17  ;;  %v2523_v47 = vadd.f32 %v9773_v13, %v2488_v9  ;;  %vm13651_vm14 = vmmov %vm13645_vm11 }
 0x568   :  { %v2841_v49 = vpop.f32.mrf.mxu3  ;;  %v2039_v62 = vpop.xlane.xlu2 %2038 }
 0x569   :  { %v9964_v7 = vpack.c.bf16 %v2524_v21, %v2523_v47  ;;  %v2073_v38 = vmul.f32 %v2039_v62, %v7947_v0 }
 0x56b   :  { %13649 = vst [vmem:[#allocation60_spill] sm:$0xff] %v9964_v7  ;;  %v9972_v40 = vpop.eup %7570  ;;  %v9983_v20 = vadd.f32 1e-05, %v2073_v38 }
 0x56c   :  { %v2388_v32 = vmul.f32 %v9972_v40, %v2103_v58 }
 0x56d   :  { %7572 = vrsqrt.f32 %v9983_v20  ;;  %vm2413_vm10 = vweird.f32 %v9983_v20 }
 0x56e   :  { %v2389_v50 = vmul.f32 %v9972_v40, %v2388_v32 }
 0x570   :  { %v2844_v60 = vpop.f32.mrf.mxu3 }
 0x572   :  { %7021 = vmatmul.msk.bf16.gmra.mxu2 %vm13650_vm13, %v9964_v7  ;;  %vm2394_vm13 = vweird.f32 %v9972_v40 }
 0x57b   :  { %v3029_v25 = vpop.f32.mrf.mxu0 }
 0x57c   :  { %v3030_v53 = vadd.f32 %v9970_v61, %v3029_v25 }
 0x57e   :  { %v3109_v19 = vmax.f32 %v3030_v53, 0.0  ;;  %v2390_v53 = vmul.f32 0.5, %v2389_v50 }
 0x582   :  { %v2750_v11 = vpop.f32.mrf.mxu2 }
 0x583   :  { %v3031_v37 = vpop.f32.mrf.mxu0  ;;  %v2840_v2 = vadd.f32 %v2839_v33, %v2750_v11  ;;  %v2846_v11 = vpop.f32.mrf.mxu3 }
 0x584   :  { %v3032_v52 = vadd.f32 %v9970_v61, %v3031_v37 }
 0x585   :  { %v2901_v8 = vadd.f32 %v9561_v23, %v2840_v2  ;;  %v9994_v2 = vpop.eup %7572 }
 0x586   :  { %v3110_v14 = vmax.f32 %v3032_v52, 0.0 }
 0x587   :  { %v2933_v38 = vmax.f32 %v2901_v8, 0.0 }
 0x588   :  { %v3141_v9 = vpack.c.bf16 %v3110_v14, %v3109_v19  ;;  %v2391_v14 = vsub.f32 1.5, %v2390_v53 }
 0x589   :  { %v2036_v47 = vpop.xlane.xlu0 %2035 }
 0x58a   :  { %v2072_v21 = vmul.f32 %v2036_v47, %v7947_v0  ;;  %v2752_v39 = vpop.f32.mrf.mxu2  ;;  %7072 = vmatmul.msk.bf16.vlgmr.msra.gmra.mxu1 %vm13645_vm11, %v3141_v9  ;;  %vm2393_vm11 = vweird.f32 %v2103_v58 }
 0x58b   :  { %v2842_v25 = vadd.f32 %v2841_v49, %v2752_v39  ;;  %v2408_v39 = vmul.f32 %v9994_v2, %v9983_v20  ;;  %vm2395_vm9 = vmor %vm2393_vm11, %vm2394_vm13  ;;  %vm13652_vm11 = vcmask 261120  }
 0x58c   :  { %v2104_v62 = vadd.f32 1e-05, %v2072_v21  ;;  %v2392_v21 = vmul.f32 %v9972_v40, %v2391_v14 }
 0x58d   :  { %v2902_v33 = vadd.f32 %v9561_v23, %v2842_v25  ;;  %v2409_v14 = vmul.f32 %v9994_v2, %v2408_v39 }
 0x58e   :  { %7574 = vrsqrt.f32 %v2104_v62  ;;  %v2042_v37 = vpop.xlane.xlu1 %2041 }
 0x58f   :  { %v2934_v52 = vmax.f32 %v2902_v33, 0.0  ;;  %v2074_v32 = vmul.f32 %v2042_v37, %v7947_v0  ;;  %v3034_v19 = vpop.f32.mrf.mxu0 }
 0x590   :  { %v3035_v25 = vadd.f32 %v9970_v61, %v3034_v19 }
 0x591   :  { %v2958_v47 = vpack.c.bf16 %v2934_v52, %v2933_v38  ;;  %v9992_v9 = vadd.f32 1e-05, %v2074_v32  ;;  %v2849_v38 = vpop.f32.mrf.mxu3 }
 0x592   :  { %v2755_v49 = vpop.f32.mrf.mxu2  ;;  %v3111_v1 = vmax.f32 %v3035_v25, 0.0 }
 0x593   :  { %7576 = vrsqrt.f32 %v9992_v9  ;;  %7063 = vmatmul.msk.bf16.gmra.mxu0 %vm13651_vm14, %v2958_v47  ;;  %v2845_v33 = vadd.f32 %v2844_v60, %v2755_v49  ;;  %v2396_v47 = vsel %vm2395_vm9, %v9972_v40, %v2392_v21  ;;  %v2410_v40 = vmul.f32 0.5, %v2409_v14  ;;  %v10016_v14 = vpop.permute.xlu2 %305 }
 0x594   :  { %v7575_v50 = vpop.eup %7574  ;;  %v2455_v49 = vmul.f32 %v2396_v47, %v9480_v28  ;;  %vm2403_vm9 = vweird.f32 %v2104_v62 }
 0x595   :  { %v2398_v8 = vmul.f32 %v7575_v50, %v2104_v62  ;;  %vm2404_vm14 = vweird.f32 %v7575_v50  ;;  %v2903_v58 = vadd.f32 %v9561_v23, %v2845_v33 }
 0x596   :  { %vm2405_vm13 = vmor %vm2403_vm9, %vm2404_vm14 }
 0x597   :  { %v2399_v53 = vmul.f32 %v7575_v50, %v2398_v8  ;;  %v3036_v37 = vpop.f32.mrf.mxu0  ;;  %vm13653_vm9 = vmmov %vm13652_vm11 }
 0x598   :  { %v3037_v52 = vadd.f32 %v9970_v61, %v3036_v37 }
 0x599   :  { %v7577_v32 = vpop.eup %7576  ;;  %v2400_v55 = vmul.f32 0.5, %v2399_v53  ;;  %v2935_v53 = vmax.f32 %v2903_v58, 0.0 }
 0x59a   :  { %v2418_v57 = vmul.f32 %v7577_v32, %v9992_v9  ;;  %v3112_v35 = vmax.f32 %v3037_v52, 0.0  ;;  %v2757_v36 = vpop.f32.mrf.mxu2  ;;  %vm2424_vm14 = vweird.f32 %v7577_v32 }
 0x59b   :  { %v2401_v19 = vsub.f32 1.5, %v2400_v55  ;;  %v2847_v60 = vadd.f32 %v2846_v11, %v2757_v36  ;;  %v2851_v11 = vpop.f32.mrf.mxu3 }
 0x59c   :  { %v2419_v8 = vmul.f32 %v7577_v32, %v2418_v57  ;;  %v3142_v37 = vpack.c.bf16 %v3112_v35, %v3111_v1  ;;  %v10009_v56 = vpop.permute.xlu0 %302  ;;  %v2490_v35 = vmul.f32 %v9742_v6, %v2455_v49  ;;  %v2411_v1 = vsub.f32 1.5, %v2410_v40 }
 0x59d   :  { %v2402_v21 = vmul.f32 %v7575_v50, %v2401_v19  ;;  %v2904_v39 = vadd.f32 %v9561_v23, %v2847_v60 }
 0x59e   :  { %v2420_v25 = vmul.f32 0.5, %v2419_v8  ;;  %7073 = vmatmul.msk.bf16.gmra.mxu1 %vm13652_vm11, %v3142_v37  ;;  %v2525_v58 = vadd.f32 %v9773_v13, %v2490_v35  ;;  %v2412_v60 = vmul.f32 %v9994_v2, %v2411_v1  ;;  %vm2423_vm11 = vweird.f32 %v9992_v9 }
 0x59f   :  { %v2406_v55 = vsel %vm2405_vm13, %v7575_v50, %v2402_v21  ;;  %v2936_v52 = vmax.f32 %v2904_v39, 0.0  ;;  %v3039_v33 = vpop.f32.mrf.mxu0  ;;  %vm2414_vm13 = vweird.f32 %v9994_v2  ;;  %vm2425_vm15 = vmor %vm2423_vm11, %vm2424_vm14 }
 0x5a0   :  { %v2456_v36 = vmul.f32 %v2406_v55, %v9674_v16  ;;  %v2421_v28 = vsub.f32 1.5, %v2420_v25  ;;  %v3040_v49 = vadd.f32 %v9970_v61, %v3039_v33 }
 0x5a1   :  { %v2959_v57 = vpack.c.bf16 %v2936_v52, %v2935_v53 }
 0x5a2   :  { %v2760_v47 = vpop.f32.mrf.mxu2  ;;  %v2491_v62 = vmul.f32 %v9742_v6, %v2456_v36  ;;  %v2422_v19 = vmul.f32 %v7577_v32, %v2421_v28  ;;  %v3113_v55 = vmax.f32 %v3040_v49, 0.0 }
 0x5a3   :  { %7064 = vmatmul.msk.bf16.gmra.mxu0 %vm13653_vm9, %v2959_v57  ;;  %v2850_v40 = vadd.f32 %v2849_v38, %v2760_v47  ;;  %vm2415_vm9 = vmor %vm2413_vm10, %vm2414_vm13  ;;  %v2854_v33 = vpop.f32.mrf.mxu3  ;;  %vm13268_vm10 = vcmp.eq.s32.totalorder %v13554_v26, %v10016_v14 }
 0x5a4   :  { %v495_v50 = vpop.permute.xlu0 %494  ;;  %v2526_v16 = vadd.f32 %v9773_v13, %v2491_v62  ;;  %v2426_v37 = vsel %vm2425_vm15, %v7577_v32, %v2422_v19  ;;  %v2416_v25 = vsel %vm2415_vm9, %v9994_v2, %v2412_v60  ;;  %vm13270_vm15 = vcmp.eq.s32.totalorder %v13554_v26, %v10009_v56 }
 0x5a5   :  { %v2458_v9 = vmul.f32 %v2426_v37, %v9725_v46  ;;  %vm533_vm14 = vcmp.eq.s32.totalorder %v13554_v26, %v495_v50  ;;  %v2905_v20 = vadd.f32 %v9561_v23, %v2850_v40  ;;  %v2457_v38 = vmul.f32 %v2416_v25, %v9496_v4  ;;  %v312_v46 = vpop.permute.xlu2 %311 }
 0x5a6   :  { %v10025_v8 = vpack.c.bf16 %v2526_v16, %v2525_v58  ;;  %v13656_v2 = vmov 0  ;;  %v13659_v4 = vmov 0  ;;  %vm13662_vm9 = vcmask 261120  }
 0x5a7   :  { %v3041_v21 = vpop.f32.mrf.mxu0  ;;  %v2493_v1 = vmul.f32 %v9742_v6, %v2458_v9  ;;  %v2937_v57 = vmax.f32 %v2905_v20, 0.0 }
 0x5a8   :  { %13654 = vst [vmem:[#allocation63_spill] sm:$0xff] %v10025_v8  ;;  %v3042_v39 = vadd.f32 %v9970_v61, %v3041_v21  ;;  %7022 = vmatmul.msk.bf16.gmra.mxu2 %vm13655_vm2, %v10025_v8  ;;  %vm10043_vm2 = vmor %vm13270_vm15, %vm533_vm14 }
 0x5a9   :  { %v13657_v2 = vsel %vm10043_vm2, 4294967295, %v13656_v2  ;;  %v2528_v50 = vadd.f32 %v9773_v13, %v2493_v1 }
 0x5aa   :  { %v3114_v53 = vmax.f32 %v3042_v39, 0.0  ;;  %v2762_v52 = vpop.f32.mrf.mxu2  ;;  %13658 = vst [vmem:[#allocation66_spill] sm:$0xff] %v13657_v2 }
 0x5ab   :  { %v2852_v32 = vadd.f32 %v2851_v11, %v2762_v52  ;;  %v2856_v60 = vpop.f32.mrf.mxu3 }
 0x5ac   :  { %v3143_v36 = vpack.c.bf16 %v3114_v53, %v3113_v55  ;;  %v498_v28 = vpop.permute.xlu0 %497  ;;  %v10094_v55 = vld [vmem:[%s9202_s10] ss:$0 sm:$0xff] }
 0x5ad   :  { %v2906_v35 = vadd.f32 %v9561_v23, %v2852_v32  ;;  %vm534_vm13 = vcmp.eq.s32.totalorder %v13554_v26, %v498_v28  ;;  %v2492_v23 = vmul.f32 %v9742_v6, %v2457_v38  ;;  %v504_v37 = vpop.permute.xlu2 %503  ;;  %v13674_v38 = vmov 0 }
 0x5ae   :  { %vm10052_vm11 = vmor %vm13268_vm10, %vm534_vm13  ;;  %7074 = vmatmul.msk.bf16.gmra.mxu1 %vm13662_vm9, %v3143_v36  ;;  %vm13272_vm10 = vcmp.eq.s32.totalorder %v13554_v26, %v312_v46  ;;  %vm536_vm15 = vcmp.eq.s32.totalorder %v13554_v26, %v504_v37 }
 0x5af   :  { %v13660_v4 = vsel %vm10052_vm11, 4294967295, %v13659_v4  ;;  %v2938_v11 = vmax.f32 %v2906_v35, 0.0  ;;  %v3044_v47 = vpop.f32.mrf.mxu0  ;;  %vm13269_vm14 = vmpackc.low %vm10052_vm11, %vm10043_vm2  ;;  %v2527_v16 = vadd.f32 %v9773_v13, %v2492_v23 }
 0x5b0   :  { %13661 = vst [vmem:[#allocation59_spill] sm:$0xff] %v13660_v4  ;;  %7053 = vmatmul.msk.bf16.gmra.mxu3 %vm13269_vm14, %v13501_v17  ;;  %vm13663_vm13 = vmmov %vm13662_vm9  ;;  %v3045_v49 = vadd.f32 %v9970_v61, %v3044_v47 }
 0x5b1   :  { %v2960_v62 = vpack.c.bf16 %v2938_v11, %v2937_v57  ;;  %v10079_v6 = vpack.c.bf16 %v2528_v50, %v2527_v16 }
 0x5b2   :  { %v2765_v19 = vpop.f32.mrf.mxu2  ;;  %v3115_v39 = vmax.f32 %v3045_v49, 0.0 }
 0x5b3   :  { %7065 = vmatmul.msk.bf16.gmra.mxu0 %vm13663_vm13, %v2960_v62  ;;  %13664 = vst [vmem:[#allocation55_spill] sm:$0xff] %v10079_v6  ;;  %v2855_v40 = vadd.f32 %v2854_v33, %v2765_v19  ;;  %v2859_v36 = vpop.f32.mrf.mxu3 }
 0x5b4   :  { %v309_v58 = vpop.permute.xlu0 %308 }
 0x5b5   :  { %vm13271_vm9 = vcmp.eq.s32.totalorder %v13554_v26, %v309_v58  ;;  %v2907_v53 = vadd.f32 %v10094_v55, %v2855_v40 }
 0x5b6   :  { %vm7364_vm14 = vmpackc.low %vm13272_vm10, %vm13271_vm9  ;;  %vm13665_vm9 = vcmp.eq.s32.totalorder %v13554_v26, %v10009_v56  ;;  %vm13666_vm10 = vcmp.eq.s32.totalorder %v13554_v26, %v10016_v14  ;;  %v13670_v56 = vmov 0 }
 0x5b7   :  { %v3046_v21 = vpop.f32.mrf.mxu0  ;;  %7365 = vmatpush.lsf.msk.bf16.msk.msrb.mxu3 %vm7364_vm14, %v13501_v17  ;;  %7397 = vmatpush.lsf.msk.bf16.msk.msrb.mxu1 %vm7364_vm14, %v13501_v17  ;;  %vm7366_vm2 = vmpackc.low %vm13666_vm10, %vm13665_vm9  ;;  %vm13667_vm14 = vcmp.eq.s32.totalorder %v13554_v26, %v9884_v43  ;;  %vm13669_vm10 = vcmp.eq.s32.totalorder %v13554_v26, %v312_v46 }
 0x5b8   :  { %v3047_v13 = vadd.f32 %v9970_v61, %v3046_v21  ;;  %7023 = vmatmul.msk.bf16.gmra.mxu2 %vm13663_vm13, %v10079_v6  ;;  %vm13668_vm13 = vcmp.eq.s32.totalorder %v13554_v26, %v9873_v3  ;;  %vm10107_vm9 = vmor %vm13669_vm10, %vm536_vm15  ;;  %v2939_v3 = vmax.f32 %v2907_v53, 0.0 }
 0x5b9   :  { %vm7368_vm11 = vmpackc.low %vm13668_vm13, %vm13667_vm14  ;;  %v13671_v56 = vsel %vm10107_vm9, 4294967295, %v13670_v56  ;;  %vm13680_vm14 = vcmask 261120  }
 0x5ba   :  { %v3116_v25 = vmax.f32 %v3047_v13, 0.0  ;;  %v2767_v9 = vpop.f32.mrf.mxu2  ;;  %13672 = vst [vmem:[#allocation54_spill] sm:$0xff] %v13671_v56  ;;  %vm13683_vm13 = vmmov %vm13680_vm14  ;;  %v13686_v13 = vld [vmem:[#allocation40_spill] sm:$0xff] }
 0x5bb   :  { %v2857_v52 = vadd.f32 %v2856_v60, %v2767_v9  ;;  %7367 = vmatpush.lsf.msk.bf16.msk.msrb.mxu3 %vm7366_vm2, %v13501_v17  ;;  %7399 = vmatpush.lsf.msk.bf16.msk.msrb.mxu1 %vm7366_vm2, %v13501_v17  ;;  %vm13673_vm2 = vcmp.eq.s32.totalorder %v13554_v26, %v309_v58  ;;  %v13688_v9 = vld [vmem:[#allocation32_spill] sm:$0xff] }
 0x5bc   :  { %v3144_v20 = vpack.c.bf16 %v3116_v25, %v3115_v39  ;;  %v501_v32 = vpop.permute.xlu0 %500  ;;  %vm13689_vm10 = vnez %v13688_v9 }
 0x5bd   :  { %v2908_v14 = vadd.f32 %v10094_v55, %v2857_v52  ;;  %vm535_vm0 = vcmp.eq.s32.totalorder %v13554_v26, %v501_v32  ;;  %v13690_v32 = vld [vmem:[#allocation33_spill] sm:$0xff] }
 0x5be   :  { %vm10115_vm4 = vmor %vm13673_vm2, %vm535_vm0  ;;  %7075 = vmatmul.msk.bf16.gmra.mxu1 %vm13677_vm6, %v3144_v20  ;;  %vm13678_vm6 = vcmp.eq.s32.totalorder %v13554_v26, %v13625_v24  ;;  %vm13679_vm0 = vcmp.eq.s32.totalorder %v13554_v26, %v13621_v51  ;;  %v2861_v26 = vpop.f32.mrf.mxu3 }
 0x5bf   :  { %v13675_v38 = vsel %vm10115_vm4, 4294967295, %v13674_v38  ;;  %v2940_v43 = vmax.f32 %v2908_v14, 0.0  ;;  %v3049_v33 = vpop.f32.mrf.mxu0  ;;  %7369 = vmatpush.lsf.msk.bf16.msk.msrb.mxu3 %vm7368_vm11, %v13501_v17  ;;  %7401 = vmatpush.lsf.msk.bf16.msk.msrb.mxu1 %vm7368_vm11, %v13501_v17  ;;  %vm7054_vm15 = vmpackc.low %vm10107_vm9, %vm10115_vm4 }
 0x5c0   :  { %13676 = vst [vmem:[#allocation64_spill] sm:$0xff] %v13675_v38  ;;  %7055 = vmatmul.msk.bf16.gmra.mxu3 %vm7054_vm15, %v13501_v17  ;;  %vm7370_vm11 = vmpackc.low %vm13679_vm0, %vm13678_vm6  ;;  %v3050_v35 = vadd.f32 %v9970_v61, %v3049_v33 }
 0x5c1   :  { %v2961_v28 = vpack.c.bf16 %v2940_v43, %v2939_v3  ;;  %v13693_v43 = vld [vmem:[#allocation34_spill] sm:$0xff] }
 0x5c2   :  { %v2770_v46 = vpop.f32.mrf.mxu2  ;;  %v3117_v51 = vmax.f32 %v3050_v35, 0.0  ;;  %vm13694_vm6 = vnez %v13693_v43 }
 0x5c3   :  { %7066 = vmatmul.msk.bf16.gmra.mxu0 %vm13680_vm14, %v2961_v28  ;;  %7371 = vmatpush.lsf.msk.bf16.msk.msrb.mxu3 %vm7370_vm11, %v13501_v17  ;;  %v2860_v1 = vadd.f32 %v2859_v36, %v2770_v46  ;;  %v13695_v36 = vld [vmem:[#allocation37_spill] sm:$0xff] }
 0x5c4   :  { %7403 = vmatpush.lsf.msk.bf16.msk.msrb.mxu1 %vm7370_vm11, %v13501_v17  ;;  %vm13696_vm0 = vnez %v13695_v36 }
 0x5c5   :  { %v2909_v62 = vadd.f32 %v10094_v55, %v2860_v1  ;;  %v13697_v1 = vld [vmem:[#allocation39_spill] sm:$0xff] }
 0x5c6   :  { %v2864_v33 = vpop.f32.mrf.mxu3  ;;  %vm13698_vm11 = vnez %v13697_v1 }
 0x5c7   :  { %v3051_v57 = vpop.f32.mrf.mxu0  ;;  %7373 = vmatpush.lsf.msk.bf16.msk.msrb.mxu3 %vm9010_vm7, %v13501_v17  ;;  %v2941_v60 = vmax.f32 %v2909_v62, 0.0 }
 0x5c8   :  { %v3052_v24 = vadd.f32 %v9970_v61, %v3051_v57  ;;  %7405 = vmatpush.lsf.msk.bf16.msk.msrb.mxu1 %vm9010_vm7, %v13501_v17  ;;  %vm13685_vm7 = vmmov %vm13683_vm13 }
 0x5c9   :  { %vm13692_vm2 = vmmov %vm13685_vm7 }
 0x5ca   :  { %v3118_v47 = vmax.f32 %v3052_v24, 0.0  ;;  %v2772_v23 = vpop.f32.mrf.mxu2 }
 0x5cb   :  { %v2862_v19 = vadd.f32 %v2861_v26, %v2772_v23  ;;  %7375 = vmatpush.lsf.msk.bf16.msk.msrb.mxu3 %vm8834_vm1, %v13501_v17  ;;  %v13699_v26 = vld [vmem:[#allocation41_spill] sm:$0xff] }
 0x5cc   :  { %v3145_v58 = vpack.c.bf16 %v3118_v47, %v3117_v51  ;;  %7407 = vmatpush.lsf.msk.bf16.msk.msrb.mxu1 %vm8834_vm1, %v13501_v17  ;;  %vm13687_vm1 = vnez %v13686_v13  ;;  %vm13700_vm14 = vnez %v13699_v26 }
 0x5cd   :  { %v2910_v16 = vadd.f32 %v10094_v55, %v2862_v19  ;;  %v13702_v19 = vld [vmem:[#allocation44_spill] sm:$0xff] }
 0x5ce   :  { %7076 = vmatmul.msk.bf16.gmra.mxu1 %vm13683_vm13, %v3145_v58  ;;  %v2866_v23 = vpop.f32.mrf.mxu3  ;;  %vm13701_vm13 = vmmov %vm13692_vm2 }
 0x5cf   :  { %v2942_v49 = vmax.f32 %v2910_v16, 0.0  ;;  %v3054_v37 = vpop.f32.mrf.mxu0  ;;  %7377 = vmatpush.lsf.msk.bf16.msk.msrb.mxu3 %vm8809_vm5, %v13501_v17 }
 0x5d0   :  { %7409 = vmatpush.lsf.msk.bf16.msk.msrb.mxu1 %vm8809_vm5, %v13501_v17  ;;  %v3055_v39 = vadd.f32 %v9970_v61, %v3054_v37  ;;  %vm13691_vm5 = vnez %v13690_v32 }
 0x5d1   :  { %v2962_v21 = vpack.c.bf16 %v2942_v49, %v2941_v60  ;;  %v13704_v60 = vld [vmem:[#allocation45_spill] sm:$0xff] }
 0x5d2   :  { %v3119_v52 = vmax.f32 %v3055_v39, 0.0 }
 0x5d3   :  { %7067 = vmatmul.msk.bf16.gmra.mxu0 %vm13685_vm7, %v2962_v21  ;;  %7379 = vmatpush.lsf.msk.bf16.msk.msrb.mxu3 %vm13687_vm1, %v13501_v17  ;;  %vm13703_vm7 = vnez %v13702_v19 }
 0x5d4   :  { %7411 = vmatpush.lsf.msk.bf16.msk.msrb.mxu1 %vm13687_vm1, %v13501_v17  ;;  %vm13705_vm1 = vnez %v13704_v60 }
 0x5d5   :  { %7322 = vllmr.8.mxu3 }
 0x5d7   :  { %v3056_v25 = vpop.f32.mrf.mxu0  ;;  %7381 = vmatpush.lsf.msk.bf16.msk.msrb.mxu3 %vm13689_vm10, %v13501_v17  ;;  %vm13706_vm10 = vmmov %vm13692_vm2 }
 0x5d8   :  { %v3057_v53 = vadd.f32 %v9970_v61, %v3056_v25 }
 0x5da   :  { %v3120_v20 = vmax.f32 %v3057_v53, 0.0 }
 0x5db   :  { %7383 = vmatpush.lsf.msk.bf16.msk.msrb.mxu3 %vm13691_vm5, %v13501_v17  ;;  %vm13707_vm5 = vmmov %vm13692_vm2 }
 0x5dc   :  { %v3146_v14 = vpack.c.bf16 %v3120_v20, %v3119_v52 }
 0x5dd   :  { %7279 = vllmr.8.mxu1 }
 0x5de   :  { %7077 = vmatmul.msk.bf16.gmra.mxu1 %vm13692_vm2, %v3146_v14 }
 0x5df   :  { %v3059_v3 = vpop.f32.mrf.mxu0  ;;  %7385 = vmatpush.lsf.msk.bf16.msk.msrb.mxu3 %vm13694_vm6, %v13501_v17  ;;  %vm13708_vm6 = vmmov %vm13692_vm2 }
 0x5e0   :  { %v3060_v28 = vadd.f32 %v9970_v61, %v3059_v3  ;;  %v10207_v3 = vld [vmem:[%s9978_s25] ss:$0 sm:$0xff] }
 0x5e2   :  { %v3121_v11 = vmax.f32 %v3060_v28, 0.0 }
 0x5e3   :  { %7387 = vmatpush.lsf.msk.bf16.msk.msrb.mxu3 %vm13696_vm0, %v13501_v17  ;;  %vm13709_vm0 = vmmov %vm13692_vm2 }
 0x5e5   :  { %v2775_v46 = vpop.f32.mrf.mxu2 }
 0x5e6   :  { %v2865_v51 = vadd.f32 %v2864_v33, %v2775_v46 }
 0x5e7   :  { %v3061_v35 = vpop.f32.mrf.mxu0  ;;  %7389 = vmatpush.lsf.msk.bf16.msk.msrb.mxu3 %vm13698_vm11, %v13501_v17  ;;  %vm13710_vm11 = vmmov %vm13709_vm0 }
 0x5e8   :  { %v3062_v57 = vadd.f32 %v9970_v61, %v3061_v35  ;;  %v2911_v50 = vadd.f32 %v10094_v55, %v2865_v51 }
 0x5ea   :  { %v3122_v24 = vmax.f32 %v3062_v57, 0.0  ;;  %v2943_v49 = vmax.f32 %v2911_v50, 0.0  ;;  %v2869_v40 = vpop.f32.mrf.mxu3 }
 0x5eb   :  { %7391 = vmatpush.lsf.msk.bf16.msk.msrb.mxu3 %vm13700_vm14, %v13501_v17  ;;  %vm13711_vm14 = vmmov %vm13709_vm0 }
 0x5ec   :  { %v3147_v47 = vpack.c.bf16 %v3122_v24, %v3121_v11 }
 0x5ed   :  { %v2777_v62 = vpop.f32.mrf.mxu2 }
 0x5ee   :  { %7078 = vmatmul.msk.bf16.gmra.mxu1 %vm13701_vm13, %v3147_v47  ;;  %v2867_v58 = vadd.f32 %v2866_v23, %v2777_v62  ;;  %vm13712_vm13 = vmmov %vm13709_vm0 }
 0x5ef   :  { %7393 = vmatpush.lsf.msk.bf16.msk.msrb.mxu3 %vm13703_vm7, %v13501_v17  ;;  %vm13713_vm7 = vmmov %vm13709_vm0 }
 0x5f0   :  { %v2912_v16 = vadd.f32 %v10094_v55, %v2867_v58 }
 0x5f2   :  { %v2944_v37 = vmax.f32 %v2912_v16, 0.0  ;;  %v2871_v25 = vpop.f32.mrf.mxu3 }
 0x5f3   :  { %7395 = vmatpush.lsf.msk.bf16.msk.msrb.mxu3 %vm13705_vm1, %v13501_v17  ;;  %vm13714_vm1 = vmmov %vm13709_vm0 }
 0x5f4   :  { %v2963_v21 = vpack.c.bf16 %v2944_v37, %v2943_v49 }
 0x5f5   :  { %v2780_v13 = vpop.f32.mrf.mxu2 }
 0x5f6   :  { %7068 = vmatmul.msk.bf16.gmra.mxu0 %vm13706_vm10, %v2963_v21  ;;  %v2870_v39 = vadd.f32 %v2869_v40, %v2780_v13  ;;  %vm13715_vm10 = vmmov %vm13709_vm0 }
 0x5f8   :  { %v2913_v53 = vadd.f32 %v10094_v55, %v2870_v39 }
 0x5fa   :  { %v2945_v32 = vmax.f32 %v2913_v53, 0.0 }
 0x5fd   :  { %v2782_v9 = vpop.f32.mrf.mxu2 }
 0x5fe   :  { %v2872_v52 = vadd.f32 %v2871_v25, %v2782_v9 }
 0x600   :  { %v2914_v20 = vadd.f32 %v10094_v55, %v2872_v52 }
 0x602   :  { %v2946_v14 = vmax.f32 %v2914_v20, 0.0 }
 0x604   :  { %v2964_v43 = vpack.c.bf16 %v2946_v14, %v2945_v32 }
 0x606   :  { %7069 = vmatmul.msk.bf16.gmra.mxu0 %vm13707_vm5, %v2964_v43  ;;  %vm13716_vm5 = vmmov %vm13709_vm0 }
 0x607   :  { %v3219_v33 = vpop.f32.mrf.mxu1 }
 0x608   :  { %v10211_v36 = vadd.f32 %v10207_v3, %v3219_v33 }
 0x60a   :  { %v3299_v28 = vsel %vm13692_vm2, %v10211_v36, 0.0  ;;  %vm13717_vm2 = vmmov %vm13709_vm0 }
 0x60b   :  { %3300 = vadd.xlane.f32.xlu1 %v3299_v28 }
 0x60f   :  { %v3221_v46 = vpop.f32.mrf.mxu1 }
 0x610   :  { %v10216_v35 = vadd.f32 %v10207_v3, %v3221_v46  ;;  %v3064_v1 = vpop.f32.mrf.mxu0 }
 0x611   :  { %v3065_v11 = vadd.f32 %v9970_v61, %v3064_v1 }
 0x612   :  { %v3302_v57 = vsel %vm13708_vm6, %v10216_v35, 0.0  ;;  %vm13718_vm6 = vmmov %vm13709_vm0 }
 0x613   :  { %3303 = vadd.xlane.f32.xlu0 %v3302_v57  ;;  %v3123_v51 = vmax.f32 %v3065_v11, 0.0 }
 0x618   :  { %v3066_v24 = vpop.f32.mrf.mxu0 }
 0x619   :  { %v3067_v26 = vadd.f32 %v9970_v61, %v3066_v24 }
 0x61b   :  { %v3124_v47 = vmax.f32 %v3067_v26, 0.0  ;;  %v3224_v23 = vpop.f32.mrf.mxu1 }
 0x61c   :  { %v10223_v62 = vadd.f32 %v10207_v3, %v3224_v23 }
 0x61d   :  { %v3148_v19 = vpack.c.bf16 %v3124_v47, %v3123_v51 }
 0x61e   :  { %v3305_v50 = vsel %vm13709_vm0, %v10223_v62, 0.0 }
 0x61f   :  { %3306 = vadd.xlane.f32.xlu2 %v3305_v50  ;;  %7079 = vmatmul.msk.bf16.gmra.mxu1 %vm13710_vm11, %v3148_v19  ;;  %vm13719_vm11 = vmmov %vm13709_vm0 }
 0x620   :  { %v3069_v58 = vpop.f32.mrf.mxu0 }
 0x621   :  { %v3070_v37 = vadd.f32 %v9970_v61, %v3069_v58  ;;  %v4185_v58 = vld [vmem:[%s10244_s29 + $0x30] sm:$0xff] }
 0x623   :  { %v3226_v16 = vpop.f32.mrf.mxu1  ;;  %v3125_v13 = vmax.f32 %v3070_v37, 0.0 }
 0x624   :  { %v10229_v60 = vadd.f32 %v10207_v3, %v3226_v16  ;;  %v4186_v16 = vld [vmem:[%s10244_s29 + $0x38] sm:$0xff] }
 0x626   :  { %v3308_v49 = vsel %vm13711_vm14, %v10229_v60, 0.0  ;;  %vm13720_vm14 = vmmov %vm13709_vm0 }
 0x627   :  { %3309 = vadd.xlane.f32.xlu1 %v3308_v49 }
 0x628   :  { %v3071_v40 = vpop.f32.mrf.mxu0 }
 0x629   :  { %v3072_v21 = vadd.f32 %v9970_v61, %v3071_v40  ;;  %v4259_v40 = vpack.c.bf16 %v4186_v16, %v4185_v58 }
 0x62b   :  { %v3126_v39 = vmax.f32 %v3072_v21, 0.0  ;;  %v3229_v25 = vpop.f32.mrf.mxu1  ;;  %v2785_v52 = vpop.f32.mrf.mxu2  ;;  %4266 = vmatpush.bf16.msrb.mxu0 %v4259_v40 }
 0x62c   :  { %v10236_v9 = vadd.f32 %v10207_v3, %v3229_v25 }
 0x62d   :  { %v3149_v53 = vpack.c.bf16 %v3126_v39, %v3125_v13 }
 0x62e   :  { %v3311_v20 = vsel %vm13712_vm13, %v10236_v9, 0.0  ;;  %vm13721_vm13 = vmmov %vm13709_vm0 }
 0x62f   :  { %3312 = vadd.xlane.f32.xlu0 %v3311_v20  ;;  %7080 = vmatmul.msk.bf16.gmra.mxu1 %vm13713_vm7, %v3149_v53  ;;  %v4184_v20 = vld [vmem:[%s10244_s29 + $0x28] sm:$0xff]  ;;  %vm13722_vm7 = vmmov %vm13709_vm0 }
 0x630   :  { %v3074_v32 = vpop.f32.mrf.mxu0 }
 0x631   :  { %v3075_v28 = vadd.f32 %v9970_v61, %v3074_v32 }
 0x633   :  { %v2874_v14 = vpop.f32.mrf.mxu3  ;;  %v3231_v43 = vpop.f32.mrf.mxu1  ;;  %v3127_v26 = vmax.f32 %v3075_v28, 0.0 }
 0x634   :  { %v10247_v33 = vadd.f32 %v10207_v3, %v3231_v43  ;;  %v2787_v46 = vpop.f32.mrf.mxu2  ;;  %v2875_v57 = vadd.f32 %v2874_v14, %v2785_v52  ;;  %v4183_v52 = vld [vmem:[%s10244_s29 + $0x20] sm:$0xff] }
 0x635   :  { %v4258_v14 = vpack.c.bf16 %v4184_v20, %v4183_v52 }
 0x636   :  { %v3314_v1 = vsel %vm13714_vm1, %v10247_v33, 0.0  ;;  %v2915_v23 = vadd.f32 %v10094_v55, %v2875_v57  ;;  %vm13723_vm1 = vmmov %vm13709_vm0 }
 0x637   :  { %3315 = vadd.xlane.f32.xlu2 %v3314_v1  ;;  %4267 = vmatpush.bf16.msrb.mxu0 %v4258_v14 }
 0x638   :  { %v3076_v11 = vpop.f32.mrf.mxu0  ;;  %v2947_v39 = vmax.f32 %v2915_v23, 0.0 }
 0x639   :  { %v3077_v24 = vadd.f32 %v9970_v61, %v3076_v11 }
 0x63b   :  { %v3128_v51 = vmax.f32 %v3077_v24, 0.0  ;;  %v2876_v47 = vpop.f32.mrf.mxu3  ;;  %v3234_v50 = vpop.f32.mrf.mxu1 }
 0x63c   :  { %v2877_v19 = vadd.f32 %v2876_v47, %v2787_v46  ;;  %v10257_v37 = vadd.f32 %v10207_v3, %v3234_v50  ;;  %v2790_v32 = vpop.f32.mrf.mxu2 }
 0x63d   :  { %v3150_v49 = vpack.c.bf16 %v3128_v51, %v3127_v26 }
 0x63e   :  { %v2916_v21 = vadd.f32 %v10094_v55, %v2877_v19  ;;  %v3317_v13 = vsel %vm13715_vm10, %v10257_v37, 0.0  ;;  %vm13725_vm10 = vmmov %vm13709_vm0 }
 0x63f   :  { %7081 = vmatmul.msk.bf16.gmra.mxu1 %vm13716_vm5, %v3150_v49  ;;  %3318 = vadd.xlane.f32.xlu1 %v3317_v13  ;;  %vm13726_vm5 = vmmov %vm13709_vm0 }
 0x640   :  { %v2948_v25 = vmax.f32 %v2916_v21, 0.0  ;;  %v3079_v53 = vpop.f32.mrf.mxu0 }
 0x641   :  { %v3080_v57 = vadd.f32 %v9970_v61, %v3079_v53 }
 0x642   :  { %v2965_v43 = vpack.c.bf16 %v2948_v25, %v2947_v39 }
 0x643   :  { %v2879_v28 = vpop.f32.mrf.mxu3  ;;  %v3236_v46 = vpop.f32.mrf.mxu1  ;;  %v3129_v47 = vmax.f32 %v3080_v57, 0.0 }
 0x644   :  { %7070 = vmatmul.msk.bf16.gmra.mxu0 %vm13717_vm2, %v2965_v43  ;;  %v10267_v1 = vadd.f32 %v10207_v3, %v3236_v46  ;;  %v2880_v24 = vadd.f32 %v2879_v28, %v2790_v32  ;;  %v2792_v23 = vpop.f32.mrf.mxu2  ;;  %vm13727_vm2 = vmmov %vm13709_vm0 }
 0x646   :  { %v3320_v11 = vsel %vm13718_vm6, %v10267_v1, 0.0  ;;  %v2917_v58 = vadd.f32 %v10094_v55, %v2880_v24  ;;  %vm13729_vm6 = vmmov %vm13709_vm0 }
 0x647   :  { %3321 = vadd.xlane.f32.xlu0 %v3320_v11 }
 0x648   :  { %v3081_v26 = vpop.f32.mrf.mxu0  ;;  %v2949_v25 = vmax.f32 %v2917_v58, 0.0 }
 0x649   :  { %v3082_v51 = vadd.f32 %v9970_v61, %v3081_v26 }
 0x64b   :  { %v3130_v19 = vmax.f32 %v3082_v51, 0.0  ;;  %v2881_v50 = vpop.f32.mrf.mxu3  ;;  %v3239_v49 = vpop.f32.mrf.mxu1 }
 0x64c   :  { %v2882_v16 = vadd.f32 %v2881_v50, %v2792_v23  ;;  %v10275_v21 = vadd.f32 %v10207_v3, %v3239_v49 }
 0x64d   :  { %v3151_v40 = vpack.c.bf16 %v3130_v19, %v3129_v47  ;;  %v13724_v19 = vld [vmem:[#allocation4_spill] sm:$0xff] }
 0x64e   :  { %v2918_v13 = vadd.f32 %v10094_v55, %v2882_v16  ;;  %v3323_v39 = vsel %vm13709_vm0, %v10275_v21, 0.0 }
 0x64f   :  { %7082 = vmatmul.msk.bf16.gmra.mxu1 %vm13719_vm11, %v3151_v40  ;;  %3324 = vadd.xlane.f32.xlu2 %v3323_v39  ;;  %v13728_v39 = vld [vmem:[#allocation7_spill] sm:$0xff]  ;;  %vm13730_vm11 = vmmov %vm13709_vm0 }
 0x650   :  { %v2950_v53 = vmax.f32 %v2918_v13, 0.0  ;;  %v3084_v52 = vpop.f32.mrf.mxu0 }
 0x651   :  { %v3085_v43 = vadd.f32 %v9970_v61, %v3084_v52 }
 0x652   :  { %v2966_v20 = vpack.c.bf16 %v2950_v53, %v2949_v25 }
 0x653   :  { %v3241_v32 = vpop.f32.mrf.mxu1  ;;  %v3131_v57 = vmax.f32 %v3085_v43, 0.0 }
 0x654   :  { %7071 = vmatmul.msk.bf16.gmra.mxu0 %vm13720_vm14, %v2966_v20  ;;  %v10283_v14 = vadd.f32 %v10207_v3, %v3241_v32  ;;  %vm13732_vm14 = vmmov %vm13709_vm0 }
 0x656   :  { %v3326_v55 = vsel %vm13721_vm13, %v10283_v14, 0.0  ;;  %vm13733_vm13 = vmmov %vm13709_vm0 }
 0x657   :  { %3327 = vadd.xlane.f32.xlu1 %v3326_v55 }
 0x658   :  { %v3086_v28 = vpop.f32.mrf.mxu0 }
 0x659   :  { %v3087_v46 = vadd.f32 %v9970_v61, %v3086_v28 }
 0x65b   :  { %v3132_v11 = vmax.f32 %v3087_v46, 0.0  ;;  %v3244_v24 = vpop.f32.mrf.mxu1 }
 0x65c   :  { %v10290_v51 = vadd.f32 %v10207_v3, %v3244_v24 }
 0x65d   :  { %v3152_v26 = vpack.c.bf16 %v3132_v11, %v3131_v57  ;;  %v13731_v57 = vld [vmem:[#allocation15_spill] sm:$0xff] }
 0x65e   :  { %v3329_v47 = vsel %vm13722_vm7, %v10290_v51, 0.0  ;;  %vm13735_vm7 = vmmov %vm13709_vm0 }
 0x65f   :  { %7083 = vmatmul.msk.bf16.gmra.mxu1 %vm13723_vm1, %v3152_v26  ;;  %3330 = vadd.xlane.f32.xlu0 %v3329_v47  ;;  %vm13736_vm1 = vmmov %vm13709_vm0 }
 0x663   :  { %v3246_v23 = vpop.f32.mrf.mxu1 }
 0x664   :  { %7092 = vmatmul.msk.bf16.vlgmr.msrb.gmra.mxu0 %vm13725_vm10, %v13724_v19  ;;  %v10298_v50 = vadd.f32 %v10207_v3, %v3246_v23  ;;  %vm13737_vm10 = vmmov %vm13709_vm0 }
 0x666   :  { %v3332_v58 = vsel %vm13726_vm5, %v10298_v50, 0.0  ;;  %vm13738_vm5 = vmmov %vm13709_vm0 }
 0x667   :  { %3333 = vadd.xlane.f32.xlu2 %v3332_v58 }
 0x66b   :  { %v3249_v16 = vpop.f32.mrf.mxu1 }
 0x66c   :  { %v10303_v49 = vadd.f32 %v10207_v3, %v3249_v16  ;;  %v13734_v16 = vld [vmem:[#allocation31_spill] sm:$0xff] }
 0x66e   :  { %v3335_v40 = vsel %vm13727_vm2, %v10303_v49, 0.0  ;;  %vm13739_vm2 = vmmov %vm13709_vm0 }
 0x66f   :  { %3336 = vadd.xlane.f32.xlu1 %v3335_v40 }
 0x673   :  { %v3251_v13 = vpop.f32.mrf.mxu1  ;;  %v3089_v25 = vpop.f32.mrf.mxu0 }
 0x674   :  { %7093 = vmatmul.msk.bf16.gmra.mxu0 %vm13729_vm6, %v13728_v39  ;;  %v10310_v53 = vadd.f32 %v10207_v3, %v3251_v13  ;;  %v3090_v20 = vadd.f32 %v9970_v61, %v3089_v25  ;;  %vm13740_vm6 = vmmov %vm13709_vm0 }
 0x676   :  { %v3338_v52 = vsel %vm13709_vm0, %v10310_v53, 0.0  ;;  %v3133_v55 = vmax.f32 %v3090_v20, 0.0 }
 0x677   :  { %3339 = vadd.xlane.f32.xlu1 %v3338_v52 }
 0x67b   :  { %v3091_v32 = vpop.f32.mrf.mxu0 }
 0x67c   :  { %v3092_v43 = vadd.f32 %v9970_v61, %v3091_v32 }
 0x67e   :  { %v3134_v28 = vmax.f32 %v3092_v43, 0.0 }
 0x680   :  { %v3153_v46 = vpack.c.bf16 %v3134_v28, %v3133_v55 }
 0x682   :  { %7084 = vmatmul.msk.bf16.gmra.mxu1 %vm13730_vm11, %v3153_v46  ;;  %vm13741_vm11 = vmmov %vm13709_vm0 }
 0x683   :  { %v3094_v11 = vpop.f32.mrf.mxu0 }
 0x684   :  { %7094 = vmatmul.msk.bf16.gmra.mxu0 %vm13732_vm14, %v13731_v57  ;;  %v3095_v24 = vadd.f32 %v9970_v61, %v3094_v11  ;;  %vm13742_vm14 = vmmov %vm13709_vm0 }
 0x686   :  { %v3135_v23 = vmax.f32 %v3095_v24, 0.0 }
 0x68b   :  { %v3096_v26 = vpop.f32.mrf.mxu0 }
 0x68c   :  { %v3097_v47 = vadd.f32 %v9970_v61, %v3096_v26 }
 0x68e   :  { %v3136_v19 = vmax.f32 %v3097_v47, 0.0 }
 0x690   :  { %v3154_v58 = vpack.c.bf16 %v3136_v19, %v3135_v23 }
 0x692   :  { %7085 = vmatmul.msk.bf16.gmra.mxu1 %vm13733_vm13, %v3154_v58  ;;  %vm13743_vm13 = vmmov %vm13709_vm0 }
 0x694   :  { %7095 = vmatmul.msk.bf16.gmra.mxu0 %vm13735_vm7, %v13734_v16  ;;  %vm13744_vm7 = vmmov %vm13709_vm0 }
 0x69c   :  { %v3254_v40 = vpop.f32.mrf.mxu1 }
 0x69d   :  { %v10325_v13 = vadd.f32 %v10207_v3, %v3254_v40 }
 0x69f   :  { %v3341_v39 = vsel %vm13736_vm1, %v10325_v13, 0.0  ;;  %vm13745_vm1 = vmmov %vm13709_vm0 }
 0x6a0   :  { %3342 = vadd.xlane.f32.xlu1 %v3341_v39 }
 0x6a4   :  { %v3256_v25 = vpop.f32.mrf.mxu1 }
 0x6a5   :  { %v10330_v52 = vadd.f32 %v10207_v3, %v3256_v25 }
 0x6a7   :  { %v3344_v20 = vsel %vm13737_vm10, %v10330_v52, 0.0  ;;  %vm13746_vm10 = vmmov %vm13709_vm0 }
 0x6a8   :  { %3345 = vadd.xlane.f32.xlu0 %v3344_v20 }
 0x6ac   :  { %v3259_v32 = vpop.f32.mrf.mxu1 }
 0x6ad   :  { %v10335_v43 = vadd.f32 %v10207_v3, %v3259_v32 }
 0x6af   :  { %v3347_v55 = vsel %vm13738_vm5, %v10335_v43, 0.0  ;;  %vm13747_vm5 = vmmov %vm13709_vm0 }
 0x6b0   :  { %3348 = vadd.xlane.f32.xlu2 %v3347_v55 }
 0x6b4   :  { %v3261_v28 = vpop.f32.mrf.mxu1 }
 0x6b5   :  { %v10340_v46 = vadd.f32 %v10207_v3, %v3261_v28 }
 0x6b7   :  { %v3350_v57 = vsel %vm13739_vm2, %v10340_v46, 0.0  ;;  %vm13748_vm2 = vmmov %vm13709_vm0 }
 0x6b8   :  { %3351 = vadd.xlane.f32.xlu1 %v3350_v57 }
 0x6bc   :  { %v3264_v11 = vpop.f32.mrf.mxu1 }
 0x6bd   :  { %v10345_v24 = vadd.f32 %v10207_v3, %v3264_v11 }
 0x6bf   :  { %v3353_v26 = vsel %vm13740_vm6, %v10345_v24, 0.0  ;;  %vm13749_vm6 = vmmov %vm13709_vm0 }
 0x6c0   :  { %3354 = vadd.xlane.f32.xlu0 %v3353_v26 }
 0x6c1   :  { %v3099_v47 = vpop.f32.mrf.mxu0 }
 0x6c2   :  { %v3100_v16 = vadd.f32 %v9970_v61, %v3099_v47 }
 0x6c4   :  { %v3266_v23 = vpop.f32.mrf.mxu1  ;;  %v3137_v25 = vmax.f32 %v3100_v16, 0.0 }
 0x6c5   :  { %v10350_v19 = vadd.f32 %v10207_v3, %v3266_v23 }
 0x6c7   :  { %v3356_v58 = vsel %vm13709_vm0, %v10350_v19, 0.0 }
 0x6c8   :  { %3357 = vadd.xlane.f32.xlu2 %v3356_v58 }
 0x6c9   :  { %v3101_v40 = vpop.f32.mrf.mxu0 }
 0x6ca   :  { %v3102_v39 = vadd.f32 %v9970_v61, %v3101_v40 }
 0x6cc   :  { %v3138_v20 = vmax.f32 %v3102_v39, 0.0  ;;  %v3269_v32 = vpop.f32.mrf.mxu1 }
 0x6cd   :  { %v10357_v55 = vadd.f32 %v10207_v3, %v3269_v32 }
 0x6ce   :  { %v3155_v28 = vpack.c.bf16 %v3138_v20, %v3137_v25 }
 0x6cf   :  { %v3359_v57 = vsel %vm13741_vm11, %v10357_v55, 0.0  ;;  %vm13750_vm11 = vmmov %vm13709_vm0 }
 0x6d0   :  { %3360 = vadd.xlane.f32.xlu1 %v3359_v57  ;;  %7086 = vmatmul.msk.bf16.gmra.mxu1 %vm13742_vm14, %v3155_v28  ;;  %vm13751_vm14 = vmmov %vm13709_vm0 }
 0x6d1   :  { %v3104_v11 = vpop.f32.mrf.mxu0 }
 0x6d2   :  { %v3105_v58 = vadd.f32 %v9970_v61, %v3104_v11 }
 0x6d4   :  { %v3271_v26 = vpop.f32.mrf.mxu1  ;;  %v3139_v39 = vmax.f32 %v3105_v58, 0.0 }
 0x6d5   :  { %v10363_v47 = vadd.f32 %v10207_v3, %v3271_v26  ;;  %v10375_v26 = vpop.xlane.xlu1 %3300 }
 0x6d7   :  { %v3362_v23 = vsel %vm13743_vm13, %v10363_v47, 0.0  ;;  %vm13752_vm13 = vmmov %vm13709_vm0 }
 0x6d8   :  { %3363 = vadd.xlane.f32.xlu0 %v3362_v23 }
 0x6d9   :  { %v3106_v16 = vpop.f32.mrf.mxu0 }
 0x6da   :  { %v3107_v40 = vadd.f32 %v9970_v61, %v3106_v16 }
 0x6dc   :  { %v3140_v25 = vmax.f32 %v3107_v40, 0.0  ;;  %v3274_v20 = vpop.f32.mrf.mxu1 }
 0x6dd   :  { %v10370_v32 = vadd.f32 %v10207_v3, %v3274_v20  ;;  %v10382_v58 = vpop.xlane.xlu1 %3309 }
 0x6de   :  { %v3156_v28 = vpack.c.bf16 %v3140_v25, %v3139_v39 }
 0x6df   :  { %v3365_v57 = vsel %vm13744_vm7, %v10370_v32, 0.0  ;;  %vm13753_vm7 = vmmov %vm13709_vm0 }
 0x6e0   :  { %3366 = vadd.xlane.f32.xlu2 %v3365_v57  ;;  %7087 = vmatmul.msk.bf16.gmra.mxu1 %vm13745_vm1, %v3156_v28  ;;  %v10393_v57 = vpop.xlane.xlu2 %3306  ;;  %vm13754_vm1 = vmmov %vm13709_vm0 }
 0x6e4   :  { %v3276_v11 = vpop.f32.mrf.mxu1 }
 0x6e5   :  { %v10378_v23 = vadd.f32 %v10207_v3, %v3276_v11  ;;  %v10384_v16 = vpop.xlane.xlu1 %3318 }
 0x6e7   :  { %v3368_v61 = vsel %vm13746_vm10, %v10378_v23, 0.0  ;;  %vm13755_vm10 = vmmov %vm13709_vm0 }
 0x6e8   :  { %3369 = vadd.xlane.f32.xlu1 %v3368_v61  ;;  %v10404_v2 = vpop.xlane.xlu2 %3315 }
 0x6ed   :  { %v10386_v40 = vpop.xlane.xlu1 %3327 }
 0x6f5   :  { %v3337_v20 = vpop.xlane.xlu1 %3336 }
 0x6f6   :  { %v3407_v11 = vmul.f32 %v3337_v20, %v7947_v0 }
 0x6f8   :  { %v10400_v56 = vsub.f32 %v10303_v49, %v3407_v11  ;;  %v3325_v11 = vpop.xlane.xlu2 %3324 }
 0x6fd   :  { %v10406_v4 = vpop.xlane.xlu1 %3339 }
 0x6ff   :  { %v3279_v39 = vpop.f32.mrf.mxu1 }
 0x700   :  { %v10389_v25 = vadd.f32 %v10207_v3, %v3279_v39 }
 0x702   :  { %v3371_v28 = vsel %vm13747_vm5, %v10389_v25, 0.0  ;;  %vm13756_vm5 = vmmov %vm13709_vm0 }
 0x703   :  { %3372 = vadd.xlane.f32.xlu0 %v3371_v28  ;;  %v3471_v28 = vmul.f32 %v10400_v56, %v10400_v56 }
 0x707   :  { %v3281_v61 = vpop.f32.mrf.mxu1 }
 0x708   :  { %v10397_v38 = vadd.f32 %v10207_v3, %v3281_v61  ;;  %v3527_v61 = vsel %vm13749_vm6, %v3471_v28, 0.0  ;;  %vm13758_vm6 = vmmov %vm13709_vm0 }
 0x70a   :  { %v3374_v39 = vsel %vm13748_vm2, %v10397_v38, 0.0  ;;  %vm13757_vm2 = vmmov %vm13709_vm0 }
 0x70b   :  { %3375 = vadd.xlane.f32.xlu2 %v3374_v39 }
 0x70f   :  { %v3284_v5 = vpop.f32.mrf.mxu1 }
 0x710   :  { %v10411_v20 = vadd.f32 %v10207_v3, %v3284_v5 }
 0x712   :  { %v3377_v49 = vsel %vm13709_vm0, %v10411_v20, 0.0 }
 0x713   :  { %v3343_v59 = vpop.xlane.xlu1 %3342  ;;  %3528 = vadd.xlane.f32.xlu2 %v3527_v61  ;;  %3378 = vadd.xlane.f32.xlu1 %v3377_v49 }
 0x714   :  { %v3409_v31 = vmul.f32 %v3343_v59, %v7947_v0 }
 0x716   :  { %v10426_v5 = vsub.f32 %v10325_v13, %v3409_v31  ;;  %v3403_v13 = vmul.f32 %v3325_v11, %v7947_v0 }
 0x717   :  { %v3286_v12 = vpop.f32.mrf.mxu1 }
 0x718   :  { %v10418_v39 = vadd.f32 %v10207_v3, %v3286_v12  ;;  %v3334_v12 = vpop.xlane.xlu2 %3333  ;;  %v3473_v61 = vmul.f32 %v10426_v5, %v10426_v5  ;;  %v10446_v48 = vsub.f32 %v10275_v21, %v3403_v13 }
 0x719   :  { %v3406_v59 = vmul.f32 %v3334_v12, %v7947_v0 }
 0x71a   :  { %v3380_v28 = vsel %vm13750_vm11, %v10418_v39, 0.0  ;;  %v3533_v31 = vsel %vm13751_vm14, %v3473_v61, 0.0  ;;  %v3467_v12 = vmul.f32 %v10446_v48, %v10446_v48  ;;  %vm13759_vm11 = vmmov %vm13709_vm0 }
 0x71b   :  { %3381 = vadd.xlane.f32.xlu0 %v3380_v28  ;;  %v10439_v49 = vsub.f32 %v10298_v50, %v3406_v59  ;;  %v10452_v59 = vpop.xlane.xlu0 %3303  ;;  %vm13760_vm14 = vmmov %vm13709_vm0 }
 0x71c   :  { %v3515_v50 = vsel %vm13753_vm7, %v3467_v12, 0.0  ;;  %vm13762_vm7 = vmmov %vm13709_vm0 }
 0x71d   :  { %v3470_v18 = vmul.f32 %v10439_v49, %v10439_v49 }
 0x71f   :  { %v3524_v28 = vsel %vm13752_vm13, %v3470_v18, 0.0  ;;  %vm13761_vm13 = vmmov %vm13709_vm0 }
 0x723   :  { %3534 = vadd.xlane.f32.xlu0 %v3533_v31  ;;  %v10454_v61 = vpop.xlane.xlu0 %3312  ;;  %v10456_v11 = vpop.xlane.xlu2 %3348 }
 0x72b   :  { %3525 = vadd.xlane.f32.xlu0 %v3524_v28  ;;  %v3322_v31 = vpop.xlane.xlu0 %3321  ;;  %v10486_v54 = vpop.xlane.xlu1 %3351 }
 0x733   :  { %3516 = vadd.xlane.f32.xlu0 %v3515_v50  ;;  %v3331_v28 = vpop.xlane.xlu0 %3330 }
 0x73b   :  { %v10458_v17 = vpop.xlane.xlu2 %3357  ;;  %v3346_v41 = vpop.xlane.xlu0 %3345 }
 0x743   :  { %v10506_v15 = vpop.xlane.xlu0 %3354 }
 0x74d   :  { %v3289_v21 = vpop.f32.mrf.mxu1 }
 0x74e   :  { %v10461_v13 = vadd.f32 %v10207_v3, %v3289_v21 }
 0x750   :  { %v3383_v18 = vsel %vm13754_vm1, %v10461_v13, 0.0  ;;  %vm13763_vm1 = vmmov %vm13709_vm0 }
 0x751   :  { %3384 = vadd.xlane.f32.xlu1 %v3383_v18 }
 0x753   :  { %v3367_v12 = vpop.xlane.xlu2 %3366 }
 0x754   :  { %v3417_v50 = vmul.f32 %v3367_v12, %v7947_v0  ;;  %v3410_v12 = vmul.f32 %v3346_v41, %v7947_v0 }
 0x755   :  { %v3291_v6 = vpop.f32.mrf.mxu1 }
 0x756   :  { %v10467_v8 = vsub.f32 %v10370_v32, %v3417_v50  ;;  %v10470_v7 = vadd.f32 %v10207_v3, %v3291_v6  ;;  %v10482_v6 = vsub.f32 %v10330_v52, %v3410_v12 }
 0x758   :  { %v3386_v27 = vsel %vm13755_vm10, %v10470_v7, 0.0  ;;  %v3481_v21 = vmul.f32 %v10467_v8, %v10467_v8  ;;  %v3474_v41 = vmul.f32 %v10482_v6, %v10482_v6  ;;  %vm13764_vm10 = vmmov %vm13709_vm0 }
 0x759   :  { %3387 = vadd.xlane.f32.xlu1 %v3386_v27  ;;  %v3404_v27 = vmul.f32 %v10386_v40, %v7947_v0 }
 0x75a   :  { %v3557_v18 = vsel %vm13756_vm5, %v3481_v21, 0.0  ;;  %v3408_v21 = vmul.f32 %v10406_v4, %v7947_v0  ;;  %v3536_v40 = vsel %vm13709_vm0, %v3474_v41, 0.0  ;;  %v10508_v4 = vpop.xlane.xlu1 %3360  ;;  %vm13765_vm5 = vmmov %vm13709_vm0 }
 0x75b   :  { %3558 = vadd.xlane.f32.xlu0 %v3557_v18  ;;  %v10498_v52 = vsub.f32 %v10283_v14, %v3404_v27  ;;  %v3405_v14 = vmul.f32 %v3331_v28, %v7947_v0  ;;  %v3402_v28 = vmul.f32 %v3322_v31, %v7947_v0 }
 0x75c   :  { %v10501_v12 = vsub.f32 %v10310_v53, %v3408_v21 }
 0x75d   :  { %v3294_v45 = vpop.f32.mrf.mxu1  ;;  %v3468_v27 = vmul.f32 %v10498_v52, %v10498_v52  ;;  %v10521_v41 = vsub.f32 %v10290_v51, %v3405_v14 }
 0x75e   :  { %v10479_v32 = vadd.f32 %v10207_v3, %v3294_v45  ;;  %v3472_v53 = vmul.f32 %v10501_v12, %v10501_v12 }
 0x760   :  { %v3389_v50 = vsel %vm13757_vm2, %v10479_v32, 0.0  ;;  %vm13766_vm2 = vmmov %vm13709_vm0 }
 0x761   :  { %3390 = vadd.xlane.f32.xlu2 %v3389_v50 }
 0x765   :  { %v3296_v45 = vpop.f32.mrf.mxu1 }
 0x766   :  { %v10495_v18 = vadd.f32 %v10207_v3, %v3296_v45  ;;  %v3401_v3 = vmul.f32 %v10384_v16, %v7947_v0  ;;  %v3530_v45 = vsel %vm13759_vm11, %v3472_v53, 0.0  ;;  %v3370_v16 = vpop.xlane.xlu1 %3369  ;;  %vm13768_vm11 = vmmov %vm13709_vm0 }
 0x767   :  { %v3418_v44 = vmul.f32 %v3370_v16, %v7947_v0 }
 0x768   :  { %v3392_v50 = vsel %vm13758_vm6, %v10495_v18, 0.0  ;;  %v10518_v21 = vsub.f32 %v10257_v37, %v3401_v3  ;;  %v3469_v37 = vmul.f32 %v10521_v41, %v10521_v41  ;;  %v10534_v3 = vsub.f32 %v10267_v1, %v3402_v28  ;;  %vm13767_vm6 = vmmov %vm13709_vm0 }
 0x769   :  { %3393 = vadd.xlane.f32.xlu1 %v3392_v50  ;;  %3537 = vadd.xlane.f32.xlu2 %v3536_v40  ;;  %v3518_v50 = vsel %vm13760_vm14, %v3468_v27, 0.0  ;;  %v10525_v40 = vpop.xlane.xlu0 %3363  ;;  %v10537_v14 = vsub.f32 %v10378_v23, %v3418_v44  ;;  %vm13769_vm14 = vmmov %vm13709_vm0 }
 0x76a   :  { %v3465_v51 = vmul.f32 %v10518_v21, %v10518_v21  ;;  %v3521_v53 = vsel %vm13761_vm13, %v3469_v37, 0.0  ;;  %vm13770_vm13 = vmmov %vm13709_vm0 }
 0x76b   :  { %v3482_v16 = vmul.f32 %v10537_v14, %v10537_v14 }
 0x76c   :  { %v3509_v27 = vsel %vm13762_vm7, %v3465_v51, 0.0  ;;  %vm13771_vm7 = vmmov %vm13709_vm0 }
 0x76d   :  { %v3560_v28 = vsel %vm13764_vm10, %v3482_v16, 0.0  ;;  %vm13773_vm10 = vmmov %vm13709_vm0 }
 0x771   :  { %3531 = vadd.xlane.f32.xlu1 %v3530_v45  ;;  %3519 = vadd.xlane.f32.xlu2 %v3518_v50  ;;  %v3466_v50 = vmul.f32 %v10534_v3, %v10534_v3 }
 0x773   :  { %v3512_v23 = vsel %vm13763_vm1, %v3466_v50, 0.0  ;;  %vm13772_vm1 = vmmov %vm13709_vm0 }
 0x776   :  { %v3373_v45 = vpop.xlane.xlu0 %3372 }
 0x777   :  { %v3419_v31 = vmul.f32 %v3373_v45, %v7947_v0 }
 0x779   :  { %3522 = vadd.xlane.f32.xlu1 %v3521_v53  ;;  %3510 = vadd.xlane.f32.xlu2 %v3509_v27  ;;  %v10547_v1 = vsub.f32 %v10389_v25, %v3419_v31 }
 0x77b   :  { %v3483_v53 = vmul.f32 %v10547_v1, %v10547_v1 }
 0x77d   :  { %v3563_v31 = vsel %vm13766_vm2, %v3483_v53, 0.0  ;;  %vm13776_vm2 = vmmov %vm13709_vm0 }
 0x77e   :  { %v3376_v44 = vpop.xlane.xlu2 %3375 }
 0x77f   :  { %v3420_v37 = vmul.f32 %v3376_v44, %v7947_v0 }
 0x781   :  { %3513 = vadd.xlane.f32.xlu1 %v3512_v23  ;;  %3561 = vadd.xlane.f32.xlu2 %v3560_v28  ;;  %v10553_v51 = vsub.f32 %v10397_v38, %v3420_v37 }
 0x783   :  { %v3484_v27 = vmul.f32 %v10553_v51, %v10553_v51 }
 0x785   :  { %v3566_v25 = vsel %vm13765_vm5, %v3484_v27, 0.0  ;;  %vm13774_vm5 = vmmov %vm13709_vm0 }
 0x786   :  { %3567 = vadd.xlane.f32.xlu0 %v3566_v25  ;;  %v3379_v45 = vpop.xlane.xlu1 %3378 }
 0x787   :  { %v3421_v50 = vmul.f32 %v3379_v45, %v7947_v0 }
 0x789   :  { %3564 = vadd.xlane.f32.xlu1 %v3563_v31  ;;  %v10563_v16 = vsub.f32 %v10411_v20, %v3421_v50  ;;  %v3529_v50 = vpop.xlane.xlu2 %3528 }
 0x78b   :  { %v3485_v38 = vmul.f32 %v10563_v16, %v10563_v16 }
 0x78d   :  { %v3569_v44 = vsel %vm13767_vm6, %v3485_v38, 0.0  ;;  %vm13777_vm6 = vmmov %vm13709_vm0 }
 0x78e   :  { %3570 = vadd.xlane.f32.xlu2 %v3569_v44  ;;  %v3382_v23 = vpop.xlane.xlu0 %3381  ;;  %v3599_v44 = vmul.f32 %v3529_v50, %v7947_v0 }
 0x78f   :  { %v3422_v28 = vmul.f32 %v3382_v23, %v7947_v0 }
 0x791   :  { %v10570_v37 = vsub.f32 %v10418_v39, %v3422_v28 }
 0x793   :  { %v3486_v53 = vmul.f32 %v10570_v37, %v10570_v37 }
 0x795   :  { %v3572_v27 = vsel %vm13709_vm0, %v3486_v53, 0.0 }
 0x796   :  { %3573 = vadd.xlane.f32.xlu1 %v3572_v27  ;;  %v3535_v25 = vpop.xlane.xlu0 %3534 }
 0x797   :  { %v3601_v39 = vmul.f32 %v3535_v25, %v7947_v0 }
 0x799   :  { %v10585_v27 = vadd.f32 1e-05, %v3601_v39 }
 0x79b   :  { %7578 = vrsqrt.f32 %v10585_v27 }
 0x7c4   :  { %v3385_v20 = vpop.xlane.xlu1 %3384 }
 0x7c5   :  { %v3423_v45 = vmul.f32 %v3385_v20, %v7947_v0  ;;  %v10589_v20 = vadd.f32 1e-05, %v3599_v44 }
 0x7c7   :  { %v10577_v31 = vsub.f32 %v10461_v13, %v3423_v45  ;;  %v3415_v13 = vmul.f32 %v10508_v4, %v7947_v0  ;;  %v3526_v45 = vpop.xlane.xlu0 %3525  ;;  %7580 = vrsqrt.f32 %v10589_v20 }
 0x7c8   :  { %v3598_v44 = vmul.f32 %v3526_v45, %v7947_v0 }
 0x7c9   :  { %v3487_v38 = vmul.f32 %v10577_v31, %v10577_v31  ;;  %v10598_v50 = vsub.f32 %v10357_v55, %v3415_v13 }
 0x7cb   :  { %v3575_v23 = vsel %vm13768_vm11, %v3487_v38, 0.0  ;;  %v3479_v55 = vmul.f32 %v10598_v50, %v10598_v50  ;;  %vm13778_vm11 = vmmov %vm13709_vm0 }
 0x7cc   :  { %3576 = vadd.xlane.f32.xlu0 %v3575_v23  ;;  %v3388_v28 = vpop.xlane.xlu1 %3387 }
 0x7cd   :  { %v3424_v53 = vmul.f32 %v3388_v28, %v7947_v0  ;;  %v10611_v28 = vpop.eup %7578 }
 0x7ce   :  { %v10615_v13 = vpop.eup %7580 }
 0x7cf   :  { %v10592_v10 = vsub.f32 %v10470_v7, %v3424_v53  ;;  %v3398_v7 = vmul.f32 %v10382_v58, %v7947_v0  ;;  %v3399_v53 = vmul.f32 %v10454_v61, %v7947_v0  ;;  %v3395_v58 = vmul.f32 %v10375_v26, %v7947_v0 }
 0x7d0   :  { %v3792_v61 = vmul.f32 %v10611_v28, %v10585_v27  ;;  %v3772_v26 = vmul.f32 %v10615_v13, %v10589_v20 }
 0x7d1   :  { %v3488_v25 = vmul.f32 %v10592_v10, %v10592_v10  ;;  %v10633_v42 = vsub.f32 %v10236_v9, %v3399_v53  ;;  %v10645_v53 = vsub.f32 %v10211_v36, %v3395_v58 }
 0x7d2   :  { %v3773_v36 = vmul.f32 %v10615_v13, %v3772_v26 }
 0x7d3   :  { %v3578_v38 = vsel %vm13769_vm14, %v3488_v25, 0.0  ;;  %v3517_v25 = vpop.xlane.xlu0 %3516  ;;  %vm3798_vm14 = vweird.f32 %v10611_v28 }
 0x7d4   :  { %v3391_v39 = vpop.xlane.xlu2 %3390  ;;  %3579 = vadd.xlane.f32.xlu2 %v3578_v38  ;;  %v10623_v38 = vadd.f32 1e-05, %v3598_v44 }
 0x7d5   :  { %v3425_v4 = vmul.f32 %v3391_v39, %v7947_v0  ;;  %v10626_v39 = vsub.f32 %v10229_v60, %v3398_v7  ;;  %v3397_v60 = vmul.f32 %v10393_v57, %v7947_v0  ;;  %v3400_v7 = vmul.f32 %v10404_v2, %v7947_v0 }
 0x7d6   :  { %7582 = vrsqrt.f32 %v10623_v38 }
 0x7d7   :  { %v10607_v23 = vsub.f32 %v10479_v32, %v3425_v4  ;;  %v3396_v32 = vmul.f32 %v10452_v59, %v7947_v0  ;;  %v3551_v4 = vsel %vm13770_vm13, %v3479_v55, 0.0  ;;  %v3595_v59 = vmul.f32 %v3517_v25, %v7947_v0 }
 0x7d8   :  { %v3462_v2 = vmul.f32 %v10626_v39, %v10626_v39  ;;  %vm3778_vm13 = vweird.f32 %v10615_v13 }
 0x7d9   :  { %v3489_v45 = vmul.f32 %v10607_v23, %v10607_v23  ;;  %v10662_v58 = vadd.f32 1e-05, %v3595_v59 }
 0x7db   :  { %v3581_v30 = vsel %vm13771_vm7, %v3489_v45, 0.0  ;;  %v10648_v45 = vsub.f32 %v10216_v35, %v3396_v32  ;;  %v3463_v35 = vmul.f32 %v10633_v42, %v10633_v42  ;;  %v10667_v32 = vsub.f32 %v10223_v62, %v3397_v60  ;;  %vm13780_vm7 = vmmov %vm13709_vm0 }
 0x7dc   :  { %v3394_v44 = vpop.xlane.xlu1 %3393  ;;  %3552 = vadd.xlane.f32.xlu2 %v3551_v4  ;;  %v3538_v22 = vpop.xlane.xlu2 %3537  ;;  %3582 = vadd.xlane.f32.xlu1 %v3581_v30  ;;  %v3793_v30 = vmul.f32 %v10611_v28, %v3792_v61  ;;  %v3459_v4 = vmul.f32 %v10645_v53, %v10645_v53  ;;  %v3500_v62 = vsel %vm13773_vm10, %v3462_v2, 0.0  ;;  %vm3777_vm10 = vweird.f32 %v10589_v20 }
 0x7dd   :  { %v3426_v55 = vmul.f32 %v3394_v44, %v7947_v0  ;;  %v3602_v9 = vmul.f32 %v3538_v22, %v7947_v0  ;;  %v3416_v22 = vmul.f32 %v10525_v40, %v7947_v0  ;;  %v3412_v40 = vmul.f32 %v10486_v54, %v7947_v0  ;;  %v10683_v44 = vpop.eup %7582 }
 0x7de   :  { %v3794_v26 = vmul.f32 0.5, %v3793_v30 }
 0x7df   :  { %v10653_v25 = vsub.f32 %v10495_v18, %v3426_v55  ;;  %v10655_v57 = vadd.f32 1e-05, %v3602_v9  ;;  %v10670_v18 = vsub.f32 %v10247_v33, %v3400_v7  ;;  %v3460_v33 = vmul.f32 %v10648_v45, %v10648_v45 }
 0x7e0   :  { %v10686_v60 = vsub.f32 %v10363_v47, %v3416_v22  ;;  %v3774_v7 = vmul.f32 0.5, %v3773_v36  ;;  %v3503_v9 = vsel %vm13774_vm5, %v3463_v35, 0.0  ;;  %v3461_v47 = vmul.f32 %v10667_v32, %v10667_v32 }
 0x7e1   :  { %7584 = vrsqrt.f32 %v10655_v57  ;;  %v3490_v61 = vmul.f32 %v10653_v25, %v10653_v25  ;;  %v10697_v22 = vsub.f32 %v10340_v46, %v3412_v40  ;;  %v3413_v36 = vmul.f32 %v10506_v15, %v7947_v0 }
 0x7e2   :  { %7586 = vrsqrt.f32 %v10662_v58  ;;  %v3414_v35 = vmul.f32 %v10458_v17, %v7947_v0  ;;  %v3775_v34 = vsub.f32 1.5, %v3774_v7  ;;  %v3480_v15 = vmul.f32 %v10686_v60, %v10686_v60 }
 0x7e3   :  { %v3584_v59 = vsel %vm13772_vm1, %v3490_v61, 0.0  ;;  %v3464_v61 = vmul.f32 %v10670_v18, %v10670_v18  ;;  %13775 = vst [vmem:[#allocation62_spill] sm:$0xff] %v10697_v22  ;;  %v10714_v40 = vsel %vm13777_vm6, %v3460_v33, 0.0  ;;  %v3411_v17 = vmul.f32 %v10456_v11, %v7947_v0  ;;  %vm10765_vm6 = vmor %vm3777_vm10, %vm3778_vm13 }
 0x7e4   :  { %3585 = vadd.xlane.f32.xlu0 %v3584_v59  ;;  %v3532_v54 = vpop.xlane.xlu1 %3531  ;;  %3501 = vadd.xlane.f32.xlu2 %v3500_v62  ;;  %v3520_v55 = vpop.xlane.xlu2 %3519  ;;  %v3491_v59 = vsel %vm13776_vm2, %v3459_v4, 0.0  ;;  %v10724_v7 = vsub.f32 %v10345_v24, %v3413_v36  ;;  %v3476_v33 = vmul.f32 %v10697_v22, %v10697_v22  ;;  %v10730_v63 = vsub.f32 %v10350_v19, %v3414_v35  ;;  %vm13786_vm13 = vmmov %vm13780_vm7 }
 0x7e5   :  { %v3600_v30 = vmul.f32 %v3532_v54, %v7947_v0  ;;  %v3596_v2 = vmul.f32 %v3520_v55, %v7947_v0  ;;  %3504 = vadd.xlane.f32.xlu1 %v3503_v9  ;;  %v3795_v54 = vsub.f32 1.5, %v3794_v26  ;;  %v3762_v55 = vmul.f32 %v10683_v44, %v10623_v38 }
 0x7e6   :  { %v3506_v4 = vsel %vm13709_vm0, %v3464_v61, 0.0  ;;  %v3497_v26 = vsel %vm13778_vm11, %v3461_v47, 0.0  ;;  %13779 = vst [vmem:[#allocation57_spill] sm:$0xff] %v10730_v63  ;;  %v3776_v47 = vmul.f32 %v10615_v13, %v3775_v34  ;;  %v3554_v22 = vsel %vm13780_vm7, %v3480_v15, 0.0 }
 0x7e7   :  { %v7585_v62 = vpop.eup %7584  ;;  %v10706_v9 = vadd.f32 1e-05, %v3600_v30  ;;  %v10708_v29 = vadd.f32 1e-05, %v3596_v2  ;;  %v3796_v11 = vmul.f32 %v10611_v28, %v3795_v54  ;;  %v3763_v61 = vmul.f32 %v10683_v44, %v3762_v55 }
 0x7e8   :  { %v3802_v46 = vmul.f32 %v7585_v62, %v10655_v57  ;;  %v10721_v30 = vpop.eup %7586  ;;  %vm3797_vm1 = vweird.f32 %v10585_v27  ;;  %vm3808_vm2 = vweird.f32 %v7585_v62  ;;  %v3477_v27 = vmul.f32 %v10724_v7, %v10724_v7 }
 0x7e9   :  { %7588 = vrsqrt.f32 %v10706_v9  ;;  %v3732_v19 = vmul.f32 %v10721_v30, %v10662_v58  ;;  %vm10746_vm5 = vmor %vm3797_vm1, %vm3798_vm14  ;;  %vm3807_vm0 = vweird.f32 %v10655_v57  ;;  %vm3768_vm10 = vweird.f32 %v10683_v44 }
 0x7ea   :  { %v3803_v2 = vmul.f32 %v7585_v62, %v3802_v46  ;;  %7590 = vrsqrt.f32 %v10708_v29  ;;  %v3800_v15 = vsel %vm10746_vm5, %v10611_v28, %v3796_v11  ;;  %v3478_v11 = vmul.f32 %v10730_v63, %v10730_v63  ;;  %vm3809_vm11 = vmor %vm3807_vm0, %vm3808_vm2 }
 0x7eb   :  { %v3985_v57 = vmul.f32 %v3800_v15, %v10426_v5  ;;  %vm13785_vm14 = vmmov %vm13780_vm7  ;;  %v10792_v63 = vsub.f32 %v10335_v43, %v3411_v17  ;;  %v10801_v17 = vld [vmem:[%s10433_s11] ss:$0 sm:$0xff]  ;;  %vm3787_vm5 = vweird.f32 %v10706_v9 }
 0x7ec   :  { %v3804_v24 = vmul.f32 0.5, %v3803_v2  ;;  %3507 = vadd.xlane.f32.xlu0 %v3506_v4  ;;  %v3523_v36 = vpop.xlane.xlu1 %3522  ;;  %3492 = vadd.xlane.f32.xlu2 %v3491_v59  ;;  %v3511_v46 = vpop.xlane.xlu2 %3510  ;;  %vm13787_vm1 = vmmov %vm13786_vm13 }
 0x7ed   :  { %v3597_v35 = vmul.f32 %v3523_v36, %v7947_v0  ;;  %v3593_v54 = vmul.f32 %v3511_v46, %v7947_v0  ;;  %3555 = vadd.xlane.f32.xlu1 %v3554_v22  ;;  %v3764_v22 = vmul.f32 0.5, %v3763_v61  ;;  %v3780_v61 = vsel %vm10765_vm6, %v10615_v13, %v3776_v47 }
 0x7ee   :  { %v3805_v59 = vsub.f32 1.5, %v3804_v24  ;;  %v3733_v46 = vmul.f32 %v10721_v30, %v3732_v19  ;;  %v3542_v47 = vsel %vm13785_vm14, %v3476_v33, 0.0  ;;  %v10789_v19 = vld [vmem:[%s10423_s6] ss:$0 sm:$0xff]  ;;  %v3983_v5 = vmul.f32 %v3780_v61, %v10400_v56 }
 0x7ef   :  { %v10752_v55 = vpop.eup %7588  ;;  %v10757_v4 = vadd.f32 1e-05, %v3597_v35  ;;  %v10759_v20 = vadd.f32 1e-05, %v3593_v54  ;;  %v4020_v43 = vmul.f32 %v10789_v19, %v3985_v57  ;;  %v3548_v56 = vsel %vm13787_vm1, %v3478_v11, 0.0 }
 0x7f0   :  { %v10761_v2 = vpop.eup %7590  ;;  %v3806_v36 = vmul.f32 %v7585_v62, %v3805_v59  ;;  %v3782_v28 = vmul.f32 %v10752_v55, %v10706_v9  ;;  %v3765_v59 = vsub.f32 1.5, %v3764_v22  ;;  %v3545_v22 = vsel %vm13786_vm13, %v3477_v27, 0.0 }
 0x7f1   :  { %v3742_v35 = vmul.f32 %v10761_v2, %v10708_v29  ;;  %7592 = vrsqrt.f32 %v10757_v4  ;;  %vm3788_vm7 = vweird.f32 %v10752_v55  ;;  %vm3767_vm6 = vweird.f32 %v10623_v38 }
 0x7f2   :  { %v3810_v54 = vsel %vm3809_vm11, %v7585_v62, %v3806_v36  ;;  %v3783_v34 = vmul.f32 %v10752_v55, %v3782_v28  ;;  %7594 = vrsqrt.f32 %v10759_v20  ;;  %v3734_v36 = vmul.f32 0.5, %v3733_v46  ;;  %vm3789_vm2 = vmor %vm3787_vm5, %vm3788_vm7 }
 0x7f3   :  { %v3986_v24 = vmul.f32 %v3810_v54, %v10482_v6  ;;  %v3743_v13 = vmul.f32 %v10761_v2, %v3742_v35  ;;  %v3766_v61 = vmul.f32 %v10683_v44, %v3765_v59  ;;  %v4018_v59 = vmul.f32 %v10789_v19, %v3983_v5  ;;  %vm10825_vm0 = vmor %vm3767_vm6, %vm3768_vm10 }
 0x7f4   :  { %v3784_v62 = vmul.f32 0.5, %v3783_v34  ;;  %3498 = vadd.xlane.f32.xlu0 %v3497_v26  ;;  %v3514_v15 = vpop.xlane.xlu1 %3513  ;;  %3543 = vadd.xlane.f32.xlu2 %v3542_v47  ;;  %vm3748_vm11 = vweird.f32 %v10761_v2  ;;  %vm3738_vm14 = vweird.f32 %v10721_v30  ;;  %vm3747_vm13 = vweird.f32 %v10708_v29 }
 0x7f5   :  { %v3744_v6 = vmul.f32 0.5, %v3743_v13  ;;  %v3594_v28 = vmul.f32 %v3514_v15, %v7947_v0  ;;  %3546 = vadd.xlane.f32.xlu1 %v3545_v22  ;;  %v4021_v33 = vmul.f32 %v10789_v19, %v3986_v24  ;;  %v3735_v13 = vsub.f32 1.5, %v3734_v36  ;;  %vm10842_vm1 = vmor %vm3747_vm13, %vm3748_vm11 }
 0x7f6   :  { %v3785_v35 = vsub.f32 1.5, %v3784_v62  ;;  %v4055_v62 = vadd.f32 %v10801_v17, %v4020_v43  ;;  %v3770_v38 = vsel %vm10825_vm0, %v10683_v44, %v3766_v61  ;;  %vm3737_vm7 = vweird.f32 %v10662_v58 }
 0x7f7   :  { %v7593_v26 = vpop.eup %7592  ;;  %v3745_v27 = vsub.f32 1.5, %v3744_v6  ;;  %v10806_v46 = vadd.f32 1e-05, %v3594_v28  ;;  %v4056_v24 = vadd.f32 %v10801_v17, %v4021_v33  ;;  %v3736_v28 = vmul.f32 %v10721_v30, %v3735_v13  ;;  %vm10855_vm5 = vmor %vm3737_vm7, %vm3738_vm14 }
 0x7f8   :  { %v10808_v54 = vpop.eup %7594  ;;  %v3786_v34 = vmul.f32 %v10752_v55, %v3785_v35  ;;  %v3752_v57 = vmul.f32 %v7593_v26, %v10757_v4  ;;  %vm3758_vm10 = vweird.f32 %v7593_v26  ;;  %v3475_v43 = vmul.f32 %v10792_v63, %v10792_v63 }
 0x7f9   :  { %v3712_v11 = vmul.f32 %v10808_v54, %v10759_v20  ;;  %7596 = vrsqrt.f32 %v10806_v46  ;;  %v3746_v36 = vmul.f32 %v10761_v2, %v3745_v27  ;;  %v4080_v6 = vpack.c.bf16 %v4056_v24, %v4055_v62 }
 0x7fa   :  { %v3790_v47 = vsel %vm3789_vm2, %v10752_v55, %v3786_v34  ;;  %v3753_v9 = vmul.f32 %v7593_v26, %v3752_v57  ;;  %v3982_v29 = vmul.f32 %v3770_v38, %v10439_v49  ;;  %vm3757_vm2 = vweird.f32 %v10757_v4 }
 0x7fb   :  { %v3984_v22 = vmul.f32 %v3790_v47, %v10501_v12  ;;  %v3713_v5 = vmul.f32 %v10808_v54, %v3712_v11  ;;  %4121 = vmatpush.bf16.msra.mxu2 %v4080_v6  ;;  %v3740_v49 = vsel %vm10855_vm5, %v10721_v30, %v3736_v28  ;;  %vm3759_vm6 = vmor %vm3757_vm2, %vm3758_vm10  ;;  %vm3718_vm0 = vweird.f32 %v10808_v54 }
 0x7fc   :  { %v3754_v55 = vmul.f32 0.5, %v3753_v9  ;;  %3549 = vadd.xlane.f32.xlu0 %v3548_v56  ;;  %v4053_v24 = vadd.f32 %v10801_v17, %v4018_v59  ;;  %vm13794_vm11 = vcmask 261120   ;;  %vm3717_vm14 = vweird.f32 %v10759_v20 }
 0x7fd   :  { %v3714_v12 = vmul.f32 0.5, %v3713_v5  ;;  %3495 = vadd.xlane.f32.xlu1 %v10714_v40  ;;  %v4019_v33 = vmul.f32 %v10789_v19, %v3984_v22  ;;  %v3750_v40 = vsel %vm10842_vm1, %v10761_v2, %v3746_v36  ;;  %v3539_v9 = vsel %vm13794_vm11, %v3475_v43, 0.0  ;;  %vm3719_vm13 = vmor %vm3717_vm14, %vm3718_vm0 }
 0x7fe   :  { %v3755_v44 = vsub.f32 1.5, %v3754_v55  ;;  %v3980_v13 = vmul.f32 %v3750_v40, %v10498_v52  ;;  %v4017_v30 = vmul.f32 %v10789_v19, %v3982_v29  ;;  %v3979_v15 = vmul.f32 %v3740_v49, %v10446_v48  ;;  %v3565_v29 = vpop.xlane.xlu1 %3564  ;;  %v3562_v40 = vpop.xlane.xlu2 %3561 }
 0x7ff   :  { %v7597_v56 = vpop.eup %7596  ;;  %v3715_v61 = vsub.f32 1.5, %v3714_v12  ;;  %v4054_v58 = vadd.f32 %v10801_v17, %v4019_v33  ;;  %vm3727_vm1 = vweird.f32 %v10806_v46  ;;  %v3610_v27 = vmul.f32 %v3562_v40, %v7947_v0 }
 0x800   :  { %v3756_v34 = vmul.f32 %v7593_v26, %v3755_v44  ;;  %v3722_v57 = vmul.f32 %v7597_v56, %v10806_v46  ;;  %vm3728_vm7 = vweird.f32 %v7597_v56  ;;  %v4015_v36 = vmul.f32 %v10789_v19, %v3980_v13 }
 0x801   :  { %v3716_v2 = vmul.f32 %v10808_v54, %v3715_v61  ;;  %v4079_v62 = vpack.c.bf16 %v4054_v58, %v4053_v24  ;;  %v4052_v20 = vadd.f32 %v10801_v17, %v4017_v30  ;;  %v4014_v48 = vmul.f32 %v10789_v19, %v3979_v15  ;;  %vm3729_vm10 = vmor %vm3727_vm1, %vm3728_vm7 }
 0x802   :  { %v3760_v11 = vsel %vm3759_vm6, %v7593_v26, %v3756_v34  ;;  %v3723_v47 = vmul.f32 %v7597_v56, %v3722_v57  ;;  %v4050_v6 = vadd.f32 %v10801_v17, %v4015_v36  ;;  %v10893_v13 = vadd.f32 1e-05, %v3610_v27 }
 0x803   :  { %v3981_v4 = vmul.f32 %v3760_v11, %v10521_v41  ;;  %v3720_v59 = vsel %vm3719_vm13, %v10808_v54, %v3716_v2  ;;  %4122 = vmatpush.bf16.msra.mxu2 %v4079_v62  ;;  %v4049_v12 = vadd.f32 %v10801_v17, %v4014_v48  ;;  %v3611_v2 = vmul.f32 %v3565_v29, %v7947_v0 }
 0x804   :  { %v3724_v22 = vmul.f32 0.5, %v3723_v47  ;;  %3540 = vadd.xlane.f32.xlu0 %v3539_v9  ;;  %v3977_v5 = vmul.f32 %v3720_v59, %v10518_v21  ;;  %vm3887_vm0 = vweird.f32 %v10893_v13 }
 0x805   :  { %v4016_v52 = vmul.f32 %v10789_v19, %v3981_v4  ;;  %v4077_v21 = vpack.c.bf16 %v4050_v6, %v4049_v12  ;;  %v10898_v9 = vadd.f32 1e-05, %v3611_v2 }
 0x806   :  { %v3725_v26 = vsub.f32 1.5, %v3724_v22  ;;  %v4012_v33 = vmul.f32 %v10789_v19, %v3977_v5  ;;  %v3571_v49 = vpop.xlane.xlu2 %3570 }
 0x807   :  { %v4051_v41 = vadd.f32 %v10801_v17, %v4016_v52  ;;  %v3613_v11 = vmul.f32 %v3571_v49, %v7947_v0  ;;  %vm3897_vm7 = vweird.f32 %v10898_v9 }
 0x808   :  { %v3726_v38 = vmul.f32 %v7597_v56, %v3725_v26  ;;  %v4047_v46 = vadd.f32 %v10801_v17, %v4012_v33 }
 0x809   :  { %v4078_v55 = vpack.c.bf16 %v4052_v20, %v4051_v41  ;;  %v3574_v34 = vpop.xlane.xlu1 %3573  ;;  %v10903_v62 = vadd.f32 1e-05, %v3613_v11 }
 0x80a   :  { %v3730_v54 = vsel %vm3729_vm10, %v7597_v56, %v3726_v38  ;;  %v3559_v56 = vpop.xlane.xlu0 %3558  ;;  %v3614_v24 = vmul.f32 %v3574_v34, %v7947_v0 }
 0x80b   :  { %v3978_v28 = vmul.f32 %v3730_v54, %v10534_v3  ;;  %4123 = vmatpush.bf16.msra.mxu2 %v4078_v55  ;;  %v3609_v3 = vmul.f32 %v3559_v56, %v7947_v0 }
 0x80c   :  { %v10900_v4 = vadd.f32 1e-05, %v3614_v24 }
 0x80d   :  { %v4013_v35 = vmul.f32 %v10789_v19, %v3978_v28  ;;  %v3641_v58 = vadd.f32 1e-05, %v3609_v3 }
 0x80f   :  { %4124 = vmatpush.bf16.msra.mxu2 %v4077_v21  ;;  %v4048_v44 = vadd.f32 %v10801_v17, %v4013_v35  ;;  %7598 = vrsqrt.f32 %v3641_v58  ;;  %vm3877_vm2 = vweird.f32 %v3641_v58 }
 0x810   :  { %7600 = vrsqrt.f32 %v10893_v13 }
 0x811   :  { %v4076_v43 = vpack.c.bf16 %v4048_v44, %v4047_v46 }
 0x812   :  { %v3568_v61 = vpop.xlane.xlu0 %3567 }
 0x813   :  { %4125 = vmatpush.bf16.msra.mxu2 %v4076_v43  ;;  %v3612_v57 = vmul.f32 %v3568_v61, %v7947_v0 }
 0x815   :  { %v10896_v47 = vadd.f32 1e-05, %v3612_v57  ;;  %v10905_v30 = vpop.eup %7598 }
 0x816   :  { %v3872_v15 = vmul.f32 %v10905_v30, %v3641_v58  ;;  %v10912_v22 = vpop.eup %7600  ;;  %vm3878_vm5 = vweird.f32 %v10905_v30 }
 0x817   :  { %7602 = vrsqrt.f32 %v10896_v47  ;;  %v3882_v41 = vmul.f32 %v10912_v22, %v10893_v13  ;;  %vm10952_vm6 = vmor %vm3877_vm2, %vm3878_vm5  ;;  %vm3888_vm11 = vweird.f32 %v10912_v22  ;;  %vm3907_vm13 = vweird.f32 %v10896_v47 }
 0x818   :  { %7604 = vrsqrt.f32 %v10898_v9  ;;  %v3873_v26 = vmul.f32 %v10905_v30, %v3872_v15  ;;  %vm10975_vm10 = vmor %vm3887_vm0, %vm3888_vm11  ;;  %vm3927_vm11 = vweird.f32 %v10900_v4 }
 0x819   :  { %7606 = vrsqrt.f32 %v10900_v4  ;;  %v3883_v12 = vmul.f32 %v10912_v22, %v3882_v41 }
 0x81a   :  { %7608 = vrsqrt.f32 %v10903_v62  ;;  %v3874_v55 = vmul.f32 0.5, %v3873_v26 }
 0x81b   :  { %v3884_v43 = vmul.f32 0.5, %v3883_v12 }
 0x81c   :  { %v3875_v46 = vsub.f32 1.5, %v3874_v55 }
 0x81d   :  { %v10914_v59 = vpop.eup %7602  ;;  %v3885_v2 = vsub.f32 1.5, %v3884_v43 }
 0x81e   :  { %v10916_v52 = vpop.eup %7604  ;;  %v3902_v38 = vmul.f32 %v10914_v59, %v10896_v47  ;;  %v3876_v34 = vmul.f32 %v10905_v30, %v3875_v46  ;;  %vm3908_vm14 = vweird.f32 %v10914_v59 }
 0x81f   :  { %v10919_v36 = vpop.eup %7606  ;;  %v3892_v54 = vmul.f32 %v10916_v52, %v10898_v9  ;;  %vm3898_vm1 = vweird.f32 %v10916_v52  ;;  %vm10990_vm2 = vmor %vm3907_vm13, %vm3908_vm14  ;;  %vm3917_vm14 = vweird.f32 %v10903_v62 }
 0x820   :  { %v10923_v5 = vpop.eup %7608  ;;  %v3922_v6 = vmul.f32 %v10919_v36, %v10900_v4  ;;  %v3903_v35 = vmul.f32 %v10914_v59, %v3902_v38  ;;  %v3880_v38 = vsel %vm10952_vm6, %v10905_v30, %v3876_v34  ;;  %vm3928_vm5 = vweird.f32 %v10919_v36  ;;  %vm11001_vm0 = vmor %vm3897_vm7, %vm3898_vm1 }
 0x821   :  { %v3912_v33 = vmul.f32 %v10923_v5, %v10903_v62  ;;  %v3893_v21 = vmul.f32 %v10916_v52, %v3892_v54  ;;  %v3886_v54 = vmul.f32 %v10912_v22, %v3885_v2  ;;  %vm3918_vm6 = vweird.f32 %v10923_v5  ;;  %vm11011_vm13 = vmor %vm3927_vm11, %vm3928_vm5 }
 0x822   :  { %v3923_v44 = vmul.f32 %v10919_v36, %v3922_v6  ;;  %v3904_v40 = vmul.f32 0.5, %v3903_v35  ;;  %v3993_v34 = vmul.f32 %v3880_v38, %v10467_v8  ;;  %vm11019_vm7 = vmor %vm3917_vm14, %vm3918_vm6 }
 0x823   :  { %v3913_v56 = vmul.f32 %v10923_v5, %v3912_v33  ;;  %v3894_v61 = vmul.f32 0.5, %v3893_v21  ;;  %v3890_v9 = vsel %vm10975_vm10, %v10912_v22, %v3886_v54 }
 0x824   :  { %v3924_v57 = vmul.f32 0.5, %v3923_v44  ;;  %v3905_v15 = vsub.f32 1.5, %v3904_v40  ;;  %v3994_v2 = vmul.f32 %v3890_v9, %v10537_v14 }
 0x825   :  { %v3914_v24 = vmul.f32 0.5, %v3913_v56  ;;  %v3895_v41 = vsub.f32 1.5, %v3894_v61 }
 0x826   :  { %v3906_v12 = vmul.f32 %v10914_v59, %v3905_v15 }
 0x827   :  { %v3915_v58 = vsub.f32 1.5, %v3914_v24  ;;  %v3896_v30 = vmul.f32 %v10916_v52, %v3895_v41 }
 0x83f   :  { %v3577_v20 = vpop.xlane.xlu0 %3576 }
 0x840   :  { %v3615_v48 = vmul.f32 %v3577_v20, %v7947_v0 }
 0x842   :  { %v10932_v28 = vadd.f32 1e-05, %v3615_v48  ;;  %v3925_v48 = vsub.f32 1.5, %v3924_v57 }
 0x844   :  { %7610 = vrsqrt.f32 %v10932_v28  ;;  %v3926_v43 = vmul.f32 %v10919_v36, %v3925_v48  ;;  %v4028_v48 = vmul.f32 %v10789_v19, %v3993_v34  ;;  %vm3937_vm10 = vweird.f32 %v10932_v28 }
 0x846   :  { %v3930_v8 = vsel %vm11011_vm13, %v10919_v36, %v3926_v43 }
 0x847   :  { %v3580_v29 = vpop.xlane.xlu2 %3579  ;;  %v3998_v14 = vmul.f32 %v3930_v8, %v10570_v37 }
 0x848   :  { %v3616_v3 = vmul.f32 %v3580_v29, %v7947_v0  ;;  %v3916_v29 = vmul.f32 %v10923_v5, %v3915_v58 }
 0x84a   :  { %v10943_v27 = vpop.eup %7610  ;;  %v10947_v49 = vadd.f32 1e-05, %v3616_v3  ;;  %v3910_v3 = vsel %vm10990_vm2, %v10914_v59, %v3906_v12  ;;  %v3900_v59 = vsel %vm11001_vm0, %v10916_v52, %v3896_v30 }
 0x84b   :  { %v3932_v11 = vmul.f32 %v10943_v27, %v10932_v28  ;;  %v3996_v24 = vmul.f32 %v3910_v3, %v10553_v51  ;;  %vm3938_vm1 = vweird.f32 %v10943_v27  ;;  %v3995_v38 = vmul.f32 %v3900_v59, %v10547_v1 }
 0x84c   :  { %7612 = vrsqrt.f32 %v10947_v49  ;;  %vm3939_vm5 = vmor %vm3937_vm10, %vm3938_vm1  ;;  %v11071_v3 = vadd.f32 %v10801_v17, %v4028_v48  ;;  %vm3947_vm6 = vweird.f32 %v10947_v49 }
 0x84d   :  { %v3933_v20 = vmul.f32 %v10943_v27, %v3932_v11  ;;  %v3920_v11 = vsel %vm11019_vm7, %v10923_v5, %v3916_v29  ;;  %v4030_v30 = vmul.f32 %v10789_v19, %v3995_v38 }
 0x84e   :  { %v3997_v12 = vmul.f32 %v3920_v11, %v10563_v16  ;;  %v4033_v16 = vmul.f32 %v10789_v19, %v3998_v14 }
 0x84f   :  { %v3553_v55 = vpop.xlane.xlu2 %3552  ;;  %v3583_v6 = vpop.xlane.xlu1 %3582  ;;  %v3934_v33 = vmul.f32 0.5, %v3933_v20  ;;  %v11087_v8 = vadd.f32 %v10801_v17, %v4030_v30 }
 0x850   :  { %v3607_v35 = vmul.f32 %v3553_v55, %v7947_v0  ;;  %v3617_v21 = vmul.f32 %v3583_v6, %v7947_v0  ;;  %v11084_v4 = vadd.f32 %v10801_v17, %v4033_v16 }
 0x851   :  { %v3935_v22 = vsub.f32 1.5, %v3934_v33  ;;  %v4029_v33 = vmul.f32 %v10789_v19, %v3994_v2 }
 0x852   :  { %v10971_v46 = vpop.eup %7612  ;;  %v10981_v56 = vadd.f32 1e-05, %v3607_v35  ;;  %v10983_v47 = vadd.f32 1e-05, %v3617_v21  ;;  %v4031_v21 = vmul.f32 %v10789_v19, %v3996_v24 }
 0x853   :  { %v3942_v40 = vmul.f32 %v10971_v46, %v10947_v49  ;;  %v3936_v26 = vmul.f32 %v10943_v27, %v3935_v22  ;;  %v11079_v59 = vadd.f32 %v10801_v17, %v4029_v33  ;;  %vm3948_vm2 = vweird.f32 %v10971_v46 }
 0x854   :  { %7614 = vrsqrt.f32 %v10981_v56  ;;  %v11076_v57 = vadd.f32 %v10801_v17, %v4031_v21  ;;  %vm11114_vm0 = vmor %vm3947_vm6, %vm3948_vm2  ;;  %vm3857_vm11 = vweird.f32 %v10981_v56  ;;  %vm3957_vm14 = vweird.f32 %v10983_v47 }
 0x855   :  { %7616 = vrsqrt.f32 %v10983_v47  ;;  %v3943_v62 = vmul.f32 %v10971_v46, %v3942_v40  ;;  %v3940_v28 = vsel %vm3939_vm5, %v10943_v27, %v3936_v26  ;;  %v4032_v40 = vmul.f32 %v10789_v19, %v3997_v12 }
 0x856   :  { %v3999_v27 = vmul.f32 %v3940_v28, %v10577_v31  ;;  %v4085_v12 = vpack.c.bf16 %v11076_v57, %v11087_v8  ;;  %v13825_v8 = vld [vmem:[#allocation57_spill] sm:$0xff] }
 0x857   :  { %v3502_v15 = vpop.xlane.xlu2 %3501  ;;  %v3586_v52 = vpop.xlane.xlu0 %3585  ;;  %v3944_v54 = vmul.f32 0.5, %v3943_v62 }
 0x858   :  { %v3590_v41 = vmul.f32 %v3502_v15, %v7947_v0  ;;  %v3505_v20 = vpop.xlane.xlu1 %3504  ;;  %v3618_v36 = vmul.f32 %v3586_v52, %v7947_v0 }
 0x859   :  { %v3591_v51 = vmul.f32 %v3505_v20, %v7947_v0  ;;  %v3945_v44 = vsub.f32 1.5, %v3944_v54  ;;  %v11101_v20 = vadd.f32 %v10801_v17, %v4032_v40 }
 0x85a   :  { %v11040_v5 = vpop.eup %7614  ;;  %v11043_v58 = vadd.f32 1e-05, %v3590_v41  ;;  %v11045_v55 = vadd.f32 1e-05, %v3618_v36  ;;  %v4034_v41 = vmul.f32 %v10789_v19, %v3999_v27 }
 0x85b   :  { %v11047_v6 = vpop.eup %7616  ;;  %v3852_v1 = vmul.f32 %v11040_v5, %v10981_v56  ;;  %v11054_v37 = vadd.f32 1e-05, %v3591_v51  ;;  %v3946_v2 = vmul.f32 %v10971_v46, %v3945_v44  ;;  %v4086_v54 = vpack.c.bf16 %v11084_v4, %v11101_v20 }
 0x85c   :  { %v3952_v35 = vmul.f32 %v11047_v6, %v10983_v47  ;;  %7618 = vrsqrt.f32 %v11043_v58  ;;  %v11133_v44 = vadd.f32 %v10801_v17, %v4034_v41  ;;  %vm3858_vm13 = vweird.f32 %v11040_v5 }
 0x85d   :  { %7620 = vrsqrt.f32 %v11054_v37  ;;  %v3853_v43 = vmul.f32 %v11040_v5, %v3852_v1  ;;  %v3950_v1 = vsel %vm11114_vm0, %v10971_v46, %v3946_v2  ;;  %vm3958_vm7 = vweird.f32 %v11047_v6  ;;  %vm11154_vm10 = vmor %vm3857_vm11, %vm3858_vm13 }
 0x85e   :  { %v3953_v9 = vmul.f32 %v11047_v6, %v3952_v35  ;;  %7622 = vrsqrt.f32 %v11045_v55  ;;  %v4000_v27 = vmul.f32 %v3950_v1, %v10592_v10  ;;  %vm3697_vm5 = vweird.f32 %v11054_v37  ;;  %vm11166_vm6 = vmor %vm3957_vm14, %vm3958_vm7 }
 0x85f   :  { %v3493_v13 = vpop.xlane.xlu2 %3492  ;;  %v3508_v29 = vpop.xlane.xlu0 %3507  ;;  %v3854_v24 = vmul.f32 0.5, %v3853_v43  ;;  %vm3967_vm2 = vweird.f32 %v11045_v55  ;;  %vm3687_vm11 = vweird.f32 %v11043_v58 }
 0x860   :  { %v3587_v61 = vmul.f32 %v3493_v13, %v7947_v0  ;;  %v3556_v22 = vpop.xlane.xlu1 %3555  ;;  %v3592_v34 = vmul.f32 %v3508_v29, %v7947_v0  ;;  %v3954_v11 = vmul.f32 0.5, %v3953_v9  ;;  %v4035_v1 = vmul.f32 %v10789_v19, %v4000_v27 }
 0x861   :  { %v3608_v31 = vmul.f32 %v3556_v22, %v7947_v0  ;;  %v3855_v33 = vsub.f32 1.5, %v3854_v24 }
 0x862   :  { %v11089_v62 = vpop.eup %7618  ;;  %v11092_v15 = vadd.f32 1e-05, %v3587_v61  ;;  %v11110_v51 = vadd.f32 1e-05, %v3592_v34  ;;  %v3955_v28 = vsub.f32 1.5, %v3954_v11 }
 0x863   :  { %v11094_v52 = vpop.eup %7620  ;;  %v11097_v26 = vadd.f32 1e-05, %v3608_v31  ;;  %v3682_v38 = vmul.f32 %v11089_v62, %v11043_v58  ;;  %v3856_v22 = vmul.f32 %v11040_v5, %v3855_v33  ;;  %vm3688_vm13 = vweird.f32 %v11089_v62 }
 0x864   :  { %v11103_v36 = vpop.eup %7622  ;;  %v3692_v14 = vmul.f32 %v11094_v52, %v11054_v37  ;;  %7624 = vrsqrt.f32 %v11092_v15  ;;  %v3956_v34 = vmul.f32 %v11047_v6, %v3955_v28  ;;  %vm3698_vm0 = vweird.f32 %v11094_v52 }
 0x865   :  { %v3962_v48 = vmul.f32 %v11103_v36, %v11045_v55  ;;  %7626 = vrsqrt.f32 %v11097_v26  ;;  %v3683_v43 = vmul.f32 %v11089_v62, %v3682_v38  ;;  %vm3968_vm1 = vweird.f32 %v11103_v36  ;;  %vm11212_vm7 = vmor %vm3697_vm5, %vm3698_vm0 }
 0x866   :  { %v3693_v35 = vmul.f32 %v11094_v52, %v3692_v14  ;;  %7628 = vrsqrt.f32 %v11110_v51  ;;  %v3960_v55 = vsel %vm11166_vm6, %v11047_v6, %v3956_v34  ;;  %vm3969_vm14 = vmor %vm3967_vm2, %vm3968_vm1  ;;  %vm3707_vm1 = vweird.f32 %v11110_v51 }
 0x867   :  { %v3963_v21 = vmul.f32 %v11103_v36, %v3962_v48  ;;  %v3544_v16 = vpop.xlane.xlu2 %3543  ;;  %v3499_v30 = vpop.xlane.xlu0 %3498  ;;  %v3684_v41 = vmul.f32 0.5, %v3683_v43  ;;  %vm3867_vm2 = vweird.f32 %v11097_v26  ;;  %vm11244_vm6 = vmor %vm3687_vm11, %vm3688_vm13 }
 0x868   :  { %v3694_v46 = vmul.f32 0.5, %v3693_v35  ;;  %v3547_v9 = vpop.xlane.xlu1 %3546  ;;  %v3604_v29 = vmul.f32 %v3544_v16, %v7947_v0  ;;  %v3589_v31 = vmul.f32 %v3499_v30, %v7947_v0 }
 0x869   :  { %v3964_v13 = vmul.f32 0.5, %v3963_v21  ;;  %v3605_v40 = vmul.f32 %v3547_v9, %v7947_v0  ;;  %v3860_v21 = vsel %vm11154_vm10, %v11040_v5, %v3856_v22  ;;  %vm3657_vm10 = vweird.f32 %v11092_v15 }
 0x86a   :  { %v11141_v61 = vpop.eup %7624  ;;  %v3695_v2 = vsub.f32 1.5, %v3694_v46  ;;  %v11160_v38 = vadd.f32 1e-05, %v3604_v29  ;;  %v11186_v35 = vadd.f32 1e-05, %v3589_v31  ;;  %v3685_v46 = vsub.f32 1.5, %v3684_v41 }
 0x86b   :  { %v3965_v24 = vsub.f32 1.5, %v3964_v13  ;;  %v3652_v10 = vmul.f32 %v11141_v61, %v11092_v15  ;;  %v11162_v14 = vpop.eup %7626  ;;  %v11172_v48 = vadd.f32 1e-05, %v3605_v40  ;;  %v4001_v29 = vmul.f32 %v3960_v55, %v10607_v23 }
 0x86c   :  { %v11175_v33 = vpop.eup %7628  ;;  %v3862_v28 = vmul.f32 %v11162_v14, %v11097_v26  ;;  %v3696_v16 = vmul.f32 %v11094_v52, %v3695_v2  ;;  %7630 = vrsqrt.f32 %v11160_v38  ;;  %v11205_v40 = vmul.f32 %v3860_v21, %v10598_v50 }
 0x86d   :  { %v3966_v56 = vmul.f32 %v11103_v36, %v3965_v24  ;;  %v3653_v47 = vmul.f32 %v11141_v61, %v3652_v10  ;;  %v3702_v30 = vmul.f32 %v11175_v33, %v11110_v51  ;;  %7632 = vrsqrt.f32 %v11172_v48 }
 0x86e   :  { %v3863_v27 = vmul.f32 %v11162_v14, %v3862_v28  ;;  %7634 = vrsqrt.f32 %v11186_v35  ;;  %v3700_v22 = vsel %vm11212_vm7, %v11094_v52, %v3696_v16  ;;  %v3686_v2 = vmul.f32 %v11089_v62, %v3685_v46 }
 0x86f   :  { %v3970_v6 = vsel %vm3969_vm14, %v11103_v36, %v3966_v56  ;;  %v3550_v43 = vpop.xlane.xlu0 %3549  ;;  %v3703_v5 = vmul.f32 %v11175_v33, %v3702_v30  ;;  %v11202_v36 = vadd.f32 %v10801_v17, %v4035_v1  ;;  %v3654_v23 = vmul.f32 0.5, %v3653_v47 }
 0x870   :  { %v4002_v9 = vmul.f32 %v3970_v6, %v10653_v25  ;;  %v3496_v13 = vpop.xlane.xlu1 %3495  ;;  %v3606_v31 = vmul.f32 %v3550_v43, %v7947_v0  ;;  %v3864_v24 = vmul.f32 0.5, %v3863_v27  ;;  %vm3708_vm5 = vweird.f32 %v11175_v33 }
 0x871   :  { %v3704_v34 = vmul.f32 0.5, %v3703_v5  ;;  %v3588_v50 = vmul.f32 %v3496_v13, %v7947_v0  ;;  %v4036_v52 = vmul.f32 %v10789_v19, %v4001_v29  ;;  %v3975_v49 = vmul.f32 %v3700_v22, %v10633_v42  ;;  %vm3709_vm11 = vmor %vm3707_vm1, %vm3708_vm5 }
 0x872   :  { %v4037_v37 = vmul.f32 %v10789_v19, %v4002_v9  ;;  %v11230_v41 = vpop.eup %7630  ;;  %v3655_v56 = vsub.f32 1.5, %v3654_v23  ;;  %v11234_v1 = vadd.f32 1e-05, %v3606_v31  ;;  %v4087_v55 = vpack.c.bf16 %v11202_v36, %v11133_v44 }
 0x873   :  { %v3705_v10 = vsub.f32 1.5, %v3704_v34  ;;  %v11227_v11 = vadd.f32 1e-05, %v3588_v50  ;;  %v11238_v47 = vpop.eup %7632  ;;  %v3822_v21 = vmul.f32 %v11230_v41, %v11160_v38  ;;  %v3690_v6 = vsel %vm11244_vm6, %v11089_v62, %v3686_v2 }
 0x874   :  { %v4072_v16 = vadd.f32 %v10801_v17, %v4037_v37  ;;  %v7635_v44 = vpop.eup %7634  ;;  %vm3658_vm0 = vweird.f32 %v11141_v61  ;;  %v3865_v58 = vsub.f32 1.5, %v3864_v24  ;;  %v3832_v30 = vmul.f32 %v11238_v47, %v11172_v48 }
 0x875   :  { %v3706_v42 = vmul.f32 %v11175_v33, %v3705_v10  ;;  %7636 = vrsqrt.f32 %v11227_v11  ;;  %vm3868_vm14 = vweird.f32 %v11162_v14  ;;  %v3672_v46 = vmul.f32 %v7635_v44, %v11186_v35  ;;  %vm11285_vm1 = vmor %vm3657_vm10, %vm3658_vm0 }
 0x876   :  { %v4071_v9 = vadd.f32 %v10801_v17, %v4036_v52  ;;  %v3823_v13 = vmul.f32 %v11230_v41, %v3822_v21  ;;  %v3833_v29 = vmul.f32 %v11238_v47, %v3832_v30  ;;  %7638 = vrsqrt.f32 %v11234_v1  ;;  %vm11300_vm5 = vmor %vm3867_vm2, %vm3868_vm14 }
 0x877   :  { %v3710_v43 = vsel %vm3709_vm11, %v11175_v33, %v3706_v42  ;;  %v3541_v62 = vpop.xlane.xlu0 %3540  ;;  %v3656_v51 = vmul.f32 %v11141_v61, %v3655_v56  ;;  %v3673_v5 = vmul.f32 %v7635_v44, %v3672_v46  ;;  %v4010_v25 = vmul.f32 %v10789_v19, %v3975_v49 }
 0x878   :  { %v3976_v27 = vmul.f32 %v3710_v43, %v10670_v18  ;;  %v4088_v36 = vpack.c.bf16 %v4072_v16, %v4071_v9  ;;  %v3866_v33 = vmul.f32 %v11162_v14, %v3865_v58  ;;  %v3834_v23 = vmul.f32 0.5, %v3833_v29 }
 0x879   :  { %v3603_v22 = vmul.f32 %v3541_v62, %v7947_v0  ;;  %v3974_v50 = vmul.f32 %v3690_v6, %v10626_v39  ;;  %vm3837_vm13 = vweird.f32 %v11172_v48  ;;  %v3674_v31 = vmul.f32 0.5, %v3673_v5 }
 0x87a   :  { %v4011_v34 = vmul.f32 %v10789_v19, %v3976_v27  ;;  %vm3677_vm7 = vweird.f32 %v11186_v35  ;;  %4150 = vmatpush.bf16.msra.mxu3 %v4088_v36  ;;  %v3824_v24 = vmul.f32 0.5, %v3823_v13  ;;  %v3835_v37 = vsub.f32 1.5, %v3834_v23 }
 0x87b   :  { %v11276_v18 = vpop.eup %7636  ;;  %v11291_v39 = vadd.f32 1e-05, %v3603_v22  ;;  %v3660_v52 = vsel %vm11285_vm1, %v11141_v61, %v3656_v51  ;;  %v3675_v49 = vsub.f32 1.5, %v3674_v31  ;;  %vm3678_vm10 = vweird.f32 %v7635_v44 }
 0x87c   :  { %v3662_v10 = vmul.f32 %v11276_v18, %v11227_v11  ;;  %v4046_v56 = vadd.f32 %v10801_v17, %v4011_v34  ;;  %v7639_v28 = vpop.eup %7638  ;;  %v3870_v42 = vsel %vm11300_vm5, %v11162_v14, %v3866_v33  ;;  %vm3827_vm6 = vweird.f32 %v11160_v38  ;;  %vm3679_vm0 = vmor %vm3677_vm7, %vm3678_vm10 }
 0x87d   :  { %7640 = vrsqrt.f32 %v11291_v39  ;;  %v4045_v26 = vadd.f32 %v10801_v17, %v4010_v25  ;;  %v3836_v21 = vmul.f32 %v11238_v47, %v3835_v37  ;;  %vm3838_vm2 = vweird.f32 %v11238_v47 }
 0x87e   :  { %v3663_v61 = vmul.f32 %v11276_v18, %v3662_v10  ;;  %v3676_v16 = vmul.f32 %v7635_v44, %v3675_v49  ;;  %v3842_v6 = vmul.f32 %v7639_v28, %v11234_v1  ;;  %4151 = vmatpush.bf16.msra.mxu3 %v4087_v55  ;;  %v3825_v58 = vsub.f32 1.5, %v3824_v24  ;;  %vm11323_vm14 = vmor %vm3837_vm13, %vm3838_vm2 }
 0x87f   :  { %v4075_v30 = vpack.c.bf16 %v4046_v56, %v4045_v26  ;;  %v4009_v43 = vmul.f32 %v10789_v19, %v3974_v50  ;;  %v3971_v46 = vmul.f32 %v3660_v52, %v10645_v53  ;;  %v3992_v9 = vmul.f32 %v3870_v42, %v10686_v60 }
 0x880   :  { %v3664_v14 = vmul.f32 0.5, %v3663_v61  ;;  %v3680_v62 = vsel %vm3679_vm0, %v7635_v44, %v3676_v16  ;;  %v3843_v27 = vmul.f32 %v7639_v28, %v3842_v6  ;;  %vm3828_vm11 = vweird.f32 %v11230_v41 }
 0x881   :  { %v3973_v35 = vmul.f32 %v3680_v62, %v10667_v32  ;;  %vm3668_vm7 = vweird.f32 %v11276_v18  ;;  %4126 = vmatpush.bf16.msra.mxu2 %v4075_v30  ;;  %v3840_v53 = vsel %vm11323_vm14, %v11238_v47, %v3836_v21  ;;  %vm3667_vm1 = vweird.f32 %v11227_v11  ;;  %vm11352_vm2 = vmor %vm3827_vm6, %vm3828_vm11 }
 0x882   :  { %v3665_v13 = vsub.f32 1.5, %v3664_v14  ;;  %v3844_v60 = vmul.f32 0.5, %v3843_v27  ;;  %vm3847_vm5 = vweird.f32 %v11234_v1  ;;  %4152 = vmatpush.bf16.msra.mxu3 %v4086_v54  ;;  %v3826_v32 = vmul.f32 %v11230_v41, %v3825_v58  ;;  %vm3669_vm13 = vmor %vm3667_vm1, %vm3668_vm7  ;;  %v4179_v58 = vld [vmem:[%s10244_s29] sm:$0xff]  ;;  %v4180_v14 = vld [vmem:[%s10244_s29 + $0x8] sm:$0xff] }
 0x883   :  { %v7641_v48 = vpop.eup %7640  ;;  %v4008_v29 = vmul.f32 %v10789_v19, %v3973_v35  ;;  %v4044_v51 = vadd.f32 %v10801_v17, %v4009_v43  ;;  %vm3848_vm10 = vweird.f32 %v7639_v28  ;;  %v4027_v5 = vmul.f32 %v10789_v19, %v3992_v9 }
 0x884   :  { %v3666_v44 = vmul.f32 %v11276_v18, %v3665_v13  ;;  %v3845_v47 = vsub.f32 1.5, %v3844_v60  ;;  %v3812_v11 = vmul.f32 %v7641_v48, %v11291_v39  ;;  %v3989_v36 = vmul.f32 %v3840_v53, %v10724_v7  ;;  %vm3849_vm6 = vmor %vm3847_vm5, %vm3848_vm10 }
 0x885   :  { %v4043_v20 = vadd.f32 %v10801_v17, %v4008_v29  ;;  %v4026_v54 = vmul.f32 %v10789_v19, %v11205_v40  ;;  %v4006_v7 = vmul.f32 %v10789_v19, %v3971_v46  ;;  %v3830_v40 = vsel %vm11352_vm2, %v11230_v41, %v3826_v32 }
 0x886   :  { %v3670_v4 = vsel %vm3669_vm13, %v11276_v18, %v3666_v44  ;;  %v3846_v23 = vmul.f32 %v7639_v28, %v3845_v47  ;;  %v3813_v22 = vmul.f32 %v7641_v48, %v3812_v11  ;;  %4153 = vmatpush.bf16.msra.mxu3 %v4085_v12  ;;  %v4084_v34 = vpack.c.bf16 %v11079_v59, %v11071_v3  ;;  %v13826_v59 = vld [vmem:[#allocation62_spill] sm:$0xff] }
 0x887   :  { %v3972_v33 = vmul.f32 %v3670_v4, %v10648_v45  ;;  %v4074_v38 = vpack.c.bf16 %v4044_v51, %v4043_v20  ;;  %v4062_v50 = vadd.f32 %v10801_v17, %v4027_v5  ;;  %v4061_v31 = vadd.f32 %v10801_v17, %v4026_v54 }
 0x888   :  { %v3850_v45 = vsel %vm3849_vm6, %v7639_v28, %v3846_v23  ;;  %v3814_v18 = vmul.f32 0.5, %v3813_v22  ;;  %v4024_v41 = vmul.f32 %v10789_v19, %v3989_v36  ;;  %vm3818_vm0 = vweird.f32 %v7641_v48 }
 0x889   :  { %v4007_v57 = vmul.f32 %v10789_v19, %v3972_v33  ;;  %v3990_v12 = vmul.f32 %v3850_v45, %v13825_v8  ;;  %4127 = vmatpush.bf16.msra.mxu2 %v4074_v38  ;;  %v4041_v1 = vadd.f32 %v10801_v17, %v4006_v7  ;;  %v3988_v24 = vmul.f32 %v3830_v40, %v13826_v59  ;;  %v4190_v38 = vld [vmem:[%s11401_s20 + $0x10] sm:$0xff]  ;;  %v4188_v45 = vld [vmem:[%s11401_s20] sm:$0xff]  ;;  %v4269_v8 = vpop.f32.mrf.mxu0 }
 0x88a   :  { %v3815_v2 = vsub.f32 1.5, %v3814_v18  ;;  %4154 = vmatpush.bf16.msra.mxu3 %v4084_v34  ;;  %vm3817_vm11 = vweird.f32 %v11291_v39  ;;  %v4083_v52 = vpack.c.bf16 %v4062_v50, %v4061_v31  ;;  %v4059_v49 = vadd.f32 %v10801_v17, %v4024_v41  ;;  %v4191_v34 = vld [vmem:[%s11401_s20 + $0x18] sm:$0xff]  ;;  %v4189_v50 = vld [vmem:[%s11401_s20 + $0x8] sm:$0xff]  ;;  %v7478_v41 = vld [vmem:[%s11388_s17] ss:$0 sm:$0xff] }
 0x88b   :  { %v4042_v3 = vadd.f32 %v10801_v17, %v4007_v57  ;;  %v4025_v37 = vmul.f32 %v10789_v19, %v3990_v12  ;;  %vm3819_vm14 = vmor %vm3817_vm11, %vm3818_vm0  ;;  %v4023_v26 = vmul.f32 %v10789_v19, %v3988_v24  ;;  %v4204_v30 = vpack.c.bf16 %v4180_v14, %v4179_v58  ;;  %v7115_v58 = vld [vmem:[%s9074_s4 + $0x38] sm:$0xff]  ;;  %v7112_v14 = vld [vmem:[%s9074_s4 + $0x20] sm:$0xff] }
 0x88c   :  { %v3816_v10 = vmul.f32 %v7641_v48, %v3815_v2  ;;  %vm13827_vm7 = vcmask 261120   ;;  %v4310_v18 = vpack.c.bf16 %v4191_v34, %v4190_v38  ;;  %v4309_v57 = vpack.c.bf16 %v4189_v50, %v4188_v45  ;;  %v13841_v38 = vld [vmem:[#allocation71_spill] sm:$0xff]  ;;  %v13843_v50 = vld [vmem:[#allocation72_spill] sm:$0xff] }
 0x88d   :  { %v4073_v15 = vpack.c.bf16 %v4042_v3, %v4041_v1  ;;  %v4060_v56 = vadd.f32 %v10801_v17, %v4025_v37  ;;  %v4058_v16 = vadd.f32 %v10801_v17, %v4023_v26  ;;  %vm13828_vm1 = vmmov %vm13827_vm7 }
 0x88e   :  { %v3820_v28 = vsel %vm3819_vm14, %v7641_v48, %v3816_v10  ;;  %4155 = vmatpush.bf16.msra.mxu3 %v4083_v52  ;;  %vm13829_vm5 = vmmov %vm13828_vm1 }
 0x88f   :  { %4128 = vmatpush.bf16.msra.mxu2 %v4073_v15  ;;  %v3987_v42 = vmul.f32 %v3820_v28, %v10792_v63  ;;  %v4082_v61 = vpack.c.bf16 %v4060_v56, %v4059_v49  ;;  %v4181_v63 = vld [vmem:[%s10244_s29 + $0x10] sm:$0xff]  ;;  %vm13830_vm13 = vmmov %vm13828_vm1 }
 0x890   :  { %vm13831_vm10 = vmmov %vm13828_vm1 }
 0x891   :  { %v4022_v21 = vmul.f32 %v10789_v19, %v3987_v42  ;;  %v4182_v19 = vld [vmem:[%s10244_s29 + $0x18] sm:$0xff]  ;;  %v4271_v12 = vpop.f32.mrf.mxu0  ;;  %vm13832_vm2 = vmmov %vm13828_vm1 }
 0x892   :  { %7300 = vmatmul.lmr.bf16.vlgmr.msra.gmra.8.mxu2  ;;  %4156 = vmatpush.bf16.msra.mxu3 %v4082_v61  ;;  %vm13833_vm6 = vmmov %vm13828_vm1 }
 0x893   :  { %v4057_v39 = vadd.f32 %v10801_v17, %v4022_v21  ;;  %v4205_v17 = vpack.c.bf16 %v4182_v19, %v4181_v63  ;;  %vm13834_vm0 = vmmov %vm13828_vm1 }
 0x894   :  { %vm13836_vm11 = vmmov %vm13834_vm0 }
 0x895   :  { %v4081_v6 = vpack.c.bf16 %v4058_v16, %v4057_v39  ;;  %4224 = vmatpush.bf16.msra.mxu2 %v4205_v17  ;;  %v7114_v17 = vld [vmem:[%s9074_s4 + $0x30] sm:$0xff]  ;;  %vm13838_vm14 = vmmov %vm13834_vm0 }
 0x897   :  { %4157 = vmatpush.bf16.msra.mxu3 %v4081_v6 }
 0x899   :  { %4225 = vmatpush.bf16.msra.mxu2 %v4204_v30  ;;  %v4274_v1 = vpop.f32.mrf.mxu0  ;;  %v4741_v30 = vpack.c.bf16 %v7115_v58, %v7114_v17 }
 0x89a   :  { %7301 = vmatmul.lmr.bf16.gmra.8.mxu2  ;;  %7323 = vmatmul.lmr.bf16.vlgmr.msra.gmra.8.mxu3 }
 0x89b   :  { %4332 = vmatpush.bf16.msra.mxu3 %v4310_v18 }
 0x89f   :  { %4333 = vmatpush.bf16.msra.mxu3 %v4309_v57 }
 0x8a1   :  { %v4276_v56 = vpop.f32.mrf.mxu0 }
 0x8a2   :  { %7302 = vmatmul.lmr.bf16.gmra.8.mxu2  ;;  %7324 = vmatmul.lmr.bf16.gmra.8.mxu3 }
 0x8a9   :  { %v4279_v39 = vpop.f32.mrf.mxu0 }
 0x8aa   :  { %7303 = vmatmul.lmr.bf16.gmra.8.mxu2  ;;  %7325 = vmatmul.lmr.bf16.gmra.8.mxu3 }
 0x8b2   :  { %7304 = vmatmul.lmr.bf16.gmra.8.mxu2  ;;  %7326 = vmatmul.lmr.bf16.gmra.8.mxu3 }
 0x8ba   :  { %7305 = vmatmul.lmr.bf16.gmra.8.mxu2  ;;  %7327 = vmatmul.lmr.bf16.gmra.8.mxu3 }
 0x8c2   :  { %7306 = vmatmul.lmr.bf16.gmra.8.mxu2  ;;  %7328 = vmatmul.lmr.bf16.gmra.8.mxu3 }
 0x8ca   :  { %7307 = vmatmul.lmr.bf16.gmra.8.mxu2  ;;  %7329 = vmatmul.lmr.bf16.gmra.8.mxu3 }
 0x8d2   :  { %7330 = vmatmul.lmr.bf16.gmra.8.mxu3 }
 0x8d9   :  { %7339 = vllmr.8.mxu3 }
 0x915   :  { %v4130_v43 = vpop.f32.mrf.mxu2 }
 0x91d   :  { %v4132_v46 = vpop.f32.mrf.mxu2  ;;  %v4159_v9 = vpop.f32.mrf.mxu3 }
 0x91e   :  { %v4160_v55 = vadd.f32 %v4159_v9, %v4130_v43  ;;  %v7113_v43 = vld [vmem:[%s9074_s4 + $0x28] sm:$0xff]  ;;  %s7782_s4 = smov 34  }
 0x91f   :  { %s11426_s2 = sld [smem:[%s13104_s0 + %s7782_s4]]  }
 0x925   :  { %v4135_v62 = vpop.f32.mrf.mxu2  ;;  %v4161_v27 = vpop.f32.mrf.mxu3  ;;  %v4193_v34 = vld [vmem:[%s11426_s2] sm:$0xff]  ;;  %v4194_v45 = vld [vmem:[%s11426_s2 + $0x8] sm:$0xff] }
 0x926   :  { %v4162_v35 = vadd.f32 %v4161_v27, %v4132_v46  ;;  %v4740_v46 = vpack.c.bf16 %v7113_v43, %v7112_v14  ;;  %v4367_v18 = vpack.c.bf16 %v4194_v45, %v4193_v34 }
 0x928   :  { %v4200_v13 = vpack.c.bf16 %v4162_v35, %v4160_v55 }
 0x92a   :  { %7088 = vmatmul.msk.bf16.vlgmr.msra.gmra.mxu2 %vm13827_vm7, %v4200_v13  ;;  %vm13840_vm7 = vmmov %vm13834_vm0 }
 0x92d   :  { %v4137_v53 = vpop.f32.mrf.mxu2  ;;  %v4164_v60 = vpop.f32.mrf.mxu3 }
 0x92e   :  { %v4165_v48 = vadd.f32 %v4164_v60, %v4135_v62  ;;  %v4281_v62 = vpop.f32.mrf.mxu0 }
 0x935   :  { %v4166_v32 = vpop.f32.mrf.mxu3  ;;  %v4140_v44 = vpop.f32.mrf.mxu2 }
 0x936   :  { %v4167_v29 = vadd.f32 %v4166_v32, %v4137_v53  ;;  %v4284_v32 = vpop.f32.mrf.mxu0 }
 0x938   :  { %v4201_v51 = vpack.c.bf16 %v4167_v29, %v4165_v48 }
 0x93a   :  { %7089 = vmatmul.msk.bf16.gmra.mxu2 %vm13828_vm1, %v4201_v51  ;;  %vm13842_vm1 = vmmov %vm13834_vm0 }
 0x93d   :  { %v4169_v47 = vpop.f32.mrf.mxu3  ;;  %v4142_v11 = vpop.f32.mrf.mxu2 }
 0x93e   :  { %v4170_v5 = vadd.f32 %v4169_v47, %v4140_v44 }
 0x945   :  { %v4171_v36 = vpop.f32.mrf.mxu3  ;;  %v4145_v54 = vpop.f32.mrf.mxu2 }
 0x946   :  { %v4172_v4 = vadd.f32 %v4171_v36, %v4142_v11 }
 0x948   :  { %v4202_v20 = vpack.c.bf16 %v4172_v4, %v4170_v5  ;;  %v4286_v5 = vpop.f32.mrf.mxu0 }
 0x94a   :  { %7090 = vmatmul.msk.bf16.gmra.mxu2 %vm13829_vm5, %v4202_v20  ;;  %vm13844_vm5 = vmmov %vm13834_vm0 }
 0x94d   :  { %v4174_v25 = vpop.f32.mrf.mxu3  ;;  %v4147_v33 = vpop.f32.mrf.mxu2 }
 0x94e   :  { %v4175_v23 = vadd.f32 %v4174_v25, %v4145_v54  ;;  %v13835_v25 = vld [vmem:[#allocation68_spill] sm:$0xff] }
 0x955   :  { %v4176_v22 = vpop.f32.mrf.mxu3 }
 0x956   :  { %v4177_v7 = vadd.f32 %v4176_v22, %v4147_v33  ;;  %v13837_v33 = vld [vmem:[#allocation69_spill] sm:$0xff] }
 0x957   :  { %v4196_v22 = vld [vmem:[%s11426_s2 + $0x18] sm:$0xff] }
 0x958   :  { %v4203_v40 = vpack.c.bf16 %v4177_v7, %v4175_v23  ;;  %v4195_v23 = vld [vmem:[%s11426_s2 + $0x10] sm:$0xff] }
 0x959   :  { %v4368_v7 = vpack.c.bf16 %v4196_v22, %v4195_v23 }
 0x95a   :  { %7091 = vmatmul.msk.bf16.gmra.mxu2 %vm13830_vm13, %v4203_v40  ;;  %v13839_v40 = vld [vmem:[#allocation70_spill] sm:$0xff]  ;;  %vm13846_vm13 = vmmov %vm13834_vm0 }
 0x95b   :  { %4390 = vmatpush.bf16.msra.mxu1 %v4368_v7 }
 0x95f   :  { %4391 = vmatpush.bf16.msra.mxu1 %v4367_v18 }
 0x9ad   :  { %v4227_v31 = vpop.f32.mrf.mxu2 }
 0x9ae   :  { %v4250_v2 = vadd.f32 %v7478_v41, %v4227_v31 }
 0x9b0   :  { %v4289_v59 = vadd.f32 %v4269_v8, %v4250_v2  ;;  %v7479_v8 = vld [vmem:[%s11412_s27] ss:$0 sm:$0xff] }
 0x9b2   :  { %v4297_v10 = vmax.f32 %v4289_v59, 0.0  ;;  %v13845_v59 = vld [vmem:[#allocation73_spill] sm:$0xff] }
 0x9b5   :  { %v4229_v3 = vpop.f32.mrf.mxu2 }
 0x9b6   :  { %v4251_v24 = vadd.f32 %v7478_v41, %v4229_v3 }
 0x9b8   :  { %v4290_v37 = vadd.f32 %v4271_v12, %v4251_v24 }
 0x9ba   :  { %v4298_v52 = vmax.f32 %v4290_v37, 0.0 }
 0x9bc   :  { %v4305_v15 = vpack.c.bf16 %v4298_v52, %v4297_v10 }
 0x9bd   :  { %v4232_v49 = vpop.f32.mrf.mxu2 }
 0x9be   :  { %7096 = vmatmul.msk.bf16.vlgmr.msra.gmra.mxu3 %vm13831_vm10, %v4305_v15  ;;  %v4252_v28 = vadd.f32 %v7478_v41, %v4232_v49  ;;  %vm13847_vm10 = vmmov %vm13834_vm0 }
 0x9bf   :  { %4748 = vmatpush.bf16.msra.mxu3 %v4741_v30 }
 0x9c0   :  { %v4291_v61 = vadd.f32 %v4274_v1, %v4252_v28  ;;  %v13848_v28 = vld [vmem:[#allocation74_spill] sm:$0xff] }
 0x9c2   :  { %v4299_v16 = vmax.f32 %v4291_v61, 0.0 }
 0x9c3   :  { %4749 = vmatpush.bf16.msra.mxu3 %v4740_v46 }
 0x9c5   :  { %v4234_v42 = vpop.f32.mrf.mxu2 }
 0x9c6   :  { %v4253_v26 = vadd.f32 %v7478_v41, %v4234_v42 }
 0x9c8   :  { %v4292_v21 = vadd.f32 %v4276_v56, %v4253_v26 }
 0x9ca   :  { %v4300_v6 = vmax.f32 %v4292_v21, 0.0 }
 0x9cc   :  { %v4306_v63 = vpack.c.bf16 %v4300_v6, %v4299_v16 }
 0x9cd   :  { %v4237_v19 = vpop.f32.mrf.mxu2 }
 0x9ce   :  { %7097 = vmatmul.msk.bf16.gmra.mxu3 %vm13832_vm2, %v4306_v63  ;;  %v4254_v9 = vadd.f32 %v7478_v41, %v4237_v19  ;;  %vm13849_vm2 = vmmov %vm13834_vm0  ;;  %v13851_v63 = vld [vmem:[#allocation24_spill] sm:$0xff] }
 0x9d0   :  { %v4293_v55 = vadd.f32 %v4279_v39, %v4254_v9  ;;  %v13853_v9 = vld [vmem:[#allocation49_spill] sm:$0xff] }
 0x9d2   :  { %v4301_v53 = vmax.f32 %v4293_v55, 0.0 }
 0x9d5   :  { %v4239_v27 = vpop.f32.mrf.mxu2 }
 0x9d6   :  { %v4255_v35 = vadd.f32 %v7478_v41, %v4239_v27  ;;  %v13858_v27 = vld [vmem:[#allocation53_spill] sm:$0xff] }
 0x9d8   :  { %v4294_v13 = vadd.f32 %v4281_v62, %v4255_v35  ;;  %v13856_v62 = vld [vmem:[#allocation48_spill] sm:$0xff]  ;;  %v13860_v35 = vld [vmem:[#allocation65_spill] sm:$0xff] }
 0x9da   :  { %v4302_v60 = vmax.f32 %v4294_v13, 0.0 }
 0x9dc   :  { %v4307_v48 = vpack.c.bf16 %v4302_v60, %v4301_v53  ;;  %v13862_v60 = vld [vmem:[#allocation50_spill] sm:$0xff] }
 0x9dd   :  { %v4242_v44 = vpop.f32.mrf.mxu2 }
 0x9de   :  { %7098 = vmatmul.msk.bf16.gmra.mxu3 %vm13833_vm6, %v4307_v48  ;;  %v4256_v29 = vadd.f32 %v7478_v41, %v4242_v44  ;;  %vm13850_vm6 = vmmov %vm13834_vm0 }
 0x9e0   :  { %v4295_v47 = vadd.f32 %v4284_v32, %v4256_v29  ;;  %v7480_v32 = vld [vmem:[%s11444_s8] ss:$0 sm:$0xff] }
 0x9e2   :  { %v4303_v4 = vmax.f32 %v4295_v47, 0.0 }
 0x9e5   :  { %v4244_v51 = vpop.f32.mrf.mxu2 }
 0x9e6   :  { %v4257_v11 = vadd.f32 %v7478_v41, %v4244_v51  ;;  %v13864_v51 = vld [vmem:[#allocation60_spill] sm:$0xff] }
 0x9e8   :  { %v4296_v36 = vadd.f32 %v4286_v5, %v4257_v11 }
 0x9ea   :  { %v4304_v20 = vmax.f32 %v4296_v36, 0.0 }
 0x9ec   :  { %v4308_v54 = vpack.c.bf16 %v4304_v20, %v4303_v4 }
 0x9ee   :  { %7099 = vmatmul.msk.bf16.gmra.mxu3 %vm13834_vm0, %v4308_v54 }
 0x9fe   :  { %7137 = vmatmul.msk.bf16.vlgmr.msra.gmra.mxu3 %vm13836_vm11, %v13835_v25  ;;  %vm13852_vm11 = vmmov %vm13834_vm0 }
 0xa0e   :  { %7138 = vmatmul.msk.bf16.gmra.mxu3 %vm13838_vm14, %v13837_v33  ;;  %vm13854_vm14 = vmmov %vm13834_vm0  ;;  %v13867_v33 = vld [vmem:[#allocation63_spill] sm:$0xff] }
 0xa1e   :  { %7139 = vmatmul.msk.bf16.gmra.mxu3 %vm13840_vm7, %v13839_v40  ;;  %vm13855_vm7 = vmmov %vm13834_vm0 }
 0xa2e   :  { %7140 = vmatmul.msk.bf16.gmra.mxu3 %vm13842_vm1, %v13841_v38  ;;  %vm13857_vm1 = vmmov %vm13834_vm0 }
 0xa3e   :  { %7141 = vmatmul.msk.bf16.gmra.mxu3 %vm13844_vm5, %v13843_v50  ;;  %vm13859_vm5 = vmmov %vm13834_vm0  ;;  %v13871_v50 = vld [vmem:[#allocation55_spill] sm:$0xff] }
 0xa41   :  { %v4335_v57 = vpop.f32.mrf.mxu3 }
 0xa42   :  { %v4336_v12 = vadd.f32 %v7479_v8, %v4335_v57 }
 0xa44   :  { %v4355_v2 = vmax.f32 %v4336_v12, 0.0 }
 0xa49   :  { %v4337_v31 = vpop.f32.mrf.mxu3 }
 0xa4a   :  { %v4338_v41 = vadd.f32 %v7479_v8, %v4337_v31 }
 0xa4c   :  { %v4356_v1 = vmax.f32 %v4338_v41, 0.0 }
 0xa4e   :  { %v4363_v3 = vpack.c.bf16 %v4356_v1, %v4355_v2  ;;  %7142 = vmatmul.msk.bf16.gmra.mxu3 %vm13846_vm13, %v13845_v59  ;;  %vm13861_vm13 = vmmov %vm13834_vm0 }
 0xa50   :  { %7100 = vmatmul.msk.bf16.vlgmr.msra.gmra.mxu1 %vm13847_vm10, %v4363_v3  ;;  %vm13863_vm10 = vmmov %vm13834_vm0 }
 0xa51   :  { %v4340_v24 = vpop.f32.mrf.mxu3 }
 0xa52   :  { %v4341_v37 = vadd.f32 %v7479_v8, %v4340_v24 }
 0xa54   :  { %v4357_v15 = vmax.f32 %v4341_v37, 0.0 }
 0xa59   :  { %v4342_v10 = vpop.f32.mrf.mxu3 }
 0xa5a   :  { %v4343_v52 = vadd.f32 %v7479_v8, %v4342_v10 }
 0xa5c   :  { %v4358_v49 = vmax.f32 %v4343_v52, 0.0 }
 0xa5e   :  { %v4364_v56 = vpack.c.bf16 %v4358_v49, %v4357_v15  ;;  %7143 = vmatmul.msk.bf16.gmra.mxu3 %vm13849_vm2, %v13848_v28  ;;  %vm13865_vm2 = vmmov %vm13834_vm0 }
 0xa60   :  { %7101 = vmatmul.msk.bf16.gmra.mxu1 %vm13850_vm6, %v4364_v56  ;;  %vm13866_vm6 = vmmov %vm13834_vm0 }
 0xa61   :  { %v4345_v42 = vpop.f32.mrf.mxu3 }
 0xa62   :  { %v4346_v61 = vadd.f32 %v7479_v8, %v4345_v42 }
 0xa64   :  { %v4359_v39 = vmax.f32 %v4346_v61, 0.0 }
 0xa69   :  { %v4347_v26 = vpop.f32.mrf.mxu3 }
 0xa6a   :  { %v4348_v21 = vadd.f32 %v7479_v8, %v4347_v26 }
 0xa6c   :  { %v4360_v16 = vmax.f32 %v4348_v21, 0.0 }
 0xa6e   :  { %v4365_v6 = vpack.c.bf16 %v4360_v16, %v4359_v39  ;;  %7144 = vmatmul.msk.bf16.gmra.mxu3 %vm13834_vm0, %v13851_v63 }
 0xa70   :  { %7102 = vmatmul.msk.bf16.gmra.mxu1 %vm13852_vm11, %v4365_v6  ;;  %vm13868_vm11 = vmmov %vm13834_vm0 }
 0xa71   :  { %v4350_v19 = vpop.f32.mrf.mxu3 }
 0xa72   :  { %v4351_v17 = vadd.f32 %v7479_v8, %v4350_v19 }
 0xa74   :  { %v4361_v30 = vmax.f32 %v4351_v17, 0.0 }
 0xa79   :  { %v4352_v58 = vpop.f32.mrf.mxu3 }
 0xa7a   :  { %v4353_v14 = vadd.f32 %v7479_v8, %v4352_v58 }
 0xa7c   :  { %v4362_v43 = vmax.f32 %v4353_v14, 0.0 }
 0xa7e   :  { %v4366_v46 = vpack.c.bf16 %v4362_v43, %v4361_v30  ;;  %7145 = vmatmul.msk.bf16.gmra.mxu3 %vm13854_vm14, %v13853_v9  ;;  %vm13869_vm14 = vmmov %vm13834_vm0 }
 0xa80   :  { %7103 = vmatmul.msk.bf16.gmra.mxu1 %vm13855_vm7, %v4366_v46  ;;  %vm13870_vm7 = vmmov %vm13834_vm0 }
 0xa81   :  { %v11462_v55 = vpop.f32.mrf.mxu3 }
 0xa89   :  { %v11466_v13 = vpop.f32.mrf.mxu3 }
 0xa8e   :  { %7146 = vmatmul.msk.bf16.gmra.mxu3 %vm13857_vm1, %v13856_v62  ;;  %vm13872_vm1 = vmmov %vm13834_vm0 }
 0xa91   :  { %v11468_v53 = vpop.f32.mrf.mxu3 }
 0xa99   :  { %v11472_v48 = vpop.f32.mrf.mxu3 }
 0xa9e   :  { %7147 = vmatmul.msk.bf16.gmra.mxu3 %vm13859_vm5, %v13858_v27  ;;  %vm13873_vm5 = vmmov %vm13834_vm0 }
 0xaa1   :  { %v11477_v47 = vpop.f32.mrf.mxu3 }
 0xaa9   :  { %v11481_v20 = vpop.f32.mrf.mxu3 }
 0xaae   :  { %7148 = vmatmul.msk.bf16.gmra.mxu3 %vm13861_vm13, %v13860_v35  ;;  %vm13874_vm13 = vmmov %vm13834_vm0 }
 0xab1   :  { %v11486_v22 = vpop.f32.mrf.mxu3 }
 0xab9   :  { %v11489_v45 = vpop.f32.mrf.mxu3 }
 0xabe   :  { %7149 = vmatmul.msk.bf16.gmra.mxu3 %vm13863_vm10, %v13862_v60  ;;  %vm13875_vm10 = vmmov %vm13834_vm0 }
 0xacd   :  { %v4393_v44 = vpop.f32.mrf.mxu1 }
 0xace   :  { %v4394_v29 = vadd.f32 %v7480_v32, %v4393_v44  ;;  %7150 = vmatmul.msk.bf16.gmra.mxu3 %vm13865_vm2, %v13864_v51  ;;  %vm13876_vm2 = vmmov %vm13834_vm0 }
 0xad0   :  { %v4413_v11 = vsel %vm13866_vm6, %v4394_v29, 0.0  ;;  %vm13877_vm6 = vmmov %vm13834_vm0 }
 0xad1   :  { %4414 = vadd.xlane.f32.xlu1 %v4413_v11 }
 0xad5   :  { %v4395_v5 = vpop.f32.mrf.mxu1 }
 0xad6   :  { %v4396_v36 = vadd.f32 %v7480_v32, %v4395_v5 }
 0xad8   :  { %v4416_v4 = vsel %vm13834_vm0, %v4396_v36, 0.0 }
 0xad9   :  { %4417 = vadd.xlane.f32.xlu0 %v4416_v4 }
 0xadd   :  { %v4398_v54 = vpop.f32.mrf.mxu1 }
 0xade   :  { %v4399_v25 = vadd.f32 %v7480_v32, %v4398_v54  ;;  %7151 = vmatmul.msk.bf16.gmra.mxu3 %vm13868_vm11, %v13867_v33  ;;  %vm13878_vm11 = vmmov %vm13834_vm0 }
 0xae0   :  { %v4419_v23 = vsel %vm13869_vm14, %v4399_v25, 0.0  ;;  %vm13879_vm14 = vmmov %vm13834_vm0 }
 0xae1   :  { %4420 = vadd.xlane.f32.xlu2 %v4419_v23 }
 0xae5   :  { %v4400_v7 = vpop.f32.mrf.mxu1 }
 0xae6   :  { %v4401_v40 = vadd.f32 %v7480_v32, %v4400_v7 }
 0xae8   :  { %v4422_v38 = vsel %vm13870_vm7, %v4401_v40, 0.0  ;;  %vm13880_vm7 = vmmov %vm13834_vm0 }
 0xae9   :  { %4423 = vadd.xlane.f32.xlu1 %v4422_v38 }
 0xaed   :  { %v4403_v34 = vpop.f32.mrf.mxu1 }
 0xaee   :  { %v4404_v18 = vadd.f32 %v7480_v32, %v4403_v34  ;;  %7152 = vmatmul.msk.bf16.gmra.mxu3 %vm13872_vm1, %v13871_v50  ;;  %vm13881_vm1 = vmmov %vm13834_vm0 }
 0xaf0   :  { %v4425_v57 = vsel %vm13873_vm5, %v4404_v18, 0.0  ;;  %vm13882_vm5 = vmmov %vm13834_vm0 }
 0xaf1   :  { %4426 = vadd.xlane.f32.xlu0 %v4425_v57 }
 0xaf5   :  { %v4405_v8 = vpop.f32.mrf.mxu1 }
 0xaf6   :  { %v4406_v12 = vadd.f32 %v7480_v32, %v4405_v8 }
 0xaf8   :  { %v4428_v31 = vsel %vm13874_vm13, %v4406_v12, 0.0  ;;  %vm13883_vm13 = vmmov %vm13834_vm0 }
 0xaf9   :  { %4429 = vadd.xlane.f32.xlu2 %v4428_v31 }
 0xafd   :  { %v4408_v41 = vpop.f32.mrf.mxu1 }
 0xafe   :  { %v4409_v2 = vadd.f32 %v7480_v32, %v4408_v41 }
 0xb00   :  { %v4431_v1 = vsel %vm13875_vm10, %v4409_v2, 0.0 }
 0xb01   :  { %4432 = vadd.xlane.f32.xlu2 %v4431_v1  ;;  %v7106_v1 = vld [vmem:[%s8088_s18 + $0x30] sm:$0xff] }
 0xb05   :  { %v4410_v52 = vpop.f32.mrf.mxu1 }
 0xb06   :  { %v4411_v56 = vadd.f32 %v7480_v32, %v4410_v52  ;;  %v7111_v52 = vld [vmem:[%s8509_s22 + $0x38] sm:$0xff] }
 0xb08   :  { %v4434_v26 = vsel %vm13834_vm0, %v4411_v56, 0.0 }
 0xb44   :  { %v4415_v3 = vpop.xlane.xlu1 %4414 }
 0xb45   :  { %v4437_v59 = vmul.f32 %v4415_v3, %v7947_v0  ;;  %v7107_v3 = vld [vmem:[%s8088_s18 + $0x38] sm:$0xff] }
 0xb47   :  { %v11507_v24 = vsub.f32 %v4394_v29, %v4437_v59  ;;  %v7110_v59 = vld [vmem:[%s8509_s22 + $0x30] sm:$0xff] }
 0xb49   :  { %v4453_v37 = vmul.f32 %v11507_v24, %v11507_v24 }
 0xb4b   :  { %v4461_v10 = vsel %vm13876_vm2, %v4453_v37, 0.0 }
 0xb4c   :  { %v4418_v15 = vpop.xlane.xlu0 %4417  ;;  %4462 = vadd.xlane.f32.xlu1 %v4461_v10  ;;  %v4659_v10 = vpack.c.bf16 %v7107_v3, %v7106_v1 }
 0xb4d   :  { %v4438_v49 = vmul.f32 %v4418_v15, %v7947_v0 }
 0xb4e   :  { %4678 = vmatpush.bf16.msra.mxu2 %v4659_v10 }
 0xb4f   :  { %v11513_v28 = vsub.f32 %v4396_v36, %v4438_v49  ;;  %v4702_v49 = vpack.c.bf16 %v7111_v52, %v7110_v59 }
 0xb51   :  { %v4454_v42 = vmul.f32 %v11513_v28, %v11513_v28  ;;  %4709 = vmatpush.bf16.msra.mxu0 %v4702_v49 }
 0xb53   :  { %v4464_v61 = vsel %vm13877_vm6, %v4454_v42, 0.0 }
 0xb54   :  { %v4421_v21 = vpop.xlane.xlu2 %4420  ;;  %4465 = vadd.xlane.f32.xlu0 %v4464_v61  ;;  %4435 = vadd.xlane.f32.xlu1 %v4434_v26 }
 0xb55   :  { %v4439_v39 = vmul.f32 %v4421_v21, %v7947_v0  ;;  %v7104_v21 = vld [vmem:[%s8088_s18 + $0x20] sm:$0xff] }
 0xb57   :  { %v11520_v16 = vsub.f32 %v4399_v25, %v4439_v39  ;;  %v7105_v39 = vld [vmem:[%s8088_s18 + $0x28] sm:$0xff]  ;;  %s7786_s18 = smov 38  }
 0xb59   :  { %v4455_v6 = vmul.f32 %v11520_v16, %v11520_v16 }
 0xb5b   :  { %v4467_v63 = vsel %vm13878_vm11, %v4455_v6, 0.0  ;;  %v7108_v6 = vld [vmem:[%s8509_s22 + $0x20] sm:$0xff] }
 0xb5c   :  { %v4424_v19 = vpop.xlane.xlu1 %4423  ;;  %4468 = vadd.xlane.f32.xlu0 %v4467_v63  ;;  %v4658_v63 = vpack.c.bf16 %v7105_v39, %v7104_v21 }
 0xb5d   :  { %v4440_v17 = vmul.f32 %v4424_v19, %v7947_v0  ;;  %v7109_v19 = vld [vmem:[%s8509_s22 + $0x28] sm:$0xff] }
 0xb5e   :  { %4679 = vmatpush.bf16.msra.mxu2 %v4658_v63 }
 0xb5f   :  { %v11526_v58 = vsub.f32 %v4401_v40, %v4440_v17 }
 0xb61   :  { %v4456_v14 = vmul.f32 %v11526_v58, %v11526_v58 }
 0xb63   :  { %v4470_v30 = vsel %vm13879_vm14, %v4456_v14, 0.0 }
 0xb64   :  { %v4427_v43 = vpop.xlane.xlu0 %4426  ;;  %4471 = vadd.xlane.f32.xlu2 %v4470_v30  ;;  %v4701_v30 = vpack.c.bf16 %v7109_v19, %v7108_v6 }
 0xb65   :  { %v4441_v46 = vmul.f32 %v4427_v43, %v7947_v0 }
 0xb66   :  { %4710 = vmatpush.bf16.msra.mxu0 %v4701_v30 }
 0xb67   :  { %v11532_v9 = vsub.f32 %v4404_v18, %v4441_v46 }
 0xb69   :  { %v4457_v62 = vmul.f32 %v11532_v9, %v11532_v9 }
 0xb6b   :  { %v4473_v27 = vsel %vm13880_vm7, %v4457_v62, 0.0  ;;  %v11567_v62 = vld [vmem:[%s11498_s1] ss:$0 sm:$0xff] }
 0xb6c   :  { %v4430_v35 = vpop.xlane.xlu2 %4429  ;;  %4474 = vadd.xlane.f32.xlu1 %v4473_v27 }
 0xb6d   :  { %v4442_v60 = vmul.f32 %v4430_v35, %v7947_v0 }
 0xb6f   :  { %v11538_v32 = vsub.f32 %v4406_v12, %v4442_v60 }
 0xb71   :  { %v4458_v44 = vmul.f32 %v11538_v32, %v11538_v32 }
 0xb73   :  { %v4476_v29 = vsel %vm13881_vm1, %v4458_v44, 0.0 }
 0xb74   :  { %4477 = vadd.xlane.f32.xlu0 %v4476_v29  ;;  %v4433_v51 = vpop.xlane.xlu2 %4432 }
 0xb75   :  { %v4443_v11 = vmul.f32 %v4433_v51, %v7947_v0 }
 0xb77   :  { %v11544_v5 = vsub.f32 %v4409_v2, %v4443_v11 }
 0xb79   :  { %v4459_v36 = vmul.f32 %v11544_v5, %v11544_v5 }
 0xb7b   :  { %v4479_v4 = vsel %vm13882_vm5, %v4459_v36, 0.0  ;;  %v11572_v36 = vld [vmem:[%s11503_s24] ss:$0 sm:$0xff] }
 0xb7c   :  { %4480 = vadd.xlane.f32.xlu2 %v4479_v4 }
 0xbbf   :  { %v4463_v54 = vpop.xlane.xlu1 %4462 }
 0xbc0   :  { %v4485_v25 = vmul.f32 %v4463_v54, %v7947_v0 }
 0xbc2   :  { %v4493_v33 = vadd.f32 1e-05, %v4485_v25 }
 0xbc4   :  { %7642 = vrsqrt.f32 %v4493_v33  ;;  %vm4507_vm2 = vweird.f32 %v4493_v33 }
 0xbc7   :  { %v4466_v23 = vpop.xlane.xlu0 %4465  ;;  %v4436_v7 = vpop.xlane.xlu1 %4435 }
 0xbc8   :  { %v4486_v40 = vmul.f32 %v4466_v23, %v7947_v0  ;;  %v4444_v38 = vmul.f32 %v4436_v7, %v7947_v0 }
 0xbca   :  { %v7643_v34 = vpop.eup %7642  ;;  %v4494_v18 = vadd.f32 1e-05, %v4486_v40  ;;  %v11552_v50 = vsub.f32 %v4411_v56, %v4444_v38 }
 0xbcb   :  { %v4502_v57 = vmul.f32 %v7643_v34, %v4493_v33  ;;  %vm4508_vm10 = vweird.f32 %v7643_v34 }
 0xbcc   :  { %7644 = vrsqrt.f32 %v4494_v18  ;;  %v4460_v8 = vmul.f32 %v11552_v50, %v11552_v50  ;;  %vm4509_vm6 = vmor %vm4507_vm2, %vm4508_vm10  ;;  %vm4517_vm11 = vweird.f32 %v4494_v18 }
 0xbcd   :  { %v4503_v12 = vmul.f32 %v7643_v34, %v4502_v57  ;;  %vm13888_vm10 = vmmov %vm13883_vm13 }
 0xbce   :  { %v4482_v31 = vsel %vm13883_vm13, %v4460_v8, 0.0 }
 0xbcf   :  { %v4504_v41 = vmul.f32 0.5, %v4503_v12  ;;  %v4469_v2 = vpop.xlane.xlu0 %4468  ;;  %4483 = vadd.xlane.f32.xlu1 %v4482_v31 }
 0xbd0   :  { %v4487_v37 = vmul.f32 %v4469_v2, %v7947_v0 }
 0xbd1   :  { %v4505_v15 = vsub.f32 1.5, %v4504_v41  ;;  %v13884_v41 = vld [vmem:[#allocation2_spill] sm:$0xff] }
 0xbd2   :  { %v7645_v56 = vpop.eup %7644  ;;  %v4495_v42 = vadd.f32 1e-05, %v4487_v37 }
 0xbd3   :  { %v4506_v61 = vmul.f32 %v7643_v34, %v4505_v15  ;;  %v4512_v26 = vmul.f32 %v7645_v56, %v4494_v18  ;;  %vm4518_vm0 = vweird.f32 %v7645_v56 }
 0xbd4   :  { %7646 = vrsqrt.f32 %v4495_v42  ;;  %vm4519_vm14 = vmor %vm4517_vm11, %vm4518_vm0  ;;  %vm4527_vm1 = vweird.f32 %v4495_v42 }
 0xbd5   :  { %v4510_v17 = vsel %vm4509_vm6, %v7643_v34, %v4506_v61  ;;  %v4513_v14 = vmul.f32 %v7645_v56, %v4512_v26 }
 0xbd6   :  { %v4581_v27 = vmul.f32 %v4510_v17, %v11507_v24 }
 0xbd7   :  { %v4514_v43 = vmul.f32 0.5, %v4513_v14  ;;  %v4472_v46 = vpop.xlane.xlu2 %4471 }
 0xbd8   :  { %v4488_v35 = vmul.f32 %v4472_v46, %v7947_v0  ;;  %v4592_v4 = vmul.f32 %v11567_v62, %v4581_v27 }
 0xbd9   :  { %v4515_v60 = vsub.f32 1.5, %v4514_v43 }
 0xbda   :  { %v7647_v44 = vpop.eup %7646  ;;  %v4496_v29 = vadd.f32 1e-05, %v4488_v35  ;;  %v4603_v7 = vadd.f32 %v11572_v36, %v4592_v4 }
 0xbdb   :  { %v4516_v51 = vmul.f32 %v7645_v56, %v4515_v60  ;;  %v4522_v11 = vmul.f32 %v7647_v44, %v4495_v42  ;;  %vm4528_vm7 = vweird.f32 %v7647_v44  ;;  %v13889_v60 = vld [vmem:[#allocation5_spill] sm:$0xff] }
 0xbdc   :  { %7648 = vrsqrt.f32 %v4496_v29  ;;  %v11581_v2 = vadd.f32 %v4603_v7, %v13884_v41  ;;  %vm4529_vm5 = vmor %vm4527_vm1, %vm4528_vm7  ;;  %vm4537_vm6 = vweird.f32 %v4496_v29 }
 0xbdd   :  { %v4520_v54 = vsel %vm4519_vm14, %v7645_v56, %v4516_v51  ;;  %v4523_v25 = vmul.f32 %v7647_v44, %v4522_v11  ;;  %vm13893_vm1 = vmmov %vm13888_vm10 }
 0xbde   :  { %v4582_v33 = vmul.f32 %v4520_v54, %v11513_v28  ;;  %13885 = vst [vmem:[#allocation52_spill] sm:$0xff] %v11581_v2  ;;  %v13886_v28 = vld [vmem:[#allocation3_spill] sm:$0xff] }
 0xbdf   :  { %v4524_v24 = vmul.f32 0.5, %v4523_v25  ;;  %v4475_v23 = vpop.xlane.xlu1 %4474 }
 0xbe0   :  { %v4593_v40 = vmul.f32 %v11567_v62, %v4582_v33  ;;  %v4489_v38 = vmul.f32 %v4475_v23, %v7947_v0 }
 0xbe1   :  { %v4525_v34 = vsub.f32 1.5, %v4524_v24 }
 0xbe2   :  { %v7649_v18 = vpop.eup %7648  ;;  %v4604_v57 = vadd.f32 %v11572_v36, %v4593_v40  ;;  %v4497_v8 = vadd.f32 1e-05, %v4489_v38 }
 0xbe3   :  { %v4526_v12 = vmul.f32 %v7647_v44, %v4525_v34  ;;  %v4532_v31 = vmul.f32 %v7649_v18, %v4496_v29  ;;  %vm4538_vm2 = vweird.f32 %v7649_v18  ;;  %v13891_v29 = vld [vmem:[#allocation6_spill] sm:$0xff] }
 0xbe4   :  { %v11584_v1 = vadd.f32 %v4604_v57, %v13886_v28  ;;  %7650 = vrsqrt.f32 %v4497_v8  ;;  %vm4539_vm0 = vmor %vm4537_vm6, %vm4538_vm2  ;;  %vm4547_vm14 = vweird.f32 %v4497_v8 }
 0xbe5   :  { %v4530_v3 = vsel %vm4529_vm5, %v7647_v44, %v4526_v12  ;;  %v4533_v59 = vmul.f32 %v7649_v18, %v4532_v31  ;;  %vm13894_vm5 = vmmov %vm13893_vm1 }
 0xbe6   :  { %13887 = vst [vmem:[#allocation47_spill] sm:$0xff] %v11584_v1  ;;  %v11588_v37 = vpack.c.bf16 %v11584_v1, %v11581_v2  ;;  %v4583_v15 = vmul.f32 %v4530_v3, %v11520_v16  ;;  %vm13899_vm6 = vmmov %vm13893_vm1 }
 0xbe7   :  { %v4534_v10 = vmul.f32 0.5, %v4533_v59  ;;  %v4478_v52 = vpop.xlane.xlu0 %4477 }
 0xbe8   :  { %v4490_v49 = vmul.f32 %v4478_v52, %v7947_v0  ;;  %7129 = vmatmul.msk.bf16.vlgmr.msra.gmra.mxu2 %vm13883_vm13, %v11588_v37  ;;  %7133 = vmatmul.msk.bf16.vlgmr.msra.gmra.mxu0 %vm13888_vm10, %v11588_v37  ;;  %v4594_v39 = vmul.f32 %v11567_v62, %v4583_v15 }
 0xbe9   :  { %v4535_v56 = vsub.f32 1.5, %v4534_v10 }
 0xbea   :  { %v7651_v42 = vpop.eup %7650  ;;  %v4498_v61 = vadd.f32 1e-05, %v4490_v49  ;;  %v4605_v14 = vadd.f32 %v11572_v36, %v4594_v39 }
 0xbeb   :  { %v4536_v26 = vmul.f32 %v7649_v18, %v4535_v56  ;;  %v4542_v21 = vmul.f32 %v7651_v42, %v4497_v8  ;;  %vm4548_vm11 = vweird.f32 %v7651_v42  ;;  %v13897_v8 = vld [vmem:[#allocation14_spill] sm:$0xff] }
 0xbec   :  { %7652 = vrsqrt.f32 %v4498_v61  ;;  %vm4549_vm7 = vmor %vm4547_vm14, %vm4548_vm11  ;;  %v11602_v44 = vadd.f32 %v4605_v14, %v13889_v60  ;;  %vm4557_vm10 = vweird.f32 %v4498_v61  ;;  %v13901_v60 = vld [vmem:[#allocation29_spill] sm:$0xff] }
 0xbed   :  { %v4540_v16 = vsel %vm4539_vm0, %v7649_v18, %v4536_v26  ;;  %v4543_v6 = vmul.f32 %v7651_v42, %v4542_v21  ;;  %v13895_v18 = vld [vmem:[#allocation13_spill] sm:$0xff]  ;;  %vm13900_vm0 = vmmov %vm13893_vm1 }
 0xbee   :  { %v4584_v63 = vmul.f32 %v4540_v16, %v11526_v58  ;;  %13890 = vst [vmem:[#allocation40_spill] sm:$0xff] %v11602_v44 }
 0xbef   :  { %v4544_v19 = vmul.f32 0.5, %v4543_v6 }
 0xbf0   :  { %v4595_v17 = vmul.f32 %v11567_v62, %v4584_v63 }
 0xbf1   :  { %v4545_v30 = vsub.f32 1.5, %v4544_v19 }
 0xbf2   :  { %v7653_v43 = vpop.eup %7652  ;;  %v4606_v46 = vadd.f32 %v11572_v36, %v4595_v17 }
 0xbf3   :  { %v4546_v27 = vmul.f32 %v7651_v42, %v4545_v30  ;;  %v4552_v35 = vmul.f32 %v7653_v43, %v4498_v61  ;;  %vm4558_vm13 = vweird.f32 %v7653_v43 }
 0xbf4   :  { %v11605_v51 = vadd.f32 %v4606_v46, %v13891_v29  ;;  %vm4559_vm2 = vmor %vm4557_vm10, %vm4558_vm13 }
 0xbf5   :  { %v4550_v58 = vsel %vm4549_vm7, %v7651_v42, %v4546_v27  ;;  %v4553_v11 = vmul.f32 %v7653_v43, %v4552_v35  ;;  %vm13905_vm10 = vmmov %vm13900_vm0 }
 0xbf6   :  { %13892 = vst [vmem:[#allocation32_spill] sm:$0xff] %v11605_v51  ;;  %v11609_v4 = vpack.c.bf16 %v11605_v51, %v11602_v44  ;;  %v4585_v25 = vmul.f32 %v4550_v58, %v11532_v9 }
 0xbf7   :  { %v4554_v54 = vmul.f32 0.5, %v4553_v11 }
 0xbf8   :  { %7130 = vmatmul.msk.bf16.gmra.mxu2 %vm13893_vm1, %v11609_v4  ;;  %7134 = vmatmul.msk.bf16.gmra.mxu0 %vm13894_vm5, %v11609_v4  ;;  %v4596_v23 = vmul.f32 %v11567_v62, %v4585_v25 }
 0xbf9   :  { %v4555_v33 = vsub.f32 1.5, %v4554_v54 }
 0xbfa   :  { %v4607_v9 = vadd.f32 %v11572_v36, %v4596_v23 }
 0xbfb   :  { %v4556_v24 = vmul.f32 %v7653_v43, %v4555_v33 }
 0xbfc   :  { %v11622_v57 = vadd.f32 %v4607_v9, %v13895_v18 }
 0xbfd   :  { %v4560_v7 = vsel %vm4559_vm2, %v7653_v43, %v4556_v24  ;;  %vm13906_vm2 = vmmov %vm13900_vm0 }
 0xbfe   :  { %v4586_v40 = vmul.f32 %v4560_v7, %v11538_v32  ;;  %13896 = vst [vmem:[#allocation33_spill] sm:$0xff] %v11622_v57  ;;  %v4481_v32 = vpop.xlane.xlu2 %4480 }
 0xbff   :  { %v4491_v41 = vmul.f32 %v4481_v32, %v7947_v0 }
 0xc00   :  { %v4597_v38 = vmul.f32 %v11567_v62, %v4586_v40 }
 0xc01   :  { %v4499_v28 = vadd.f32 1e-05, %v4491_v41 }
 0xc02   :  { %v4608_v34 = vadd.f32 %v11572_v36, %v4597_v38 }
 0xc03   :  { %7654 = vrsqrt.f32 %v4499_v28  ;;  %vm4567_vm14 = vweird.f32 %v4499_v28 }
 0xc04   :  { %v11625_v12 = vadd.f32 %v4608_v34, %v13897_v8 }
 0xc06   :  { %13898 = vst [vmem:[#allocation34_spill] sm:$0xff] %v11625_v12  ;;  %v11629_v31 = vpack.c.bf16 %v11625_v12, %v11622_v57 }
 0xc08   :  { %7131 = vmatmul.msk.bf16.gmra.mxu2 %vm13899_vm6, %v11629_v31  ;;  %7135 = vmatmul.msk.bf16.gmra.mxu0 %vm13900_vm0, %v11629_v31 }
 0xc09   :  { %v7655_v3 = vpop.eup %7654 }
 0xc0a   :  { %v4562_v59 = vmul.f32 %v7655_v3, %v4499_v28  ;;  %vm4568_vm11 = vweird.f32 %v7655_v3 }
 0xc0b   :  { %vm4569_vm7 = vmor %vm4567_vm14, %vm4568_vm11 }
 0xc0c   :  { %v4563_v10 = vmul.f32 %v7655_v3, %v4562_v59 }
 0xc0e   :  { %v4564_v49 = vmul.f32 0.5, %v4563_v10 }
 0xc10   :  { %v4565_v42 = vsub.f32 1.5, %v4564_v49 }
 0xc12   :  { %v4566_v61 = vmul.f32 %v7655_v3, %v4565_v42 }
 0xc14   :  { %v4570_v39 = vsel %vm4569_vm7, %v7655_v3, %v4566_v61  ;;  %v13909_v61 = vld [vmem:[#allocation9_spill] sm:$0xff] }
 0xc15   :  { %v4587_v63 = vmul.f32 %v4570_v39, %v11544_v5  ;;  %v13903_v5 = vld [vmem:[#allocation30_spill] sm:$0xff]  ;;  %vm13910_vm6 = vnez %v13909_v61  ;;  %v13917_v39 = vld [vmem:[#allocation17_spill] sm:$0xff] }
 0xc16   :  { %vm13911_vm0 = vmpackc.low %vm8214_vm8, %vm13910_vm6 }
 0xc17   :  { %v4598_v14 = vmul.f32 %v11567_v62, %v4587_v63  ;;  %v13924_v63 = vld [vmem:[#allocation18_spill] sm:$0xff] }
 0xc18   :  { %vm13925_vm8 = vnez %v13924_v63 }
 0xc19   :  { %v4609_v27 = vadd.f32 %v11572_v36, %v4598_v14 }
 0xc1b   :  { %v11644_v29 = vadd.f32 %v4609_v27, %v13901_v60  ;;  %v7119_v27 = vld [vmem:[%s9449_s14 + $0x30] sm:$0xff]  ;;  %v7117_v60 = vld [vmem:[%s9449_s14 + $0x20] sm:$0xff] }
 0xc1d   :  { %13902 = vst [vmem:[#allocation37_spill] sm:$0xff] %v11644_v29 }
 0xc42   :  { %v4484_v52 = vpop.xlane.xlu1 %4483 }
 0xc43   :  { %v4492_v15 = vmul.f32 %v4484_v52, %v7947_v0 }
 0xc45   :  { %v4500_v56 = vadd.f32 1e-05, %v4492_v15 }
 0xc47   :  { %7656 = vrsqrt.f32 %v4500_v56  ;;  %vm4577_vm5 = vweird.f32 %v4500_v56 }
 0xc4d   :  { %v7657_v26 = vpop.eup %7656 }
 0xc4e   :  { %v4572_v21 = vmul.f32 %v7657_v26, %v4500_v56  ;;  %vm4578_vm1 = vweird.f32 %v7657_v26  ;;  %v13907_v56 = vmov 1.0|1.0  }
 0xc4f   :  { %vm4579_vm13 = vmor %vm4577_vm5, %vm4578_vm1  ;;  %vm13918_vm1 = vnez %v13917_v39  ;;  %v13957_v39 = vld [vmem:[#allocation43_spill] sm:$0xff] }
 0xc50   :  { %v4573_v16 = vmul.f32 %v7657_v26, %v4572_v21  ;;  %v13914_v21 = vld [vmem:[#allocation12_spill] sm:$0xff] }
 0xc51   :  { %vm13915_vm14 = vnez %v13914_v21 }
 0xc52   :  { %v4574_v6 = vmul.f32 0.5, %v4573_v16  ;;  %v13919_v16 = vld [vmem:[#allocation16_spill] sm:$0xff] }
 0xc53   :  { %vm13920_vm5 = vnez %v13919_v16  ;;  %v13959_v16 = vld [vmem:[#allocation38_spill] sm:$0xff] }
 0xc54   :  { %v4575_v19 = vsub.f32 1.5, %v4574_v6  ;;  %v13922_v6 = vld [vmem:[#allocation19_spill] sm:$0xff] }
 0xc56   :  { %v4576_v17 = vmul.f32 %v7657_v26, %v4575_v19  ;;  %v13927_v19 = vld [vmem:[#allocation20_spill] sm:$0xff] }
 0xc57   :  { %vm13928_vm6 = vnez %v13927_v19 }
 0xc58   :  { %v4580_v30 = vsel %vm4579_vm13, %v7657_v26, %v4576_v17  ;;  %v13912_v26 = vld [vmem:[#allocation11_spill] sm:$0xff]  ;;  %vm13921_vm13 = vmpackc.low %vm13918_vm1, %vm13920_vm5  ;;  %v13929_v17 = vld [vmem:[#allocation21_spill] sm:$0xff] }
 0xc59   :  { %v4588_v43 = vmul.f32 %v4580_v30, %v11552_v50  ;;  %vm13913_vm11 = vnez %v13912_v26 }
 0xc5a   :  { %vm13916_vm7 = vmpackc.low %vm13913_vm11, %vm13915_vm14 }
 0xc5b   :  { %v4599_v46 = vmul.f32 %v11567_v62, %v4588_v43  ;;  %vm13934_vm14 = vmpackc.low %vm13531_vm12, %vm13533_vm3  ;;  %v13935_v43 = vld [vmem:[#allocation28_spill] sm:$0xff] }
 0xc5d   :  { %v4610_v35 = vadd.f32 %v11572_v36, %v4599_v46  ;;  %v13937_v46 = vld [vmem:[#allocation27_spill] sm:$0xff] }
 0xc5e   :  { %vm13938_vm1 = vnez %v13937_v46 }
 0xc5f   :  { %v11647_v58 = vadd.f32 %v4610_v35, %v13903_v5  ;;  %v7120_v35 = vld [vmem:[%s9449_s14 + $0x38] sm:$0xff] }
 0xc60   :  { %v5004_v5 = vpack.c.bf16 %v7120_v35, %v7119_v27  ;;  %v13963_v35 = vld [vmem:[#allocation56_spill] sm:$0xff] }
 0xc61   :  { %13904 = vst [vmem:[#allocation39_spill] sm:$0xff] %v11647_v58  ;;  %v11651_v11 = vpack.c.bf16 %v11647_v58, %v11644_v29 }
 0xc62   :  { %5062 = vmatpush.bf16.msra.mxu2 %v5004_v5 }
 0xc63   :  { %7132 = vmatmul.msk.bf16.gmra.mxu2 %vm13905_vm10, %v11651_v11  ;;  %7136 = vmatmul.msk.bf16.gmra.mxu0 %vm13906_vm2, %v11651_v11  ;;  %vm13923_vm10 = vnez %v13922_v6 }
 0xc64   :  { %vm13926_vm2 = vmpackc.low %vm13923_vm10, %vm13925_vm8 }
 0xc65   :  { %v4712_v50 = vpop.f32.mrf.mxu0 }
 0xc6b   :  { %v4681_v54 = vpop.f32.mrf.mxu2 }
 0xc6d   :  { %v4714_v62 = vpop.f32.mrf.mxu0 }
 0xc6e   :  { %v4736_v3 = vpack.c.bf16 %v4714_v62, %v4712_v50  ;;  %v7118_v50 = vld [vmem:[%s9449_s14 + $0x28] sm:$0xff]  ;;  %s6869_s14 = sld [smem:[%s13104_s0 + %s7786_s18]]  }
 0xc6f   :  { %v5003_v62 = vpack.c.bf16 %v7118_v50, %v7117_v60  ;;  %v13965_v60 = vld [vmem:[#allocation25_spill] sm:$0xff] }
 0xc71   :  { %5063 = vmatpush.bf16.msra.mxu2 %v5003_v62 }
 0xc73   :  { %v4683_v25 = vpop.f32.mrf.mxu2 }
 0xc74   :  { %v4732_v49 = vpack.c.bf16 %v4683_v25, %v4681_v54  ;;  %v13940_v54 = vld [vmem:[#allocation36_spill] sm:$0xff] }
 0xc75   :  { %v4717_v36 = vpop.f32.mrf.mxu0 }
 0xc7b   :  { %v4686_v24 = vpop.f32.mrf.mxu2 }
 0xc7d   :  { %v4719_v33 = vpop.f32.mrf.mxu0 }
 0xc7e   :  { %v4737_v28 = vpack.c.bf16 %v4719_v33, %v4717_v36  ;;  %v13942_v36 = vld [vmem:[#allocation35_spill] sm:$0xff]  ;;  %v13945_v33 = vld [vmem:[#allocation58_spill] sm:$0xff] }
 0xc7f   :  { %vm13943_vm12 = vnez %v13942_v36  ;;  %vm13946_vm10 = vnez %v13945_v33 }
 0xc83   :  { %v4688_v7 = vpop.f32.mrf.mxu2 }
 0xc84   :  { %v4733_v15 = vpack.c.bf16 %v4688_v7, %v4686_v24  ;;  %v13947_v24 = vld [vmem:[#allocation61_spill] sm:$0xff]  ;;  %v11717_v7 = vld [vmem:[%s9202_s10 + $0x1] ss:$0 sm:$0xff] }
 0xc85   :  { %v4722_v23 = vpop.f32.mrf.mxu0  ;;  %vm13948_vm8 = vnez %v13947_v24 }
 0xc8b   :  { %v4691_v38 = vpop.f32.mrf.mxu2 }
 0xc8d   :  { %v4724_v40 = vpop.f32.mrf.mxu0 }
 0xc8e   :  { %v4738_v41 = vpack.c.bf16 %v4724_v40, %v4722_v23 }
 0xc93   :  { %v4693_v34 = vpop.f32.mrf.mxu2 }
 0xc94   :  { %v4734_v52 = vpack.c.bf16 %v4693_v34, %v4691_v38 }
 0xce0   :  { %v4727_v9 = vpop.f32.mrf.mxu0 }
 0xce6   :  { %v4696_v32 = vpop.f32.mrf.mxu2 }
 0xce8   :  { %v4729_v18 = vpop.f32.mrf.mxu0 }
 0xce9   :  { %v4739_v8 = vpack.c.bf16 %v4729_v18, %v4727_v9 }
 0xceb   :  { %4831 = vmatpush.bf16.msra.mxu1 %v4739_v8 }
 0xcee   :  { %v4698_v59 = vpop.f32.mrf.mxu2 }
 0xcef   :  { %4832 = vmatpush.bf16.msra.mxu1 %v4738_v41  ;;  %v4735_v10 = vpack.c.bf16 %v4698_v59, %v4696_v32 }
 0xcf3   :  { %4833 = vmatpush.bf16.msra.mxu1 %v4737_v28  ;;  %v4771_v28 = vpop.f32.mrf.mxu3 }
 0xcf7   :  { %4834 = vmatpush.bf16.msra.mxu1 %v4736_v3  ;;  %v13951_v3 = vld [vmem:[#allocation42_spill] sm:$0xff] }
 0xcfb   :  { %4835 = vmatpush.bf16.msra.mxu1 %v4735_v10 }
 0xcff   :  { %4836 = vmatpush.bf16.msra.mxu1 %v4734_v52 }
 0xd03   :  { %4837 = vmatpush.bf16.msra.mxu1 %v4733_v15 }
 0xd07   :  { %4838 = vmatpush.bf16.msra.mxu1 %v4732_v49  ;;  %v4773_v49 = vpop.f32.mrf.mxu3 }
 0xd0a   :  { %7154 = vmatmul.msk.bf16.vlgmr.msra.gmra.mxu1 %vm13911_vm0, %v13907_v56  ;;  %vm13930_vm0 = vnez %v13929_v17 }
 0xd0b   :  { %vm13931_vm11 = vmpackc.low %vm13928_vm6, %vm13930_vm0  ;;  %vm13950_vm6 = vcmask 261120   ;;  %vm13952_vm0 = vnez %v13951_v3 }
 0xd0f   :  { %v4776_v6 = vpop.f32.mrf.mxu3 }
 0xd17   :  { %v4778_v46 = vpop.f32.mrf.mxu3 }
 0xd1a   :  { %7156 = vmatmul.msk.bf16.gmra.mxu1 %vm13916_vm7, %v13907_v56  ;;  %vm13936_vm7 = vnez %v13935_v43 }
 0xd1b   :  { %vm13939_vm5 = vmpackc.low %vm13936_vm7, %vm13938_vm1  ;;  %vm13958_vm1 = vnez %v13957_v39 }
 0xd1c   :  { %vm13956_vm7 = vmmov %vm13950_vm6 }
 0xd1f   :  { %v4781_v62 = vpop.f32.mrf.mxu3 }
 0xd2a   :  { %7158 = vmatmul.msk.bf16.gmra.mxu1 %vm13921_vm13, %v13907_v56  ;;  %vm13941_vm13 = vnez %v13940_v54 }
 0xd2b   :  { %vm13944_vm3 = vmpackc.low %vm13941_vm13, %vm13943_vm12 }
 0xd2c   :  { %vm13962_vm12 = vmmov %vm13950_vm6 }
 0xd3a   :  { %7160 = vmatmul.msk.bf16.gmra.mxu1 %vm13926_vm2, %v13907_v56  ;;  %vm13949_vm2 = vmpackc.low %vm13946_vm10, %vm13948_vm8  ;;  %vm13966_vm10 = vnez %v13965_v60 }
 0xd4a   :  { %7162 = vmatmul.msk.bf16.gmra.mxu1 %vm13931_vm11, %v13907_v56 }
 0xd5a   :  { %7164 = vmatmul.msk.bf16.gmra.mxu1 %vm13934_vm14, %v13907_v56 }
 0xd6a   :  { %7166 = vmatmul.msk.bf16.gmra.mxu1 %vm13939_vm5, %v13907_v56  ;;  %vm13960_vm5 = vnez %v13959_v16 }
 0xd6b   :  { %vm13961_vm13 = vmpackc.low %vm13958_vm1, %vm13960_vm5 }
 0xd7a   :  { %7168 = vmatmul.msk.bf16.gmra.mxu1 %vm13944_vm3, %v13907_v56  ;;  %vm13964_vm3 = vnez %v13963_v35 }
 0xd7b   :  { %vm13967_vm8 = vmpackc.low %vm13964_vm3, %vm13966_vm10 }
 0xd87   :  { %v4840_v25 = vpop.f32.mrf.mxu1 }
 0xd88   :  { %v4841_v23 = vadd.f32 %v4840_v25, %v11462_v55  ;;  %v13953_v55 = vld [vmem:[#allocation8_spill] sm:$0xff] }
 0xd89   :  { %vm13954_vm11 = vnez %v13953_v55 }
 0xd8a   :  { %7170 = vmatmul.msk.bf16.gmra.mxu1 %vm13949_vm2, %v13907_v56  ;;  %v4923_v38 = vadd.f32 %v11717_v7, %v4841_v23  ;;  %vm13955_vm14 = vmpackc.low %vm13952_vm0, %vm13954_vm11  ;;  %v13969_v23 = vld [vmem:[#allocation46_spill] sm:$0xff] }
 0xd8b   :  { %vm13968_vm2 = vmmov %vm13950_vm6 }
 0xd8c   :  { %v4955_v18 = vmax.f32 %v4923_v38, 0.0  ;;  %vm13989_vm4 = vmmov %vm13968_vm2 }
 0xd8d   :  { %vm13990_vm9 = vmmov %vm13968_vm2 }
 0xd8f   :  { %v4842_v40 = vpop.f32.mrf.mxu1 }
 0xd90   :  { %v4843_v9 = vadd.f32 %v4842_v40, %v11466_v13  ;;  %v13971_v40 = vld [vmem:[#allocation67_spill] sm:$0xff] }
 0xd91   :  { %vm13972_vm0 = vnez %v13971_v40 }
 0xd92   :  { %v4924_v34 = vadd.f32 %v11717_v7, %v4843_v9 }
 0xd94   :  { %v4956_v8 = vmax.f32 %v4924_v34, 0.0 }
 0xd96   :  { %v4987_v32 = vpack.c.bf16 %v4956_v8, %v4955_v18 }
 0xd97   :  { %v4845_v41 = vpop.f32.mrf.mxu1 }
 0xd98   :  { %7185 = vmatmul.msk.bf16.vlgmr.msra.gmra.mxu2 %vm13950_vm6, %v4987_v32  ;;  %v4846_v59 = vadd.f32 %v4845_v41, %v11468_v53  ;;  %vm13970_vm6 = vnez %v13969_v23 }
 0xd99   :  { %vm13973_vm11 = vmpackc.low %vm13970_vm6, %vm13972_vm0 }
 0xd9a   :  { %7172 = vmatmul.msk.bf16.gmra.mxu1 %vm13955_vm14, %v13907_v56  ;;  %v4925_v13 = vadd.f32 %v11717_v7, %v4846_v59  ;;  %vm13974_vm14 = vmmov %vm13968_vm2  ;;  %v13975_v59 = vld [vmem:[#allocation26_spill] sm:$0xff] }
 0xd9b   :  { %vm13992_vm6 = vmmov %vm13968_vm2 }
 0xd9c   :  { %v4957_v42 = vmax.f32 %v4925_v13, 0.0  ;;  %vm13993_vm0 = vmmov %vm13968_vm2 }
 0xd9f   :  { %v4847_v10 = vpop.f32.mrf.mxu1 }
 0xda0   :  { %v4848_v52 = vadd.f32 %v4847_v10, %v11472_v48  ;;  %v13977_v10 = vld [vmem:[#allocation51_spill] sm:$0xff] }
 0xda1   :  { %vm13978_vm1 = vnez %v13977_v10 }
 0xda2   :  { %v4926_v15 = vadd.f32 %v11717_v7, %v4848_v52 }
 0xda4   :  { %v4958_v61 = vmax.f32 %v4926_v15, 0.0 }
 0xda6   :  { %v4988_v26 = vpack.c.bf16 %v4958_v61, %v4957_v42 }
 0xda7   :  { %v4850_v21 = vpop.f32.mrf.mxu1 }
 0xda8   :  { %7186 = vmatmul.msk.bf16.gmra.mxu2 %vm13956_vm7, %v4988_v26  ;;  %v4851_v53 = vadd.f32 %v4850_v21, %v11477_v47  ;;  %vm13976_vm7 = vnez %v13975_v59 }
 0xda9   :  { %vm13979_vm5 = vmpackc.low %vm13976_vm7, %vm13978_vm1 }
 0xdaa   :  { %7174 = vmatmul.msk.bf16.gmra.mxu1 %vm13961_vm13, %v13907_v56  ;;  %v4927_v63 = vadd.f32 %v11717_v7, %v4851_v53  ;;  %vm13980_vm13 = vmmov %vm13968_vm2  ;;  %v13981_v53 = vld [vmem:[#allocation59_spill] sm:$0xff] }
 0xdab   :  { %vm13996_vm7 = vmmov %vm13993_vm0 }
 0xdac   :  { %v4959_v14 = vmax.f32 %v4927_v63, 0.0  ;;  %vm13997_vm1 = vmmov %vm13993_vm0 }
 0xdaf   :  { %v4852_v48 = vpop.f32.mrf.mxu1 }
 0xdb0   :  { %v4853_v19 = vadd.f32 %v4852_v48, %v11481_v20  ;;  %v13983_v48 = vld [vmem:[#allocation66_spill] sm:$0xff] }
 0xdb1   :  { %vm13984_vm3 = vnez %v13983_v48 }
 0xdb2   :  { %v4928_v17 = vadd.f32 %v11717_v7, %v4853_v19 }
 0xdb4   :  { %v4960_v30 = vmax.f32 %v4928_v17, 0.0 }
 0xdb6   :  { %v4989_v43 = vpack.c.bf16 %v4960_v30, %v4959_v14 }
 0xdb7   :  { %v4855_v27 = vpop.f32.mrf.mxu1 }
 0xdb8   :  { %7187 = vmatmul.msk.bf16.gmra.mxu2 %vm13962_vm12, %v4989_v43  ;;  %v4856_v47 = vadd.f32 %v4855_v27, %v11486_v22  ;;  %v4783_v22 = vpop.f32.mrf.mxu3  ;;  %vm13982_vm12 = vnez %v13981_v53 }
 0xdb9   :  { %vm13985_vm10 = vmpackc.low %vm13982_vm12, %vm13984_vm3 }
 0xdba   :  { %7176 = vmatmul.msk.bf16.gmra.mxu1 %vm13967_vm8, %v13907_v56  ;;  %v4929_v20 = vadd.f32 %v11717_v7, %v4856_v47  ;;  %vm13986_vm8 = vmmov %vm13968_vm2 }
 0xdbb   :  { %vm14000_vm12 = vmmov %vm13993_vm0 }
 0xdbc   :  { %v4961_v36 = vmax.f32 %v4929_v20, 0.0  ;;  %vm14001_vm3 = vmmov %vm13993_vm0 }
 0xdbf   :  { %v4857_v5 = vpop.f32.mrf.mxu1 }
 0xdc0   :  { %v4858_v50 = vadd.f32 %v4857_v5, %v11489_v45  ;;  %v4786_v41 = vpop.f32.mrf.mxu3 }
 0xdc2   :  { %v4930_v54 = vadd.f32 %v11717_v7, %v4858_v50 }
 0xdc4   :  { %v4962_v25 = vmax.f32 %v4930_v54, 0.0 }
 0xdc6   :  { %v4990_v33 = vpack.c.bf16 %v4962_v25, %v4961_v36 }
 0xdc7   :  { %v4860_v24 = vpop.f32.mrf.mxu1 }
 0xdc8   :  { %7188 = vmatmul.msk.bf16.gmra.mxu2 %vm13968_vm2, %v4990_v33  ;;  %v4861_v38 = vadd.f32 %v4860_v24, %v4771_v28  ;;  %v4788_v13 = vpop.f32.mrf.mxu3 }
 0xdca   :  { %7178 = vmatmul.msk.bf16.gmra.mxu1 %vm13973_vm11, %v13907_v56  ;;  %v4931_v45 = vadd.f32 %v11717_v7, %v4861_v38  ;;  %v7125_v38 = vld [vmem:[%s9900_s21 + $0x38] sm:$0xff]  ;;  %vm13994_vm11 = vmmov %vm13993_vm0 }
 0xdcc   :  { %v4963_v8 = vmax.f32 %v4931_v45, 0.0  ;;  %v7122_v45 = vld [vmem:[%s9900_s21 + $0x20] sm:$0xff] }
 0xdcf   :  { %v4862_v9 = vpop.f32.mrf.mxu1 }
 0xdd0   :  { %v4863_v34 = vadd.f32 %v4862_v9, %v4773_v49  ;;  %v4791_v16 = vpop.f32.mrf.mxu3 }
 0xdd2   :  { %v4932_v18 = vadd.f32 %v11717_v7, %v4863_v34  ;;  %v7123_v34 = vld [vmem:[%s9900_s21 + $0x28] sm:$0xff] }
 0xdd4   :  { %v4964_v32 = vmax.f32 %v4932_v18, 0.0  ;;  %v5193_v18 = vpack.c.bf16 %v7123_v34, %v7122_v45 }
 0xdd6   :  { %v4991_v3 = vpack.c.bf16 %v4964_v32, %v4963_v8 }
 0xdd7   :  { %v4865_v55 = vpop.f32.mrf.mxu1 }
 0xdd8   :  { %7189 = vmatmul.msk.bf16.gmra.mxu2 %vm13974_vm14, %v4991_v3  ;;  %v4866_v28 = vadd.f32 %v4865_v55, %v4776_v6  ;;  %v4793_v30 = vpop.f32.mrf.mxu3  ;;  %vm13995_vm14 = vmmov %vm13993_vm0 }
 0xdda   :  { %7180 = vmatmul.msk.bf16.gmra.mxu1 %vm13979_vm5, %v13907_v56  ;;  %v4933_v15 = vadd.f32 %v11717_v7, %v4866_v28  ;;  %vm13998_vm5 = vmmov %vm13993_vm0 }
 0xddc   :  { %v4965_v61 = vmax.f32 %v4933_v15, 0.0 }
 0xddf   :  { %v4867_v52 = vpop.f32.mrf.mxu1 }
 0xde0   :  { %v4868_v49 = vadd.f32 %v4867_v52, %v4778_v46  ;;  %v4796_v20 = vpop.f32.mrf.mxu3 }
 0xde2   :  { %v4934_v42 = vadd.f32 %v11717_v7, %v4868_v49 }
 0xde4   :  { %v4966_v26 = vmax.f32 %v4934_v42, 0.0  ;;  %v11800_v42 = vld [vmem:[%s9583_s12 + $0x1] ss:$0 sm:$0xff]  ;;  %s7787_s12 = smov 39  }
 0xde6   :  { %v4992_v21 = vpack.c.bf16 %v4966_v26, %v4965_v61 }
 0xde7   :  { %v4870_v39 = vpop.f32.mrf.mxu1 }
 0xde8   :  { %7190 = vmatmul.msk.bf16.gmra.mxu2 %vm13980_vm13, %v4992_v21  ;;  %v4871_v6 = vadd.f32 %v4870_v39, %v4781_v62  ;;  %v4798_v23 = vpop.f32.mrf.mxu3  ;;  %vm13999_vm13 = vmmov %vm13993_vm0 }
 0xdea   :  { %7182 = vmatmul.msk.bf16.gmra.mxu1 %vm13985_vm10, %v13907_v56  ;;  %v4935_v19 = vadd.f32 %v11717_v7, %v4871_v6  ;;  %vm14002_vm10 = vmmov %vm13993_vm0 }
 0xdec   :  { %v4967_v43 = vmax.f32 %v4935_v19, 0.0 }
 0xdef   :  { %v4872_v63 = vpop.f32.mrf.mxu1 }
 0xdf0   :  { %v4873_v17 = vadd.f32 %v4872_v63, %v4783_v22  ;;  %v7124_v22 = vld [vmem:[%s9900_s21 + $0x30] sm:$0xff]  ;;  %v4801_v3 = vpop.f32.mrf.mxu3 }
 0xdf2   :  { %v4936_v14 = vadd.f32 %v11717_v7, %v4873_v17 }
 0xdf4   :  { %v4968_v46 = vmax.f32 %v4936_v14, 0.0 }
 0xdf6   :  { %v4993_v27 = vpack.c.bf16 %v4968_v46, %v4967_v43 }
 0xdf7   :  { %v4875_v35 = vpop.f32.mrf.mxu1 }
 0xdf8   :  { %7191 = vmatmul.msk.bf16.gmra.mxu2 %vm13986_vm8, %v4993_v27  ;;  %v4876_v5 = vadd.f32 %v4875_v35, %v4786_v41  ;;  %v4803_v52 = vpop.f32.mrf.mxu3  ;;  %vm14003_vm8 = vmmov %vm13993_vm0 }
 0xdfa   :  { %7184 = vmatmul.msk.bf16.gmra.mxu1 %vm7054_vm15, %v13907_v56  ;;  %v4937_v62 = vadd.f32 %v11717_v7, %v4876_v5  ;;  %v5194_v56 = vpack.c.bf16 %v7125_v38, %v7124_v22  ;;  %vm13991_vm15 = vmmov %vm13968_vm2 }
 0xdfc   :  { %v4969_v25 = vmax.f32 %v4937_v62, 0.0  ;;  %5252 = vmatpush.bf16.msrb.mxu0 %v5194_v56 }
 0xdff   :  { %v4877_v50 = vpop.f32.mrf.mxu1 }
 0xe00   :  { %v4878_v54 = vadd.f32 %v4877_v50, %v4788_v13  ;;  %5253 = vmatpush.bf16.msrb.mxu0 %v5193_v18  ;;  %v4806_v19 = vpop.f32.mrf.mxu3 }
 0xe02   :  { %v4938_v36 = vadd.f32 %v11717_v7, %v4878_v54 }
 0xe04   :  { %v4970_v33 = vmax.f32 %v4938_v36, 0.0 }
 0xe06   :  { %v4994_v24 = vpack.c.bf16 %v4970_v33, %v4969_v25 }
 0xe07   :  { %v4880_v40 = vpop.f32.mrf.mxu1 }
 0xe08   :  { %7192 = vmatmul.msk.bf16.gmra.mxu2 %vm13968_vm2, %v4994_v24  ;;  %v4881_v9 = vadd.f32 %v4880_v40, %v4791_v16  ;;  %v4808_v60 = vpop.f32.mrf.mxu3  ;;  %vm14004_vm2 = vmmov %vm13993_vm0 }
 0xe0a   :  { %v4939_v32 = vadd.f32 %v11717_v7, %v4881_v9 }
 0xe0c   :  { %v4971_v59 = vmax.f32 %v4939_v32, 0.0 }
 0xe0f   :  { %v4882_v8 = vpop.f32.mrf.mxu1 }
 0xe10   :  { %v4883_v41 = vadd.f32 %v4882_v8, %v4793_v30  ;;  %v4811_v56 = vpop.f32.mrf.mxu3 }
 0xe12   :  { %v4940_v55 = vadd.f32 %v11717_v7, %v4883_v41 }
 0xe14   :  { %v4972_v10 = vmax.f32 %v4940_v55, 0.0 }
 0xe16   :  { %v4995_v28 = vpack.c.bf16 %v4972_v10, %v4971_v59 }
 0xe17   :  { %v4885_v13 = vpop.f32.mrf.mxu1 }
 0xe18   :  { %7193 = vmatmul.msk.bf16.gmra.mxu2 %vm13989_vm4, %v4995_v28  ;;  %v4886_v49 = vadd.f32 %v4885_v13, %v4796_v20  ;;  %vm14005_vm4 = vmmov %vm13993_vm0 }
 0xe1a   :  { %v4941_v26 = vadd.f32 %v11717_v7, %v4886_v49 }
 0xe1b   :  { %v5065_v15 = vpop.f32.mrf.mxu2 }
 0xe1c   :  { %v5066_v39 = vadd.f32 %v11800_v42, %v5065_v15  ;;  %v4973_v48 = vmax.f32 %v4941_v26, 0.0 }
 0xe1e   :  { %v5145_v17 = vmax.f32 %v5066_v39, 0.0 }
 0xe1f   :  { %v4887_v61 = vpop.f32.mrf.mxu1 }
 0xe20   :  { %v4888_v21 = vadd.f32 %v4887_v61, %v4798_v23 }
 0xe22   :  { %v4942_v16 = vadd.f32 %v11717_v7, %v4888_v21 }
 0xe23   :  { %v5067_v53 = vpop.f32.mrf.mxu2 }
 0xe24   :  { %v4974_v6 = vmax.f32 %v4942_v16, 0.0  ;;  %v5068_v63 = vadd.f32 %v11800_v42, %v5067_v53 }
 0xe26   :  { %v4996_v14 = vpack.c.bf16 %v4974_v6, %v4973_v48  ;;  %v5146_v30 = vmax.f32 %v5068_v63, 0.0 }
 0xe27   :  { %v4890_v43 = vpop.f32.mrf.mxu1 }
 0xe28   :  { %v5177_v46 = vpack.c.bf16 %v5146_v30, %v5145_v17  ;;  %7194 = vmatmul.msk.bf16.gmra.mxu2 %vm13990_vm9, %v4996_v14  ;;  %v4891_v35 = vadd.f32 %v4890_v43, %v4801_v3  ;;  %v4813_v3 = vpop.f32.mrf.mxu3  ;;  %vm14006_vm9 = vmmov %vm13993_vm0 }
 0xe2a   :  { %7201 = vmatmul.msk.bf16.vlgmr.msrb.gmra.mxu0 %vm13991_vm15, %v5177_v46  ;;  %v4943_v5 = vadd.f32 %v11717_v7, %v4891_v35  ;;  %vm14007_vm15 = vmmov %vm13993_vm0 }
 0xe2b   :  { %v5070_v27 = vpop.f32.mrf.mxu2 }
 0xe2c   :  { %v5071_v50 = vadd.f32 %v11800_v42, %v5070_v27  ;;  %v4975_v36 = vmax.f32 %v4943_v5, 0.0 }
 0xe2e   :  { %v5147_v24 = vmax.f32 %v5071_v50, 0.0 }
 0xe2f   :  { %v4892_v47 = vpop.f32.mrf.mxu1 }
 0xe30   :  { %v4893_v20 = vadd.f32 %v4892_v47, %v4803_v52  ;;  %v4816_v39 = vpop.f32.mrf.mxu3 }
 0xe32   :  { %v4944_v62 = vadd.f32 %v11717_v7, %v4893_v20 }
 0xe33   :  { %v5072_v54 = vpop.f32.mrf.mxu2 }
 0xe34   :  { %v4976_v25 = vmax.f32 %v4944_v62, 0.0  ;;  %v5073_v33 = vadd.f32 %v11800_v42, %v5072_v54 }
 0xe36   :  { %v4997_v23 = vpack.c.bf16 %v4976_v25, %v4975_v36  ;;  %v5148_v40 = vmax.f32 %v5073_v33, 0.0 }
 0xe37   :  { %v4895_v22 = vpop.f32.mrf.mxu1 }
 0xe38   :  { %v5178_v38 = vpack.c.bf16 %v5148_v40, %v5147_v24  ;;  %7195 = vmatmul.msk.bf16.gmra.mxu2 %vm13992_vm6, %v4997_v23  ;;  %v4896_v45 = vadd.f32 %v4895_v22, %v4806_v19  ;;  %v4818_v35 = vpop.f32.mrf.mxu3  ;;  %vm14008_vm6 = vmmov %vm13993_vm0 }
 0xe3a   :  { %7202 = vmatmul.msk.bf16.gmra.mxu0 %vm13993_vm0, %v5178_v38  ;;  %v4945_v18 = vadd.f32 %v11717_v7, %v4896_v45 }
 0xe3b   :  { %v5075_v9 = vpop.f32.mrf.mxu2 }
 0xe3c   :  { %v5076_v32 = vadd.f32 %v11800_v42, %v5075_v9  ;;  %v4977_v59 = vmax.f32 %v4945_v18, 0.0 }
 0xe3e   :  { %v5149_v13 = vmax.f32 %v5076_v32, 0.0 }
 0xe3f   :  { %v4897_v34 = vpop.f32.mrf.mxu1 }
 0xe40   :  { %v4898_v8 = vadd.f32 %v4897_v34, %v4808_v60  ;;  %v4821_v36 = vpop.f32.mrf.mxu3 }
 0xe42   :  { %v4946_v41 = vadd.f32 %v11717_v7, %v4898_v8 }
 0xe43   :  { %v5077_v55 = vpop.f32.mrf.mxu2 }
 0xe44   :  { %v4978_v10 = vmax.f32 %v4946_v41, 0.0  ;;  %v5078_v28 = vadd.f32 %v11800_v42, %v5077_v55 }
 0xe46   :  { %v4998_v52 = vpack.c.bf16 %v4978_v10, %v4977_v59  ;;  %v5150_v15 = vmax.f32 %v5078_v28, 0.0 }
 0xe47   :  { %v4900_v49 = vpop.f32.mrf.mxu1 }
 0xe48   :  { %v5179_v61 = vpack.c.bf16 %v5150_v15, %v5149_v13  ;;  %7196 = vmatmul.msk.bf16.gmra.mxu2 %vm13994_vm11, %v4998_v52  ;;  %v4901_v21 = vadd.f32 %v4900_v49, %v4811_v56  ;;  %v4823_v18 = vpop.f32.mrf.mxu3  ;;  %vm14009_vm11 = vmmov %vm13993_vm0 }
 0xe4a   :  { %7203 = vmatmul.msk.bf16.gmra.mxu0 %vm13995_vm14, %v5179_v61  ;;  %v4947_v53 = vadd.f32 %v11717_v7, %v4901_v21  ;;  %vm14010_vm14 = vmmov %vm13993_vm0 }
 0xe4b   :  { %v5080_v26 = vpop.f32.mrf.mxu2 }
 0xe4c   :  { %v5081_v6 = vadd.f32 %v11800_v42, %v5080_v26  ;;  %v4979_v17 = vmax.f32 %v4947_v53, 0.0 }
 0xe4e   :  { %v5151_v43 = vmax.f32 %v5081_v6, 0.0 }
 0xe4f   :  { %v4902_v16 = vpop.f32.mrf.mxu1 }
 0xe50   :  { %v4903_v48 = vadd.f32 %v4902_v16, %v4813_v3  ;;  %v4826_v49 = vpop.f32.mrf.mxu3 }
 0xe52   :  { %v4948_v63 = vadd.f32 %v11717_v7, %v4903_v48 }
 0xe53   :  { %v5082_v19 = vpop.f32.mrf.mxu2 }
 0xe54   :  { %v4980_v14 = vmax.f32 %v4948_v63, 0.0  ;;  %v5083_v30 = vadd.f32 %v11800_v42, %v5082_v19 }
 0xe56   :  { %v4999_v46 = vpack.c.bf16 %v4980_v14, %v4979_v17  ;;  %v5152_v27 = vmax.f32 %v5083_v30, 0.0 }
 0xe57   :  { %v4905_v60 = vpop.f32.mrf.mxu1 }
 0xe58   :  { %v5180_v47 = vpack.c.bf16 %v5152_v27, %v5151_v43  ;;  %7197 = vmatmul.msk.bf16.gmra.mxu2 %vm13996_vm7, %v4999_v46  ;;  %v4906_v20 = vadd.f32 %v4905_v60, %v4816_v39  ;;  %v4828_v6 = vpop.f32.mrf.mxu3  ;;  %vm14011_vm7 = vmmov %vm13993_vm0 }
 0xe5a   :  { %7204 = vmatmul.msk.bf16.gmra.mxu0 %vm13997_vm1, %v5180_v47  ;;  %v4949_v62 = vadd.f32 %v11717_v7, %v4906_v20  ;;  %vm14012_vm1 = vmmov %vm13993_vm0 }
 0xe5b   :  { %v5085_v5 = vpop.f32.mrf.mxu2 }
 0xe5c   :  { %v5086_v25 = vadd.f32 %v11800_v42, %v5085_v5  ;;  %v4981_v23 = vmax.f32 %v4949_v62, 0.0 }
 0xe5e   :  { %v5153_v38 = vmax.f32 %v5086_v25, 0.0 }
 0xe5f   :  { %v4907_v50 = vpop.f32.mrf.mxu1 }
 0xe60   :  { %v4908_v54 = vadd.f32 %v4907_v50, %v4818_v35 }
 0xe62   :  { %v4950_v33 = vadd.f32 %v11717_v7, %v4908_v54 }
 0xe63   :  { %v5087_v24 = vpop.f32.mrf.mxu2 }
 0xe64   :  { %v4982_v40 = vmax.f32 %v4950_v33, 0.0  ;;  %v5088_v22 = vadd.f32 %v11800_v42, %v5087_v24 }
 0xe66   :  { %v5000_v56 = vpack.c.bf16 %v4982_v40, %v4981_v23  ;;  %v5154_v9 = vmax.f32 %v5088_v22, 0.0 }
 0xe67   :  { %v4910_v45 = vpop.f32.mrf.mxu1 }
 0xe68   :  { %v5181_v34 = vpack.c.bf16 %v5154_v9, %v5153_v38  ;;  %7198 = vmatmul.msk.bf16.gmra.mxu2 %vm13998_vm5, %v5000_v56  ;;  %v4911_v32 = vadd.f32 %v4910_v45, %v4821_v36  ;;  %v11850_v38 = vld [vmem:[%s9978_s25 + $0x1] ss:$0 sm:$0xff]  ;;  %vm14013_vm5 = vmmov %vm13993_vm0 }
 0xe6a   :  { %7205 = vmatmul.msk.bf16.gmra.mxu0 %vm13999_vm13, %v5181_v34  ;;  %v4951_v3 = vadd.f32 %v11717_v7, %v4911_v32  ;;  %vm14014_vm13 = vmmov %vm13993_vm0 }
 0xe6b   :  { %v5090_v8 = vpop.f32.mrf.mxu2 }
 0xe6c   :  { %v5091_v59 = vadd.f32 %v11800_v42, %v5090_v8  ;;  %v4983_v13 = vmax.f32 %v4951_v3, 0.0 }
 0xe6e   :  { %v5155_v61 = vmax.f32 %v5091_v59, 0.0 }
 0xe6f   :  { %v4912_v41 = vpop.f32.mrf.mxu1 }
 0xe70   :  { %v4913_v55 = vadd.f32 %v4912_v41, %v4823_v18 }
 0xe72   :  { %v4952_v10 = vadd.f32 %v11717_v7, %v4913_v55 }
 0xe73   :  { %v5092_v28 = vpop.f32.mrf.mxu2 }
 0xe74   :  { %v4984_v52 = vmax.f32 %v4952_v10, 0.0  ;;  %v5093_v15 = vadd.f32 %v11800_v42, %v5092_v28 }
 0xe76   :  { %v5001_v26 = vpack.c.bf16 %v4984_v52, %v4983_v13  ;;  %v5156_v21 = vmax.f32 %v5093_v15, 0.0 }
 0xe77   :  { %v4915_v39 = vpop.f32.mrf.mxu1 }
 0xe78   :  { %v5182_v16 = vpack.c.bf16 %v5156_v21, %v5155_v61  ;;  %7199 = vmatmul.msk.bf16.gmra.mxu2 %vm14000_vm12, %v5001_v26  ;;  %v4916_v48 = vadd.f32 %v4915_v39, %v4826_v49  ;;  %vm14015_vm12 = vmmov %vm13993_vm0 }
 0xe7a   :  { %7206 = vmatmul.msk.bf16.gmra.mxu0 %vm14001_vm3, %v5182_v16  ;;  %v4953_v19 = vadd.f32 %v11717_v7, %v4916_v48  ;;  %vm14016_vm3 = vmmov %vm13993_vm0 }
 0xe7b   :  { %v5095_v53 = vpop.f32.mrf.mxu2 }
 0xe7c   :  { %v5096_v14 = vadd.f32 %v11800_v42, %v5095_v53  ;;  %v4985_v46 = vmax.f32 %v4953_v19, 0.0 }
 0xe7e   :  { %v5157_v60 = vmax.f32 %v5096_v14, 0.0 }
 0xe7f   :  { %v4917_v63 = vpop.f32.mrf.mxu1 }
 0xe80   :  { %v4918_v17 = vadd.f32 %v4917_v63, %v4828_v6 }
 0xe82   :  { %v4954_v30 = vadd.f32 %v11717_v7, %v4918_v17 }
 0xe83   :  { %v5097_v43 = vpop.f32.mrf.mxu2 }
 0xe84   :  { %v4986_v27 = vmax.f32 %v4954_v30, 0.0  ;;  %v5098_v35 = vadd.f32 %v11800_v42, %v5097_v43 }
 0xe86   :  { %v5002_v47 = vpack.c.bf16 %v4986_v27, %v4985_v46  ;;  %v5158_v5 = vmax.f32 %v5098_v35, 0.0 }
 0xe88   :  { %v5183_v20 = vpack.c.bf16 %v5158_v5, %v5157_v60  ;;  %7200 = vmatmul.msk.bf16.gmra.mxu2 %vm14002_vm10, %v5002_v47  ;;  %vm14017_vm10 = vmmov %vm13993_vm0 }
 0xe8a   :  { %7207 = vmatmul.msk.bf16.gmra.mxu0 %vm14003_vm8, %v5183_v20  ;;  %vm14018_vm8 = vmmov %vm13993_vm0 }
 0xe8b   :  { %v5100_v50 = vpop.f32.mrf.mxu2 }
 0xe8c   :  { %v5101_v62 = vadd.f32 %v11800_v42, %v5100_v50 }
 0xe8e   :  { %v5159_v36 = vmax.f32 %v5101_v62, 0.0 }
 0xe93   :  { %v5102_v54 = vpop.f32.mrf.mxu2 }
 0xe94   :  { %v5103_v7 = vadd.f32 %v11800_v42, %v5102_v54 }
 0xe96   :  { %v5160_v25 = vmax.f32 %v5103_v7, 0.0 }
 0xe98   :  { %v5184_v33 = vpack.c.bf16 %v5160_v25, %v5159_v36 }
 0xe9a   :  { %7208 = vmatmul.msk.bf16.gmra.mxu0 %vm14004_vm2, %v5184_v33  ;;  %vm14019_vm2 = vmmov %vm13993_vm0 }
 0xe9b   :  { %v5105_v24 = vpop.f32.mrf.mxu2 }
 0xe9c   :  { %v5106_v23 = vadd.f32 %v11800_v42, %v5105_v24 }
 0xe9e   :  { %v5161_v56 = vmax.f32 %v5106_v23, 0.0 }
 0xea3   :  { %v5107_v40 = vpop.f32.mrf.mxu2 }
 0xea4   :  { %v5108_v22 = vadd.f32 %v11800_v42, %v5107_v40 }
 0xea6   :  { %v5162_v9 = vmax.f32 %v5108_v22, 0.0 }
 0xea7   :  { %v5255_v45 = vpop.f32.mrf.mxu0 }
 0xea8   :  { %v5185_v34 = vpack.c.bf16 %v5162_v9, %v5161_v56  ;;  %v11853_v18 = vadd.f32 %v11850_v38, %v5255_v45 }
 0xeaa   :  { %7209 = vmatmul.msk.bf16.gmra.mxu0 %vm14005_vm4, %v5185_v34  ;;  %v5335_v8 = vsel %vm14006_vm9, %v11853_v18, 0.0  ;;  %vm14020_vm4 = vmmov %vm13993_vm0 }
 0xeab   :  { %v5110_v32 = vpop.f32.mrf.mxu2  ;;  %5336 = vadd.xlane.f32.xlu1 %v5335_v8  ;;  %vm14021_vm9 = vmmov %vm13993_vm0 }
 0xeac   :  { %v5111_v55 = vadd.f32 %v11800_v42, %v5110_v32 }
 0xeae   :  { %v5163_v13 = vmax.f32 %v5111_v55, 0.0 }
 0xeaf   :  { %v5257_v41 = vpop.f32.mrf.mxu0 }
 0xeb0   :  { %v11859_v3 = vadd.f32 %v11850_v38, %v5257_v41 }
 0xeb2   :  { %v5338_v59 = vsel %vm14007_vm15, %v11859_v3, 0.0  ;;  %vm14022_vm15 = vmmov %vm13993_vm0 }
 0xeb3   :  { %v5112_v10 = vpop.f32.mrf.mxu2  ;;  %5339 = vadd.xlane.f32.xlu0 %v5338_v59 }
 0xeb4   :  { %v5113_v28 = vadd.f32 %v11800_v42, %v5112_v10 }
 0xeb6   :  { %v5164_v52 = vmax.f32 %v5113_v28, 0.0 }
 0xeb7   :  { %v5260_v15 = vpop.f32.mrf.mxu0 }
 0xeb8   :  { %v5186_v49 = vpack.c.bf16 %v5164_v52, %v5163_v13  ;;  %v11866_v61 = vadd.f32 %v11850_v38, %v5260_v15 }
 0xeba   :  { %7210 = vmatmul.msk.bf16.gmra.mxu0 %vm14008_vm6, %v5186_v49  ;;  %v5341_v26 = vsel %vm13993_vm0, %v11866_v61, 0.0  ;;  %vm14023_vm6 = vmmov %vm13993_vm0 }
 0xebb   :  { %v5115_v21 = vpop.f32.mrf.mxu2  ;;  %5342 = vadd.xlane.f32.xlu2 %v5341_v26 }
 0xebc   :  { %v5116_v53 = vadd.f32 %v11800_v42, %v5115_v21 }
 0xebe   :  { %v5165_v19 = vmax.f32 %v5116_v53, 0.0 }
 0xebf   :  { %v5262_v39 = vpop.f32.mrf.mxu0 }
 0xec0   :  { %v11872_v16 = vadd.f32 %v11850_v38, %v5262_v39 }
 0xec2   :  { %v5344_v48 = vsel %vm14009_vm11, %v11872_v16, 0.0  ;;  %vm14024_vm11 = vmmov %vm13993_vm0 }
 0xec3   :  { %v5117_v6 = vpop.f32.mrf.mxu2  ;;  %5345 = vadd.xlane.f32.xlu1 %v5344_v48 }
 0xec4   :  { %v5118_v63 = vadd.f32 %v11800_v42, %v5117_v6 }
 0xec6   :  { %v5166_v17 = vmax.f32 %v5118_v63, 0.0 }
 0xec7   :  { %v5265_v14 = vpop.f32.mrf.mxu0 }
 0xec8   :  { %v5187_v30 = vpack.c.bf16 %v5166_v17, %v5165_v19  ;;  %v11879_v43 = vadd.f32 %v11850_v38, %v5265_v14 }
 0xeca   :  { %7211 = vmatmul.msk.bf16.gmra.mxu0 %vm14010_vm14, %v5187_v30  ;;  %v5347_v46 = vsel %vm14011_vm7, %v11879_v43, 0.0  ;;  %v7223_v30 = vld [vmem:[%s10244_s29 + $0x70] sm:$0xff]  ;;  %vm14025_vm14 = vmmov %vm13993_vm0 }
 0xecb   :  { %v5120_v27 = vpop.f32.mrf.mxu2  ;;  %5348 = vadd.xlane.f32.xlu0 %v5347_v46  ;;  %v7224_v46 = vld [vmem:[%s10244_s29 + $0x78] sm:$0xff]  ;;  %vm14026_vm7 = vmmov %vm13993_vm0 }
 0xecc   :  { %v5121_v47 = vadd.f32 %v11800_v42, %v5120_v27 }
 0xece   :  { %v5167_v62 = vmax.f32 %v5121_v47, 0.0  ;;  %v6271_v47 = vpack.c.bf16 %v7224_v46, %v7223_v30 }
 0xecf   :  { %v5267_v35 = vpop.f32.mrf.mxu0 }
 0xed0   :  { %v11885_v60 = vadd.f32 %v11850_v38, %v5267_v35  ;;  %6278 = vmatpush.bf16.msra.mxu0 %v6271_v47 }
 0xed2   :  { %v5350_v5 = vsel %vm14012_vm1, %v11885_v60, 0.0  ;;  %vm14027_vm1 = vmmov %vm13993_vm0 }
 0xed3   :  { %v5122_v20 = vpop.f32.mrf.mxu2  ;;  %5351 = vadd.xlane.f32.xlu2 %v5350_v5 }
 0xed4   :  { %v5123_v50 = vadd.f32 %v11800_v42, %v5122_v20 }
 0xed6   :  { %v5168_v54 = vmax.f32 %v5123_v50, 0.0 }
 0xed7   :  { %v5270_v7 = vpop.f32.mrf.mxu0 }
 0xed8   :  { %v5188_v36 = vpack.c.bf16 %v5168_v54, %v5167_v62  ;;  %v11892_v25 = vadd.f32 %v11850_v38, %v5270_v7 }
 0xeda   :  { %7212 = vmatmul.msk.bf16.gmra.mxu0 %vm14013_vm5, %v5188_v36  ;;  %v5353_v33 = vsel %vm14014_vm13, %v11892_v25, 0.0  ;;  %vm14028_vm5 = vmmov %vm13993_vm0 }
 0xedb   :  { %v5125_v24 = vpop.f32.mrf.mxu2  ;;  %5354 = vadd.xlane.f32.xlu1 %v5353_v33  ;;  %v7221_v33 = vld [vmem:[%s10244_s29 + $0x60] sm:$0xff]  ;;  %vm14029_vm13 = vmmov %vm13993_vm0 }
 0xedc   :  { %v5126_v22 = vadd.f32 %v11800_v42, %v5125_v24  ;;  %v7222_v24 = vld [vmem:[%s10244_s29 + $0x68] sm:$0xff] }
 0xede   :  { %v5169_v34 = vmax.f32 %v5126_v22, 0.0  ;;  %v6270_v22 = vpack.c.bf16 %v7222_v24, %v7221_v33 }
 0xedf   :  { %v5272_v23 = vpop.f32.mrf.mxu0 }
 0xee0   :  { %v11898_v40 = vadd.f32 %v11850_v38, %v5272_v23  ;;  %6279 = vmatpush.bf16.msra.mxu0 %v6270_v22 }
 0xee2   :  { %v5356_v56 = vsel %vm14015_vm12, %v11898_v40, 0.0  ;;  %vm14030_vm12 = vmmov %vm13993_vm0 }
 0xee3   :  { %v5127_v9 = vpop.f32.mrf.mxu2  ;;  %5357 = vadd.xlane.f32.xlu0 %v5356_v56 }
 0xee4   :  { %v5128_v45 = vadd.f32 %v11800_v42, %v5127_v9 }
 0xee6   :  { %v5170_v8 = vmax.f32 %v5128_v45, 0.0 }
 0xee7   :  { %v5275_v32 = vpop.f32.mrf.mxu0 }
 0xee8   :  { %v5189_v41 = vpack.c.bf16 %v5170_v8, %v5169_v34  ;;  %v11905_v55 = vadd.f32 %v11850_v38, %v5275_v32 }
 0xeea   :  { %7213 = vmatmul.msk.bf16.gmra.mxu0 %vm14016_vm3, %v5189_v41  ;;  %v5359_v59 = vsel %vm14017_vm10, %v11905_v55, 0.0  ;;  %vm14031_vm3 = vmmov %vm13993_vm0 }
 0xeeb   :  { %v5130_v10 = vpop.f32.mrf.mxu2  ;;  %5360 = vadd.xlane.f32.xlu2 %v5359_v59  ;;  %vm14032_vm10 = vmmov %vm13993_vm0 }
 0xeec   :  { %v5131_v52 = vadd.f32 %v11800_v42, %v5130_v10 }
 0xeee   :  { %v5171_v21 = vmax.f32 %v5131_v52, 0.0 }
 0xeef   :  { %v5277_v28 = vpop.f32.mrf.mxu0 }
 0xef0   :  { %v11911_v13 = vadd.f32 %v11850_v38, %v5277_v28 }
 0xef2   :  { %v5362_v15 = vsel %vm14018_vm8, %v11911_v13, 0.0  ;;  %vm14033_vm8 = vmmov %vm13993_vm0 }
 0xef3   :  { %v5132_v49 = vpop.f32.mrf.mxu2  ;;  %5363 = vadd.xlane.f32.xlu1 %v5362_v15 }
 0xef4   :  { %v5133_v26 = vadd.f32 %v11800_v42, %v5132_v49 }
 0xef6   :  { %v5172_v39 = vmax.f32 %v5133_v26, 0.0 }
 0xef7   :  { %v5280_v53 = vpop.f32.mrf.mxu0 }
 0xef8   :  { %v5190_v48 = vpack.c.bf16 %v5172_v39, %v5171_v21  ;;  %v11918_v6 = vadd.f32 %v11850_v38, %v5280_v53 }
 0xefa   :  { %7214 = vmatmul.msk.bf16.gmra.mxu0 %vm14019_vm2, %v5190_v48  ;;  %v5365_v63 = vsel %vm14020_vm4, %v11918_v6, 0.0  ;;  %vm14034_vm2 = vmmov %vm13993_vm0 }
 0xefb   :  { %v5135_v19 = vpop.f32.mrf.mxu2  ;;  %5366 = vadd.xlane.f32.xlu0 %v5365_v63  ;;  %vm14035_vm4 = vmmov %vm13993_vm0 }
 0xefc   :  { %v5136_v27 = vadd.f32 %v11800_v42, %v5135_v19 }
 0xefe   :  { %v5173_v50 = vmax.f32 %v5136_v27, 0.0 }
 0xeff   :  { %v5282_v17 = vpop.f32.mrf.mxu0 }
 0xf00   :  { %v11924_v14 = vadd.f32 %v11850_v38, %v5282_v17 }
 0xf02   :  { %v5368_v35 = vsel %vm14021_vm9, %v11924_v14, 0.0  ;;  %vm14036_vm9 = vmmov %vm13993_vm0 }
 0xf03   :  { %v5137_v5 = vpop.f32.mrf.mxu2  ;;  %5369 = vadd.xlane.f32.xlu2 %v5368_v35 }
 0xf04   :  { %v5138_v20 = vadd.f32 %v11800_v42, %v5137_v5 }
 0xf06   :  { %v5174_v62 = vmax.f32 %v5138_v20, 0.0 }
 0xf07   :  { %v5285_v54 = vpop.f32.mrf.mxu0 }
 0xf08   :  { %v5191_v7 = vpack.c.bf16 %v5174_v62, %v5173_v50  ;;  %v11933_v36 = vadd.f32 %v11850_v38, %v5285_v54 }
 0xf0a   :  { %7215 = vmatmul.msk.bf16.gmra.mxu0 %vm14022_vm15, %v5191_v7  ;;  %v5371_v23 = vsel %vm14023_vm6, %v11933_v36, 0.0  ;;  %vm14037_vm15 = vmmov %vm13993_vm0 }
 0xf0b   :  { %v5140_v56 = vpop.f32.mrf.mxu2  ;;  %5372 = vadd.xlane.f32.xlu1 %v5371_v23  ;;  %vm14038_vm6 = vmmov %vm13993_vm0 }
 0xf0c   :  { %v5141_v34 = vadd.f32 %v11800_v42, %v5140_v56 }
 0xf0e   :  { %v5175_v59 = vmax.f32 %v5141_v34, 0.0 }
 0xf0f   :  { %v5287_v9 = vpop.f32.mrf.mxu0 }
 0xf10   :  { %v11941_v45 = vadd.f32 %v11850_v38, %v5287_v9 }
 0xf12   :  { %v5374_v8 = vsel %vm13993_vm0, %v11941_v45, 0.0 }
 0xf13   :  { %v5142_v32 = vpop.f32.mrf.mxu2  ;;  %5375 = vadd.xlane.f32.xlu0 %v5374_v8 }
 0xf14   :  { %v5143_v41 = vadd.f32 %v11800_v42, %v5142_v32 }
 0xf16   :  { %v5176_v10 = vmax.f32 %v5143_v41, 0.0 }
 0xf17   :  { %v5290_v28 = vpop.f32.mrf.mxu0 }
 0xf18   :  { %v5192_v52 = vpack.c.bf16 %v5176_v10, %v5175_v59  ;;  %v11948_v15 = vadd.f32 %v11850_v38, %v5290_v28 }
 0xf1a   :  { %7216 = vmatmul.msk.bf16.gmra.mxu0 %vm14024_vm11, %v5192_v52  ;;  %v5377_v49 = vsel %vm14025_vm14, %v11948_v15, 0.0  ;;  %vm14039_vm11 = vmmov %vm13993_vm0 }
 0xf1b   :  { %5378 = vadd.xlane.f32.xlu0 %v5377_v49  ;;  %vm14040_vm14 = vmmov %vm13993_vm0 }
 0xf1e   :  { %v12001_v24 = vpop.xlane.xlu1 %5336 }
 0xf1f   :  { %v5292_v26 = vpop.f32.mrf.mxu0 }
 0xf20   :  { %v11954_v21 = vadd.f32 %v11850_v38, %v5292_v26 }
 0xf22   :  { %v5380_v42 = vsel %vm14026_vm7, %v11954_v21, 0.0  ;;  %vm14041_vm7 = vmmov %vm13993_vm0 }
 0xf23   :  { %5381 = vadd.xlane.f32.xlu2 %v5380_v42 }
 0xf26   :  { %v12008_v9 = vpop.xlane.xlu0 %5339 }
 0xf27   :  { %v5295_v39 = vpop.f32.mrf.mxu0 }
 0xf28   :  { %v11959_v53 = vadd.f32 %v11850_v38, %v5295_v39 }
 0xf2a   :  { %7242 = vmatmul.msk.bf16.vlgmr.msra.gmra.mxu0 %vm14027_vm1, %v11588_v37  ;;  %v5383_v48 = vsel %vm14028_vm5, %v11959_v53, 0.0  ;;  %vm14042_vm1 = vmmov %vm13993_vm0 }
 0xf2b   :  { %5384 = vadd.xlane.f32.xlu0 %v5383_v48  ;;  %vm14043_vm5 = vmmov %vm13993_vm0 }
 0xf2e   :  { %v12024_v49 = vpop.xlane.xlu2 %5342 }
 0xf2f   :  { %v5297_v63 = vpop.f32.mrf.mxu0 }
 0xf30   :  { %v11966_v19 = vadd.f32 %v11850_v38, %v5297_v63 }
 0xf32   :  { %v5386_v17 = vsel %vm14029_vm13, %v11966_v19, 0.0  ;;  %vm14044_vm13 = vmmov %vm13993_vm0 }
 0xf33   :  { %5387 = vadd.xlane.f32.xlu2 %v5386_v17 }
 0xf36   :  { %v12010_v34 = vpop.xlane.xlu1 %5345 }
 0xf37   :  { %v5300_v30 = vpop.f32.mrf.mxu0 }
 0xf38   :  { %v11971_v46 = vadd.f32 %v11850_v38, %v5300_v30 }
 0xf3a   :  { %7243 = vmatmul.msk.bf16.gmra.mxu0 %vm14030_vm12, %v11609_v4  ;;  %v5389_v37 = vsel %vm14031_vm3, %v11971_v46, 0.0  ;;  %vm14045_vm12 = vmmov %vm13993_vm0 }
 0xf3b   :  { %5390 = vadd.xlane.f32.xlu2 %v5389_v37  ;;  %vm14046_vm3 = vmmov %vm13993_vm0 }
 0xf3e   :  { %v12017_v41 = vpop.xlane.xlu0 %5348 }
 0xf3f   :  { %v5302_v27 = vpop.f32.mrf.mxu0 }
 0xf40   :  { %v11978_v35 = vadd.f32 %v11850_v38, %v5302_v27 }
 0xf42   :  { %v5392_v47 = vsel %vm14032_vm10, %v11978_v35, 0.0  ;;  %vm14047_vm10 = vmmov %vm13993_vm0 }
 0xf43   :  { %5393 = vadd.xlane.f32.xlu1 %v5392_v47 }
 0xf46   :  { %v5352_v17 = vpop.xlane.xlu2 %5351 }
 0xf47   :  { %v5305_v5 = vpop.f32.mrf.mxu0 }
 0xf48   :  { %v11983_v20 = vadd.f32 %v11850_v38, %v5305_v5 }
 0xf4a   :  { %7244 = vmatmul.msk.bf16.gmra.mxu0 %vm14033_vm8, %v11629_v31  ;;  %v5395_v4 = vsel %vm14034_vm2, %v11983_v20, 0.0  ;;  %vm14048_vm8 = vmmov %vm13993_vm0 }
 0xf4b   :  { %5396 = vadd.xlane.f32.xlu0 %v5395_v4  ;;  %vm14049_vm2 = vmmov %vm13993_vm0 }
 0xf4e   :  { %v5355_v59 = vpop.xlane.xlu1 %5354 }
 0xf4f   :  { %v5307_v50 = vpop.f32.mrf.mxu0 }
 0xf50   :  { %v11990_v62 = vadd.f32 %v11850_v38, %v5307_v50 }
 0xf52   :  { %v5398_v54 = vsel %vm14035_vm4, %v11990_v62, 0.0  ;;  %vm14050_vm4 = vmmov %vm13993_vm0 }
 0xf53   :  { %5399 = vadd.xlane.f32.xlu2 %v5398_v54 }
 0xf56   :  { %v12026_v26 = vpop.xlane.xlu0 %5357 }
 0xf57   :  { %v5310_v7 = vpop.f32.mrf.mxu0 }
 0xf58   :  { %v11995_v33 = vadd.f32 %v11850_v38, %v5310_v7 }
 0xf5a   :  { %7245 = vmatmul.msk.bf16.gmra.mxu0 %vm14036_vm9, %v11651_v11  ;;  %v5401_v31 = vsel %vm14037_vm15, %v11995_v33, 0.0  ;;  %vm14051_vm9 = vmmov %vm13993_vm0 }
 0xf5b   :  { %5402 = vadd.xlane.f32.xlu1 %v5401_v31  ;;  %vm14052_vm15 = vmmov %vm13993_vm0 }
 0xf5e   :  { %v5361_v54 = vpop.xlane.xlu2 %5360 }
 0xf5f   :  { %v5312_v23 = vpop.f32.mrf.mxu0 }
 0xf60   :  { %v12004_v22 = vadd.f32 %v11850_v38, %v5312_v23 }
 0xf62   :  { %v5404_v56 = vsel %vm14038_vm6, %v12004_v22, 0.0  ;;  %vm14053_vm6 = vmmov %vm13993_vm0 }
 0xf63   :  { %5405 = vadd.xlane.f32.xlu0 %v5404_v56 }
 0xf66   :  { %v5364_v42 = vpop.xlane.xlu1 %5363 }
 0xf67   :  { %v5315_v8 = vpop.f32.mrf.mxu0 }
 0xf68   :  { %v12013_v11 = vadd.f32 %v11850_v38, %v5315_v8 }
 0xf6a   :  { %v5407_v32 = vsel %vm13993_vm0, %v12013_v11, 0.0 }
 0xf6b   :  { %5408 = vadd.xlane.f32.xlu2 %v5407_v32 }
 0xf6e   :  { %v5367_v30 = vpop.xlane.xlu0 %5366 }
 0xf6f   :  { %v5317_v10 = vpop.f32.mrf.mxu0 }
 0xf70   :  { %v12020_v28 = vadd.f32 %v11850_v38, %v5317_v10 }
 0xf72   :  { %v5410_v52 = vsel %vm14039_vm11, %v12020_v28, 0.0  ;;  %vm14054_vm11 = vmmov %vm13993_vm0 }
 0xf73   :  { %5411 = vadd.xlane.f32.xlu1 %v5410_v52 }
 0xf77   :  { %v5320_v39 = vpop.f32.mrf.mxu0 }
 0xf78   :  { %v12029_v48 = vadd.f32 %v11850_v38, %v5320_v39 }
 0xf7a   :  { %v5413_v63 = vsel %vm14040_vm14, %v12029_v48, 0.0  ;;  %vm14055_vm14 = vmmov %vm13993_vm0 }
 0xf7b   :  { %5414 = vadd.xlane.f32.xlu0 %v5413_v63 }
 0xf7e   :  { %v5373_v37 = vpop.xlane.xlu1 %5372 }
 0xf7f   :  { %v5443_v27 = vmul.f32 %v5373_v37, %v7947_v0  ;;  %v5322_v47 = vpop.f32.mrf.mxu0 }
 0xf80   :  { %v12035_v5 = vadd.f32 %v11850_v38, %v5322_v47 }
 0xf81   :  { %v12038_v4 = vsub.f32 %v11933_v36, %v5443_v27  ;;  %v5370_v36 = vpop.xlane.xlu2 %5369 }
 0xf82   :  { %v5416_v50 = vsel %vm14041_vm7, %v12035_v5, 0.0  ;;  %vm14056_vm7 = vmmov %vm13993_vm0 }
 0xf83   :  { %5417 = vadd.xlane.f32.xlu2 %v5416_v50  ;;  %v5507_v31 = vmul.f32 %v12038_v4, %v12038_v4 }
 0xf85   :  { %v5563_v32 = vsel %vm14043_vm5, %v5507_v31, 0.0  ;;  %v5440_v31 = vmul.f32 %v5364_v42, %v7947_v0  ;;  %vm14058_vm5 = vmmov %vm13993_vm0 }
 0xf86   :  { %v5376_v7 = vpop.xlane.xlu0 %5375 }
 0xf87   :  { %v5325_v23 = vpop.f32.mrf.mxu0 }
 0xf88   :  { %v12045_v56 = vadd.f32 %v11850_v38, %v5325_v23 }
 0xf8a   :  { %v5419_v8 = vsel %vm14042_vm1, %v12045_v56, 0.0  ;;  %vm14057_vm1 = vmmov %vm13993_vm0 }
 0xf8b   :  { %5420 = vadd.xlane.f32.xlu1 %v5419_v8  ;;  %5564 = vadd.xlane.f32.xlu2 %v5563_v32 }
 0xf8e   :  { %v5379_v10 = vpop.xlane.xlu0 %5378 }
 0xf8f   :  { %v5445_v52 = vmul.f32 %v5379_v10, %v7947_v0  ;;  %v5327_v39 = vpop.f32.mrf.mxu0 }
 0xf90   :  { %v12052_v63 = vadd.f32 %v11850_v38, %v5327_v39  ;;  %v12072_v39 = vsub.f32 %v11911_v13, %v5440_v31 }
 0xf91   :  { %v12055_v37 = vsub.f32 %v11948_v15, %v5445_v52  ;;  %v5442_v15 = vmul.f32 %v5370_v36, %v7947_v0  ;;  %v5437_v36 = vmul.f32 %v5355_v59, %v7947_v0 }
 0xf92   :  { %v5422_v27 = vsel %vm14044_vm13, %v12052_v63, 0.0  ;;  %v5504_v13 = vmul.f32 %v12072_v39, %v12072_v39  ;;  %vm14059_vm13 = vmmov %vm13993_vm0 }
 0xf93   :  { %5423 = vadd.xlane.f32.xlu0 %v5422_v27  ;;  %v5509_v47 = vmul.f32 %v12055_v37, %v12055_v37 }
 0xf95   :  { %v5569_v50 = vsel %vm14045_vm12, %v5509_v47, 0.0  ;;  %v12079_v47 = vsub.f32 %v11924_v14, %v5442_v15  ;;  %v5554_v15 = vsel %vm14049_vm2, %v5504_v13, 0.0  ;;  %vm14060_vm12 = vmmov %vm13993_vm0 }
 0xf96   :  { %v5382_v23 = vpop.xlane.xlu2 %5381  ;;  %5570 = vadd.xlane.f32.xlu1 %v5569_v50  ;;  %vm14064_vm2 = vmmov %vm13993_vm0 }
 0xf97   :  { %v5446_v8 = vmul.f32 %v5382_v23, %v7947_v0  ;;  %v5330_v32 = vpop.f32.mrf.mxu0  ;;  %v5506_v14 = vmul.f32 %v12079_v47, %v12079_v47 }
 0xf98   :  { %v12065_v10 = vadd.f32 %v11850_v38, %v5330_v32  ;;  %v12093_v32 = vsub.f32 %v11892_v25, %v5437_v36 }
 0xf99   :  { %v12069_v52 = vsub.f32 %v11954_v21, %v5446_v8  ;;  %v5444_v21 = vmul.f32 %v5376_v7, %v7947_v0  ;;  %v5439_v8 = vmul.f32 %v5361_v54, %v7947_v0  ;;  %v5560_v54 = vsel %vm14050_vm4, %v5506_v14, 0.0  ;;  %vm14065_vm4 = vmmov %vm13993_vm0 }
 0xf9a   :  { %v5425_v27 = vsel %vm14046_vm3, %v12065_v10, 0.0  ;;  %vm14061_vm3 = vmmov %vm13993_vm0 }
 0xf9b   :  { %5426 = vadd.xlane.f32.xlu2 %v5425_v27  ;;  %v5510_v42 = vmul.f32 %v12069_v52, %v12069_v52  ;;  %v12096_v59 = vsub.f32 %v11941_v45, %v5444_v21  ;;  %v5441_v27 = vmul.f32 %v5367_v30, %v7947_v0  ;;  %v5501_v45 = vmul.f32 %v12093_v32, %v12093_v32 }
 0xf9d   :  { %v5572_v50 = vsel %vm14047_vm10, %v5510_v42, 0.0  ;;  %v5508_v25 = vmul.f32 %v12096_v59, %v12096_v59  ;;  %v5436_v42 = vmul.f32 %v5352_v17, %v7947_v0  ;;  %v12114_v36 = vsub.f32 %v11918_v6, %v5441_v27  ;;  %vm14062_vm10 = vmmov %vm13993_vm0 }
 0xf9e   :  { %5573 = vadd.xlane.f32.xlu0 %v5572_v50  ;;  %v5545_v21 = vsel %vm14052_vm15, %v5501_v45, 0.0  ;;  %v5438_v17 = vmul.f32 %v12026_v26, %v7947_v0  ;;  %v12146_v45 = vpop.xlane.xlu0 %5384  ;;  %vm14068_vm15 = vmmov %vm13993_vm0 }
 0xf9f   :  { %v5332_v31 = vpop.f32.mrf.mxu0  ;;  %v12119_v30 = vsub.f32 %v11885_v60, %v5436_v42 }
 0xfa0   :  { %v12087_v23 = vadd.f32 %v11850_v38, %v5332_v31  ;;  %v12102_v38 = vsub.f32 %v11905_v55, %v5439_v8  ;;  %v5566_v55 = vsel %vm14051_vm9, %v5508_v25, 0.0  ;;  %v5505_v31 = vmul.f32 %v12114_v36, %v12114_v36  ;;  %vm14066_vm9 = vmmov %vm13993_vm0 }
 0xfa1   :  { %v5500_v6 = vmul.f32 %v12119_v30, %v12119_v30  ;;  %v12129_v8 = vsub.f32 %v11898_v40, %v5438_v17 }
 0xfa2   :  { %v5428_v7 = vsel %vm14048_vm8, %v12087_v23, 0.0  ;;  %v5503_v50 = vmul.f32 %v12102_v38, %v12102_v38  ;;  %v5557_v14 = vsel %vm13993_vm0, %v5505_v31, 0.0  ;;  %vm14063_vm8 = vmmov %vm13993_vm0 }
 0xfa3   :  { %5429 = vadd.xlane.f32.xlu1 %v5428_v7  ;;  %5555 = vadd.xlane.f32.xlu2 %v5554_v15  ;;  %v5542_v60 = vsel %vm14054_vm11, %v5500_v6, 0.0  ;;  %v5435_v7 = vmul.f32 %v12017_v41, %v7947_v0  ;;  %v5502_v26 = vmul.f32 %v12129_v8, %v12129_v8  ;;  %vm14070_vm11 = vmmov %vm14057_vm1 }
 0xfa4   :  { %v5551_v13 = vsel %vm14053_vm6, %v5503_v50, 0.0  ;;  %vm14069_vm6 = vmmov %vm13993_vm0 }
 0xfa5   :  { %v12138_v15 = vsub.f32 %v11879_v43, %v5435_v7 }
 0xfa6   :  { %5561 = vadd.xlane.f32.xlu0 %v5560_v54  ;;  %v5548_v54 = vsel %vm14055_vm14, %v5502_v26, 0.0  ;;  %v12144_v25 = vpop.xlane.xlu2 %5387 }
 0xfa7   :  { %v5499_v40 = vmul.f32 %v12138_v15, %v12138_v15 }
 0xfa9   :  { %v5539_v27 = vsel %vm14056_vm7, %v5499_v40, 0.0 }
 0xfab   :  { %5567 = vadd.xlane.f32.xlu1 %v5566_v55  ;;  %5546 = vadd.xlane.f32.xlu2 %v5545_v21 }
 0xfae   :  { %5552 = vadd.xlane.f32.xlu0 %v5551_v13  ;;  %v12150_v42 = vpop.xlane.xlu2 %5390 }
 0xfb3   :  { %5558 = vadd.xlane.f32.xlu1 %v5557_v14 }
 0xfb6   :  { %5543 = vadd.xlane.f32.xlu0 %v5542_v60  ;;  %v12148_v41 = vpop.xlane.xlu1 %5393 }
 0xfbb   :  { %5549 = vadd.xlane.f32.xlu1 %v5548_v54 }
 0xfbe   :  { %v5397_v50 = vpop.xlane.xlu0 %5396 }
 0xfc3   :  { %5540 = vadd.xlane.f32.xlu1 %v5539_v27 }
 0xfc6   :  { %v12159_v31 = vpop.xlane.xlu2 %5399 }
 0xfce   :  { %v5403_v43 = vpop.xlane.xlu1 %5402 }
 0xfcf   :  { %v5453_v55 = vmul.f32 %v5403_v43, %v7947_v0 }
 0xfd1   :  { %v12154_v21 = vsub.f32 %v11995_v33, %v5453_v55 }
 0xfd3   :  { %v5517_v13 = vmul.f32 %v12154_v21, %v12154_v21 }
 0xfd5   :  { %v5593_v17 = vsel %vm14057_vm1, %v5517_v13, 0.0 }
 0xfd6   :  { %v5406_v6 = vpop.xlane.xlu0 %5405  ;;  %5594 = vadd.xlane.f32.xlu2 %v5593_v17 }
 0xfd7   :  { %v5454_v14 = vmul.f32 %v5406_v6, %v7947_v0 }
 0xfd9   :  { %v12163_v60 = vsub.f32 %v12004_v22, %v5454_v14 }
 0xfdb   :  { %v5518_v7 = vmul.f32 %v12163_v60, %v12163_v60 }
 0xfdd   :  { %v5596_v33 = vsel %vm14058_vm5, %v5518_v7, 0.0  ;;  %vm14073_vm5 = vmmov %vm14064_vm2 }
 0xfde   :  { %v5409_v26 = vpop.xlane.xlu2 %5408  ;;  %5597 = vadd.xlane.f32.xlu1 %v5596_v33 }
 0xfdf   :  { %v5455_v54 = vmul.f32 %v5409_v26, %v7947_v0 }
 0xfe1   :  { %v12170_v40 = vsub.f32 %v12013_v11, %v5455_v54 }
 0xfe3   :  { %v5519_v27 = vmul.f32 %v12170_v40, %v12170_v40 }
 0xfe5   :  { %v5599_v43 = vsel %vm14059_vm13, %v5519_v27, 0.0 }
 0xfe6   :  { %5600 = vadd.xlane.f32.xlu0 %v5599_v43  ;;  %v5412_v22 = vpop.xlane.xlu1 %5411 }
 0xfe7   :  { %v5456_v55 = vmul.f32 %v5412_v22, %v7947_v0 }
 0xfe9   :  { %v12177_v13 = vsub.f32 %v12020_v28, %v5456_v55 }
 0xfeb   :  { %v5520_v17 = vmul.f32 %v12177_v13, %v12177_v13 }
 0xfed   :  { %v5602_v6 = vsel %vm14060_vm12, %v5520_v17, 0.0 }
 0xfee   :  { %v5415_v14 = vpop.xlane.xlu0 %5414  ;;  %5603 = vadd.xlane.f32.xlu2 %v5602_v6 }
 0xfef   :  { %v5457_v11 = vmul.f32 %v5415_v14, %v7947_v0 }
 0xff1   :  { %v12184_v7 = vsub.f32 %v12029_v48, %v5457_v11 }
 0xff3   :  { %v5521_v33 = vmul.f32 %v12184_v7, %v12184_v7 }
 0xff5   :  { %v5605_v26 = vsel %vm14061_vm3, %v5521_v33, 0.0  ;;  %vm14078_vm3 = vmmov %vm14064_vm2 }
 0xff6   :  { %v5418_v54 = vpop.xlane.xlu2 %5417  ;;  %5606 = vadd.xlane.f32.xlu1 %v5605_v26 }
 0xff7   :  { %v5458_v28 = vmul.f32 %v5418_v54, %v7947_v0 }
 0xff9   :  { %v12191_v27 = vsub.f32 %v12035_v5, %v5458_v28 }
 0xffb   :  { %v5522_v43 = vmul.f32 %v12191_v27, %v12191_v27 }
 0xffd   :  { %v5608_v22 = vsel %vm14062_vm10, %v5522_v43, 0.0  ;;  %v5451_v43 = vmul.f32 %v5397_v50, %v7947_v0  ;;  %v5433_v50 = vmul.f32 %v12024_v49, %v7947_v0 }
 0xffe   :  { %5609 = vadd.xlane.f32.xlu0 %v5608_v22  ;;  %v5565_v48 = vpop.xlane.xlu2 %5564  ;;  %v5421_v55 = vpop.xlane.xlu1 %5420 }
 0xfff   :  { %v5635_v17 = vmul.f32 %v5565_v48, %v7947_v0  ;;  %v5459_v6 = vmul.f32 %v5421_v55, %v7947_v0 }
0x1001   :  { %v12198_v14 = vadd.f32 1e-05, %v5635_v17  ;;  %v12201_v11 = vsub.f32 %v12045_v56, %v5459_v6 }
0x1003   :  { %7658 = vrsqrt.f32 %v12198_v14  ;;  %v5523_v5 = vmul.f32 %v12201_v11, %v12201_v11  ;;  %vm5813_vm14 = vweird.f32 %v12198_v14 }
0x1005   :  { %v5611_v33 = vsel %vm14063_vm8, %v5523_v5, 0.0  ;;  %v12222_v5 = vsub.f32 %v11983_v20, %v5451_v43  ;;  %v5431_v20 = vmul.f32 %v12001_v24, %v7947_v0  ;;  %vm14079_vm8 = vmmov %vm14064_vm2 }
0x1006   :  { %v5424_v26 = vpop.xlane.xlu0 %5423  ;;  %5612 = vadd.xlane.f32.xlu2 %v5611_v33 }
0x1007   :  { %v5460_v54 = vmul.f32 %v5424_v26, %v7947_v0  ;;  %v12255_v58 = vsub.f32 %v11853_v18, %v5431_v20 }
0x1009   :  { %v12208_v28 = vpop.eup %7658  ;;  %v12212_v22 = vsub.f32 %v12052_v63, %v5460_v54  ;;  %v5571_v56 = vpop.xlane.xlu1 %5570  ;;  %v5432_v63 = vmul.f32 %v12008_v9, %v7947_v0  ;;  %v5515_v9 = vmul.f32 %v12222_v5, %v12222_v5 }
0x100a   :  { %v5637_v48 = vmul.f32 %v5571_v56, %v7947_v0  ;;  %v5808_v17 = vmul.f32 %v12208_v28, %v12198_v14  ;;  %vm5814_vm0 = vweird.f32 %v12208_v28 }
0x100b   :  { %v5524_v55 = vmul.f32 %v12212_v22, %v12212_v22  ;;  %v12240_v49 = vsub.f32 %v11859_v3, %v5432_v63  ;;  %vm12316_vm7 = vmor %vm5813_vm14, %vm5814_vm0 }
0x100c   :  { %v12219_v6 = vadd.f32 1e-05, %v5637_v48  ;;  %v5809_v56 = vmul.f32 %v12208_v28, %v5808_v17  ;;  %v5447_v17 = vmul.f32 %v12146_v45, %v7947_v0  ;;  %v5434_v45 = vmul.f32 %v12010_v34, %v7947_v0  ;;  %vm14085_vm0 = vmmov %vm14078_vm3 }
0x100d   :  { %v5614_v33 = vsel %vm14064_vm2, %v5524_v55, 0.0  ;;  %v12243_v55 = vsub.f32 %v11866_v61, %v5433_v50  ;;  %v5587_v61 = vsel %vm14065_vm4, %v5515_v9, 0.0  ;;  %v5496_v18 = vmul.f32 %v12240_v49, %v12240_v49 }
0x100e   :  { %7660 = vrsqrt.f32 %v12219_v6  ;;  %5615 = vadd.xlane.f32.xlu1 %v5614_v33  ;;  %v5427_v26 = vpop.xlane.xlu2 %5426  ;;  %vm5833_vm13 = vweird.f32 %v12219_v6 }
0x100f   :  { %v5461_v54 = vmul.f32 %v5427_v26, %v7947_v0  ;;  %v5810_v26 = vmul.f32 0.5, %v5809_v56  ;;  %v5497_v20 = vmul.f32 %v12243_v55, %v12243_v55 }
0x1011   :  { %v12235_v43 = vsub.f32 %v12065_v10, %v5461_v54  ;;  %v5574_v48 = vpop.xlane.xlu0 %5573 }
0x1012   :  { %v5638_v33 = vmul.f32 %v5574_v48, %v7947_v0  ;;  %v12269_v48 = vsub.f32 %v11959_v53, %v5447_v17  ;;  %v5530_v17 = vsel %vm14068_vm15, %v5496_v18, 0.0  ;;  %vm14083_vm15 = vmmov %vm14078_vm3 }
0x1013   :  { %v5525_v24 = vmul.f32 %v12235_v43, %v12235_v43 }
0x1014   :  { %v12250_v10 = vpop.eup %7660  ;;  %v12252_v54 = vadd.f32 1e-05, %v5638_v33  ;;  %14067 = vst [vmem:[#allocation41_spill] sm:$0xff] %v12269_v48 }
0x1015   :  { %v5828_v3 = vmul.f32 %v12250_v10, %v12219_v6  ;;  %v5617_v63 = vsel %vm14066_vm9, %v5525_v24, 0.0  ;;  %v5452_v24 = vmul.f32 %v12159_v31, %v7947_v0  ;;  %v12289_v31 = vsub.f32 %v11872_v16, %v5434_v45  ;;  %vm14082_vm9 = vmmov %vm14078_vm3 }
0x1016   :  { %7662 = vrsqrt.f32 %v12252_v54  ;;  %5588 = vadd.xlane.f32.xlu1 %v5587_v61  ;;  %5618 = vadd.xlane.f32.xlu0 %v5617_v63  ;;  %v5556_v50 = vpop.xlane.xlu2 %5555  ;;  %v5430_v56 = vpop.xlane.xlu1 %5429  ;;  %v5811_v61 = vsub.f32 1.5, %v5810_v26  ;;  %v5511_v26 = vmul.f32 %v12269_v48, %v12269_v48  ;;  %v5448_v16 = vmul.f32 %v12144_v25, %v7947_v0 }
0x1017   :  { %v5829_v9 = vmul.f32 %v12250_v10, %v5828_v3  ;;  %v5632_v33 = vmul.f32 %v5556_v50, %v7947_v0  ;;  %v5462_v34 = vmul.f32 %v5430_v56, %v7947_v0  ;;  %v5533_v3 = vsel %vm14069_vm6, %v5497_v20, 0.0  ;;  %vm14084_vm6 = vmmov %vm14078_vm3 }
0x1018   :  { %v12286_v50 = vmul.f32 %v12255_v58, %v12255_v58  ;;  %v12299_v56 = vsub.f32 %v11990_v62, %v5452_v24  ;;  %v5812_v18 = vmul.f32 %v12208_v28, %v5811_v61  ;;  %v5450_v62 = vmul.f32 %v12148_v41, %v7947_v0 }
0x1019   :  { %v5830_v63 = vmul.f32 0.5, %v5829_v9  ;;  %v12276_v29 = vadd.f32 1e-05, %v5632_v33  ;;  %v12279_v12 = vsub.f32 %v12087_v23, %v5462_v34  ;;  %v5562_v57 = vpop.xlane.xlu0 %5561  ;;  %v5449_v34 = vmul.f32 %v12150_v42, %v7947_v0 }
0x101a   :  { %v5634_v53 = vmul.f32 %v5562_v57, %v7947_v0  ;;  %v5498_v41 = vmul.f32 %v12289_v31, %v12289_v31  ;;  %v5816_v14 = vsel %vm12316_vm7, %v12208_v28, %v5812_v18  ;;  %vm5834_vm1 = vweird.f32 %v12250_v10 }
0x101b   :  { %7664 = vrsqrt.f32 %v12276_v29  ;;  %v5526_v23 = vmul.f32 %v12279_v12, %v12279_v12  ;;  %v5831_v45 = vsub.f32 1.5, %v5830_v63  ;;  %v12340_v61 = vsub.f32 %v11966_v19, %v5448_v16  ;;  %vm12358_vm12 = vmor %vm5833_vm13, %vm5834_vm1 }
0x101c   :  { %v12296_v57 = vpop.eup %7662  ;;  %v12303_v20 = vadd.f32 1e-05, %v5634_v53  ;;  %v12343_v28 = vsub.f32 %v11971_v46, %v5449_v34  ;;  %v6019_v19 = vmul.f32 %v5816_v14, %v12038_v4  ;;  %v12374_v34 = vld [vmem:[%s10423_s6 + $0x1] ss:$0 sm:$0xff]  ;;  %vm5843_vm2 = vweird.f32 %v12252_v54 }
0x101d   :  { %v5838_v9 = vmul.f32 %v12296_v57, %v12252_v54  ;;  %v5620_v33 = vsel %vm14070_vm11, %v5526_v23, 0.0  ;;  %14074 = vst [vmem:[#allocation44_spill] sm:$0xff] %v12340_v61  ;;  %vm5844_vm10 = vweird.f32 %v12296_v57  ;;  %v5512_v14 = vmul.f32 %v12340_v61, %v12340_v61 }
0x101e   :  { %7666 = vrsqrt.f32 %v12303_v20  ;;  %5531 = vadd.xlane.f32.xlu1 %v5530_v17  ;;  %5534 = vadd.xlane.f32.xlu0 %v5533_v3  ;;  %v5547_v24 = vpop.xlane.xlu2 %5546  ;;  %v5568_v25 = vpop.xlane.xlu1 %5567  ;;  %v5575_v17 = vsel %vm14073_vm5, %v5511_v26, 0.0  ;;  %v5516_v3 = vmul.f32 %v12299_v56, %v12299_v56  ;;  %v12346_v26 = vsub.f32 %v11978_v35, %v5450_v62  ;;  %vm12389_vm4 = vmor %vm5843_vm2, %vm5844_vm10 }
0x101f   :  { %v5839_v63 = vmul.f32 %v12296_v57, %v5838_v9  ;;  %v5629_v53 = vmul.f32 %v5547_v24, %v7947_v0  ;;  %5621 = vadd.xlane.f32.xlu2 %v5620_v33  ;;  %v5636_v42 = vmul.f32 %v5568_v25, %v7947_v0  ;;  %v5832_v9 = vmul.f32 %v12250_v10, %v5831_v45 }
0x1020   :  { %14075 = vst [vmem:[#allocation45_spill] sm:$0xff] %v12346_v26  ;;  %v5590_v35 = vsel %vm14078_vm3, %v5516_v3, 0.0  ;;  %v5536_v62 = vsel %vm14079_vm8, %v5498_v41, 0.0  ;;  %v5578_v41 = vsel %vm14083_vm15, %v5512_v14, 0.0  ;;  %vm5783_vm11 = vweird.f32 %v12276_v29 }
0x1021   :  { %v12332_v23 = vpop.eup %7664  ;;  %v5840_v33 = vmul.f32 0.5, %v5839_v63  ;;  %v12335_v24 = vadd.f32 1e-05, %v5629_v53  ;;  %v12337_v25 = vadd.f32 1e-05, %v5636_v42  ;;  %v5553_v51 = vpop.xlane.xlu0 %5552  ;;  %v5836_v6 = vsel %vm12358_vm12, %v12250_v10, %v5832_v9 }
0x1022   :  { %v5631_v18 = vmul.f32 %v5553_v51, %v7947_v0  ;;  %v5778_v63 = vmul.f32 %v12332_v23, %v12276_v29  ;;  %v5513_v10 = vmul.f32 %v12343_v28, %v12343_v28  ;;  %vm5784_vm14 = vweird.f32 %v12332_v23 }
0x1023   :  { %v5841_v45 = vsub.f32 1.5, %v5840_v33  ;;  %7668 = vrsqrt.f32 %v12335_v24  ;;  %v6021_v33 = vmul.f32 %v5836_v6, %v12055_v37  ;;  %v5527_v37 = vsel %vm14082_vm9, %v12286_v50, 0.0  ;;  %vm12462_vm8 = vmor %vm5783_vm11, %vm5784_vm14 }
0x1024   :  { %v12353_v53 = vpop.eup %7666  ;;  %7670 = vrsqrt.f32 %v12337_v25  ;;  %v12363_v51 = vadd.f32 1e-05, %v5631_v18  ;;  %v5779_v3 = vmul.f32 %v12332_v23, %v5778_v63  ;;  %v5514_v18 = vmul.f32 %v12346_v26, %v12346_v26 }
0x1025   :  { %v5842_v16 = vmul.f32 %v12296_v57, %v5841_v45  ;;  %v5798_v4 = vmul.f32 %v12353_v53, %v12303_v20  ;;  %v6054_v6 = vmul.f32 %v12374_v34, %v6019_v19  ;;  %v5581_v50 = vsel %vm14084_vm6, %v5513_v10, 0.0 }
0x1026   :  { %7672 = vrsqrt.f32 %v12363_v51  ;;  %5576 = vadd.xlane.f32.xlu1 %v5575_v17  ;;  %5591 = vadd.xlane.f32.xlu0 %v5590_v35  ;;  %v5559_v42 = vpop.xlane.xlu1 %5558  ;;  %v12405_v35 = vld [vmem:[%s10433_s11 + $0x1] ss:$0 sm:$0xff]  ;;  %v5584_v2 = vsel %vm14085_vm0, %v5514_v18, 0.0  ;;  %vm5823_vm7 = vweird.f32 %v12337_v25  ;;  %vm5804_vm5 = vweird.f32 %v12353_v53 }
0x1027   :  { %v5799_v9 = vmul.f32 %v12353_v53, %v5798_v4  ;;  %5537 = vadd.xlane.f32.xlu2 %v5536_v62  ;;  %v5633_v17 = vmul.f32 %v5559_v42, %v7947_v0  ;;  %v5846_v54 = vsel %vm12389_vm4, %v12296_v57, %v5842_v16  ;;  %v5780_v57 = vmul.f32 0.5, %v5779_v3 }
0x1028   :  { %v6022_v19 = vmul.f32 %v5846_v54, %v12069_v52  ;;  %v12426_v48 = vadd.f32 %v12405_v35, %v6054_v6  ;;  %vm5803_vm13 = vweird.f32 %v12303_v20  ;;  %vm5773_vm2 = vweird.f32 %v12363_v51 }
0x1029   :  { %v12395_v45 = vpop.eup %7668  ;;  %v12400_v63 = vadd.f32 1e-05, %v5633_v17  ;;  %v5544_v46 = vpop.xlane.xlu0 %5543  ;;  %v5800_v62 = vmul.f32 0.5, %v5799_v9  ;;  %v6056_v9 = vmul.f32 %v12374_v34, %v6021_v33  ;;  %v5781_v10 = vsub.f32 1.5, %v5780_v57  ;;  %vm12451_vm10 = vmor %vm5803_vm13, %vm5804_vm5 }
0x102a   :  { %v7671_v4 = vpop.eup %7670  ;;  %v5748_v42 = vmul.f32 %v12395_v45, %v12335_v24  ;;  %v5628_v44 = vmul.f32 %v5544_v46, %v7947_v0  ;;  %v6057_v6 = vmul.f32 %v12374_v34, %v6022_v19  ;;  %vm5754_vm4 = vweird.f32 %v12395_v45 }
0x102b   :  { %v5818_v16 = vmul.f32 %v7671_v4, %v12337_v25  ;;  %7674 = vrsqrt.f32 %v12400_v63  ;;  %v5801_v52 = vsub.f32 1.5, %v5800_v62  ;;  %vm5824_vm1 = vweird.f32 %v7671_v4 }
0x102c   :  { %v12415_v17 = vpop.eup %7672  ;;  %v12418_v1 = vadd.f32 1e-05, %v5628_v44  ;;  %v5749_v46 = vmul.f32 %v12395_v45, %v5748_v42  ;;  %v6091_v42 = vadd.f32 %v12405_v35, %v6056_v9  ;;  %vm5825_vm12 = vmor %vm5823_vm7, %vm5824_vm1  ;;  %vm5793_vm6 = vweird.f32 %v12400_v63 }
0x102d   :  { %v5819_v14 = vmul.f32 %v7671_v4, %v5818_v16  ;;  %v5768_v3 = vmul.f32 %v12415_v17, %v12363_v51  ;;  %v5802_v57 = vmul.f32 %v12353_v53, %v5801_v52  ;;  %vm5774_vm3 = vweird.f32 %v12415_v17 }
0x102e   :  { %7676 = vrsqrt.f32 %v12418_v1  ;;  %5582 = vadd.xlane.f32.xlu0 %v5581_v50  ;;  %v5550_v44 = vpop.xlane.xlu1 %5549  ;;  %v5750_v62 = vmul.f32 0.5, %v5749_v46  ;;  %vm12477_vm9 = vmor %vm5773_vm2, %vm5774_vm3  ;;  %vm5753_vm0 = vweird.f32 %v12335_v24 }
0x102f   :  { %v5820_v33 = vmul.f32 0.5, %v5819_v14  ;;  %v5769_v18 = vmul.f32 %v12415_v17, %v5768_v3  ;;  %5528 = vadd.xlane.f32.xlu2 %v5527_v37  ;;  %v5630_v54 = vmul.f32 %v5550_v44, %v7947_v0  ;;  %v6092_v14 = vadd.f32 %v12405_v35, %v6057_v6  ;;  %vm5755_vm14 = vmor %vm5753_vm0, %vm5754_vm4 }
0x1030   :  { %v5782_v3 = vmul.f32 %v12332_v23, %v5781_v10  ;;  %v5806_v25 = vsel %vm12451_vm10, %v12353_v53, %v5802_v57 }
0x1031   :  { %v7675_v16 = vpop.eup %7674  ;;  %v5821_v26 = vsub.f32 1.5, %v5820_v33  ;;  %v5770_v61 = vmul.f32 0.5, %v5769_v18  ;;  %v12436_v50 = vadd.f32 1e-05, %v5630_v54  ;;  %v6116_v52 = vpack.c.bf16 %v6092_v14, %v6091_v42 }
0x1032   :  { %v5788_v37 = vmul.f32 %v7675_v16, %v12400_v63  ;;  %v5786_v29 = vsel %vm12462_vm8, %v12332_v23, %v5782_v3  ;;  %vm5794_vm15 = vweird.f32 %v7675_v16  ;;  %v6018_v57 = vmul.f32 %v5806_v25, %v12079_v47 }
0x1033   :  { %v5822_v44 = vmul.f32 %v7671_v4, %v5821_v26  ;;  %v5771_v19 = vsub.f32 1.5, %v5770_v61  ;;  %7678 = vrsqrt.f32 %v12436_v50  ;;  %v5751_v26 = vsub.f32 1.5, %v5750_v62  ;;  %6125 = vmatpush.bf16.msra.mxu3 %v6116_v52  ;;  %vm5795_vm11 = vmor %vm5793_vm6, %vm5794_vm15 }
0x1034   :  { %v12444_v9 = vpop.eup %7676  ;;  %v5789_v46 = vmul.f32 %v7675_v16, %v5788_v37  ;;  %vm5763_vm1 = vweird.f32 %v12436_v50 }
0x1035   :  { %v5826_v61 = vsel %vm5825_vm12, %v7671_v4, %v5822_v44  ;;  %v5772_v10 = vmul.f32 %v12415_v17, %v5771_v19  ;;  %v5738_v18 = vmul.f32 %v12444_v9, %v12418_v1  ;;  %v5752_v37 = vmul.f32 %v12395_v45, %v5751_v26 }
0x1036   :  { %v6020_v54 = vmul.f32 %v5826_v61, %v12096_v59  ;;  %v5790_v4 = vmul.f32 0.5, %v5789_v46  ;;  %5579 = vadd.xlane.f32.xlu0 %v5578_v41  ;;  %v5541_v6 = vpop.xlane.xlu1 %5540  ;;  %v6016_v46 = vmul.f32 %v5786_v29, %v12072_v39  ;;  %v6053_v26 = vmul.f32 %v12374_v34, %v6018_v57 }
0x1037   :  { %v5739_v59 = vmul.f32 %v12444_v9, %v5738_v18  ;;  %5585 = vadd.xlane.f32.xlu2 %v5584_v2  ;;  %v5627_v53 = vmul.f32 %v5541_v6, %v7947_v0  ;;  %v5776_v51 = vsel %vm12477_vm9, %v12415_v17, %v5772_v10  ;;  %v5756_v61 = vsel %vm5755_vm14, %v12395_v45, %v5752_v37 }
0x1038   :  { %v5791_v41 = vsub.f32 1.5, %v5790_v4  ;;  %v6055_v23 = vmul.f32 %v12374_v34, %v6020_v54  ;;  %v6015_v17 = vmul.f32 %v5776_v51, %v12102_v38  ;;  %v6013_v20 = vmul.f32 %v5756_v61, %v12093_v32 }
0x1039   :  { %v7679_v62 = vpop.eup %7678  ;;  %v5659_v14 = vadd.f32 1e-05, %v5627_v53  ;;  %v5740_v2 = vmul.f32 0.5, %v5739_v59  ;;  %v6088_v45 = vadd.f32 %v12405_v35, %v6053_v26  ;;  %vm5744_vm5 = vweird.f32 %v12444_v9 }
0x103a   :  { %v5792_v3 = vmul.f32 %v7675_v16, %v5791_v41  ;;  %v5758_v44 = vmul.f32 %v7679_v62, %v12436_v50  ;;  %v6090_v19 = vadd.f32 %v12405_v35, %v6055_v23  ;;  %v6050_v39 = vmul.f32 %v12374_v34, %v6015_v17 }
0x103b   :  { %7680 = vrsqrt.f32 %v5659_v14  ;;  %v5741_v24 = vsub.f32 1.5, %v5740_v2  ;;  %vm5764_vm7 = vweird.f32 %v7679_v62  ;;  %vm5743_vm12 = vweird.f32 %v12418_v1 }
0x103c   :  { %v5796_v47 = vsel %vm5795_vm11, %v7675_v16, %v5792_v3  ;;  %v5759_v52 = vmul.f32 %v7679_v62, %v5758_v44  ;;  %v6115_v33 = vpack.c.bf16 %v6090_v19, %v12426_v48  ;;  %v6051_v48 = vmul.f32 %v12374_v34, %v6016_v46  ;;  %vm5765_vm13 = vmor %vm5763_vm1, %vm5764_vm7 }
0x103d   :  { %v6017_v63 = vmul.f32 %v5796_v47, %v12114_v36  ;;  %v5742_v25 = vmul.f32 %v12444_v9, %v5741_v24  ;;  %v6085_v29 = vadd.f32 %v12405_v35, %v6050_v39  ;;  %vm5745_vm3 = vmor %vm5743_vm12, %vm5744_vm5  ;;  %v6048_v53 = vmul.f32 %v12374_v34, %v6013_v20 }
0x103e   :  { %v5760_v10 = vmul.f32 0.5, %v5759_v52  ;;  %6126 = vmatpush.bf16.msra.mxu3 %v6115_v33  ;;  %v6086_v59 = vadd.f32 %v12405_v35, %v6051_v48  ;;  %vm5733_vm8 = vweird.f32 %v5659_v14 }
0x103f   :  { %v6052_v38 = vmul.f32 %v12374_v34, %v6017_v63  ;;  %v5746_v51 = vsel %vm5745_vm3, %v12444_v9, %v5742_v25 }
0x1040   :  { %v5761_v16 = vsub.f32 1.5, %v5760_v10  ;;  %v6113_v23 = vpack.c.bf16 %v6086_v59, %v6085_v29  ;;  %v6012_v1 = vmul.f32 %v5746_v51, %v12119_v30 }
0x1041   :  { %v7681_v18 = vpop.eup %7680  ;;  %v6087_v36 = vadd.f32 %v12405_v35, %v6052_v38 }
0x1042   :  { %v5762_v54 = vmul.f32 %v7679_v62, %v5761_v16  ;;  %v5728_v4 = vmul.f32 %v7681_v18, %v5659_v14  ;;  %vm5734_vm10 = vweird.f32 %v7681_v18  ;;  %v6047_v19 = vmul.f32 %v12374_v34, %v6012_v1 }
0x1043   :  { %v6114_v6 = vpack.c.bf16 %v6088_v45, %v6087_v36  ;;  %vm5735_vm2 = vmor %vm5733_vm8, %vm5734_vm10 }
0x1044   :  { %v5766_v42 = vsel %vm5765_vm13, %v7679_v62, %v5762_v54  ;;  %v5729_v32 = vmul.f32 %v7681_v18, %v5728_v4  ;;  %v6083_v62 = vadd.f32 %v12405_v35, %v6048_v53  ;;  %v6082_v30 = vadd.f32 %v12405_v35, %v6047_v19 }
0x1045   :  { %v6014_v50 = vmul.f32 %v5766_v42, %v12129_v8  ;;  %6127 = vmatpush.bf16.msra.mxu3 %v6114_v6 }
0x1046   :  { %v5730_v41 = vmul.f32 0.5, %v5729_v32 }
0x1047   :  { %v6049_v57 = vmul.f32 %v12374_v34, %v6014_v50 }
0x1048   :  { %v5731_v37 = vsub.f32 1.5, %v5730_v41 }
0x1049   :  { %6128 = vmatpush.bf16.msra.mxu3 %v6113_v23  ;;  %v6084_v8 = vadd.f32 %v12405_v35, %v6049_v57  ;;  %v5595_v52 = vpop.xlane.xlu2 %5594 }
0x104a   :  { %v5732_v3 = vmul.f32 %v7681_v18, %v5731_v37 }
0x104b   :  { %v6112_v2 = vpack.c.bf16 %v6084_v8, %v6083_v62 }
0x104c   :  { %v5736_v44 = vsel %vm5735_vm2, %v7681_v18, %v5732_v3 }
0x104d   :  { %v6011_v9 = vmul.f32 %v5736_v44, %v12138_v15  ;;  %6129 = vmatpush.bf16.msra.mxu3 %v6112_v2  ;;  %v5645_v15 = vmul.f32 %v5595_v52, %v7947_v0 }
0x104f   :  { %v6046_v17 = vmul.f32 %v12374_v34, %v6011_v9  ;;  %v12532_v48 = vadd.f32 1e-05, %v5645_v15 }
0x1051   :  { %v6081_v46 = vadd.f32 %v12405_v35, %v6046_v17  ;;  %v5598_v33 = vpop.xlane.xlu1 %5597  ;;  %vm5913_vm14 = vweird.f32 %v12532_v48 }
0x1052   :  { %v5646_v10 = vmul.f32 %v5598_v33, %v7947_v0 }
0x1053   :  { %v6111_v47 = vpack.c.bf16 %v6082_v30, %v6081_v46 }
0x1054   :  { %v12534_v18 = vadd.f32 1e-05, %v5646_v10 }
0x1055   :  { %6130 = vmatpush.bf16.msra.mxu3 %v6111_v47 }
0x1056   :  { %vm5923_vm7 = vweird.f32 %v12534_v18 }
0x1059   :  { %v5601_v63 = vpop.xlane.xlu0 %5600 }
0x105a   :  { %v5647_v26 = vmul.f32 %v5601_v63, %v7947_v0 }
0x105c   :  { %v5679_v38 = vadd.f32 1e-05, %v5647_v26 }
0x105e   :  { %7682 = vrsqrt.f32 %v5679_v38  ;;  %vm5933_vm15 = vweird.f32 %v5679_v38 }
0x1061   :  { %v5604_v14 = vpop.xlane.xlu2 %5603 }
0x1062   :  { %v5648_v61 = vmul.f32 %v5604_v14, %v7947_v0 }
0x1064   :  { %v12529_v39 = vadd.f32 1e-05, %v5648_v61  ;;  %v12542_v25 = vpop.eup %7682 }
0x1065   :  { %v5928_v42 = vmul.f32 %v12542_v25, %v5679_v38  ;;  %vm5934_vm4 = vweird.f32 %v12542_v25 }
0x1066   :  { %7684 = vrsqrt.f32 %v12529_v39  ;;  %vm12593_vm0 = vmor %vm5933_vm15, %vm5934_vm4  ;;  %vm5943_vm11 = vweird.f32 %v12529_v39 }
0x1067   :  { %7686 = vrsqrt.f32 %v12532_v48  ;;  %v5929_v23 = vmul.f32 %v12542_v25, %v5928_v42 }
0x1068   :  { %7688 = vrsqrt.f32 %v12534_v18 }
0x1069   :  { %v5607_v24 = vpop.xlane.xlu1 %5606  ;;  %v5930_v3 = vmul.f32 0.5, %v5929_v23 }
0x106a   :  { %v5649_v16 = vmul.f32 %v5607_v24, %v7947_v0 }
0x106b   :  { %v5931_v47 = vsub.f32 1.5, %v5930_v3 }
0x106c   :  { %v12537_v20 = vadd.f32 1e-05, %v5649_v16  ;;  %v12545_v54 = vpop.eup %7684 }
0x106d   :  { %v12547_v4 = vpop.eup %7686  ;;  %v5938_v32 = vmul.f32 %v12545_v54, %v12529_v39  ;;  %v5932_v24 = vmul.f32 %v12542_v25, %v5931_v47  ;;  %vm5944_vm9 = vweird.f32 %v12545_v54 }
0x106e   :  { %7690 = vrsqrt.f32 %v12537_v20  ;;  %v12551_v29 = vpop.eup %7688  ;;  %v5908_v53 = vmul.f32 %v12547_v4, %v12532_v48  ;;  %vm5914_vm6 = vweird.f32 %v12547_v4  ;;  %vm12605_vm5 = vmor %vm5943_vm11, %vm5944_vm9  ;;  %vm5953_vm10 = vweird.f32 %v12537_v20 }
0x106f   :  { %v5918_v41 = vmul.f32 %v12551_v29, %v12534_v18  ;;  %v5939_v57 = vmul.f32 %v12545_v54, %v5938_v32  ;;  %vm5924_vm1 = vweird.f32 %v12551_v29  ;;  %v5936_v39 = vsel %vm12593_vm0, %v12542_v25, %v5932_v24  ;;  %vm5915_vm13 = vmor %vm5913_vm14, %vm5914_vm6 }
0x1070   :  { %v5909_v62 = vmul.f32 %v12547_v4, %v5908_v53  ;;  %vm5925_vm3 = vmor %vm5923_vm7, %vm5924_vm1 }
0x1071   :  { %v5610_v36 = vpop.xlane.xlu0 %5609  ;;  %v5919_v8 = vmul.f32 %v12551_v29, %v5918_v41  ;;  %v5940_v2 = vmul.f32 0.5, %v5939_v57 }
0x1072   :  { %v5650_v45 = vmul.f32 %v5610_v36, %v7947_v0  ;;  %v5910_v17 = vmul.f32 0.5, %v5909_v62 }
0x1073   :  { %v5920_v30 = vmul.f32 0.5, %v5919_v8  ;;  %v5941_v52 = vsub.f32 1.5, %v5940_v2  ;;  %v6031_v2 = vmul.f32 %v5936_v39, %v12170_v40 }
0x1074   :  { %v12549_v6 = vadd.f32 1e-05, %v5650_v45  ;;  %v12556_v59 = vpop.eup %7690  ;;  %v5911_v61 = vsub.f32 1.5, %v5910_v17 }
0x1075   :  { %v5948_v1 = vmul.f32 %v12556_v59, %v12537_v20  ;;  %v5921_v15 = vsub.f32 1.5, %v5920_v30  ;;  %v5942_v10 = vmul.f32 %v12545_v54, %v5941_v52  ;;  %vm5954_vm12 = vweird.f32 %v12556_v59 }
0x1076   :  { %7692 = vrsqrt.f32 %v12549_v6  ;;  %vm12631_vm8 = vmor %vm5953_vm10, %vm5954_vm12  ;;  %vm5963_vm4 = vweird.f32 %v12549_v6 }
0x1077   :  { %v5949_v9 = vmul.f32 %v12556_v59, %v5948_v1  ;;  %v5922_v38 = vmul.f32 %v12551_v29, %v5921_v15  ;;  %v5946_v48 = vsel %vm12605_vm5, %v12545_v54, %v5942_v10 }
0x1079   :  { %v5613_v50 = vpop.xlane.xlu2 %5612  ;;  %v5950_v14 = vmul.f32 0.5, %v5949_v9  ;;  %v5926_v54 = vsel %vm5925_vm3, %v12551_v29, %v5922_v38  ;;  %v6032_v9 = vmul.f32 %v5946_v48, %v12177_v13 }
0x107a   :  { %v5651_v51 = vmul.f32 %v5613_v50, %v7947_v0  ;;  %v5912_v50 = vmul.f32 %v12547_v4, %v5911_v61  ;;  %v6030_v13 = vmul.f32 %v5926_v54, %v12163_v60 }
0x107b   :  { %v5951_v36 = vsub.f32 1.5, %v5950_v14  ;;  %v6067_v61 = vmul.f32 %v12374_v34, %v6032_v9 }
0x107c   :  { %v12566_v37 = vadd.f32 1e-05, %v5651_v51  ;;  %v12573_v44 = vpop.eup %7692  ;;  %v5916_v3 = vsel %vm5915_vm13, %v12547_v4, %v5912_v50 }
0x107d   :  { %v5958_v33 = vmul.f32 %v12573_v44, %v12549_v6  ;;  %v5952_v1 = vmul.f32 %v12556_v59, %v5951_v36  ;;  %v6029_v4 = vmul.f32 %v5916_v3, %v12154_v21  ;;  %vm5964_vm2 = vweird.f32 %v12573_v44 }
0x107e   :  { %7694 = vrsqrt.f32 %v12566_v37  ;;  %vm12667_vm9 = vmor %vm5963_vm4, %vm5964_vm2  ;;  %vm5973_vm6 = vweird.f32 %v12566_v37 }
0x107f   :  { %v5959_v16 = vmul.f32 %v12573_v44, %v5958_v33 }
0x1081   :  { %v5616_v19 = vpop.xlane.xlu1 %5615  ;;  %v5960_v57 = vmul.f32 0.5, %v5959_v16 }
0x1082   :  { %v5652_v46 = vmul.f32 %v5616_v19, %v7947_v0 }
0x1083   :  { %v5961_v17 = vsub.f32 1.5, %v5960_v57 }
0x1084   :  { %v12579_v63 = vadd.f32 1e-05, %v5652_v46  ;;  %v12581_v26 = vpop.eup %7694  ;;  %v5956_v46 = vsel %vm12631_vm8, %v12556_v59, %v5952_v1  ;;  %v6066_v59 = vmul.f32 %v12374_v34, %v6031_v2 }
0x1085   :  { %v5968_v45 = vmul.f32 %v12581_v26, %v12566_v37  ;;  %v6033_v24 = vmul.f32 %v5956_v46, %v12184_v7  ;;  %v5962_v60 = vmul.f32 %v12573_v44, %v5961_v17  ;;  %v6065_v7 = vmul.f32 %v12374_v34, %v6030_v13 }
0x1086   :  { %7696 = vrsqrt.f32 %v12579_v63  ;;  %vm5974_vm15 = vweird.f32 %v12581_v26  ;;  %v12684_v1 = vadd.f32 %v12405_v35, %v6066_v59  ;;  %vm5983_vm14 = vweird.f32 %v12579_v63 }
0x1087   :  { %v5969_v62 = vmul.f32 %v12581_v26, %v5968_v45  ;;  %v5966_v6 = vsel %vm12667_vm9, %v12573_v44, %v5962_v60  ;;  %v6068_v38 = vmul.f32 %v12374_v34, %v6033_v24  ;;  %v12688_v44 = vmul.f32 %v12374_v34, %v6029_v4  ;;  %vm12704_vm0 = vmor %vm5973_vm6, %vm5974_vm15 }
0x1088   :  { %v6034_v2 = vmul.f32 %v5966_v6, %v12191_v27 }
0x1089   :  { %v5619_v42 = vpop.xlane.xlu0 %5618  ;;  %v5589_v32 = vpop.xlane.xlu1 %5588  ;;  %v5970_v30 = vmul.f32 0.5, %v5969_v62  ;;  %v12712_v37 = vadd.f32 %v12405_v35, %v6068_v38 }
0x108a   :  { %v5653_v51 = vmul.f32 %v5619_v42, %v7947_v0  ;;  %v5643_v8 = vmul.f32 %v5589_v32, %v7947_v0 }
0x108b   :  { %v5971_v36 = vsub.f32 1.5, %v5970_v30 }
0x108c   :  { %v12609_v23 = vpop.eup %7696  ;;  %v12617_v18 = vadd.f32 1e-05, %v5653_v51  ;;  %v12639_v47 = vadd.f32 1e-05, %v5643_v8  ;;  %v12674_v51 = vadd.f32 %v12405_v35, %v6067_v61  ;;  %v12734_v61 = vmul.f32 %v12374_v34, %v6034_v2 }
0x108d   :  { %v5978_v25 = vmul.f32 %v12609_v23, %v12579_v63  ;;  %v5972_v41 = vmul.f32 %v12581_v26, %v5971_v36  ;;  %vm5984_vm11 = vweird.f32 %v12609_v23 }
0x108e   :  { %7698 = vrsqrt.f32 %v12617_v18  ;;  %v6121_v19 = vpack.c.bf16 %v12674_v51, %v12684_v1  ;;  %vm12743_vm1 = vmor %vm5983_vm14, %vm5984_vm11  ;;  %vm5993_vm5 = vweird.f32 %v12617_v18  ;;  %vm5893_vm6 = vweird.f32 %v12639_v47 }
0x108f   :  { %v5979_v20 = vmul.f32 %v12609_v23, %v5978_v25  ;;  %7700 = vrsqrt.f32 %v12639_v47  ;;  %v12691_v25 = vadd.f32 %v12405_v35, %v6065_v7 }
0x1091   :  { %v5535_v29 = vpop.xlane.xlu0 %5534  ;;  %v5532_v40 = vpop.xlane.xlu1 %5531  ;;  %v5980_v32 = vmul.f32 0.5, %v5979_v20 }
0x1092   :  { %v5625_v52 = vmul.f32 %v5535_v29, %v7947_v0  ;;  %v5622_v33 = vpop.xlane.xlu2 %5621  ;;  %v5624_v14 = vmul.f32 %v5532_v40, %v7947_v0  ;;  %v5976_v40 = vsel %vm12704_vm0, %v12581_v26, %v5972_v41 }
0x1093   :  { %v5654_v21 = vmul.f32 %v5622_v33, %v7947_v0  ;;  %v5981_v62 = vsub.f32 1.5, %v5980_v32 }
0x1094   :  { %v12649_v15 = vpop.eup %7698  ;;  %v12653_v10 = vadd.f32 1e-05, %v5625_v52  ;;  %v12655_v16 = vadd.f32 1e-05, %v5624_v14 }
0x1095   :  { %v5988_v45 = vmul.f32 %v12649_v15, %v12617_v18  ;;  %v12660_v42 = vadd.f32 1e-05, %v5654_v21  ;;  %v12693_v54 = vpop.eup %7700  ;;  %v5982_v33 = vmul.f32 %v12609_v23, %v5981_v62  ;;  %vm5994_vm7 = vweird.f32 %v12649_v15 }
0x1096   :  { %7702 = vrsqrt.f32 %v12653_v10  ;;  %v5888_v14 = vmul.f32 %v12693_v54, %v12639_v47  ;;  %vm12754_vm13 = vmor %vm5993_vm5, %vm5994_vm7  ;;  %vm5713_vm2 = vweird.f32 %v12653_v10  ;;  %vm5894_vm4 = vweird.f32 %v12693_v54 }
0x1097   :  { %v5989_v53 = vmul.f32 %v12649_v15, %v5988_v45  ;;  %7704 = vrsqrt.f32 %v12660_v42  ;;  %v6035_v45 = vmul.f32 %v5976_v40, %v12201_v11  ;;  %vm6003_vm3 = vweird.f32 %v12660_v42 }
0x1098   :  { %7706 = vrsqrt.f32 %v12655_v16  ;;  %v5889_v11 = vmul.f32 %v12693_v54, %v5888_v14  ;;  %vm5703_vm15 = vweird.f32 %v12655_v16  ;;  %v6104_v47 = vadd.f32 %v12405_v35, %v12734_v61 }
0x1099   :  { %v5990_v39 = vmul.f32 0.5, %v5989_v53  ;;  %v5592_v48 = vpop.xlane.xlu0 %5591  ;;  %v5577_v57 = vpop.xlane.xlu1 %5576  ;;  %v5986_v53 = vsel %vm12743_vm1, %v12609_v23, %v5982_v33 }
0x109a   :  { %v5644_v8 = vmul.f32 %v5592_v48, %v7947_v0  ;;  %v5538_v3 = vpop.xlane.xlu2 %5537  ;;  %v5639_v27 = vmul.f32 %v5577_v57, %v7947_v0 }
0x109b   :  { %v5626_v9 = vmul.f32 %v5538_v3, %v7947_v0  ;;  %v5991_v46 = vsub.f32 1.5, %v5990_v39  ;;  %v6036_v3 = vmul.f32 %v5986_v53, %v12212_v22 }
0x109c   :  { %v12700_v17 = vpop.eup %7702  ;;  %v12708_v30 = vadd.f32 1e-05, %v5644_v8  ;;  %v12738_v36 = vadd.f32 1e-05, %v5639_v27 }
0x109d   :  { %v7705_v29 = vpop.eup %7704  ;;  %v5708_v13 = vmul.f32 %v12700_v17, %v12653_v10  ;;  %v12720_v20 = vadd.f32 1e-05, %v5626_v9  ;;  %v5992_v24 = vmul.f32 %v12649_v15, %v5991_v46  ;;  %v12771_v9 = vmul.f32 %v12374_v34, %v6035_v45 }
0x109e   :  { %v12722_v52 = vpop.eup %7706  ;;  %v5998_v21 = vmul.f32 %v7705_v29, %v12660_v42  ;;  %7708 = vrsqrt.f32 %v12708_v30  ;;  %vm6004_vm12 = vweird.f32 %v7705_v29  ;;  %vm5714_vm10 = vweird.f32 %v12700_v17 }
0x109f   :  { %v5709_v26 = vmul.f32 %v12700_v17, %v5708_v13  ;;  %v5698_v59 = vmul.f32 %v12722_v52, %v12655_v16  ;;  %7710 = vrsqrt.f32 %v12720_v20  ;;  %v5996_v23 = vsel %vm12754_vm13, %v12649_v15, %v5992_v24  ;;  %vm6005_vm8 = vmor %vm6003_vm3, %vm6004_vm12 }
0x10a0   :  { %v5999_v60 = vmul.f32 %v7705_v29, %v5998_v21  ;;  %7712 = vrsqrt.f32 %v12738_v36  ;;  %v6037_v40 = vmul.f32 %v5996_v23, %v12235_v43  ;;  %v5890_v13 = vmul.f32 0.5, %v5889_v11  ;;  %vm12785_vm9 = vmor %vm5713_vm2, %vm5714_vm10 }
0x10a1   :  { %v5710_v32 = vmul.f32 0.5, %v5709_v26  ;;  %v5699_v7 = vmul.f32 %v12722_v52, %v5698_v59  ;;  %v5583_v50 = vpop.xlane.xlu0 %5582  ;;  %v6071_v24 = vmul.f32 %v12374_v34, %v6036_v3  ;;  %vm5704_vm0 = vweird.f32 %v12722_v52  ;;  %vm12845_vm13 = vmor %vm5893_vm6, %vm5894_vm4 }
0x10a2   :  { %v6000_v6 = vmul.f32 0.5, %v5999_v60  ;;  %v5529_v38 = vpop.xlane.xlu2 %5528  ;;  %v5641_v48 = vmul.f32 %v5583_v50, %v7947_v0  ;;  %vm5723_vm14 = vweird.f32 %v12720_v20  ;;  %vm12823_vm7 = vmor %vm5703_vm15, %vm5704_vm0  ;;  %vm5903_vm12 = vweird.f32 %v12708_v30 }
0x10a3   :  { %v5711_v39 = vsub.f32 1.5, %v5710_v32  ;;  %v5623_v57 = vmul.f32 %v5529_v38, %v7947_v0  ;;  %v5700_v8 = vmul.f32 0.5, %v5699_v7  ;;  %v5891_v32 = vsub.f32 1.5, %v5890_v13 }
0x10a4   :  { %v12760_v62 = vpop.eup %7708  ;;  %v6001_v18 = vsub.f32 1.5, %v6000_v6  ;;  %v12775_v15 = vadd.f32 1e-05, %v5641_v48  ;;  %vm5853_vm15 = vweird.f32 %v12738_v36 }
0x10a5   :  { %v5898_v2 = vmul.f32 %v12760_v62, %v12708_v30  ;;  %v5712_v4 = vmul.f32 %v12700_v17, %v5711_v39  ;;  %v7711_v27 = vpop.eup %7710  ;;  %v12780_v42 = vadd.f32 1e-05, %v5623_v57  ;;  %v5701_v14 = vsub.f32 1.5, %v5700_v8 }
0x10a6   :  { %v6002_v46 = vmul.f32 %v7705_v29, %v6001_v18  ;;  %v5718_v21 = vmul.f32 %v7711_v27, %v12720_v20  ;;  %v12792_v60 = vpop.eup %7712  ;;  %7714 = vrsqrt.f32 %v12775_v15  ;;  %vm5724_vm11 = vweird.f32 %v7711_v27 }
0x10a7   :  { %v5899_v22 = vmul.f32 %v12760_v62, %v5898_v2  ;;  %v5716_v10 = vsel %vm12785_vm9, %v12700_v17, %v5712_v4  ;;  %7716 = vrsqrt.f32 %v12780_v42  ;;  %v5702_v7 = vmul.f32 %v12722_v52, %v5701_v14  ;;  %vm5725_vm5 = vmor %vm5723_vm14, %vm5724_vm11 }
0x10a8   :  { %v6006_v33 = vsel %vm6005_vm8, %v7705_v29, %v6002_v46  ;;  %v5719_v45 = vmul.f32 %v7711_v27, %v5718_v21  ;;  %v6009_v17 = vmul.f32 %v5716_v10, %v12243_v55  ;;  %v5848_v6 = vmul.f32 %v12792_v60, %v12738_v36 }
0x10a9   :  { %v6038_v43 = vmul.f32 %v6006_v33, %v12279_v12  ;;  %v5580_v59 = vpop.xlane.xlu0 %5579  ;;  %v5900_v29 = vmul.f32 0.5, %v5899_v22  ;;  %v6072_v12 = vmul.f32 %v12374_v34, %v6037_v40  ;;  %v5892_v23 = vmul.f32 %v12693_v54, %v5891_v32 }
0x10aa   :  { %v5586_v63 = vpop.xlane.xlu2 %5585  ;;  %v5720_v50 = vmul.f32 0.5, %v5719_v45  ;;  %v5640_v53 = vmul.f32 %v5580_v59, %v7947_v0  ;;  %v6106_v55 = vadd.f32 %v12405_v35, %v6071_v24  ;;  %vm5904_vm1 = vweird.f32 %v12760_v62 }
0x10ab   :  { %v5642_v11 = vmul.f32 %v5586_v63, %v7947_v0  ;;  %v6073_v38 = vmul.f32 %v12374_v34, %v6038_v43  ;;  %v5901_v41 = vsub.f32 1.5, %v5900_v29  ;;  %v6107_v20 = vadd.f32 %v12405_v35, %v6072_v12  ;;  %vm12862_vm3 = vmor %vm5903_vm12, %vm5904_vm1 }
0x10ac   :  { %v5721_v39 = vsub.f32 1.5, %v5720_v50  ;;  %v12809_v48 = vadd.f32 1e-05, %v5640_v53  ;;  %v12817_v8 = vpop.eup %7714  ;;  %v5706_v46 = vsel %vm12823_vm7, %v12722_v52, %v5702_v7  ;;  %v5849_v16 = vmul.f32 %v12792_v60, %v5848_v6 }
0x10ad   :  { %v12811_v57 = vadd.f32 1e-05, %v5642_v11  ;;  %v6108_v18 = vadd.f32 %v12405_v35, %v6073_v38  ;;  %v7717_v4 = vpop.eup %7716  ;;  %v5868_v40 = vmul.f32 %v12817_v8, %v12775_v15  ;;  %v5902_v13 = vmul.f32 %v12760_v62, %v5901_v41 }
0x10ae   :  { %v5722_v2 = vmul.f32 %v7711_v27, %v5721_v39  ;;  %7718 = vrsqrt.f32 %v12809_v48  ;;  %v5688_v33 = vmul.f32 %v7717_v4, %v12780_v42  ;;  %v6044_v14 = vmul.f32 %v12374_v34, %v6009_v17 }
0x10af   :  { %7720 = vrsqrt.f32 %v12811_v57  ;;  %v5869_v26 = vmul.f32 %v12817_v8, %v5868_v40  ;;  %v6124_v43 = vpack.c.bf16 %v6108_v18, %v6107_v20  ;;  %v5896_v59 = vsel %vm12845_vm13, %v12693_v54, %v5892_v23 }
0x10b0   :  { %v5726_v22 = vsel %vm5725_vm5, %v7711_v27, %v5722_v2  ;;  %v6105_v27 = vadd.f32 %v12405_v35, %v12771_v9  ;;  %v5689_v24 = vmul.f32 %v7717_v4, %v5688_v33  ;;  %v6008_v10 = vmul.f32 %v5706_v46, %v12240_v49 }
0x10b1   :  { %v6010_v21 = vmul.f32 %v5726_v22, %v12289_v31  ;;  %v5870_v29 = vmul.f32 0.5, %v5869_v26  ;;  %6154 = vmatpush.bf16.msra.mxu1 %v6124_v43  ;;  %v5906_v30 = vsel %vm12862_vm3, %v12760_v62, %v5902_v13  ;;  %v5850_v61 = vmul.f32 0.5, %v5849_v16  ;;  %v14118_v26 = vld [vmem:[#allocation44_spill] sm:$0xff] }
0x10b2   :  { %v6123_v9 = vpack.c.bf16 %v6106_v55, %v6105_v27  ;;  %v5690_v63 = vmul.f32 0.5, %v5689_v24  ;;  %v6079_v49 = vadd.f32 %v12405_v35, %v6044_v14  ;;  %vm5874_vm10 = vweird.f32 %v12817_v8  ;;  %v14119_v27 = vld [vmem:[#allocation45_spill] sm:$0xff] }
0x10b3   :  { %v6045_v45 = vmul.f32 %v12374_v34, %v6010_v21  ;;  %v5871_v12 = vsub.f32 1.5, %v5870_v29  ;;  %vm5873_vm8 = vweird.f32 %v12775_v15  ;;  %vm5694_vm2 = vweird.f32 %v7717_v4  ;;  %v14120_v24 = vld [vmem:[#allocation41_spill] sm:$0xff] }
0x10b4   :  { %v12867_v54 = vpop.eup %7718  ;;  %v5691_v53 = vsub.f32 1.5, %v5690_v63  ;;  %vm5693_vm4 = vweird.f32 %v12780_v42  ;;  %v6028_v38 = vmul.f32 %v5906_v30, %v12299_v56  ;;  %v5851_v41 = vsub.f32 1.5, %v5850_v61  ;;  %vm12883_vm9 = vmor %vm5873_vm8, %vm5874_vm10  ;;  %v7219_v63 = vld [vmem:[%s10244_s29 + $0x50] sm:$0xff] }
0x10b5   :  { %v7721_v32 = vpop.eup %7720  ;;  %v5858_v7 = vmul.f32 %v12867_v54, %v12809_v48  ;;  %v6080_v50 = vadd.f32 %v12405_v35, %v6045_v45  ;;  %v5872_v62 = vmul.f32 %v12817_v8, %v5871_v12  ;;  %6155 = vmatpush.bf16.msra.mxu1 %v6123_v9  ;;  %v6027_v18 = vmul.f32 %v5896_v59, %v12222_v5  ;;  %vm5695_vm6 = vmor %vm5693_vm4, %vm5694_vm2  ;;  %v7218_v12 = vld [vmem:[%s10244_s29 + $0x48] sm:$0xff] }
0x10b6   :  { %v5878_v11 = vmul.f32 %v7721_v32, %v12811_v57  ;;  %v5692_v15 = vmul.f32 %v7717_v4, %v5691_v53  ;;  %v6122_v42 = vpack.c.bf16 %v6104_v47, %v12712_v37  ;;  %vm5854_vm0 = vweird.f32 %v12792_v60 }
0x10b7   :  { %v5859_v17 = vmul.f32 %v12867_v54, %v5858_v7  ;;  %v6110_v6 = vpack.c.bf16 %v6080_v50, %v6079_v49  ;;  %v5876_v56 = vsel %vm12883_vm9, %v12817_v8, %v5872_v62  ;;  %vm5864_vm11 = vweird.f32 %v12867_v54  ;;  %vm12901_vm7 = vmor %vm5853_vm15, %vm5854_vm0  ;;  %v7220_v49 = vld [vmem:[%s10244_s29 + $0x58] sm:$0xff] }
0x10b8   :  { %v5879_v23 = vmul.f32 %v7721_v32, %v5878_v11  ;;  %v5696_v3 = vsel %vm5695_vm6, %v7717_v4, %v5692_v15  ;;  %v6043_v5 = vmul.f32 %v12374_v34, %v6008_v10  ;;  %v5852_v16 = vmul.f32 %v12792_v60, %v5851_v41 }
0x10b9   :  { %v5860_v55 = vmul.f32 0.5, %v5859_v17  ;;  %6131 = vmatpush.bf16.msra.mxu3 %v6110_v6  ;;  %v6007_v20 = vmul.f32 %v5696_v3, %v12255_v58  ;;  %6156 = vmatpush.bf16.msra.mxu1 %v6122_v42  ;;  %vm5884_vm14 = vweird.f32 %v7721_v32  ;;  %v6063_v37 = vmul.f32 %v12374_v34, %v6028_v38 }
0x10ba   :  { %v5880_v2 = vmul.f32 0.5, %v5879_v23  ;;  %v6025_v58 = vmul.f32 %v5876_v56, %v12343_v28  ;;  %vm5863_vm1 = vweird.f32 %v12809_v48  ;;  %vm5883_vm13 = vweird.f32 %v12811_v57 }
0x10bb   :  { %v5861_v46 = vsub.f32 1.5, %v5860_v55  ;;  %v6042_v13 = vmul.f32 %v12374_v34, %v6007_v20  ;;  %vm5865_vm5 = vmor %vm5863_vm1, %vm5864_vm11  ;;  %v6099_v36 = vadd.f32 %v12405_v35, %v12688_v44  ;;  %v6078_v48 = vadd.f32 %v12405_v35, %v6043_v5 }
0x10bc   :  { %v5881_v40 = vsub.f32 1.5, %v5880_v2  ;;  %vm5885_vm12 = vmor %vm5883_vm13, %vm5884_vm14  ;;  %v6062_v14 = vmul.f32 %v12374_v34, %v6027_v18  ;;  %v5856_v57 = vsel %vm12901_vm7, %v12792_v60, %v5852_v16  ;;  %v6098_v21 = vadd.f32 %v12405_v35, %v6063_v37 }
0x10bd   :  { %v5862_v4 = vmul.f32 %v12867_v54, %v5861_v46  ;;  %6157 = vmatpush.bf16.msra.mxu1 %v6121_v19  ;;  %v6077_v28 = vadd.f32 %v12405_v35, %v6042_v13  ;;  %v6120_v44 = vpack.c.bf16 %v12691_v25, %v6099_v36  ;;  %v7744_v19 = vld [vmem:[%s10423_s6 + $0x1] ss:$0 sm:$0xff]  ;;  %v6023_v47 = vmul.f32 %v5856_v57, %v14120_v24  ;;  %v7228_v36 = vld [vmem:[%s11401_s20 + $0x30] sm:$0xff]  ;;  %s7788_s6 = smov 40  }
0x10be   :  { %v5882_v22 = vmul.f32 %v7721_v32, %v5881_v40  ;;  %v6060_v59 = vmul.f32 %v7744_v19, %v6025_v58  ;;  %v6097_v34 = vadd.f32 %v12405_v35, %v6062_v14  ;;  %vm14121_vm3 = vcmask 261120   ;;  %v7227_v14 = vld [vmem:[%s11401_s20 + $0x28] sm:$0xff] }
0x10bf   :  { %v5866_v33 = vsel %vm5865_vm5, %v12867_v54, %v5862_v4  ;;  %v6109_v1 = vpack.c.bf16 %v6078_v48, %v6077_v28  ;;  %v6058_v45 = vmul.f32 %v7744_v19, %v6023_v47  ;;  %vm14122_vm10 = vmmov %vm14121_vm3  ;;  %v7226_v28 = vld [vmem:[%s11401_s20 + $0x20] sm:$0xff] }
0x10c0   :  { %v5886_v52 = vsel %vm5885_vm12, %v7721_v32, %v5882_v22  ;;  %v6024_v43 = vmul.f32 %v5866_v33, %v14118_v26  ;;  %v6119_v60 = vpack.c.bf16 %v6098_v21, %v6097_v34  ;;  %v6095_v31 = vadd.f32 %v12405_v35, %v6060_v59  ;;  %vm14123_vm8 = vmmov %vm14121_vm3  ;;  %v7229_v33 = vld [vmem:[%s11401_s20 + $0x38] sm:$0xff]  ;;  %v7488_v26 = vld [vmem:[%s11388_s17 + $0x1] ss:$0 sm:$0xff]  ;;  %s6871_s20 = sld [smem:[%s13104_s0 + %s7788_s6]]  }
0x10c1   :  { %v6026_v51 = vmul.f32 %v5886_v52, %v14119_v27  ;;  %6132 = vmatpush.bf16.msra.mxu3 %v6109_v1  ;;  %6158 = vmatpush.bf16.msra.mxu1 %v6120_v44  ;;  %v6093_v30 = vadd.f32 %v12405_v35, %v6058_v45  ;;  %v6217_v32 = vpack.c.bf16 %v7220_v49, %v7219_v63  ;;  %vm14124_vm2 = vmmov %vm14121_vm3  ;;  %v6281_v52 = vpop.f32.mrf.mxu0 }
0x10c2   :  { %v6059_v29 = vmul.f32 %v7744_v19, %v6024_v43  ;;  %v6322_v48 = vpack.c.bf16 %v7229_v33, %v7228_v36  ;;  %v6321_v57 = vpack.c.bf16 %v7227_v14, %v7226_v28  ;;  %vm14125_vm4 = vmmov %vm14124_vm2 }
0x10c3   :  { %v6061_v10 = vmul.f32 %v7744_v19, %v6026_v51  ;;  %6236 = vmatpush.bf16.msra.mxu2 %v6217_v32  ;;  %vm14126_vm9 = vmmov %vm14124_vm2 }
0x10c4   :  { %7340 = vmatmul.lmr.bf16.vlgmr.msra.gmra.8.mxu3  ;;  %v6094_v54 = vadd.f32 %v12405_v35, %v6059_v29  ;;  %vm14127_vm15 = vmmov %vm14124_vm2 }
0x10c5   :  { %v6096_v25 = vadd.f32 %v12405_v35, %v6061_v10  ;;  %6159 = vmatpush.bf16.msra.mxu1 %v6119_v60  ;;  %v7217_v35 = vld [vmem:[%s10244_s29 + $0x40] sm:$0xff]  ;;  %6344 = vmatpush.bf16.msra.mxu3 %v6322_v48  ;;  %vm14128_vm6 = vmmov %vm14124_vm2  ;;  %s13041_s29 = sld [smem:[%s13104_s0 + %s7787_s12]]  }
0x10c6   :  { %v6117_v61 = vpack.c.bf16 %v6094_v54, %v6093_v30  ;;  %v6216_v7 = vpack.c.bf16 %v7218_v12, %v7217_v35  ;;  %vm14129_vm0 = vmmov %vm14124_vm2 }
0x10c7   :  { %v6118_v9 = vpack.c.bf16 %v6096_v25, %v6095_v31  ;;  %vm14130_vm11 = vmmov %vm14129_vm0 }
0x10c8   :  { %6237 = vmatpush.bf16.msra.mxu2 %v6216_v7  ;;  %vm14131_vm14 = vmmov %vm14129_vm0 }
0x10c9   :  { %6160 = vmatpush.bf16.msra.mxu1 %v6118_v9  ;;  %6345 = vmatpush.bf16.msra.mxu3 %v6321_v57  ;;  %v6283_v44 = vpop.f32.mrf.mxu0  ;;  %vm14132_vm7 = vmmov %vm14129_vm0 }
0x10ca   :  { %vm14133_vm1 = vmmov %vm14129_vm0 }
0x10cb   :  { %vm14134_vm5 = vmmov %vm14129_vm0 }
0x10cc   :  { %7341 = vmatmul.lmr.bf16.gmra.8.mxu3  ;;  %vm14135_vm13 = vmmov %vm14129_vm0 }
0x10cd   :  { %6161 = vmatpush.bf16.msra.mxu1 %v6117_v61  ;;  %vm14136_vm12 = vmmov %vm14129_vm0 }
0x10d0   :  { %7280 = vmatmul.lmr.bf16.vlgmr.msra.gmra.8.mxu1 }
0x10d1   :  { %v6286_v27 = vpop.f32.mrf.mxu0 }
0x10d4   :  { %7342 = vmatmul.lmr.bf16.gmra.8.mxu3 }
0x10d8   :  { %7281 = vmatmul.lmr.bf16.gmra.8.mxu1 }
0x10d9   :  { %v6288_v60 = vpop.f32.mrf.mxu0 }
0x10dc   :  { %7343 = vmatmul.lmr.bf16.gmra.8.mxu3 }
0x10e0   :  { %7282 = vmatmul.lmr.bf16.gmra.8.mxu1 }
0x10e1   :  { %v6291_v54 = vpop.f32.mrf.mxu0 }
0x10e4   :  { %7344 = vmatmul.lmr.bf16.gmra.8.mxu3 }
0x10e8   :  { %7283 = vmatmul.lmr.bf16.gmra.8.mxu1 }
0x10e9   :  { %v6293_v35 = vpop.f32.mrf.mxu0 }
0x10ec   :  { %7345 = vmatmul.lmr.bf16.gmra.8.mxu3 }
0x10f0   :  { %7284 = vmatmul.lmr.bf16.gmra.8.mxu1 }
0x10f4   :  { %7346 = vmatmul.lmr.bf16.gmra.8.mxu3 }
0x10f8   :  { %7285 = vmatmul.lmr.bf16.gmra.8.mxu1 }
0x10fc   :  { %7347 = vmatmul.lmr.bf16.gmra.8.mxu3 }
0x1100   :  { %7286 = vmatmul.lmr.bf16.gmra.8.mxu1 }
0x1108   :  { %7287 = vmatmul.lmr.bf16.gmra.8.mxu1 }
0x1147   :  { %v6134_v50 = vpop.f32.mrf.mxu3 }
0x114d   :  { %v6163_v53 = vpop.f32.mrf.mxu1 }
0x114e   :  { %v6164_v17 = vadd.f32 %v6163_v53, %v6134_v50 }
0x114f   :  { %v6136_v11 = vpop.f32.mrf.mxu3 }
0x1155   :  { %v6165_v62 = vpop.f32.mrf.mxu1 }
0x1156   :  { %v6166_v6 = vadd.f32 %v6165_v62, %v6136_v11 }
0x1157   :  { %v6139_v38 = vpop.f32.mrf.mxu3 }
0x1158   :  { %v6212_v41 = vpack.c.bf16 %v6166_v6, %v6164_v17  ;;  %v6296_v6 = vpop.f32.mrf.mxu0 }
0x115a   :  { %7238 = vmatmul.msk.bf16.vlgmr.msra.gmra.mxu2 %vm14121_vm3, %v6212_v41  ;;  %vm14137_vm3 = vmmov %vm14129_vm0 }
0x115d   :  { %v6168_v39 = vpop.f32.mrf.mxu1 }
0x115e   :  { %v6169_v23 = vadd.f32 %v6168_v39, %v6139_v38 }
0x115f   :  { %v6141_v15 = vpop.f32.mrf.mxu3 }
0x1165   :  { %v6170_v18 = vpop.f32.mrf.mxu1 }
0x1166   :  { %v6171_v55 = vadd.f32 %v6170_v18, %v6141_v15  ;;  %v6298_v18 = vpop.f32.mrf.mxu0 }
0x1167   :  { %v6144_v42 = vpop.f32.mrf.mxu3 }
0x1168   :  { %v6213_v56 = vpack.c.bf16 %v6171_v55, %v6169_v23 }
0x116a   :  { %7239 = vmatmul.msk.bf16.gmra.mxu2 %vm14122_vm10, %v6213_v56  ;;  %vm14138_vm10 = vmmov %vm14129_vm0 }
0x116d   :  { %v6173_v3 = vpop.f32.mrf.mxu1 }
0x116e   :  { %v6174_v20 = vadd.f32 %v6173_v3, %v6144_v42 }
0x116f   :  { %v6146_v2 = vpop.f32.mrf.mxu3 }
0x1175   :  { %v6175_v46 = vpop.f32.mrf.mxu1 }
0x1176   :  { %v6176_v5 = vadd.f32 %v6175_v46, %v6146_v2  ;;  %v7233_v2 = vld [vmem:[%s11426_s2 + $0x30] sm:$0xff]  ;;  %v7231_v46 = vld [vmem:[%s11426_s2 + $0x20] sm:$0xff] }
0x1177   :  { %v6149_v40 = vpop.f32.mrf.mxu3 }
0x1178   :  { %v6214_v16 = vpack.c.bf16 %v6176_v5, %v6174_v20  ;;  %v7234_v20 = vld [vmem:[%s11426_s2 + $0x38] sm:$0xff] }
0x1179   :  { %v6380_v5 = vpack.c.bf16 %v7234_v20, %v7233_v2 }
0x117a   :  { %7240 = vmatmul.msk.bf16.gmra.mxu2 %vm14123_vm8, %v6214_v16  ;;  %v7232_v16 = vld [vmem:[%s11426_s2 + $0x28] sm:$0xff]  ;;  %vm14139_vm8 = vmmov %vm14129_vm0 }
0x117b   :  { %6402 = vmatpush.bf16.msra.mxu1 %v6380_v5 }
0x117d   :  { %v6178_v37 = vpop.f32.mrf.mxu1 }
0x117e   :  { %v6179_v58 = vadd.f32 %v6178_v37, %v6149_v40  ;;  %v6379_v40 = vpack.c.bf16 %v7232_v16, %v7231_v46 }
0x117f   :  { %v6151_v8 = vpop.f32.mrf.mxu3 }
0x1180   :  { %6403 = vmatpush.bf16.msra.mxu1 %v6379_v40 }
0x1185   :  { %v6180_v4 = vpop.f32.mrf.mxu1 }
0x1186   :  { %v6181_v13 = vadd.f32 %v6180_v4, %v6151_v8  ;;  %v7489_v8 = vld [vmem:[%s11412_s27 + $0x1] ss:$0 sm:$0xff] }
0x1188   :  { %v6215_v22 = vpack.c.bf16 %v6181_v13, %v6179_v58 }
0x118a   :  { %7241 = vmatmul.msk.bf16.gmra.mxu2 %vm14124_vm2, %v6215_v22  ;;  %vm14140_vm2 = vmmov %vm14129_vm0 }
0x11dd   :  { %v6239_v21 = vpop.f32.mrf.mxu2 }
0x11de   :  { %v6262_v43 = vadd.f32 %v7488_v26, %v6239_v21 }
0x11e0   :  { %v6301_v1 = vadd.f32 %v6281_v52, %v6262_v43 }
0x11e2   :  { %v6309_v24 = vmax.f32 %v6301_v1, 0.0 }
0x11e5   :  { %v6241_v51 = vpop.f32.mrf.mxu2 }
0x11e6   :  { %v6263_v19 = vadd.f32 %v7488_v26, %v6241_v51 }
0x11e8   :  { %v6302_v59 = vadd.f32 %v6283_v44, %v6263_v19 }
0x11ea   :  { %v6310_v47 = vmax.f32 %v6302_v59, 0.0 }
0x11ec   :  { %v6317_v34 = vpack.c.bf16 %v6310_v47, %v6309_v24 }
0x11ed   :  { %v6244_v10 = vpop.f32.mrf.mxu2 }
0x11ee   :  { %7246 = vmatmul.msk.bf16.vlgmr.msra.gmra.mxu3 %vm14125_vm4, %v6317_v34  ;;  %v6264_v31 = vadd.f32 %v7488_v26, %v6244_v10  ;;  %vm14141_vm4 = vmmov %vm14129_vm0 }
0x11f0   :  { %v6303_v29 = vadd.f32 %v6286_v27, %v6264_v31 }
0x11f2   :  { %v6311_v30 = vmax.f32 %v6303_v29, 0.0  ;;  %v7490_v29 = vld [vmem:[%s11444_s8 + $0x1] ss:$0 sm:$0xff] }
0x11f5   :  { %v6246_v25 = vpop.f32.mrf.mxu2 }
0x11f6   :  { %v6265_v9 = vadd.f32 %v7488_v26, %v6246_v25 }
0x11f8   :  { %v6304_v45 = vadd.f32 %v6288_v60, %v6265_v9 }
0x11fa   :  { %v6312_v61 = vmax.f32 %v6304_v45, 0.0 }
0x11fc   :  { %v6318_v63 = vpack.c.bf16 %v6312_v61, %v6311_v30 }
0x11fd   :  { %v6249_v49 = vpop.f32.mrf.mxu2 }
0x11fe   :  { %7247 = vmatmul.msk.bf16.gmra.mxu3 %vm14126_vm9, %v6318_v63  ;;  %v6266_v32 = vadd.f32 %v7488_v26, %v6249_v49  ;;  %vm14142_vm9 = vmmov %vm14129_vm0 }
0x1200   :  { %v6305_v7 = vadd.f32 %v6291_v54, %v6266_v32 }
0x1202   :  { %v6313_v11 = vmax.f32 %v6305_v7, 0.0 }
0x1205   :  { %v6251_v12 = vpop.f32.mrf.mxu2 }
0x1206   :  { %v6267_v50 = vadd.f32 %v7488_v26, %v6251_v12 }
0x1208   :  { %v6306_v53 = vadd.f32 %v6293_v35, %v6267_v50 }
0x120a   :  { %v6314_v62 = vmax.f32 %v6306_v53, 0.0 }
0x120c   :  { %v6319_v17 = vpack.c.bf16 %v6314_v62, %v6313_v11 }
0x120d   :  { %v6254_v38 = vpop.f32.mrf.mxu2 }
0x120e   :  { %7248 = vmatmul.msk.bf16.gmra.mxu3 %vm14127_vm15, %v6319_v17  ;;  %v6268_v41 = vadd.f32 %v7488_v26, %v6254_v38  ;;  %vm14143_vm15 = vmmov %vm14129_vm0 }
0x1210   :  { %v6307_v15 = vadd.f32 %v6296_v6, %v6268_v41 }
0x1212   :  { %v6315_v42 = vmax.f32 %v6307_v15, 0.0 }
0x1215   :  { %v6256_v39 = vpop.f32.mrf.mxu2 }
0x1216   :  { %v6269_v23 = vadd.f32 %v7488_v26, %v6256_v39 }
0x1218   :  { %v6308_v55 = vadd.f32 %v6298_v18, %v6269_v23 }
0x121a   :  { %v6316_v56 = vmax.f32 %v6308_v55, 0.0 }
0x121c   :  { %v6320_v3 = vpack.c.bf16 %v6316_v56, %v6315_v42 }
0x121e   :  { %7249 = vmatmul.msk.bf16.gmra.mxu3 %vm14128_vm6, %v6320_v3  ;;  %vm14144_vm6 = vmmov %vm14129_vm0 }
0x1271   :  { %v6347_v37 = vpop.f32.mrf.mxu3 }
0x1272   :  { %v6348_v58 = vadd.f32 %v7489_v8, %v6347_v37 }
0x1274   :  { %v6367_v22 = vmax.f32 %v6348_v58, 0.0 }
0x1279   :  { %v6349_v4 = vpop.f32.mrf.mxu3 }
0x127a   :  { %v6350_v13 = vadd.f32 %v7489_v8, %v6349_v4 }
0x127c   :  { %v6368_v36 = vmax.f32 %v6350_v13, 0.0 }
0x127e   :  { %v6375_v33 = vpack.c.bf16 %v6368_v36, %v6367_v22 }
0x1280   :  { %7250 = vmatmul.msk.bf16.vlgmr.msra.gmra.mxu1 %vm14129_vm0, %v6375_v33 }
0x1281   :  { %v6352_v28 = vpop.f32.mrf.mxu3 }
0x1282   :  { %v6353_v48 = vadd.f32 %v7489_v8, %v6352_v28 }
0x1284   :  { %v6369_v52 = vmax.f32 %v6353_v48, 0.0 }
0x1289   :  { %v6354_v14 = vpop.f32.mrf.mxu3 }
0x128a   :  { %v6355_v57 = vadd.f32 %v7489_v8, %v6354_v14 }
0x128c   :  { %v6370_v44 = vmax.f32 %v6355_v57, 0.0 }
0x128e   :  { %v6376_v21 = vpack.c.bf16 %v6370_v44, %v6369_v52 }
0x1290   :  { %7251 = vmatmul.msk.bf16.gmra.mxu1 %vm14130_vm11, %v6376_v21  ;;  %vm14145_vm11 = vmmov %vm14129_vm0 }
0x1291   :  { %v6357_v26 = vpop.f32.mrf.mxu3 }
0x1292   :  { %v6358_v43 = vadd.f32 %v7489_v8, %v6357_v26 }
0x1294   :  { %v6371_v1 = vmax.f32 %v6358_v43, 0.0 }
0x1299   :  { %v6359_v27 = vpop.f32.mrf.mxu3 }
0x129a   :  { %v6360_v51 = vadd.f32 %v7489_v8, %v6359_v27 }
0x129c   :  { %v6372_v19 = vmax.f32 %v6360_v51, 0.0 }
0x129e   :  { %v6377_v59 = vpack.c.bf16 %v6372_v19, %v6371_v1 }
0x12a0   :  { %7252 = vmatmul.msk.bf16.gmra.mxu1 %vm14131_vm14, %v6377_v59  ;;  %vm14146_vm14 = vmmov %vm14129_vm0 }
0x12a1   :  { %v6362_v24 = vpop.f32.mrf.mxu3 }
0x12a2   :  { %v6363_v47 = vadd.f32 %v7489_v8, %v6362_v24 }
0x12a4   :  { %v6373_v60 = vmax.f32 %v6363_v47, 0.0 }
0x12a9   :  { %v6364_v34 = vpop.f32.mrf.mxu3 }
0x12aa   :  { %v6365_v10 = vadd.f32 %v7489_v8, %v6364_v34 }
0x12ac   :  { %v6374_v31 = vmax.f32 %v6365_v10, 0.0 }
0x12ae   :  { %v6378_v25 = vpack.c.bf16 %v6374_v31, %v6373_v60 }
0x12b0   :  { %7253 = vmatmul.msk.bf16.gmra.mxu1 %vm14132_vm7, %v6378_v25  ;;  %vm14147_vm7 = vmmov %vm14129_vm0 }
0x12fd   :  { %v6405_v9 = vpop.f32.mrf.mxu1 }
0x12fe   :  { %v6406_v45 = vadd.f32 %v7490_v29, %v6405_v9 }
0x1300   :  { %v6425_v54 = vsel %vm14133_vm1, %v6406_v45, 0.0 }
0x1301   :  { %6426 = vadd.xlane.f32.xlu2 %v6425_v54 }
0x1305   :  { %v6407_v30 = vpop.f32.mrf.mxu1 }
0x1306   :  { %v6408_v61 = vadd.f32 %v7490_v29, %v6407_v30 }
0x1308   :  { %v6428_v63 = vsel %vm14134_vm5, %v6408_v61, 0.0 }
0x1309   :  { %6429 = vadd.xlane.f32.xlu1 %v6428_v63 }
0x130d   :  { %v6410_v49 = vpop.f32.mrf.mxu1 }
0x130e   :  { %v6411_v32 = vadd.f32 %v7490_v29, %v6410_v49  ;;  %v6633_v49 = vld [vmem:[%s6869_s14 + $0x10] sm:$0xff] }
0x1310   :  { %v6431_v35 = vsel %vm14135_vm13, %v6411_v32, 0.0 }
0x1311   :  { %6432 = vadd.xlane.f32.xlu0 %v6431_v35 }
0x1315   :  { %v6412_v12 = vpop.f32.mrf.mxu1 }
0x1316   :  { %v6413_v7 = vadd.f32 %v7490_v29, %v6412_v12 }
0x1318   :  { %v6434_v50 = vsel %vm14136_vm12, %v6413_v7, 0.0 }
0x1319   :  { %6435 = vadd.xlane.f32.xlu2 %v6434_v50 }
0x131d   :  { %v6415_v53 = vpop.f32.mrf.mxu1 }
0x131e   :  { %v6416_v11 = vadd.f32 %v7490_v29, %v6415_v53 }
0x1320   :  { %v6437_v62 = vsel %vm14137_vm3, %v6416_v11, 0.0 }
0x1321   :  { %6438 = vadd.xlane.f32.xlu1 %v6437_v62  ;;  %v6632_v62 = vld [vmem:[%s6869_s14 + $0x8] sm:$0xff] }
0x1325   :  { %v6417_v17 = vpop.f32.mrf.mxu1 }
0x1326   :  { %v6418_v6 = vadd.f32 %v7490_v29, %v6417_v17 }
0x1328   :  { %v6440_v38 = vsel %vm14138_vm10, %v6418_v6, 0.0 }
0x1329   :  { %6441 = vadd.xlane.f32.xlu0 %v6440_v38 }
0x132d   :  { %v6420_v41 = vpop.f32.mrf.mxu1 }
0x132e   :  { %v6421_v39 = vadd.f32 %v7490_v29, %v6420_v41 }
0x1330   :  { %v6443_v15 = vsel %vm14139_vm8, %v6421_v39, 0.0 }
0x1331   :  { %6444 = vadd.xlane.f32.xlu0 %v6443_v15 }
0x1335   :  { %v6422_v3 = vpop.f32.mrf.mxu1 }
0x1336   :  { %v6423_v46 = vadd.f32 %v7490_v29, %v6422_v3 }
0x1338   :  { %v6446_v37 = vsel %vm14142_vm9, %v6423_v46, 0.0  ;;  %vm14150_vm9 = vmmov %vm14129_vm0 }
0x1374   :  { %v6427_v23 = vpop.xlane.xlu2 %6426 }
0x1375   :  { %v6449_v18 = vmul.f32 %v6427_v23, %v7947_v0 }
0x1377   :  { %v12968_v55 = vsub.f32 %v6406_v45, %v6449_v18 }
0x1379   :  { %v6465_v42 = vmul.f32 %v12968_v55, %v12968_v55 }
0x137b   :  { %v6473_v56 = vsel %vm14140_vm2, %v6465_v42, 0.0 }
0x137c   :  { %v6430_v2 = vpop.xlane.xlu1 %6429  ;;  %6474 = vadd.xlane.f32.xlu2 %v6473_v56 }
0x137d   :  { %v6450_v20 = vmul.f32 %v6430_v2, %v7947_v0 }
0x137f   :  { %v12974_v5 = vsub.f32 %v6408_v61, %v6450_v20 }
0x1381   :  { %v6466_v16 = vmul.f32 %v12974_v5, %v12974_v5 }
0x1383   :  { %v6476_v40 = vsel %vm14141_vm4, %v6466_v16, 0.0 }
0x1384   :  { %v6433_v8 = vpop.xlane.xlu0 %6432  ;;  %6477 = vadd.xlane.f32.xlu1 %v6476_v40  ;;  %6447 = vadd.xlane.f32.xlu2 %v6446_v37 }
0x1385   :  { %v6451_v58 = vmul.f32 %v6433_v8, %v7947_v0 }
0x1387   :  { %v12981_v4 = vsub.f32 %v6411_v32, %v6451_v58  ;;  %v6634_v32 = vld [vmem:[%s6869_s14 + $0x18] sm:$0xff] }
0x1388   :  { %v6651_v12 = vpack.c.bf16 %v6634_v32, %v6633_v49 }
0x1389   :  { %v6467_v13 = vmul.f32 %v12981_v4, %v12981_v4 }
0x138a   :  { %6670 = vmatpush.bf16.msra.mxu2 %v6651_v12 }
0x138b   :  { %v6479_v22 = vsel %vm14143_vm15, %v6467_v13, 0.0 }
0x138c   :  { %v6436_v36 = vpop.xlane.xlu2 %6435  ;;  %6480 = vadd.xlane.f32.xlu1 %v6479_v22 }
0x138d   :  { %v6452_v33 = vmul.f32 %v6436_v36, %v7947_v0  ;;  %v13028_v36 = vld [vmem:[%s11503_s24 + $0x1] ss:$0 sm:$0xff] }
0x138f   :  { %v12987_v28 = vsub.f32 %v6413_v7, %v6452_v33 }
0x1391   :  { %v6468_v48 = vmul.f32 %v12987_v28, %v12987_v28 }
0x1393   :  { %v6482_v14 = vsel %vm14144_vm6, %v6468_v48, 0.0 }
0x1394   :  { %v6439_v57 = vpop.xlane.xlu1 %6438  ;;  %6483 = vadd.xlane.f32.xlu0 %v6482_v14 }
0x1395   :  { %v6453_v52 = vmul.f32 %v6439_v57, %v7947_v0 }
0x1397   :  { %v12993_v44 = vsub.f32 %v6416_v11, %v6453_v52  ;;  %v6631_v11 = vld [vmem:[%s6869_s14] sm:$0xff] }
0x1398   :  { %v6650_v38 = vpack.c.bf16 %v6632_v62, %v6631_v11 }
0x1399   :  { %v6469_v21 = vmul.f32 %v12993_v44, %v12993_v44 }
0x139a   :  { %6671 = vmatpush.bf16.msra.mxu2 %v6650_v38 }
0x139b   :  { %v6485_v26 = vsel %vm14129_vm0, %v6469_v21, 0.0 }
0x139c   :  { %v6442_v43 = vpop.xlane.xlu0 %6441  ;;  %6486 = vadd.xlane.f32.xlu2 %v6485_v26 }
0x139d   :  { %v6454_v27 = vmul.f32 %v6442_v43, %v7947_v0 }
0x139f   :  { %v12999_v51 = vsub.f32 %v6418_v6, %v6454_v27 }
0x13a1   :  { %v6470_v1 = vmul.f32 %v12999_v51, %v12999_v51 }
0x13a3   :  { %v6488_v19 = vsel %vm14145_vm11, %v6470_v1, 0.0 }
0x13a4   :  { %6489 = vadd.xlane.f32.xlu1 %v6488_v19  ;;  %v6445_v59 = vpop.xlane.xlu0 %6444 }
0x13a5   :  { %v6455_v24 = vmul.f32 %v6445_v59, %v7947_v0 }
0x13a7   :  { %v13005_v47 = vsub.f32 %v6421_v39, %v6455_v24 }
0x13a9   :  { %v6471_v34 = vmul.f32 %v13005_v47, %v13005_v47 }
0x13ab   :  { %v6491_v10 = vsel %vm14146_vm14, %v6471_v34, 0.0 }
0x13ac   :  { %6492 = vadd.xlane.f32.xlu0 %v6491_v10  ;;  %v14148_v10 = vld [vmem:[#allocation52_spill] sm:$0xff] }
0x13ef   :  { %v6475_v60 = vpop.xlane.xlu2 %6474 }
0x13f0   :  { %v6497_v31 = vmul.f32 %v6475_v60, %v7947_v0 }
0x13f2   :  { %v6505_v25 = vadd.f32 1e-05, %v6497_v31 }
0x13f4   :  { %7722 = vrsqrt.f32 %v6505_v25  ;;  %vm6519_vm5 = vweird.f32 %v6505_v25 }
0x13f7   :  { %v6478_v29 = vpop.xlane.xlu1 %6477  ;;  %v6448_v9 = vpop.xlane.xlu2 %6447 }
0x13f8   :  { %v6498_v45 = vmul.f32 %v6478_v29, %v7947_v0  ;;  %v6456_v54 = vmul.f32 %v6448_v9, %v7947_v0 }
0x13fa   :  { %v7723_v30 = vpop.eup %7722  ;;  %v6506_v61 = vadd.f32 1e-05, %v6498_v45  ;;  %v13016_v63 = vsub.f32 %v6423_v46, %v6456_v54  ;;  %v13023_v46 = vld [vmem:[%s11498_s1 + $0x1] ss:$0 sm:$0xff] }
0x13fb   :  { %v6514_v35 = vmul.f32 %v7723_v30, %v6505_v25  ;;  %vm6520_vm1 = vweird.f32 %v7723_v30 }
0x13fc   :  { %7724 = vrsqrt.f32 %v6506_v61  ;;  %v6472_v7 = vmul.f32 %v13016_v63, %v13016_v63  ;;  %vm6521_vm13 = vmor %vm6519_vm5, %vm6520_vm1  ;;  %vm6529_vm3 = vweird.f32 %v6506_v61 }
0x13fd   :  { %v6515_v50 = vmul.f32 %v7723_v30, %v6514_v35  ;;  %vm14153_vm1 = vmmov %vm14150_vm9 }
0x13fe   :  { %v6494_v53 = vsel %vm14147_vm7, %v6472_v7, 0.0 }
0x13ff   :  { %v6516_v17 = vmul.f32 0.5, %v6515_v50  ;;  %v6481_v6 = vpop.xlane.xlu1 %6480  ;;  %6495 = vadd.xlane.f32.xlu2 %v6494_v53 }
0x1400   :  { %v6499_v41 = vmul.f32 %v6481_v6, %v7947_v0 }
0x1401   :  { %v6517_v39 = vsub.f32 1.5, %v6516_v17 }
0x1402   :  { %v7725_v15 = vpop.eup %7724  ;;  %v6507_v23 = vadd.f32 1e-05, %v6499_v41 }
0x1403   :  { %v6518_v18 = vmul.f32 %v7723_v30, %v6517_v39  ;;  %v6524_v42 = vmul.f32 %v7725_v15, %v6506_v61  ;;  %vm6530_vm12 = vweird.f32 %v7725_v15 }
0x1404   :  { %7726 = vrsqrt.f32 %v6507_v23  ;;  %vm6531_vm10 = vmor %vm6529_vm3, %vm6530_vm12  ;;  %vm6539_vm2 = vweird.f32 %v6507_v23 }
0x1405   :  { %v6522_v56 = vsel %vm6521_vm13, %v7723_v30, %v6518_v18  ;;  %v6525_v3 = vmul.f32 %v7725_v15, %v6524_v42  ;;  %v14151_v18 = vld [vmem:[#allocation40_spill] sm:$0xff]  ;;  %vm14156_vm3 = vmmov %vm14153_vm1 }
0x1406   :  { %v6593_v16 = vmul.f32 %v6522_v56, %v12968_v55  ;;  %v14152_v56 = vld [vmem:[#allocation32_spill] sm:$0xff] }
0x1407   :  { %v6526_v2 = vmul.f32 0.5, %v6525_v3  ;;  %v6484_v20 = vpop.xlane.xlu0 %6483 }
0x1408   :  { %v6500_v40 = vmul.f32 %v6484_v20, %v7947_v0  ;;  %v6604_v33 = vmul.f32 %v13023_v46, %v6593_v16 }
0x1409   :  { %v6527_v37 = vsub.f32 1.5, %v6526_v2 }
0x140a   :  { %v7727_v8 = vpop.eup %7726  ;;  %v6508_v58 = vadd.f32 1e-05, %v6500_v40  ;;  %v6615_v21 = vadd.f32 %v13028_v36, %v6604_v33 }
0x140b   :  { %v6528_v13 = vmul.f32 %v7725_v15, %v6527_v37  ;;  %v6534_v22 = vmul.f32 %v7727_v8, %v6507_v23  ;;  %vm6540_vm8 = vweird.f32 %v7727_v8 }
0x140c   :  { %7728 = vrsqrt.f32 %v6508_v58  ;;  %v6623_v60 = vadd.f32 %v6615_v21, %v14148_v10  ;;  %vm6541_vm4 = vmor %vm6539_vm2, %vm6540_vm8  ;;  %vm6549_vm6 = vweird.f32 %v6508_v58 }
0x140d   :  { %v6532_v48 = vsel %vm6531_vm10, %v7725_v15, %v6528_v13  ;;  %v6535_v14 = vmul.f32 %v7727_v8, %v6534_v22 }
0x140e   :  { %v6594_v57 = vmul.f32 %v6532_v48, %v12974_v5  ;;  %v14149_v5 = vld [vmem:[#allocation47_spill] sm:$0xff] }
0x140f   :  { %v6536_v55 = vmul.f32 0.5, %v6535_v14  ;;  %v6487_v52 = vpop.xlane.xlu2 %6486 }
0x1410   :  { %v6605_v26 = vmul.f32 %v13023_v46, %v6594_v57  ;;  %v6501_v43 = vmul.f32 %v6487_v52, %v7947_v0  ;;  %v14154_v57 = vld [vmem:[#allocation33_spill] sm:$0xff] }
0x1411   :  { %v6537_v27 = vsub.f32 1.5, %v6536_v55  ;;  %v14155_v55 = vld [vmem:[#allocation34_spill] sm:$0xff] }
0x1412   :  { %v7729_v1 = vpop.eup %7728  ;;  %v6616_v19 = vadd.f32 %v13028_v36, %v6605_v26  ;;  %v6509_v59 = vadd.f32 1e-05, %v6501_v43 }
0x1413   :  { %v6538_v24 = vmul.f32 %v7727_v8, %v6537_v27  ;;  %v6544_v34 = vmul.f32 %v7729_v1, %v6508_v58  ;;  %vm6550_vm15 = vweird.f32 %v7729_v1 }
0x1414   :  { %v6624_v31 = vadd.f32 %v6616_v19, %v14149_v5  ;;  %7730 = vrsqrt.f32 %v6509_v59  ;;  %vm6551_vm0 = vmor %vm6549_vm6, %vm6550_vm15  ;;  %vm6559_vm14 = vweird.f32 %v6509_v59 }
0x1415   :  { %v6542_v25 = vsel %vm6541_vm4, %v7727_v8, %v6538_v24  ;;  %v6545_v29 = vmul.f32 %v7729_v1, %v6544_v34  ;;  %vm14159_vm6 = vmmov %vm14153_vm1 }
0x1416   :  { %v6646_v9 = vpack.c.bf16 %v6624_v31, %v6623_v60  ;;  %v6595_v30 = vmul.f32 %v6542_v25, %v12981_v4 }
0x1417   :  { %v6546_v45 = vmul.f32 0.5, %v6545_v29  ;;  %v6490_v54 = vpop.xlane.xlu1 %6489 }
0x1418   :  { %v6502_v61 = vmul.f32 %v6490_v54, %v7947_v0  ;;  %7254 = vmatmul.msk.bf16.vlgmr.msra.gmra.mxu2 %vm14150_vm9, %v6646_v9  ;;  %v6606_v50 = vmul.f32 %v13023_v46, %v6595_v30 }
0x1419   :  { %v6547_v49 = vsub.f32 1.5, %v6546_v45 }
0x141a   :  { %v7731_v32 = vpop.eup %7730  ;;  %v6510_v35 = vadd.f32 1e-05, %v6502_v61  ;;  %v6617_v6 = vadd.f32 %v13028_v36, %v6606_v50 }
0x141b   :  { %v6548_v12 = vmul.f32 %v7729_v1, %v6547_v49  ;;  %v6554_v7 = vmul.f32 %v7731_v32, %v6509_v59  ;;  %vm6560_vm11 = vweird.f32 %v7731_v32 }
0x141c   :  { %7732 = vrsqrt.f32 %v6510_v35  ;;  %vm6561_vm7 = vmor %vm6559_vm14, %vm6560_vm11  ;;  %v6625_v42 = vadd.f32 %v6617_v6, %v14151_v18  ;;  %vm6569_vm13 = vweird.f32 %v6510_v35 }
0x141d   :  { %v6552_v53 = vsel %vm6551_vm0, %v7729_v1, %v6548_v12  ;;  %v6555_v11 = vmul.f32 %v7731_v32, %v6554_v7  ;;  %v6636_v12 = vld [vmem:[%s6871_s20] sm:$0xff]  ;;  %vm14160_vm0 = vmmov %vm14153_vm1 }
0x141e   :  { %v6596_v62 = vmul.f32 %v6552_v53, %v12987_v28  ;;  %v6637_v53 = vld [vmem:[%s6871_s20 + $0x8] sm:$0xff]  ;;  %vm14161_vm11 = vmmov %vm14160_vm0 }
0x141f   :  { %v6556_v4 = vmul.f32 0.5, %v6555_v11  ;;  %v6493_v26 = vpop.xlane.xlu0 %6492  ;;  %vm14162_vm14 = vmmov %vm14160_vm0 }
0x1420   :  { %v6607_v17 = vmul.f32 %v13023_v46, %v6596_v62  ;;  %v6503_v43 = vmul.f32 %v6493_v26, %v7947_v0  ;;  %v6716_v62 = vpack.c.bf16 %v6637_v53, %v6636_v12 }
0x1421   :  { %v6557_v38 = vsub.f32 1.5, %v6556_v4 }
0x1422   :  { %v7733_v41 = vpop.eup %7732  ;;  %v6618_v39 = vadd.f32 %v13028_v36, %v6607_v17  ;;  %v6511_v27 = vadd.f32 1e-05, %v6503_v43  ;;  %v14157_v17 = vld [vmem:[#allocation37_spill] sm:$0xff] }
0x1423   :  { %v6558_v15 = vmul.f32 %v7731_v32, %v6557_v38  ;;  %v6564_v23 = vmul.f32 %v7733_v41, %v6510_v35  ;;  %vm6570_vm5 = vweird.f32 %v7733_v41  ;;  %v6639_v35 = vld [vmem:[%s6871_s20 + $0x18] sm:$0xff]  ;;  %v14158_v38 = vld [vmem:[#allocation39_spill] sm:$0xff] }
0x1424   :  { %v6626_v3 = vadd.f32 %v6618_v39, %v14152_v56  ;;  %vm6571_vm12 = vmor %vm6569_vm13, %vm6570_vm5  ;;  %7734 = vrsqrt.f32 %v6511_v27  ;;  %vm6579_vm8 = vweird.f32 %v6511_v27 }
0x1425   :  { %v6562_v2 = vsel %vm6561_vm7, %v7731_v32, %v6558_v15  ;;  %v6565_v28 = vmul.f32 %v7733_v41, %v6564_v23  ;;  %v6638_v32 = vld [vmem:[%s6871_s20 + $0x10] sm:$0xff]  ;;  %vm14163_vm7 = vmmov %vm14160_vm0 }
0x1426   :  { %v6647_v20 = vpack.c.bf16 %v6626_v3, %v6625_v42  ;;  %v6597_v40 = vmul.f32 %v6562_v2, %v12993_v44  ;;  %v6717_v50 = vpack.c.bf16 %v6639_v35, %v6638_v32  ;;  %vm14165_vm5 = vmmov %vm14160_vm0 }
0x1427   :  { %v6566_v16 = vmul.f32 0.5, %v6565_v28  ;;  %vm14166_vm13 = vmmov %vm14160_vm0 }
0x1428   :  { %7255 = vmatmul.msk.bf16.gmra.mxu2 %vm14153_vm1, %v6647_v20  ;;  %v6608_v58 = vmul.f32 %v13023_v46, %v6597_v40  ;;  %6739 = vmatpush.bf16.msrb.mxu0 %v6717_v50  ;;  %vm14164_vm1 = vmmov %vm14160_vm0 }
0x1429   :  { %v6567_v37 = vsub.f32 1.5, %v6566_v16 }
0x142a   :  { %v6619_v48 = vadd.f32 %v13028_v36, %v6608_v58  ;;  %v7735_v1 = vpop.eup %7734 }
0x142b   :  { %v6568_v8 = vmul.f32 %v7733_v41, %v6567_v37  ;;  %vm6580_vm10 = vweird.f32 %v7735_v1 }
0x142c   :  { %v6627_v44 = vadd.f32 %v6619_v48, %v14154_v57  ;;  %vm6581_vm2 = vmor %vm6579_vm8, %vm6580_vm10  ;;  %6740 = vmatpush.bf16.msrb.mxu0 %v6716_v62  ;;  %v6643_v57 = vld [vmem:[%s6873_s7 + $0x10] sm:$0xff] }
0x142d   :  { %v6572_v13 = vsel %vm6571_vm12, %v7733_v41, %v6568_v8  ;;  %vm14167_vm12 = vmmov %vm14160_vm0 }
0x142e   :  { %v6598_v22 = vmul.f32 %v6572_v13, %v12999_v51  ;;  %v6574_v51 = vmul.f32 %v7735_v1, %v6511_v27 }
0x1430   :  { %v6609_v33 = vmul.f32 %v13023_v46, %v6598_v22  ;;  %v6575_v19 = vmul.f32 %v7735_v1, %v6574_v51 }
0x1432   :  { %v6620_v14 = vadd.f32 %v13028_v36, %v6609_v33  ;;  %v6576_v34 = vmul.f32 0.5, %v6575_v19 }
0x1434   :  { %v6628_v52 = vadd.f32 %v6620_v14, %v14155_v55  ;;  %v6577_v60 = vsub.f32 1.5, %v6576_v34  ;;  %v6641_v55 = vld [vmem:[%s6873_s7] sm:$0xff] }
0x1436   :  { %v6648_v21 = vpack.c.bf16 %v6628_v52, %v6627_v44  ;;  %v6578_v5 = vmul.f32 %v7735_v1, %v6577_v60  ;;  %v6644_v44 = vld [vmem:[%s6873_s7 + $0x18] sm:$0xff] }
0x1437   :  { %v6775_v52 = vpack.c.bf16 %v6644_v44, %v6643_v57 }
0x1438   :  { %7256 = vmatmul.msk.bf16.gmra.mxu2 %vm14156_vm3, %v6648_v21  ;;  %v6582_v29 = vsel %vm6581_vm2, %v7735_v1, %v6578_v5  ;;  %v6642_v21 = vld [vmem:[%s6873_s7 + $0x8] sm:$0xff] }
0x1439   :  { %6797 = vmatpush.bf16.msra.mxu3 %v6775_v52  ;;  %v6774_v43 = vpack.c.bf16 %v6642_v21, %v6641_v55 }
0x143d   :  { %6798 = vmatpush.bf16.msra.mxu3 %v6774_v43 }
0x1472   :  { %v6496_v59 = vpop.xlane.xlu2 %6495 }
0x1473   :  { %v6504_v24 = vmul.f32 %v6496_v59, %v7947_v0  ;;  %v6599_v0 = vmul.f32 %v6582_v29, %v13005_v47 }
0x1475   :  { %v6512_v10 = vadd.f32 1e-05, %v6504_v24  ;;  %v6610_v61 = vmul.f32 %v13023_v46, %v6599_v0 }
0x1477   :  { %7736 = vrsqrt.f32 %v6512_v10  ;;  %vm6589_vm9 = vweird.f32 %v6512_v10  ;;  %v6621_v47 = vadd.f32 %v13028_v36, %v6610_v61 }
0x1479   :  { %v6629_v6 = vadd.f32 %v6621_v47, %v14157_v17 }
0x147d   :  { %v7737_v31 = vpop.eup %7736 }
0x147e   :  { %v6584_v25 = vmul.f32 %v7737_v31, %v6512_v10  ;;  %vm6590_vm4 = vweird.f32 %v7737_v31  ;;  %v7494_v10 = vld [vmem:[%s13081_s28] ss:$0 sm:$0xff] }
0x147f   :  { %vm6591_vm15 = vmor %vm6589_vm9, %vm6590_vm4 }
0x1480   :  { %v6585_v9 = vmul.f32 %v7737_v31, %v6584_v25 }
0x1482   :  { %v6586_v45 = vmul.f32 0.5, %v6585_v9 }
0x1484   :  { %v6587_v54 = vsub.f32 1.5, %v6586_v45 }
0x1486   :  { %v6588_v30 = vmul.f32 %v7737_v31, %v6587_v54 }
0x1488   :  { %v6592_v49 = vsel %vm6591_vm15, %v7737_v31, %v6588_v30 }
0x1489   :  { %v6600_v7 = vmul.f32 %v6592_v49, %v13016_v63  ;;  %v7493_v63 = vld [vmem:[%s13041_s29] ss:$0 sm:$0xff] }
0x148b   :  { %v6611_v11 = vmul.f32 %v13023_v46, %v6600_v7 }
0x148d   :  { %v6622_v4 = vadd.f32 %v13028_v36, %v6611_v11 }
0x148f   :  { %v6630_v41 = vadd.f32 %v6622_v4, %v14158_v38 }
0x1491   :  { %v6649_v39 = vpack.c.bf16 %v6630_v41, %v6629_v6 }
0x1493   :  { %7257 = vmatmul.msk.bf16.gmra.mxu2 %vm14159_vm6, %v6649_v39 }
0x149b   :  { %v6673_v15 = vpop.f32.mrf.mxu2 }
0x149c   :  { %v6696_v23 = vadd.f32 %v7493_v63, %v6673_v15  ;;  %v7495_v15 = vld [vmem:[%s13094_s15] ss:$0 sm:$0xff] }
0x149e   :  { %v6704_v46 = vmax.f32 %v6696_v23, 0.0 }
0x14a3   :  { %v6675_v18 = vpop.f32.mrf.mxu2 }
0x14a4   :  { %v6697_v42 = vadd.f32 %v7493_v63, %v6675_v18 }
0x14a6   :  { %v6705_v56 = vmax.f32 %v6697_v42, 0.0 }
0x14a8   :  { %v6712_v36 = vpack.c.bf16 %v6705_v56, %v6704_v46 }
0x14aa   :  { %7258 = vmatmul.msk.bf16.vlgmr.msrb.gmra.mxu0 %vm14160_vm0, %v6712_v36 }
0x14ab   :  { %v6678_v3 = vpop.f32.mrf.mxu2 }
0x14ac   :  { %v6698_v2 = vadd.f32 %v7493_v63, %v6678_v3 }
0x14ae   :  { %v6706_v16 = vmax.f32 %v6698_v2, 0.0 }
0x14b3   :  { %v6680_v28 = vpop.f32.mrf.mxu2 }
0x14b4   :  { %v6699_v20 = vadd.f32 %v7493_v63, %v6680_v28 }
0x14b6   :  { %v6707_v40 = vmax.f32 %v6699_v20, 0.0 }
0x14b8   :  { %v6713_v37 = vpack.c.bf16 %v6707_v40, %v6706_v16 }
0x14ba   :  { %7259 = vmatmul.msk.bf16.gmra.mxu0 %vm14161_vm11, %v6713_v37 }
0x14bb   :  { %v6683_v8 = vpop.f32.mrf.mxu2 }
0x14bc   :  { %v6700_v58 = vadd.f32 %v7493_v63, %v6683_v8 }
0x14be   :  { %v6708_v33 = vmax.f32 %v6700_v58, 0.0 }
0x14c3   :  { %v6685_v13 = vpop.f32.mrf.mxu2 }
0x14c4   :  { %v6701_v22 = vadd.f32 %v7493_v63, %v6685_v13 }
0x14c6   :  { %v6709_v48 = vmax.f32 %v6701_v22, 0.0 }
0x14c8   :  { %v6714_v14 = vpack.c.bf16 %v6709_v48, %v6708_v33 }
0x14ca   :  { %7260 = vmatmul.msk.bf16.gmra.mxu0 %vm14162_vm14, %v6714_v14 }
0x1516   :  { %v6688_v26 = vpop.f32.mrf.mxu2 }
0x1517   :  { %v6702_v27 = vadd.f32 %v7493_v63, %v6688_v26 }
0x1519   :  { %v6710_v19 = vmax.f32 %v6702_v27, 0.0 }
0x151e   :  { %v6690_v1 = vpop.f32.mrf.mxu2 }
0x151f   :  { %v6703_v51 = vadd.f32 %v7493_v63, %v6690_v1 }
0x1521   :  { %v6711_v59 = vmax.f32 %v6703_v51, 0.0 }
0x1523   :  { %v6715_v24 = vpack.c.bf16 %v6711_v59, %v6710_v19 }
0x1525   :  { %7261 = vmatmul.msk.bf16.gmra.mxu0 %vm14163_vm7, %v6715_v24 }
0x1527   :  { %v6742_v34 = vpop.f32.mrf.mxu0 }
0x1528   :  { %v6743_v60 = vadd.f32 %v7494_v10, %v6742_v34 }
0x152a   :  { %v6762_v25 = vmax.f32 %v6743_v60, 0.0 }
0x152f   :  { %v6744_v5 = vpop.f32.mrf.mxu0 }
0x1530   :  { %v6745_v31 = vadd.f32 %v7494_v10, %v6744_v5 }
0x1532   :  { %v6763_v29 = vmax.f32 %v6745_v31, 0.0 }
0x1534   :  { %v6770_v9 = vpack.c.bf16 %v6763_v29, %v6762_v25 }
0x1536   :  { %7262 = vmatmul.msk.bf16.vlgmr.msra.gmra.mxu3 %vm14164_vm1, %v6770_v9 }
0x1537   :  { %v6747_v45 = vpop.f32.mrf.mxu0 }
0x1538   :  { %v6748_v0 = vadd.f32 %v7494_v10, %v6747_v45 }
0x153a   :  { %v6764_v61 = vmax.f32 %v6748_v0, 0.0 }
0x153f   :  { %v6749_v54 = vpop.f32.mrf.mxu0 }
0x1540   :  { %v6750_v30 = vadd.f32 %v7494_v10, %v6749_v54 }
0x1542   :  { %v6765_v49 = vmax.f32 %v6750_v30, 0.0 }
0x1544   :  { %v6771_v32 = vpack.c.bf16 %v6765_v49, %v6764_v61 }
0x1546   :  { %7263 = vmatmul.msk.bf16.gmra.mxu3 %vm14165_vm5, %v6771_v32 }
0x1547   :  { %v6752_v35 = vpop.f32.mrf.mxu0 }
0x1548   :  { %v6753_v12 = vadd.f32 %v7494_v10, %v6752_v35 }
0x154a   :  { %v6766_v53 = vmax.f32 %v6753_v12, 0.0 }
0x154f   :  { %v6754_v7 = vpop.f32.mrf.mxu0 }
0x1550   :  { %v6755_v50 = vadd.f32 %v7494_v10, %v6754_v7 }
0x1552   :  { %v6767_v11 = vmax.f32 %v6755_v50, 0.0 }
0x1554   :  { %v6772_v47 = vpack.c.bf16 %v6767_v11, %v6766_v53 }
0x1556   :  { %7264 = vmatmul.msk.bf16.gmra.mxu3 %vm14166_vm13, %v6772_v47 }
0x15a2   :  { %v6757_v62 = vpop.f32.mrf.mxu0 }
0x15a3   :  { %v6758_v4 = vadd.f32 %v7494_v10, %v6757_v62 }
0x15a5   :  { %v6768_v38 = vmax.f32 %v6758_v4, 0.0 }
0x15aa   :  { %v6759_v17 = vpop.f32.mrf.mxu0 }
0x15ab   :  { %v6760_v6 = vadd.f32 %v7494_v10, %v6759_v17 }
0x15ad   :  { %v6769_v41 = vmax.f32 %v6760_v6, 0.0 }
0x15af   :  { %v6773_v39 = vpack.c.bf16 %v6769_v41, %v6768_v38 }
0x15b1   :  { %7265 = vmatmul.msk.bf16.gmra.mxu3 %vm14167_vm12, %v6773_v39 }
0x15b9   :  { %v6800_v63 = vpop.f32.mrf.mxu3 }
0x15ba   :  { %v6801_v23 = vadd.f32 %v7495_v15, %v6800_v63 }
0x15bc   :  { %6820 = vst [vmem:[%s6875_s19] sm:$0xff] %v6801_v23 }
0x15c1   :  { %v6802_v18 = vpop.f32.mrf.mxu3 }
0x15c2   :  { %v6803_v42 = vadd.f32 %v7495_v15, %v6802_v18 }
0x15c4   :  { %6821 = vst [vmem:[%s6875_s19 + $0x8] sm:$0xff] %v6803_v42 }
0x15c9   :  { %v6805_v46 = vpop.f32.mrf.mxu3 }
0x15ca   :  { %v6806_v56 = vadd.f32 %v7495_v15, %v6805_v46 }
0x15cc   :  { %6822 = vst [vmem:[%s6875_s19 + $0x10] sm:$0xff] %v6806_v56 }
0x15d1   :  { %v6807_v36 = vpop.f32.mrf.mxu3 }
0x15d2   :  { %v6808_v3 = vadd.f32 %v7495_v15, %v6807_v36 }
0x15d4   :  { %6823 = vst [vmem:[%s6875_s19 + $0x18] sm:$0xff] %v6808_v3 }
0x15d9   :  { %v6810_v2 = vpop.f32.mrf.mxu3 }
0x15da   :  { %v6811_v28 = vadd.f32 %v7495_v15, %v6810_v2 }
0x15dc   :  { %6824 = vst [vmem:[%s6875_s19 + $0x20] sm:$0xff] %v6811_v28 }
0x15e1   :  { %v6812_v20 = vpop.f32.mrf.mxu3 }
0x15e2   :  { %v6813_v16 = vadd.f32 %v7495_v15, %v6812_v20 }
0x15e4   :  { %6825 = vst [vmem:[%s6875_s19 + $0x28] sm:$0xff] %v6813_v16 }
0x1634   :  { %v6815_v40 = vpop.f32.mrf.mxu3 }
0x1635   :  { %v6816_v37 = vadd.f32 %v7495_v15, %v6815_v40 }
0x1637   :  { %6826 = vst [vmem:[%s6875_s19 + $0x30] sm:$0xff] %v6816_v37 }
0x163c   :  { %v6817_v8 = vpop.f32.mrf.mxu3 }
0x163d   :  { %v6818_v58 = vadd.f32 %v7495_v15, %v6817_v8 }
0x163f   :  { %6827 = vst [vmem:[%s6875_s19 + $0x38] sm:$0xff] %v6818_v58 }

</bundles_post_ra>
